<compile_context>
chip_gen: v5e
topology: v5e:2x2
jax: 0.10.0
libtpu: 0.0.40
codegen_flags: <defaults>
</compile_context>

<pallas_src>
import numpy as np

import jax
import jax.numpy as jnp
from jax.experimental import pallas as pl
from jax.experimental.pallas import tpu as pltpu

# ----------------------- static configuration (mirrors args) -----------------
BATCH = 2
Z_SIZE = 8            # args.latent_dim
Q_Z_OUT = 32          # args.q_z_output_dim
NUM_FLOWS = 4
# TODO(synk): args.made_h_size is not given in the spec; fixed to 64 (multiple of z_size).
H_SIZE = 64
FORGET_BIAS = 1.0
BN_EPS = 1e-5

_VMEM = pltpu.MemorySpace.VMEM


def _vmem_specs(n):
    return [pl.BlockSpec(memory_space=_VMEM)] * n


# --------------------------- in-kernel helpers (trace-time) -------------------
def _bn2d_relu(x, gb, agg, aggt, count):
    """Training-mode BatchNorm2d + ReLU in channel-major flat layout.

    x    : (B, C*H) activations, lane index = c*H + h
    gb   : (2, C)   row 0 = gamma, row 1 = beta
    agg  : (C*H, C) 0/1 channel aggregation matrix
    aggt : (C, C*H) = agg.T, broadcasts per-channel scale/shift back to lanes
    count: B * H (elements per channel)."""
    rs = jnp.concatenate([jnp.sum(x, axis=0, keepdims=True),
                          jnp.sum(x * x, axis=0, keepdims=True)], axis=0)      # (2, C*H)
    st = jnp.dot(rs, agg, preferred_element_type=jnp.float32)                   # (2, C)
    inv_n = 1.0 / count
    mean = st[0:1] * inv_n
    var = jnp.maximum(st[1:2] * inv_n - mean * mean, 0.0)
    scale = gb[0:1] * jax.lax.rsqrt(var + BN_EPS)
    shift = gb[1:2] - mean * scale
    sb = jnp.dot(jnp.concatenate([scale, shift], axis=0), aggt,
                 preferred_element_type=jnp.float32)                            # (2, C*H)
    return jnp.maximum(x * sb[0:1] + sb[1:2], 0.0)


def _bn1d_relu(x, gb):
    """Training-mode BatchNorm1d + ReLU on a (B, features) array (one-pass stats)."""
    mean = jnp.mean(x, axis=0, keepdims=True)
    var = jnp.maximum(jnp.mean(x * x, axis=0, keepdims=True) - mean * mean, 0.0)
    y = (x - mean) * jax.lax.rsqrt(var + BN_EPS) * gb[0:1] + gb[1:2]
    return jnp.maximum(y, 0.0)


def _elu(x):
    return jnp.where(x > 0.0, x, jnp.exp(jnp.minimum(x, 0.0)) - 1.0)


# ------------------------------ the fused Pallas kernel ------------------------
def _iafvae_kernel(
        x_ref, y_ref, eps_ref,
        t1_ref, gbc1_ref, t2_ref, gbc2_ref, t3_ref, gbc3_ref,
        a960_ref, a960t_ref, a416_ref, a416t_ref, a160_ref, a160t_ref,
        d1w_ref, d1wy_ref, gbd1_ref, hw_ref, hb_ref,
        fwz_ref, fbz_ref, fwh_ref, fbh_ref, fwms_ref, fbms_ref,
        d3w_ref, gbd3_ref, d4w_ref, gbd4_ref,
        td1_ref, gbdc1_ref, td2_ref, gbdc2_ref, td3_ref, dc3b_ref,
        dec_ref, stats_ref):
    f32 = jnp.float32
    x = x_ref[...]                                                      # (B, 128)

    # ---------------- encoder q_z_nn: 3x (conv + BN2d + ReLU), Toeplitz matmuls
    c1 = jnp.dot(x, t1_ref[...], preferred_element_type=f32)           # (B, 960)
    a1 = _bn2d_relu(c1, gbc1_ref[...], a960_ref[...], a960t_ref[...], float(BATCH * 30))
    c2 = jnp.dot(a1, t2_ref[...], preferred_element_type=f32)          # (B, 416)
    a2 = _bn2d_relu(c2, gbc2_ref[...], a416_ref[...], a416t_ref[...], float(BATCH * 26))
    c3 = jnp.dot(a2, t3_ref[...], preferred_element_type=f32)          # (B, 160)
    a3 = _bn2d_relu(c3, gbc3_ref[...], a160_ref[...], a160t_ref[...], float(BATCH * 20))

    # ---------------- dense1 + BN1d + ReLU (y contribution as split rank-1 term)
    h1 = jnp.dot(a3, d1w_ref[...], preferred_element_type=f32) + y_ref[...] * d1wy_ref[...]
    h1 = _bn1d_relu(h1, gbd1_ref[...])                                  # (B, 32)

    # ---------------- merged amortization heads: [q_z_mean | q_z_logvar | h_context]
    heads = jnp.dot(h1, hw_ref[...], preferred_element_type=f32) + hb_ref[...]
    mean = heads[:, 0:Z_SIZE]
    logvar = heads[:, Z_SIZE:2 * Z_SIZE]
    h_ctx = heads[:, 2 * Z_SIZE:]                                       # (B, H_SIZE)

    z0 = mean + eps_ref[...] * jnp.exp(0.5 * logvar)

    # ---------------- 4 IAF flow steps (even-flow reversals folded into weights)
    z = z0
    logdet = jnp.zeros((z0.shape[0], 1), f32)
    for k in range(NUM_FLOWS):
        h = _elu(jnp.dot(z, fwz_ref[k], preferred_element_type=f32) + fbz_ref[k])
        h = h + h_ctx
        h = _elu(jnp.dot(h, fwh_ref[k], preferred_element_type=f32) + fbh_ref[k])
        ms = jnp.dot(h, fwms_ref[k], preferred_element_type=f32) + fbms_ref[k]   # (B, 2*Z)
        m = ms[:, 0:Z_SIZE]
        u = ms[:, Z_SIZE:]                                              # forget bias pre-folded
        # stable log-sigmoid: log_gate = min(u,0) - log(1 + exp(-|u|)); gate = exp(log_gate)
        log_gate = jnp.minimum(u, 0.0) - jnp.log(1.0 + jnp.exp(-jnp.abs(u)))
        gate = jnp.exp(log_gate)
        z = gate * z + (1.0 - gate) * m
        logdet = logdet + jnp.sum(log_gate, axis=1, keepdims=True)
    zk = z

    # ---------------- decoder dense3/dense4 + BN1d + ReLU --------------------
    d = _bn1d_relu(jnp.dot(zk, d3w_ref[...], preferred_element_type=f32), gbd3_ref[...])
    d = _bn1d_relu(jnp.dot(d, d4w_ref[...], preferred_element_type=f32), gbd4_ref[...])  # (B,160)

    # ---------------- decoder p_x_nn: 2x (deconv + BN2d + ReLU) + deconv ------
    e1 = jnp.dot(d, td1_ref[...], preferred_element_type=f32)           # (B, 416)
    e1 = _bn2d_relu(e1, gbdc1_ref[...], a416_ref[...], a416t_ref[...], float(BATCH * 26))
    e2 = jnp.dot(e1, td2_ref[...], preferred_element_type=f32)          # (B, 960)
    e2 = _bn2d_relu(e2, gbdc2_ref[...], a960_ref[...], a960t_ref[...], float(BATCH * 30))
    dec_ref[...] = jnp.dot(e2, td3_ref[...], preferred_element_type=f32) + dc3b_ref[...]

    # packed narrow outputs: [mean | logvar | z0 | zk | log_det_j]
    stats_ref[...] = jnp.concatenate([mean, logvar, z0, zk, logdet], axis=1)


# ------------------------------ parameters -------------------------------------
def init_params(key):
    """Random parameters in PyTorch layouts (same shapes as the nn.Module)."""
    keys = iter(jax.random.split(key, 80))

    def rand(shape, scale=0.1):
        return scale * jax.random.normal(next(keys), shape, jnp.float32)

    p = {}
    # encoder q_z_nn
    p["conv1_w"] = rand((32, 1, 3, 4)); p["conv1_b"] = rand((32,), 0.05)
    p["bn_c1_g"] = 1.0 + rand((32,), 0.05); p["bn_c1_b"] = rand((32,), 0.05)
    p["conv2_w"] = rand((16, 32, 5, 1)); p["conv2_b"] = rand((16,), 0.05)
    p["bn_c2_g"] = 1.0 + rand((16,), 0.05); p["bn_c2_b"] = rand((16,), 0.05)
    p["conv3_w"] = rand((8, 16, 7, 1)); p["conv3_b"] = rand((8,), 0.05)
    p["bn_c3_g"] = 1.0 + rand((8,), 0.05); p["bn_c3_b"] = rand((8,), 0.05)
    # dense encoder + heads
    p["dense1_w"] = rand((Q_Z_OUT, 161)); p["dense1_b"] = rand((Q_Z_OUT,), 0.05)
    p["bn1_g"] = 1.0 + rand((Q_Z_OUT,), 0.05); p["bn1_b"] = rand((Q_Z_OUT,), 0.05)
    p["qzm_w"] = rand((Z_SIZE, Q_Z_OUT)); p["qzm_b"] = rand((Z_SIZE,), 0.05)
    p["qzv_w"] = rand((Z_SIZE, Q_Z_OUT)); p["qzv_b"] = rand((Z_SIZE,), 0.05)
    p["hctx_w"] = rand((H_SIZE, Q_Z_OUT)); p["hctx_b"] = rand((H_SIZE,), 0.05)
    # IAF flows (MaskedLinear weights stored (in, out), as in the reference code)
    for k in range(NUM_FLOWS):
        p[f"iaf{k}_wz"] = rand((Z_SIZE, H_SIZE)); p[f"iaf{k}_bz"] = rand((H_SIZE,), 0.05)
        p[f"iaf{k}_wh"] = rand((H_SIZE, H_SIZE)); p[f"iaf{k}_bh"] = rand((H_SIZE,), 0.05)
        p[f"iaf{k}_wm"] = rand((H_SIZE, Z_SIZE)); p[f"iaf{k}_bm"] = rand((Z_SIZE,), 0.05)
        p[f"iaf{k}_ws"] = rand((H_SIZE, Z_SIZE)); p[f"iaf{k}_bs"] = rand((Z_SIZE,), 0.05)
    # decoder
    p["dense3_w"] = rand((Q_Z_OUT, Z_SIZE)); p["dense3_b"] = rand((Q_Z_OUT,), 0.05)
    p["bn3_g"] = 1.0 + rand((Q_Z_OUT,), 0.05); p["bn3_b"] = rand((Q_Z_OUT,), 0.05)
    p["dense4_w"] = rand((161, Q_Z_OUT)); p["dense4_b"] = rand((161,), 0.05)
    p["bn4_g"] = 1.0 + rand((161,), 0.05); p["bn4_b"] = rand((161,), 0.05)
    p["deconv1_w"] = rand((8, 16, 7, 1)); p["deconv1_b"] = rand((16,), 0.05)
    p["bn_d1_g"] = 1.0 + rand((16,), 0.05); p["bn_d1_b"] = rand((16,), 0.05)
    p["deconv2_w"] = rand((16, 32, 5, 1)); p["deconv2_b"] = rand((32,), 0.05)
    p["bn_d2_g"] = 1.0 + rand((32,), 0.05); p["bn_d2_b"] = rand((32,), 0.05)
    p["deconv3_w"] = rand((32, 1, 3, 4)); p["deconv3_b"] = rand((1,), 0.05)
    return p


# --------------------- host-side weight preparation (numpy) ---------------------
def _made_mask(n_in, n_out, diagonal_zeros):
    """Replicates MaskedLinear.build_mask from the reference MADE/IAF layers."""
    mask = np.ones((n_in, n_out), dtype=np.float32)
    if n_out >= n_in:
        k = n_out // n_in
        for i in range(n_in):
            mask[i + 1:, i * k:(i + 1) * k] = 0
            if diagonal_zeros:
                mask[i:i + 1, i * k:(i + 1) * k] = 0
    else:
        k = n_in // n_out
        for i in range(n_out):
            mask[(i + 1) * k:, i:i + 1] = 0
            if diagonal_zeros:
                mask[i * k:(i + 1) * k:, i:i + 1] = 0
    return mask


def _conv1_toeplitz(w):
    """Conv2d(1,32,(3,4)) on a (32,4) image -> (32,30,1); flat (h*4+w) -> (co*30+oh)."""
    T = np.zeros((32 * 4, 32 * 30), np.float32)
    oh = np.arange(30)
    for co in range(32):
        for kh in range(3):
            for kw in range(4):
                T[(oh + kh) * 4 + kw, co * 30 + oh] += w[co, 0, kh, kw]
    return T


def _conv_h_toeplitz(w, h_in, h_out):
    """Conv2d(ci,co,(KH,1)); flat (ci*h_in + oh + kh) -> (co*h_out + oh)."""
    co, ci, KH = w.shape
    T = np.zeros((ci * h_in, co * h_out), np.float32)
    oh = np.arange(h_out)
    for c_o in range(co):
        for c_i in range(ci):
            for kh in range(KH):
                T[c_i * h_in + oh + kh, c_o * h_out + oh] += w[c_o, c_i, kh]
    return T


def _deconv_h_toeplitz(w, h_in, h_out):
    """ConvTranspose2d(ci,co,(KH,1)); flat (ci*h_in + ih) -> (co*h_out + ih + kh)."""
    ci, co, KH = w.shape
    T = np.zeros((ci * h_in, co * h_out), np.float32)
    ih = np.arange(h_in)
    for c_i in range(ci):
        for c_o in range(co):
            for kh in range(KH):
                T[c_i * h_in + ih, c_o * h_out + ih + kh] += w[c_i, c_o, kh]
    return T


def _deconv3_toeplitz(w):
    """ConvTranspose2d(32,1,(3,4)) on (32,30,1) -> (1,32,4); flat -> (oh*4+ow)."""
    T = np.zeros((32 * 30, 32 * 4), np.float32)
    ih = np.arange(30)
    for ci in range(32):
        for kh in range(3):
            for kw in range(4):
                T[ci * 30 + ih, (ih + kh) * 4 + kw] += w[ci, 0, kh, kw]
    return T


def _bn_agg(C, H):
    """(C*H, C) 0/1 channel aggregation matrix for channel-major flat layout."""
    A = np.zeros((C * H, C), np.float32)
    for c in range(C):
        A[c * H:(c + 1) * H, c] = 1.0
    return A


def prepare_params(p):
    """One-time host-side weight re-layout: Toeplitz conv matrices, BN aggregation
    matrices, merged heads, pre-masked + reversal-folded + m|s-merged MADE weights.
    Biases immediately followed by training-mode BatchNorm cancel exactly and are dropped."""
    g = {k: np.asarray(v, np.float32) for k, v in p.items()}
    row = lambda v: jnp.asarray(np.asarray(v, np.float32).reshape(1, -1))
    gb = lambda ga, be: jnp.asarray(np.stack([np.asarray(ga, np.float32).reshape(-1),
                                              np.asarray(be, np.float32).reshape(-1)], axis=0))
    kp = {}
    # encoder convs (channel-major flat layout, torch NCHW flatten order)
    kp["t1"] = jnp.asarray(_conv1_toeplitz(g["conv1_w"]))                              # (128, 960)
    kp["gb_c1"] = gb(g["bn_c1_g"], g["bn_c1_b"])
    kp["t2"] = jnp.asarray(_conv_h_toeplitz(g["conv2_w"][:, :, :, 0], 30, 26))         # (960, 416)
    kp["gb_c2"] = gb(g["bn_c2_g"], g["bn_c2_b"])
    kp["t3"] = jnp.asarray(_conv_h_toeplitz(g["conv3_w"][:, :, :, 0], 26, 20))         # (416, 160)
    kp["gb_c3"] = gb(g["bn_c3_g"], g["bn_c3_b"])
    # BN2d channel-aggregation / broadcast matrices (shared between encoder & decoder)
    a960 = _bn_agg(32, 30); a416 = _bn_agg(16, 26); a160 = _bn_agg(8, 20)
    kp["a960"] = jnp.asarray(a960); kp["a960t"] = jnp.asarray(np.ascontiguousarray(a960.T))
    kp["a416"] = jnp.asarray(a416); kp["a416t"] = jnp.asarray(np.ascontiguousarray(a416.T))
    kp["a160"] = jnp.asarray(a160); kp["a160t"] = jnp.asarray(np.ascontiguousarray(a160.T))
    # dense1 split into conv-feature part and y part (flat order is torch-native)
    kp["d1w"] = jnp.asarray(np.ascontiguousarray(g["dense1_w"][:, :160].T))            # (160, 32)
    kp["d1wy"] = row(g["dense1_w"][:, 160])                                            # (1, 32)
    kp["gb_d1"] = gb(g["bn1_g"], g["bn1_b"])
    # merged amortization heads
    kp["heads_w"] = jnp.asarray(np.concatenate(
        [g["qzm_w"].T, g["qzv_w"].T, g["hctx_w"].T], axis=1))                          # (32, 80)
    kp["heads_b"] = row(np.concatenate([g["qzm_b"], g["qzv_b"], g["hctx_b"]]))
    # IAF flows: pre-masked MADE weights, even-flow reversals folded, merged m|s heads
    m_zh = _made_mask(Z_SIZE, H_SIZE, False)
    m_hh = _made_mask(H_SIZE, H_SIZE, False)
    m_hz = _made_mask(H_SIZE, Z_SIZE, True)
    R = np.zeros((Z_SIZE, Z_SIZE), np.float32)
    R[np.arange(Z_SIZE), Z_SIZE - 1 - np.arange(Z_SIZE)] = 1.0
    wz_l, bz_l, wh_l, bh_l, wms_l, bms_l = [], [], [], [], [], []
    for k in range(NUM_FLOWS):
        wz = m_zh * g[f"iaf{k}_wz"]; bz = g[f"iaf{k}_bz"]
        wh = m_hh * g[f"iaf{k}_wh"]; bh = g[f"iaf{k}_bh"]
        wm = m_hz * g[f"iaf{k}_wm"]; bm = g[f"iaf{k}_bm"]
        ws = m_hz * g[f"iaf{k}_ws"]; bs = g[f"iaf{k}_bs"]
        if k in (1, 2):
            # reference flips z before flows 1 and 3; keeping z in the original frame
            # requires folding the flip into flows 1 and 2 (input rows / output cols).
            wz = R @ wz
            wm = wm @ R; bm = bm @ R
            ws = ws @ R; bs = bs @ R
        wz_l.append(wz); bz_l.append(bz.reshape(1, -1))
        wh_l.append(wh); bh_l.append(bh.reshape(1, -1))
        wms_l.append(np.concatenate([wm, ws], axis=1))
        bms_l.append(np.concatenate([bm, bs + FORGET_BIAS]).reshape(1, -1))
    kp["f_wz"] = jnp.asarray(np.stack(wz_l)); kp["f_bz"] = jnp.asarray(np.stack(bz_l))
    kp["f_wh"] = jnp.asarray(np.stack(wh_l)); kp["f_bh"] = jnp.asarray(np.stack(bh_l))
    kp["f_wms"] = jnp.asarray(np.stack(wms_l)); kp["f_bms"] = jnp.asarray(np.stack(bms_l))
    # decoder dense (dense4's dropped 161st output column & its BN params simply omitted)
    kp["d3w"] = jnp.asarray(np.ascontiguousarray(g["dense3_w"].T))                     # (8, 32)
    kp["gb_d3"] = gb(g["bn3_g"], g["bn3_b"])
    kp["d4w"] = jnp.asarray(np.ascontiguousarray(g["dense4_w"][:160, :].T))            # (32, 160)
    kp["gb_d4"] = gb(g["bn4_g"][:160], g["bn4_b"][:160])
    # decoder deconvs as Toeplitz matmuls
    kp["td1"] = jnp.asarray(_deconv_h_toeplitz(g["deconv1_w"][:, :, :, 0], 20, 26))    # (160, 416)
    kp["gb_dc1"] = gb(g["bn_d1_g"], g["bn_d1_b"])
    kp["td2"] = jnp.asarray(_deconv_h_toeplitz(g["deconv2_w"][:, :, :, 0], 26, 30))    # (416, 960)
    kp["gb_dc2"] = gb(g["bn_d2_g"], g["bn_d2_b"])
    kp["td3"] = jnp.asarray(_deconv3_toeplitz(g["deconv3_w"]))                         # (960, 128)
    kp["deconv3_b"] = jnp.asarray(g["deconv3_b"].reshape(1, 1))
    return kp


# ------------------------------- forward ----------------------------------------
def iafvae_forward(kp, x, y, eps):
    bsz = x.shape[0]
    x_flat = x.reshape(bsz, 32 * 4)                                     # NCHW flatten (c=1)
    args = (x_flat, y, eps,
            kp["t1"], kp["gb_c1"], kp["t2"], kp["gb_c2"], kp["t3"], kp["gb_c3"],
            kp["a960"], kp["a960t"], kp["a416"], kp["a416t"], kp["a160"], kp["a160t"],
            kp["d1w"], kp["d1wy"], kp["gb_d1"], kp["heads_w"], kp["heads_b"],
            kp["f_wz"], kp["f_bz"], kp["f_wh"], kp["f_bh"], kp["f_wms"], kp["f_bms"],
            kp["d3w"], kp["gb_d3"], kp["d4w"], kp["gb_d4"],
            kp["td1"], kp["gb_dc1"], kp["td2"], kp["gb_dc2"], kp["td3"], kp["deconv3_b"])
    dec_flat, stats = pl.pallas_call(
        _iafvae_kernel,
        out_shape=(jax.ShapeDtypeStruct((bsz, 32 * 4), jnp.float32),
                   jax.ShapeDtypeStruct((bsz, 4 * Z_SIZE + 1), jnp.float32)),
        in_specs=_vmem_specs(len(args)),
        out_specs=(pl.BlockSpec(memory_space=_VMEM),
                   pl.BlockSpec(memory_space=_VMEM)),
        compiler_params=pltpu.CompilerParams(vmem_limit_bytes=32 * 1024 * 1024),
    )(*args)
    x_dec = dec_flat.reshape(bsz, 1, 32, 4)
    mean = stats[:, 0:Z_SIZE]
    logvar = stats[:, Z_SIZE:2 * Z_SIZE]
    z0 = stats[:, 2 * Z_SIZE:3 * Z_SIZE]
    zk = stats[:, 3 * Z_SIZE:4 * Z_SIZE]
    log_det_j = stats[:, 4 * Z_SIZE]
    return x_dec, mean, logvar, log_det_j, z0, zk


def forward(kp, x, y, eps_key):
    # TODO(synk): torch.randn_like RNG stream replaced with jax.random.normal (same distribution).
    eps = jax.random.normal(eps_key, (x.shape[0], Z_SIZE), jnp.float32)
    return iafvae_forward(kp, x, y, eps)


# --------------------------------- main ------------------------------------------
if __name__ == "__main__":
    key = jax.random.PRNGKey(0)
    pkey, xkey, ykey, ekey = jax.random.split(key, 4)
    params = init_params(pkey)
    kparams = prepare_params(params)   # one-time host-side weight re-layout

    x = jax.random.normal(xkey, (BATCH, 1, 32, 4), jnp.float32)   # NCHW input
    y = jax.random.normal(ykey, (BATCH, 1), jnp.float32)          # conditioning feature

    fwd = jax.jit(forward)
    outs = jax.block_until_ready(fwd(kparams, x, y, ekey))

    x_dec, mean, logvar, log_det_j, z0, zk = outs
    assert x_dec.shape == (BATCH, 1, 32, 4)
    assert mean.shape == (BATCH, Z_SIZE) and logvar.shape == (BATCH, Z_SIZE)
    assert log_det_j.shape == (BATCH,)
    assert z0.shape == (BATCH, Z_SIZE) and zk.shape == (BATCH, Z_SIZE)
    assert all(bool(jnp.all(jnp.isfinite(o))) for o in outs)
    print("KERNEL_OK")
</pallas_src>

<mosaic_0001>
module attributes {stable_mosaic.version = 11 : i64} {
  func.func @_iafvae_kernel(%arg0: memref<2x128xf32, #tpu.memory_space<vmem>>, %arg1: memref<2x1xf32, #tpu.memory_space<vmem>>, %arg2: memref<2x8xf32, #tpu.memory_space<vmem>>, %arg3: memref<128x960xf32, #tpu.memory_space<vmem>>, %arg4: memref<2x32xf32, #tpu.memory_space<vmem>>, %arg5: memref<960x416xf32, #tpu.memory_space<vmem>>, %arg6: memref<2x16xf32, #tpu.memory_space<vmem>>, %arg7: memref<416x160xf32, #tpu.memory_space<vmem>>, %arg8: memref<2x8xf32, #tpu.memory_space<vmem>>, %arg9: memref<960x32xf32, #tpu.memory_space<vmem>>, %arg10: memref<32x960xf32, #tpu.memory_space<vmem>>, %arg11: memref<416x16xf32, #tpu.memory_space<vmem>>, %arg12: memref<16x416xf32, #tpu.memory_space<vmem>>, %arg13: memref<160x8xf32, #tpu.memory_space<vmem>>, %arg14: memref<8x160xf32, #tpu.memory_space<vmem>>, %arg15: memref<160x32xf32, #tpu.memory_space<vmem>>, %arg16: memref<1x32xf32, #tpu.memory_space<vmem>>, %arg17: memref<2x32xf32, #tpu.memory_space<vmem>>, %arg18: memref<32x80xf32, #tpu.memory_space<vmem>>, %arg19: memref<1x80xf32, #tpu.memory_space<vmem>>, %arg20: memref<4x8x64xf32, #tpu.memory_space<vmem>>, %arg21: memref<4x1x64xf32, #tpu.memory_space<vmem>>, %arg22: memref<4x64x64xf32, #tpu.memory_space<vmem>>, %arg23: memref<4x1x64xf32, #tpu.memory_space<vmem>>, %arg24: memref<4x64x16xf32, #tpu.memory_space<vmem>>, %arg25: memref<4x1x16xf32, #tpu.memory_space<vmem>>, %arg26: memref<8x32xf32, #tpu.memory_space<vmem>>, %arg27: memref<2x32xf32, #tpu.memory_space<vmem>>, %arg28: memref<32x160xf32, #tpu.memory_space<vmem>>, %arg29: memref<2x160xf32, #tpu.memory_space<vmem>>, %arg30: memref<160x416xf32, #tpu.memory_space<vmem>>, %arg31: memref<2x16xf32, #tpu.memory_space<vmem>>, %arg32: memref<416x960xf32, #tpu.memory_space<vmem>>, %arg33: memref<2x32xf32, #tpu.memory_space<vmem>>, %arg34: memref<960x128xf32, #tpu.memory_space<vmem>>, %arg35: memref<1x1xf32, #tpu.memory_space<vmem>>, %arg36: memref<2x128xf32, #tpu.memory_space<vmem>>, %arg37: memref<2x33xf32, #tpu.memory_space<vmem>>) attributes {dimension_semantics = [], scalar_prefetch = 0 : i64, scratch_operands = 0 : i64, tpu.core_type = #tpu.core_type<tc>} {
    %c0 = arith.constant 0 : index
    %c0_0 = arith.constant 0 : index
    %0 = vector.load %arg0[%c0, %c0_0] : memref<2x128xf32, #tpu.memory_space<vmem>>, vector<2x128xf32>
    %c0_1 = arith.constant 0 : index
    %c0_2 = arith.constant 0 : index
    %1 = vector.load %arg3[%c0_1, %c0_2] : memref<128x960xf32, #tpu.memory_space<vmem>>, vector<128x960xf32>
    %cst = arith.constant dense<0.000000e+00> : vector<2x960xf32>
    %2 = tpu.matmul %0, %1, %cst {dimension_numbers = #tpu.dot_dimension_numbers<[1], [0], [0], [1], [0, 0, 1, 1], [], []>} : vector<2x128xf32>, vector<128x960xf32>, vector<2x960xf32> -> vector<2x960xf32>
    %c0_3 = arith.constant 0 : index
    %c0_4 = arith.constant 0 : index
    %3 = vector.load %arg4[%c0_3, %c0_4] : memref<2x32xf32, #tpu.memory_space<vmem>>, vector<2x32xf32>
    %c0_5 = arith.constant 0 : index
    %c0_6 = arith.constant 0 : index
    %4 = vector.load %arg9[%c0_5, %c0_6] : memref<960x32xf32, #tpu.memory_space<vmem>>, vector<960x32xf32>
    %c0_7 = arith.constant 0 : index
    %c0_8 = arith.constant 0 : index
    %5 = vector.load %arg10[%c0_7, %c0_8] : memref<32x960xf32, #tpu.memory_space<vmem>>, vector<32x960xf32>
    %cst_9 = arith.constant dense<0.000000e+00> : vector<960xf32>
    %6 = vector.multi_reduction <add>, %2, %cst_9 [0] : vector<2x960xf32> to vector<960xf32>
    %7 = vector.shape_cast %6 : vector<960xf32> to vector<1x960xf32>
    %8 = arith.mulf %2, %2 : vector<2x960xf32>
    %cst_10 = arith.constant dense<0.000000e+00> : vector<960xf32>
    %9 = vector.multi_reduction <add>, %8, %cst_10 [0] : vector<2x960xf32> to vector<960xf32>
    %10 = vector.shape_cast %9 : vector<960xf32> to vector<1x960xf32>
    %11 = tpu.concatenate %7, %10 in 0 : vector<1x960xf32>, vector<1x960xf32> -> vector<2x960xf32>
    %cst_11 = arith.constant dense<0.000000e+00> : vector<2x32xf32>
    %12 = tpu.matmul %11, %4, %cst_11 {dimension_numbers = #tpu.dot_dimension_numbers<[1], [0], [0], [1], [0, 0, 1, 1], [], []>} : vector<2x960xf32>, vector<960x32xf32>, vector<2x32xf32> -> vector<2x32xf32>
    %13 = vector.extract_strided_slice %12 {offsets = [0, 0], sizes = [1, 32], strides = [1, 1]} : vector<2x32xf32> to vector<1x32xf32>
    %cst_12 = arith.constant 0.0166666675 : f32
    %14 = vector.broadcast %cst_12 : f32 to vector<1x32xf32>
    %15 = arith.mulf %13, %14 : vector<1x32xf32>
    %16 = vector.extract_strided_slice %12 {offsets = [1, 0], sizes = [1, 32], strides = [1, 1]} : vector<2x32xf32> to vector<1x32xf32>
    %cst_13 = arith.constant 0.0166666675 : f32
    %17 = vector.broadcast %cst_13 : f32 to vector<1x32xf32>
    %18 = arith.mulf %16, %17 : vector<1x32xf32>
    %19 = arith.mulf %15, %15 : vector<1x32xf32>
    %20 = arith.subf %18, %19 : vector<1x32xf32>
    %cst_14 = arith.constant 0.000000e+00 : f32
    %21 = vector.broadcast %cst_14 : f32 to vector<1x32xf32>
    %22 = arith.maximumf %20, %21 : vector<1x32xf32>
    %23 = vector.extract_strided_slice %3 {offsets = [0, 0], sizes = [1, 32], strides = [1, 1]} : vector<2x32xf32> to vector<1x32xf32>
    %cst_15 = arith.constant 9.99999974E-6 : f32
    %24 = vector.broadcast %cst_15 : f32 to vector<1x32xf32>
    %25 = arith.addf %22, %24 : vector<1x32xf32>
    %26 = math.rsqrt %25 : vector<1x32xf32>
    %27 = arith.mulf %23, %26 : vector<1x32xf32>
    %28 = vector.extract_strided_slice %3 {offsets = [1, 0], sizes = [1, 32], strides = [1, 1]} : vector<2x32xf32> to vector<1x32xf32>
    %29 = arith.mulf %15, %27 : vector<1x32xf32>
    %30 = arith.subf %28, %29 : vector<1x32xf32>
    %31 = tpu.concatenate %27, %30 in 0 : vector<1x32xf32>, vector<1x32xf32> -> vector<2x32xf32>
    %cst_16 = arith.constant dense<0.000000e+00> : vector<2x960xf32>
    %32 = tpu.matmul %31, %5, %cst_16 {dimension_numbers = #tpu.dot_dimension_numbers<[1], [0], [0], [1], [0, 0, 1, 1], [], []>} : vector<2x32xf32>, vector<32x960xf32>, vector<2x960xf32> -> vector<2x960xf32>
    %33 = vector.extract_strided_slice %32 {offsets = [0, 0], sizes = [1, 960], strides = [1, 1]} : vector<2x960xf32> to vector<1x960xf32>
    %34 = vector.broadcast %33 : vector<1x960xf32> to vector<2x960xf32>
    %35 = arith.mulf %2, %34 : vector<2x960xf32>
    %36 = vector.extract_strided_slice %32 {offsets = [1, 0], sizes = [1, 960], strides = [1, 1]} : vector<2x960xf32> to vector<1x960xf32>
    %37 = vector.broadcast %36 : vector<1x960xf32> to vector<2x960xf32>
    %38 = arith.addf %35, %37 : vector<2x960xf32>
    %cst_17 = arith.constant 0.000000e+00 : f32
    %39 = vector.broadcast %cst_17 : f32 to vector<2x960xf32>
    %40 = arith.maximumf %38, %39 : vector<2x960xf32>
    %c0_18 = arith.constant 0 : index
    %c0_19 = arith.constant 0 : index
    %41 = vector.load %arg5[%c0_18, %c0_19] : memref<960x416xf32, #tpu.memory_space<vmem>>, vector<960x416xf32>
    %cst_20 = arith.constant dense<0.000000e+00> : vector<2x416xf32>
    %42 = tpu.matmul %40, %41, %cst_20 {dimension_numbers = #tpu.dot_dimension_numbers<[1], [0], [0], [1], [0, 0, 1, 1], [], []>} : vector<2x960xf32>, vector<960x416xf32>, vector<2x416xf32> -> vector<2x416xf32>
    %c0_21 = arith.constant 0 : index
    %c0_22 = arith.constant 0 : index
    %43 = vector.load %arg6[%c0_21, %c0_22] : memref<2x16xf32, #tpu.memory_space<vmem>>, vector<2x16xf32>
    %c0_23 = arith.constant 0 : index
    %c0_24 = arith.constant 0 : index
    %44 = vector.load %arg11[%c0_23, %c0_24] : memref<416x16xf32, #tpu.memory_space<vmem>>, vector<416x16xf32>
    %c0_25 = arith.constant 0 : index
    %c0_26 = arith.constant 0 : index
    %45 = vector.load %arg12[%c0_25, %c0_26] : memref<16x416xf32, #tpu.memory_space<vmem>>, vector<16x416xf32>
    %cst_27 = arith.constant dense<0.000000e+00> : vector<416xf32>
    %46 = vector.multi_reduction <add>, %42, %cst_27 [0] : vector<2x416xf32> to vector<416xf32>
    %47 = vector.shape_cast %46 : vector<416xf32> to vector<1x416xf32>
    %48 = arith.mulf %42, %42 : vector<2x416xf32>
    %cst_28 = arith.constant dense<0.000000e+00> : vector<416xf32>
    %49 = vector.multi_reduction <add>, %48, %cst_28 [0] : vector<2x416xf32> to vector<416xf32>
    %50 = vector.shape_cast %49 : vector<416xf32> to vector<1x416xf32>
    %51 = tpu.concatenate %47, %50 in 0 : vector<1x416xf32>, vector<1x416xf32> -> vector<2x416xf32>
    %cst_29 = arith.constant dense<0.000000e+00> : vector<2x16xf32>
    %52 = tpu.matmul %51, %44, %cst_29 {dimension_numbers = #tpu.dot_dimension_numbers<[1], [0], [0], [1], [0, 0, 1, 1], [], []>} : vector<2x416xf32>, vector<416x16xf32>, vector<2x16xf32> -> vector<2x16xf32>
    %53 = vector.extract_strided_slice %52 {offsets = [0, 0], sizes = [1, 16], strides = [1, 1]} : vector<2x16xf32> to vector<1x16xf32>
    %cst_30 = arith.constant 0.0192307699 : f32
    %54 = vector.broadcast %cst_30 : f32 to vector<1x16xf32>
    %55 = arith.mulf %53, %54 : vector<1x16xf32>
    %56 = vector.extract_strided_slice %52 {offsets = [1, 0], sizes = [1, 16], strides = [1, 1]} : vector<2x16xf32> to vector<1x16xf32>
    %cst_31 = arith.constant 0.0192307699 : f32
    %57 = vector.broadcast %cst_31 : f32 to vector<1x16xf32>
    %58 = arith.mulf %56, %57 : vector<1x16xf32>
    %59 = arith.mulf %55, %55 : vector<1x16xf32>
    %60 = arith.subf %58, %59 : vector<1x16xf32>
    %cst_32 = arith.constant 0.000000e+00 : f32
    %61 = vector.broadcast %cst_32 : f32 to vector<1x16xf32>
    %62 = arith.maximumf %60, %61 : vector<1x16xf32>
    %63 = vector.extract_strided_slice %43 {offsets = [0, 0], sizes = [1, 16], strides = [1, 1]} : vector<2x16xf32> to vector<1x16xf32>
    %cst_33 = arith.constant 9.99999974E-6 : f32
    %64 = vector.broadcast %cst_33 : f32 to vector<1x16xf32>
    %65 = arith.addf %62, %64 : vector<1x16xf32>
    %66 = math.rsqrt %65 : vector<1x16xf32>
    %67 = arith.mulf %63, %66 : vector<1x16xf32>
    %68 = vector.extract_strided_slice %43 {offsets = [1, 0], sizes = [1, 16], strides = [1, 1]} : vector<2x16xf32> to vector<1x16xf32>
    %69 = arith.mulf %55, %67 : vector<1x16xf32>
    %70 = arith.subf %68, %69 : vector<1x16xf32>
    %71 = tpu.concatenate %67, %70 in 0 : vector<1x16xf32>, vector<1x16xf32> -> vector<2x16xf32>
    %cst_34 = arith.constant dense<0.000000e+00> : vector<2x416xf32>
    %72 = tpu.matmul %71, %45, %cst_34 {dimension_numbers = #tpu.dot_dimension_numbers<[1], [0], [0], [1], [0, 0, 1, 1], [], []>} : vector<2x16xf32>, vector<16x416xf32>, vector<2x416xf32> -> vector<2x416xf32>
    %73 = vector.extract_strided_slice %72 {offsets = [0, 0], sizes = [1, 416], strides = [1, 1]} : vector<2x416xf32> to vector<1x416xf32>
    %74 = vector.broadcast %73 : vector<1x416xf32> to vector<2x416xf32>
    %75 = arith.mulf %42, %74 : vector<2x416xf32>
    %76 = vector.extract_strided_slice %72 {offsets = [1, 0], sizes = [1, 416], strides = [1, 1]} : vector<2x416xf32> to vector<1x416xf32>
    %77 = vector.broadcast %76 : vector<1x416xf32> to vector<2x416xf32>
    %78 = arith.addf %75, %77 : vector<2x416xf32>
    %cst_35 = arith.constant 0.000000e+00 : f32
    %79 = vector.broadcast %cst_35 : f32 to vector<2x416xf32>
    %80 = arith.maximumf %78, %79 : vector<2x416xf32>
    %c0_36 = arith.constant 0 : index
    %c0_37 = arith.constant 0 : index
    %81 = vector.load %arg7[%c0_36, %c0_37] : memref<416x160xf32, #tpu.memory_space<vmem>>, vector<416x160xf32>
    %cst_38 = arith.constant dense<0.000000e+00> : vector<2x160xf32>
    %82 = tpu.matmul %80, %81, %cst_38 {dimension_numbers = #tpu.dot_dimension_numbers<[1], [0], [0], [1], [0, 0, 1, 1], [], []>} : vector<2x416xf32>, vector<416x160xf32>, vector<2x160xf32> -> vector<2x160xf32>
    %c0_39 = arith.constant 0 : index
    %c0_40 = arith.constant 0 : index
    %83 = vector.load %arg8[%c0_39, %c0_40] : memref<2x8xf32, #tpu.memory_space<vmem>>, vector<2x8xf32>
    %c0_41 = arith.constant 0 : index
    %c0_42 = arith.constant 0 : index
    %84 = vector.load %arg13[%c0_41, %c0_42] : memref<160x8xf32, #tpu.memory_space<vmem>>, vector<160x8xf32>
    %c0_43 = arith.constant 0 : index
    %c0_44 = arith.constant 0 : index
    %85 = vector.load %arg14[%c0_43, %c0_44] : memref<8x160xf32, #tpu.memory_space<vmem>>, vector<8x160xf32>
    %cst_45 = arith.constant dense<0.000000e+00> : vector<160xf32>
    %86 = vector.multi_reduction <add>, %82, %cst_45 [0] : vector<2x160xf32> to vector<160xf32>
    %87 = vector.shape_cast %86 : vector<160xf32> to vector<1x160xf32>
    %88 = arith.mulf %82, %82 : vector<2x160xf32>
    %cst_46 = arith.constant dense<0.000000e+00> : vector<160xf32>
    %89 = vector.multi_reduction <add>, %88, %cst_46 [0] : vector<2x160xf32> to vector<160xf32>
    %90 = vector.shape_cast %89 : vector<160xf32> to vector<1x160xf32>
    %91 = tpu.concatenate %87, %90 in 0 : vector<1x160xf32>, vector<1x160xf32> -> vector<2x160xf32>
    %cst_47 = arith.constant dense<0.000000e+00> : vector<2x8xf32>
    %92 = tpu.matmul %91, %84, %cst_47 {dimension_numbers = #tpu.dot_dimension_numbers<[1], [0], [0], [1], [0, 0, 1, 1], [], []>} : vector<2x160xf32>, vector<160x8xf32>, vector<2x8xf32> -> vector<2x8xf32>
    %93 = vector.extract_strided_slice %92 {offsets = [0, 0], sizes = [1, 8], strides = [1, 1]} : vector<2x8xf32> to vector<1x8xf32>
    %cst_48 = arith.constant 2.500000e-02 : f32
    %94 = vector.broadcast %cst_48 : f32 to vector<1x8xf32>
    %95 = arith.mulf %93, %94 : vector<1x8xf32>
    %96 = vector.extract_strided_slice %92 {offsets = [1, 0], sizes = [1, 8], strides = [1, 1]} : vector<2x8xf32> to vector<1x8xf32>
    %cst_49 = arith.constant 2.500000e-02 : f32
    %97 = vector.broadcast %cst_49 : f32 to vector<1x8xf32>
    %98 = arith.mulf %96, %97 : vector<1x8xf32>
    %99 = arith.mulf %95, %95 : vector<1x8xf32>
    %100 = arith.subf %98, %99 : vector<1x8xf32>
    %cst_50 = arith.constant 0.000000e+00 : f32
    %101 = vector.broadcast %cst_50 : f32 to vector<1x8xf32>
    %102 = arith.maximumf %100, %101 : vector<1x8xf32>
    %103 = vector.extract_strided_slice %83 {offsets = [0, 0], sizes = [1, 8], strides = [1, 1]} : vector<2x8xf32> to vector<1x8xf32>
    %cst_51 = arith.constant 9.99999974E-6 : f32
    %104 = vector.broadcast %cst_51 : f32 to vector<1x8xf32>
    %105 = arith.addf %102, %104 : vector<1x8xf32>
    %106 = math.rsqrt %105 : vector<1x8xf32>
    %107 = arith.mulf %103, %106 : vector<1x8xf32>
    %108 = vector.extract_strided_slice %83 {offsets = [1, 0], sizes = [1, 8], strides = [1, 1]} : vector<2x8xf32> to vector<1x8xf32>
    %109 = arith.mulf %95, %107 : vector<1x8xf32>
    %110 = arith.subf %108, %109 : vector<1x8xf32>
    %111 = tpu.concatenate %107, %110 in 0 : vector<1x8xf32>, vector<1x8xf32> -> vector<2x8xf32>
    %cst_52 = arith.constant dense<0.000000e+00> : vector<2x160xf32>
    %112 = tpu.matmul %111, %85, %cst_52 {dimension_numbers = #tpu.dot_dimension_numbers<[1], [0], [0], [1], [0, 0, 1, 1], [], []>} : vector<2x8xf32>, vector<8x160xf32>, vector<2x160xf32> -> vector<2x160xf32>
    %113 = vector.extract_strided_slice %112 {offsets = [0, 0], sizes = [1, 160], strides = [1, 1]} : vector<2x160xf32> to vector<1x160xf32>
    %114 = vector.broadcast %113 : vector<1x160xf32> to vector<2x160xf32>
    %115 = arith.mulf %82, %114 : vector<2x160xf32>
    %116 = vector.extract_strided_slice %112 {offsets = [1, 0], sizes = [1, 160], strides = [1, 1]} : vector<2x160xf32> to vector<1x160xf32>
    %117 = vector.broadcast %116 : vector<1x160xf32> to vector<2x160xf32>
    %118 = arith.addf %115, %117 : vector<2x160xf32>
    %cst_53 = arith.constant 0.000000e+00 : f32
    %119 = vector.broadcast %cst_53 : f32 to vector<2x160xf32>
    %120 = arith.maximumf %118, %119 : vector<2x160xf32>
    %c0_54 = arith.constant 0 : index
    %c0_55 = arith.constant 0 : index
    %121 = vector.load %arg15[%c0_54, %c0_55] : memref<160x32xf32, #tpu.memory_space<vmem>>, vector<160x32xf32>
    %cst_56 = arith.constant dense<0.000000e+00> : vector<2x32xf32>
    %122 = tpu.matmul %120, %121, %cst_56 {dimension_numbers = #tpu.dot_dimension_numbers<[1], [0], [0], [1], [0, 0, 1, 1], [], []>} : vector<2x160xf32>, vector<160x32xf32>, vector<2x32xf32> -> vector<2x32xf32>
    %c0_57 = arith.constant 0 : index
    %c0_58 = arith.constant 0 : index
    %123 = vector.load %arg1[%c0_57, %c0_58] : memref<2x1xf32, #tpu.memory_space<vmem>>, vector<2x1xf32>
    %c0_59 = arith.constant 0 : index
    %c0_60 = arith.constant 0 : index
    %124 = vector.load %arg16[%c0_59, %c0_60] : memref<1x32xf32, #tpu.memory_space<vmem>>, vector<1x32xf32>
    %125 = vector.broadcast %123 : vector<2x1xf32> to vector<2x32xf32>
    %126 = vector.broadcast %124 : vector<1x32xf32> to vector<2x32xf32>
    %127 = arith.mulf %125, %126 : vector<2x32xf32>
    %128 = arith.addf %122, %127 : vector<2x32xf32>
    %c0_61 = arith.constant 0 : index
    %c0_62 = arith.constant 0 : index
    %129 = vector.load %arg17[%c0_61, %c0_62] : memref<2x32xf32, #tpu.memory_space<vmem>>, vector<2x32xf32>
    %cst_63 = arith.constant dense<0.000000e+00> : vector<32xf32>
    %130 = vector.multi_reduction <add>, %128, %cst_63 [0] : vector<2x32xf32> to vector<32xf32>
    %131 = vector.shape_cast %130 : vector<32xf32> to vector<1x32xf32>
    %cst_64 = arith.constant 2.000000e+00 : f32
    %132 = vector.broadcast %cst_64 : f32 to vector<1x32xf32>
    %133 = arith.divf %131, %132 : vector<1x32xf32>
    %134 = arith.mulf %128, %128 : vector<2x32xf32>
    %cst_65 = arith.constant dense<0.000000e+00> : vector<32xf32>
    %135 = vector.multi_reduction <add>, %134, %cst_65 [0] : vector<2x32xf32> to vector<32xf32>
    %136 = vector.shape_cast %135 : vector<32xf32> to vector<1x32xf32>
    %cst_66 = arith.constant 2.000000e+00 : f32
    %137 = vector.broadcast %cst_66 : f32 to vector<1x32xf32>
    %138 = arith.divf %136, %137 : vector<1x32xf32>
    %139 = arith.mulf %133, %133 : vector<1x32xf32>
    %140 = arith.subf %138, %139 : vector<1x32xf32>
    %cst_67 = arith.constant 0.000000e+00 : f32
    %141 = vector.broadcast %cst_67 : f32 to vector<1x32xf32>
    %142 = arith.maximumf %140, %141 : vector<1x32xf32>
    %143 = vector.broadcast %133 : vector<1x32xf32> to vector<2x32xf32>
    %144 = arith.subf %128, %143 : vector<2x32xf32>
    %cst_68 = arith.constant 9.99999974E-6 : f32
    %145 = vector.broadcast %cst_68 : f32 to vector<1x32xf32>
    %146 = arith.addf %142, %145 : vector<1x32xf32>
    %147 = math.rsqrt %146 : vector<1x32xf32>
    %148 = vector.broadcast %147 : vector<1x32xf32> to vector<2x32xf32>
    %149 = arith.mulf %144, %148 : vector<2x32xf32>
    %150 = vector.extract_strided_slice %129 {offsets = [0, 0], sizes = [1, 32], strides = [1, 1]} : vector<2x32xf32> to vector<1x32xf32>
    %151 = vector.broadcast %150 : vector<1x32xf32> to vector<2x32xf32>
    %152 = arith.mulf %149, %151 : vector<2x32xf32>
    %153 = vector.extract_strided_slice %129 {offsets = [1, 0], sizes = [1, 32], strides = [1, 1]} : vector<2x32xf32> to vector<1x32xf32>
    %154 = vector.broadcast %153 : vector<1x32xf32> to vector<2x32xf32>
    %155 = arith.addf %152, %154 : vector<2x32xf32>
    %cst_69 = arith.constant 0.000000e+00 : f32
    %156 = vector.broadcast %cst_69 : f32 to vector<2x32xf32>
    %157 = arith.maximumf %155, %156 : vector<2x32xf32>
    %c0_70 = arith.constant 0 : index
    %c0_71 = arith.constant 0 : index
    %158 = vector.load %arg18[%c0_70, %c0_71] : memref<32x80xf32, #tpu.memory_space<vmem>>, vector<32x80xf32>
    %cst_72 = arith.constant dense<0.000000e+00> : vector<2x80xf32>
    %159 = tpu.matmul %157, %158, %cst_72 {dimension_numbers = #tpu.dot_dimension_numbers<[1], [0], [0], [1], [0, 0, 1, 1], [], []>} : vector<2x32xf32>, vector<32x80xf32>, vector<2x80xf32> -> vector<2x80xf32>
    %c0_73 = arith.constant 0 : index
    %c0_74 = arith.constant 0 : index
    %160 = vector.load %arg19[%c0_73, %c0_74] : memref<1x80xf32, #tpu.memory_space<vmem>>, vector<1x80xf32>
    %161 = vector.broadcast %160 : vector<1x80xf32> to vector<2x80xf32>
    %162 = arith.addf %159, %161 : vector<2x80xf32>
    %163 = vector.extract_strided_slice %162 {offsets = [0, 0], sizes = [2, 8], strides = [1, 1]} : vector<2x80xf32> to vector<2x8xf32>
    %164 = vector.extract_strided_slice %162 {offsets = [0, 8], sizes = [2, 8], strides = [1, 1]} : vector<2x80xf32> to vector<2x8xf32>
    %165 = vector.extract_strided_slice %162 {offsets = [0, 16], sizes = [2, 64], strides = [1, 1]} : vector<2x80xf32> to vector<2x64xf32>
    %c0_75 = arith.constant 0 : index
    %c0_76 = arith.constant 0 : index
    %166 = vector.load %arg2[%c0_75, %c0_76] : memref<2x8xf32, #tpu.memory_space<vmem>>, vector<2x8xf32>
    %cst_77 = arith.constant 5.000000e-01 : f32
    %167 = vector.broadcast %cst_77 : f32 to vector<2x8xf32>
    %168 = arith.mulf %167, %164 : vector<2x8xf32>
    %169 = math.exp %168 : vector<2x8xf32>
    %170 = arith.mulf %166, %169 : vector<2x8xf32>
    %171 = arith.addf %163, %170 : vector<2x8xf32>
    %cst_78 = arith.constant 0.000000e+00 : f32
    %172 = vector.broadcast %cst_78 : f32 to vector<2x1xf32>
    %c0_79 = arith.constant 0 : index
    %c0_80 = arith.constant 0 : index
    %c0_81 = arith.constant 0 : index
    %173 = vector.load %arg20[%c0_79, %c0_80, %c0_81] : memref<4x8x64xf32, #tpu.memory_space<vmem>>, vector<1x8x64xf32>
    %174 = vector.shape_cast %173 : vector<1x8x64xf32> to vector<8x64xf32>
    %cst_82 = arith.constant dense<0.000000e+00> : vector<2x64xf32>
    %175 = tpu.matmul %171, %174, %cst_82 {dimension_numbers = #tpu.dot_dimension_numbers<[1], [0], [0], [1], [0, 0, 1, 1], [], []>} : vector<2x8xf32>, vector<8x64xf32>, vector<2x64xf32> -> vector<2x64xf32>
    %c0_83 = arith.constant 0 : index
    %c0_84 = arith.constant 0 : index
    %c0_85 = arith.constant 0 : index
    %176 = vector.load %arg21[%c0_83, %c0_84, %c0_85] : memref<4x1x64xf32, #tpu.memory_space<vmem>>, vector<1x1x64xf32>
    %177 = vector.shape_cast %176 : vector<1x1x64xf32> to vector<1x64xf32>
    %178 = vector.broadcast %177 : vector<1x64xf32> to vector<2x64xf32>
    %179 = arith.addf %175, %178 : vector<2x64xf32>
    %cst_86 = arith.constant 0.000000e+00 : f32
    %180 = vector.broadcast %cst_86 : f32 to vector<2x64xf32>
    %181 = arith.cmpf ogt, %179, %180 : vector<2x64xf32>
    %cst_87 = arith.constant 0.000000e+00 : f32
    %182 = vector.broadcast %cst_87 : f32 to vector<2x64xf32>
    %183 = arith.minimumf %179, %182 : vector<2x64xf32>
    %184 = math.exp %183 : vector<2x64xf32>
    %cst_88 = arith.constant 1.000000e+00 : f32
    %185 = vector.broadcast %cst_88 : f32 to vector<2x64xf32>
    %186 = arith.subf %184, %185 : vector<2x64xf32>
    %187 = arith.select %181, %179, %186 : vector<2x64xi1>, vector<2x64xf32>
    %188 = arith.addf %187, %165 : vector<2x64xf32>
    %c0_89 = arith.constant 0 : index
    %c0_90 = arith.constant 0 : index
    %c0_91 = arith.constant 0 : index
    %189 = vector.load %arg22[%c0_89, %c0_90, %c0_91] : memref<4x64x64xf32, #tpu.memory_space<vmem>>, vector<1x64x64xf32>
    %190 = vector.shape_cast %189 : vector<1x64x64xf32> to vector<64x64xf32>
    %cst_92 = arith.constant dense<0.000000e+00> : vector<2x64xf32>
    %191 = tpu.matmul %188, %190, %cst_92 {dimension_numbers = #tpu.dot_dimension_numbers<[1], [0], [0], [1], [0, 0, 1, 1], [], []>} : vector<2x64xf32>, vector<64x64xf32>, vector<2x64xf32> -> vector<2x64xf32>
    %c0_93 = arith.constant 0 : index
    %c0_94 = arith.constant 0 : index
    %c0_95 = arith.constant 0 : index
    %192 = vector.load %arg23[%c0_93, %c0_94, %c0_95] : memref<4x1x64xf32, #tpu.memory_space<vmem>>, vector<1x1x64xf32>
    %193 = vector.shape_cast %192 : vector<1x1x64xf32> to vector<1x64xf32>
    %194 = vector.broadcast %193 : vector<1x64xf32> to vector<2x64xf32>
    %195 = arith.addf %191, %194 : vector<2x64xf32>
    %cst_96 = arith.constant 0.000000e+00 : f32
    %196 = vector.broadcast %cst_96 : f32 to vector<2x64xf32>
    %197 = arith.cmpf ogt, %195, %196 : vector<2x64xf32>
    %cst_97 = arith.constant 0.000000e+00 : f32
    %198 = vector.broadcast %cst_97 : f32 to vector<2x64xf32>
    %199 = arith.minimumf %195, %198 : vector<2x64xf32>
    %200 = math.exp %199 : vector<2x64xf32>
    %cst_98 = arith.constant 1.000000e+00 : f32
    %201 = vector.broadcast %cst_98 : f32 to vector<2x64xf32>
    %202 = arith.subf %200, %201 : vector<2x64xf32>
    %203 = arith.select %197, %195, %202 : vector<2x64xi1>, vector<2x64xf32>
    %c0_99 = arith.constant 0 : index
    %c0_100 = arith.constant 0 : index
    %c0_101 = arith.constant 0 : index
    %204 = vector.load %arg24[%c0_99, %c0_100, %c0_101] : memref<4x64x16xf32, #tpu.memory_space<vmem>>, vector<1x64x16xf32>
    %205 = vector.shape_cast %204 : vector<1x64x16xf32> to vector<64x16xf32>
    %cst_102 = arith.constant dense<0.000000e+00> : vector<2x16xf32>
    %206 = tpu.matmul %203, %205, %cst_102 {dimension_numbers = #tpu.dot_dimension_numbers<[1], [0], [0], [1], [0, 0, 1, 1], [], []>} : vector<2x64xf32>, vector<64x16xf32>, vector<2x16xf32> -> vector<2x16xf32>
    %c0_103 = arith.constant 0 : index
    %c0_104 = arith.constant 0 : index
    %c0_105 = arith.constant 0 : index
    %207 = vector.load %arg25[%c0_103, %c0_104, %c0_105] : memref<4x1x16xf32, #tpu.memory_space<vmem>>, vector<1x1x16xf32>
    %208 = vector.shape_cast %207 : vector<1x1x16xf32> to vector<1x16xf32>
    %209 = vector.broadcast %208 : vector<1x16xf32> to vector<2x16xf32>
    %210 = arith.addf %206, %209 : vector<2x16xf32>
    %211 = vector.extract_strided_slice %210 {offsets = [0, 0], sizes = [2, 8], strides = [1, 1]} : vector<2x16xf32> to vector<2x8xf32>
    %212 = vector.extract_strided_slice %210 {offsets = [0, 8], sizes = [2, 8], strides = [1, 1]} : vector<2x16xf32> to vector<2x8xf32>
    %cst_106 = arith.constant 0.000000e+00 : f32
    %213 = vector.broadcast %cst_106 : f32 to vector<2x8xf32>
    %214 = arith.minimumf %212, %213 : vector<2x8xf32>
    %215 = math.absf %212 : vector<2x8xf32>
    %cst_107 = arith.constant 0.000000e+00 : f32
    %216 = vector.broadcast %cst_107 : f32 to vector<2x8xf32>
    %217 = arith.subf %216, %215 : vector<2x8xf32>
    %218 = math.exp %217 : vector<2x8xf32>
    %cst_108 = arith.constant 1.000000e+00 : f32
    %219 = vector.broadcast %cst_108 : f32 to vector<2x8xf32>
    %220 = arith.addf %219, %218 : vector<2x8xf32>
    %221 = math.log %220 : vector<2x8xf32>
    %222 = arith.subf %214, %221 : vector<2x8xf32>
    %223 = math.exp %222 : vector<2x8xf32>
    %224 = arith.mulf %223, %171 : vector<2x8xf32>
    %cst_109 = arith.constant 1.000000e+00 : f32
    %225 = vector.broadcast %cst_109 : f32 to vector<2x8xf32>
    %226 = arith.subf %225, %223 : vector<2x8xf32>
    %227 = arith.mulf %226, %211 : vector<2x8xf32>
    %228 = arith.addf %224, %227 : vector<2x8xf32>
    %cst_110 = arith.constant dense<0.000000e+00> : vector<2xf32>
    %229 = vector.multi_reduction <add>, %222, %cst_110 [1] : vector<2x8xf32> to vector<2xf32>
    %230 = vector.shape_cast %229 : vector<2xf32> to vector<2x1xf32>
    %231 = arith.addf %172, %230 : vector<2x1xf32>
    %c1 = arith.constant 1 : index
    %c0_111 = arith.constant 0 : index
    %c0_112 = arith.constant 0 : index
    %232 = vector.load %arg20[%c1, %c0_111, %c0_112] : memref<4x8x64xf32, #tpu.memory_space<vmem>>, vector<1x8x64xf32>
    %233 = vector.shape_cast %232 : vector<1x8x64xf32> to vector<8x64xf32>
    %cst_113 = arith.constant dense<0.000000e+00> : vector<2x64xf32>
    %234 = tpu.matmul %228, %233, %cst_113 {dimension_numbers = #tpu.dot_dimension_numbers<[1], [0], [0], [1], [0, 0, 1, 1], [], []>} : vector<2x8xf32>, vector<8x64xf32>, vector<2x64xf32> -> vector<2x64xf32>
    %c1_114 = arith.constant 1 : index
    %c0_115 = arith.constant 0 : index
    %c0_116 = arith.constant 0 : index
    %235 = vector.load %arg21[%c1_114, %c0_115, %c0_116] : memref<4x1x64xf32, #tpu.memory_space<vmem>>, vector<1x1x64xf32>
    %236 = vector.shape_cast %235 : vector<1x1x64xf32> to vector<1x64xf32>
    %237 = vector.broadcast %236 : vector<1x64xf32> to vector<2x64xf32>
    %238 = arith.addf %234, %237 : vector<2x64xf32>
    %cst_117 = arith.constant 0.000000e+00 : f32
    %239 = vector.broadcast %cst_117 : f32 to vector<2x64xf32>
    %240 = arith.cmpf ogt, %238, %239 : vector<2x64xf32>
    %cst_118 = arith.constant 0.000000e+00 : f32
    %241 = vector.broadcast %cst_118 : f32 to vector<2x64xf32>
    %242 = arith.minimumf %238, %241 : vector<2x64xf32>
    %243 = math.exp %242 : vector<2x64xf32>
    %cst_119 = arith.constant 1.000000e+00 : f32
    %244 = vector.broadcast %cst_119 : f32 to vector<2x64xf32>
    %245 = arith.subf %243, %244 : vector<2x64xf32>
    %246 = arith.select %240, %238, %245 : vector<2x64xi1>, vector<2x64xf32>
    %247 = arith.addf %246, %165 : vector<2x64xf32>
    %c1_120 = arith.constant 1 : index
    %c0_121 = arith.constant 0 : index
    %c0_122 = arith.constant 0 : index
    %248 = vector.load %arg22[%c1_120, %c0_121, %c0_122] : memref<4x64x64xf32, #tpu.memory_space<vmem>>, vector<1x64x64xf32>
    %249 = vector.shape_cast %248 : vector<1x64x64xf32> to vector<64x64xf32>
    %cst_123 = arith.constant dense<0.000000e+00> : vector<2x64xf32>
    %250 = tpu.matmul %247, %249, %cst_123 {dimension_numbers = #tpu.dot_dimension_numbers<[1], [0], [0], [1], [0, 0, 1, 1], [], []>} : vector<2x64xf32>, vector<64x64xf32>, vector<2x64xf32> -> vector<2x64xf32>
    %c1_124 = arith.constant 1 : index
    %c0_125 = arith.constant 0 : index
    %c0_126 = arith.constant 0 : index
    %251 = vector.load %arg23[%c1_124, %c0_125, %c0_126] : memref<4x1x64xf32, #tpu.memory_space<vmem>>, vector<1x1x64xf32>
    %252 = vector.shape_cast %251 : vector<1x1x64xf32> to vector<1x64xf32>
    %253 = vector.broadcast %252 : vector<1x64xf32> to vector<2x64xf32>
    %254 = arith.addf %250, %253 : vector<2x64xf32>
    %cst_127 = arith.constant 0.000000e+00 : f32
    %255 = vector.broadcast %cst_127 : f32 to vector<2x64xf32>
    %256 = arith.cmpf ogt, %254, %255 : vector<2x64xf32>
    %cst_128 = arith.constant 0.000000e+00 : f32
    %257 = vector.broadcast %cst_128 : f32 to vector<2x64xf32>
    %258 = arith.minimumf %254, %257 : vector<2x64xf32>
    %259 = math.exp %258 : vector<2x64xf32>
    %cst_129 = arith.constant 1.000000e+00 : f32
    %260 = vector.broadcast %cst_129 : f32 to vector<2x64xf32>
    %261 = arith.subf %259, %260 : vector<2x64xf32>
    %262 = arith.select %256, %254, %261 : vector<2x64xi1>, vector<2x64xf32>
    %c1_130 = arith.constant 1 : index
    %c0_131 = arith.constant 0 : index
    %c0_132 = arith.constant 0 : index
    %263 = vector.load %arg24[%c1_130, %c0_131, %c0_132] : memref<4x64x16xf32, #tpu.memory_space<vmem>>, vector<1x64x16xf32>
    %264 = vector.shape_cast %263 : vector<1x64x16xf32> to vector<64x16xf32>
    %cst_133 = arith.constant dense<0.000000e+00> : vector<2x16xf32>
    %265 = tpu.matmul %262, %264, %cst_133 {dimension_numbers = #tpu.dot_dimension_numbers<[1], [0], [0], [1], [0, 0, 1, 1], [], []>} : vector<2x64xf32>, vector<64x16xf32>, vector<2x16xf32> -> vector<2x16xf32>
    %c1_134 = arith.constant 1 : index
    %c0_135 = arith.constant 0 : index
    %c0_136 = arith.constant 0 : index
    %266 = vector.load %arg25[%c1_134, %c0_135, %c0_136] : memref<4x1x16xf32, #tpu.memory_space<vmem>>, vector<1x1x16xf32>
    %267 = vector.shape_cast %266 : vector<1x1x16xf32> to vector<1x16xf32>
    %268 = vector.broadcast %267 : vector<1x16xf32> to vector<2x16xf32>
    %269 = arith.addf %265, %268 : vector<2x16xf32>
    %270 = vector.extract_strided_slice %269 {offsets = [0, 0], sizes = [2, 8], strides = [1, 1]} : vector<2x16xf32> to vector<2x8xf32>
    %271 = vector.extract_strided_slice %269 {offsets = [0, 8], sizes = [2, 8], strides = [1, 1]} : vector<2x16xf32> to vector<2x8xf32>
    %cst_137 = arith.constant 0.000000e+00 : f32
    %272 = vector.broadcast %cst_137 : f32 to vector<2x8xf32>
    %273 = arith.minimumf %271, %272 : vector<2x8xf32>
    %274 = math.absf %271 : vector<2x8xf32>
    %cst_138 = arith.constant 0.000000e+00 : f32
    %275 = vector.broadcast %cst_138 : f32 to vector<2x8xf32>
    %276 = arith.subf %275, %274 : vector<2x8xf32>
    %277 = math.exp %276 : vector<2x8xf32>
    %cst_139 = arith.constant 1.000000e+00 : f32
    %278 = vector.broadcast %cst_139 : f32 to vector<2x8xf32>
    %279 = arith.addf %278, %277 : vector<2x8xf32>
    %280 = math.log %279 : vector<2x8xf32>
    %281 = arith.subf %273, %280 : vector<2x8xf32>
    %282 = math.exp %281 : vector<2x8xf32>
    %283 = arith.mulf %282, %228 : vector<2x8xf32>
    %cst_140 = arith.constant 1.000000e+00 : f32
    %284 = vector.broadcast %cst_140 : f32 to vector<2x8xf32>
    %285 = arith.subf %284, %282 : vector<2x8xf32>
    %286 = arith.mulf %285, %270 : vector<2x8xf32>
    %287 = arith.addf %283, %286 : vector<2x8xf32>
    %cst_141 = arith.constant dense<0.000000e+00> : vector<2xf32>
    %288 = vector.multi_reduction <add>, %281, %cst_141 [1] : vector<2x8xf32> to vector<2xf32>
    %289 = vector.shape_cast %288 : vector<2xf32> to vector<2x1xf32>
    %290 = arith.addf %231, %289 : vector<2x1xf32>
    %c2 = arith.constant 2 : index
    %c0_142 = arith.constant 0 : index
    %c0_143 = arith.constant 0 : index
    %291 = vector.load %arg20[%c2, %c0_142, %c0_143] : memref<4x8x64xf32, #tpu.memory_space<vmem>>, vector<1x8x64xf32>
    %292 = vector.shape_cast %291 : vector<1x8x64xf32> to vector<8x64xf32>
    %cst_144 = arith.constant dense<0.000000e+00> : vector<2x64xf32>
    %293 = tpu.matmul %287, %292, %cst_144 {dimension_numbers = #tpu.dot_dimension_numbers<[1], [0], [0], [1], [0, 0, 1, 1], [], []>} : vector<2x8xf32>, vector<8x64xf32>, vector<2x64xf32> -> vector<2x64xf32>
    %c2_145 = arith.constant 2 : index
    %c0_146 = arith.constant 0 : index
    %c0_147 = arith.constant 0 : index
    %294 = vector.load %arg21[%c2_145, %c0_146, %c0_147] : memref<4x1x64xf32, #tpu.memory_space<vmem>>, vector<1x1x64xf32>
    %295 = vector.shape_cast %294 : vector<1x1x64xf32> to vector<1x64xf32>
    %296 = vector.broadcast %295 : vector<1x64xf32> to vector<2x64xf32>
    %297 = arith.addf %293, %296 : vector<2x64xf32>
    %cst_148 = arith.constant 0.000000e+00 : f32
    %298 = vector.broadcast %cst_148 : f32 to vector<2x64xf32>
    %299 = arith.cmpf ogt, %297, %298 : vector<2x64xf32>
    %cst_149 = arith.constant 0.000000e+00 : f32
    %300 = vector.broadcast %cst_149 : f32 to vector<2x64xf32>
    %301 = arith.minimumf %297, %300 : vector<2x64xf32>
    %302 = math.exp %301 : vector<2x64xf32>
    %cst_150 = arith.constant 1.000000e+00 : f32
    %303 = vector.broadcast %cst_150 : f32 to vector<2x64xf32>
    %304 = arith.subf %302, %303 : vector<2x64xf32>
    %305 = arith.select %299, %297, %304 : vector<2x64xi1>, vector<2x64xf32>
    %306 = arith.addf %305, %165 : vector<2x64xf32>
    %c2_151 = arith.constant 2 : index
    %c0_152 = arith.constant 0 : index
    %c0_153 = arith.constant 0 : index
    %307 = vector.load %arg22[%c2_151, %c0_152, %c0_153] : memref<4x64x64xf32, #tpu.memory_space<vmem>>, vector<1x64x64xf32>
    %308 = vector.shape_cast %307 : vector<1x64x64xf32> to vector<64x64xf32>
    %cst_154 = arith.constant dense<0.000000e+00> : vector<2x64xf32>
    %309 = tpu.matmul %306, %308, %cst_154 {dimension_numbers = #tpu.dot_dimension_numbers<[1], [0], [0], [1], [0, 0, 1, 1], [], []>} : vector<2x64xf32>, vector<64x64xf32>, vector<2x64xf32> -> vector<2x64xf32>
    %c2_155 = arith.constant 2 : index
    %c0_156 = arith.constant 0 : index
    %c0_157 = arith.constant 0 : index
    %310 = vector.load %arg23[%c2_155, %c0_156, %c0_157] : memref<4x1x64xf32, #tpu.memory_space<vmem>>, vector<1x1x64xf32>
    %311 = vector.shape_cast %310 : vector<1x1x64xf32> to vector<1x64xf32>
    %312 = vector.broadcast %311 : vector<1x64xf32> to vector<2x64xf32>
    %313 = arith.addf %309, %312 : vector<2x64xf32>
    %cst_158 = arith.constant 0.000000e+00 : f32
    %314 = vector.broadcast %cst_158 : f32 to vector<2x64xf32>
    %315 = arith.cmpf ogt, %313, %314 : vector<2x64xf32>
    %cst_159 = arith.constant 0.000000e+00 : f32
    %316 = vector.broadcast %cst_159 : f32 to vector<2x64xf32>
    %317 = arith.minimumf %313, %316 : vector<2x64xf32>
    %318 = math.exp %317 : vector<2x64xf32>
    %cst_160 = arith.constant 1.000000e+00 : f32
    %319 = vector.broadcast %cst_160 : f32 to vector<2x64xf32>
    %320 = arith.subf %318, %319 : vector<2x64xf32>
    %321 = arith.select %315, %313, %320 : vector<2x64xi1>, vector<2x64xf32>
    %c2_161 = arith.constant 2 : index
    %c0_162 = arith.constant 0 : index
    %c0_163 = arith.constant 0 : index
    %322 = vector.load %arg24[%c2_161, %c0_162, %c0_163] : memref<4x64x16xf32, #tpu.memory_space<vmem>>, vector<1x64x16xf32>
    %323 = vector.shape_cast %322 : vector<1x64x16xf32> to vector<64x16xf32>
    %cst_164 = arith.constant dense<0.000000e+00> : vector<2x16xf32>
    %324 = tpu.matmul %321, %323, %cst_164 {dimension_numbers = #tpu.dot_dimension_numbers<[1], [0], [0], [1], [0, 0, 1, 1], [], []>} : vector<2x64xf32>, vector<64x16xf32>, vector<2x16xf32> -> vector<2x16xf32>
    %c2_165 = arith.constant 2 : index
    %c0_166 = arith.constant 0 : index
    %c0_167 = arith.constant 0 : index
    %325 = vector.load %arg25[%c2_165, %c0_166, %c0_167] : memref<4x1x16xf32, #tpu.memory_space<vmem>>, vector<1x1x16xf32>
    %326 = vector.shape_cast %325 : vector<1x1x16xf32> to vector<1x16xf32>
    %327 = vector.broadcast %326 : vector<1x16xf32> to vector<2x16xf32>
    %328 = arith.addf %324, %327 : vector<2x16xf32>
    %329 = vector.extract_strided_slice %328 {offsets = [0, 0], sizes = [2, 8], strides = [1, 1]} : vector<2x16xf32> to vector<2x8xf32>
    %330 = vector.extract_strided_slice %328 {offsets = [0, 8], sizes = [2, 8], strides = [1, 1]} : vector<2x16xf32> to vector<2x8xf32>
    %cst_168 = arith.constant 0.000000e+00 : f32
    %331 = vector.broadcast %cst_168 : f32 to vector<2x8xf32>
    %332 = arith.minimumf %330, %331 : vector<2x8xf32>
    %333 = math.absf %330 : vector<2x8xf32>
    %cst_169 = arith.constant 0.000000e+00 : f32
    %334 = vector.broadcast %cst_169 : f32 to vector<2x8xf32>
    %335 = arith.subf %334, %333 : vector<2x8xf32>
    %336 = math.exp %335 : vector<2x8xf32>
    %cst_170 = arith.constant 1.000000e+00 : f32
    %337 = vector.broadcast %cst_170 : f32 to vector<2x8xf32>
    %338 = arith.addf %337, %336 : vector<2x8xf32>
    %339 = math.log %338 : vector<2x8xf32>
    %340 = arith.subf %332, %339 : vector<2x8xf32>
    %341 = math.exp %340 : vector<2x8xf32>
    %342 = arith.mulf %341, %287 : vector<2x8xf32>
    %cst_171 = arith.constant 1.000000e+00 : f32
    %343 = vector.broadcast %cst_171 : f32 to vector<2x8xf32>
    %344 = arith.subf %343, %341 : vector<2x8xf32>
    %345 = arith.mulf %344, %329 : vector<2x8xf32>
    %346 = arith.addf %342, %345 : vector<2x8xf32>
    %cst_172 = arith.constant dense<0.000000e+00> : vector<2xf32>
    %347 = vector.multi_reduction <add>, %340, %cst_172 [1] : vector<2x8xf32> to vector<2xf32>
    %348 = vector.shape_cast %347 : vector<2xf32> to vector<2x1xf32>
    %349 = arith.addf %290, %348 : vector<2x1xf32>
    %c3 = arith.constant 3 : index
    %c0_173 = arith.constant 0 : index
    %c0_174 = arith.constant 0 : index
    %350 = vector.load %arg20[%c3, %c0_173, %c0_174] : memref<4x8x64xf32, #tpu.memory_space<vmem>>, vector<1x8x64xf32>
    %351 = vector.shape_cast %350 : vector<1x8x64xf32> to vector<8x64xf32>
    %cst_175 = arith.constant dense<0.000000e+00> : vector<2x64xf32>
    %352 = tpu.matmul %346, %351, %cst_175 {dimension_numbers = #tpu.dot_dimension_numbers<[1], [0], [0], [1], [0, 0, 1, 1], [], []>} : vector<2x8xf32>, vector<8x64xf32>, vector<2x64xf32> -> vector<2x64xf32>
    %c3_176 = arith.constant 3 : index
    %c0_177 = arith.constant 0 : index
    %c0_178 = arith.constant 0 : index
    %353 = vector.load %arg21[%c3_176, %c0_177, %c0_178] : memref<4x1x64xf32, #tpu.memory_space<vmem>>, vector<1x1x64xf32>
    %354 = vector.shape_cast %353 : vector<1x1x64xf32> to vector<1x64xf32>
    %355 = vector.broadcast %354 : vector<1x64xf32> to vector<2x64xf32>
    %356 = arith.addf %352, %355 : vector<2x64xf32>
    %cst_179 = arith.constant 0.000000e+00 : f32
    %357 = vector.broadcast %cst_179 : f32 to vector<2x64xf32>
    %358 = arith.cmpf ogt, %356, %357 : vector<2x64xf32>
    %cst_180 = arith.constant 0.000000e+00 : f32
    %359 = vector.broadcast %cst_180 : f32 to vector<2x64xf32>
    %360 = arith.minimumf %356, %359 : vector<2x64xf32>
    %361 = math.exp %360 : vector<2x64xf32>
    %cst_181 = arith.constant 1.000000e+00 : f32
    %362 = vector.broadcast %cst_181 : f32 to vector<2x64xf32>
    %363 = arith.subf %361, %362 : vector<2x64xf32>
    %364 = arith.select %358, %356, %363 : vector<2x64xi1>, vector<2x64xf32>
    %365 = arith.addf %364, %165 : vector<2x64xf32>
    %c3_182 = arith.constant 3 : index
    %c0_183 = arith.constant 0 : index
    %c0_184 = arith.constant 0 : index
    %366 = vector.load %arg22[%c3_182, %c0_183, %c0_184] : memref<4x64x64xf32, #tpu.memory_space<vmem>>, vector<1x64x64xf32>
    %367 = vector.shape_cast %366 : vector<1x64x64xf32> to vector<64x64xf32>
    %cst_185 = arith.constant dense<0.000000e+00> : vector<2x64xf32>
    %368 = tpu.matmul %365, %367, %cst_185 {dimension_numbers = #tpu.dot_dimension_numbers<[1], [0], [0], [1], [0, 0, 1, 1], [], []>} : vector<2x64xf32>, vector<64x64xf32>, vector<2x64xf32> -> vector<2x64xf32>
    %c3_186 = arith.constant 3 : index
    %c0_187 = arith.constant 0 : index
    %c0_188 = arith.constant 0 : index
    %369 = vector.load %arg23[%c3_186, %c0_187, %c0_188] : memref<4x1x64xf32, #tpu.memory_space<vmem>>, vector<1x1x64xf32>
    %370 = vector.shape_cast %369 : vector<1x1x64xf32> to vector<1x64xf32>
    %371 = vector.broadcast %370 : vector<1x64xf32> to vector<2x64xf32>
    %372 = arith.addf %368, %371 : vector<2x64xf32>
    %cst_189 = arith.constant 0.000000e+00 : f32
    %373 = vector.broadcast %cst_189 : f32 to vector<2x64xf32>
    %374 = arith.cmpf ogt, %372, %373 : vector<2x64xf32>
    %cst_190 = arith.constant 0.000000e+00 : f32
    %375 = vector.broadcast %cst_190 : f32 to vector<2x64xf32>
    %376 = arith.minimumf %372, %375 : vector<2x64xf32>
    %377 = math.exp %376 : vector<2x64xf32>
    %cst_191 = arith.constant 1.000000e+00 : f32
    %378 = vector.broadcast %cst_191 : f32 to vector<2x64xf32>
    %379 = arith.subf %377, %378 : vector<2x64xf32>
    %380 = arith.select %374, %372, %379 : vector<2x64xi1>, vector<2x64xf32>
    %c3_192 = arith.constant 3 : index
    %c0_193 = arith.constant 0 : index
    %c0_194 = arith.constant 0 : index
    %381 = vector.load %arg24[%c3_192, %c0_193, %c0_194] : memref<4x64x16xf32, #tpu.memory_space<vmem>>, vector<1x64x16xf32>
    %382 = vector.shape_cast %381 : vector<1x64x16xf32> to vector<64x16xf32>
    %cst_195 = arith.constant dense<0.000000e+00> : vector<2x16xf32>
    %383 = tpu.matmul %380, %382, %cst_195 {dimension_numbers = #tpu.dot_dimension_numbers<[1], [0], [0], [1], [0, 0, 1, 1], [], []>} : vector<2x64xf32>, vector<64x16xf32>, vector<2x16xf32> -> vector<2x16xf32>
    %c3_196 = arith.constant 3 : index
    %c0_197 = arith.constant 0 : index
    %c0_198 = arith.constant 0 : index
    %384 = vector.load %arg25[%c3_196, %c0_197, %c0_198] : memref<4x1x16xf32, #tpu.memory_space<vmem>>, vector<1x1x16xf32>
    %385 = vector.shape_cast %384 : vector<1x1x16xf32> to vector<1x16xf32>
    %386 = vector.broadcast %385 : vector<1x16xf32> to vector<2x16xf32>
    %387 = arith.addf %383, %386 : vector<2x16xf32>
    %388 = vector.extract_strided_slice %387 {offsets = [0, 0], sizes = [2, 8], strides = [1, 1]} : vector<2x16xf32> to vector<2x8xf32>
    %389 = vector.extract_strided_slice %387 {offsets = [0, 8], sizes = [2, 8], strides = [1, 1]} : vector<2x16xf32> to vector<2x8xf32>
    %cst_199 = arith.constant 0.000000e+00 : f32
    %390 = vector.broadcast %cst_199 : f32 to vector<2x8xf32>
    %391 = arith.minimumf %389, %390 : vector<2x8xf32>
    %392 = math.absf %389 : vector<2x8xf32>
    %cst_200 = arith.constant 0.000000e+00 : f32
    %393 = vector.broadcast %cst_200 : f32 to vector<2x8xf32>
    %394 = arith.subf %393, %392 : vector<2x8xf32>
    %395 = math.exp %394 : vector<2x8xf32>
    %cst_201 = arith.constant 1.000000e+00 : f32
    %396 = vector.broadcast %cst_201 : f32 to vector<2x8xf32>
    %397 = arith.addf %396, %395 : vector<2x8xf32>
    %398 = math.log %397 : vector<2x8xf32>
    %399 = arith.subf %391, %398 : vector<2x8xf32>
    %400 = math.exp %399 : vector<2x8xf32>
    %401 = arith.mulf %400, %346 : vector<2x8xf32>
    %cst_202 = arith.constant 1.000000e+00 : f32
    %402 = vector.broadcast %cst_202 : f32 to vector<2x8xf32>
    %403 = arith.subf %402, %400 : vector<2x8xf32>
    %404 = arith.mulf %403, %388 : vector<2x8xf32>
    %405 = arith.addf %401, %404 : vector<2x8xf32>
    %cst_203 = arith.constant dense<0.000000e+00> : vector<2xf32>
    %406 = vector.multi_reduction <add>, %399, %cst_203 [1] : vector<2x8xf32> to vector<2xf32>
    %407 = vector.shape_cast %406 : vector<2xf32> to vector<2x1xf32>
    %408 = arith.addf %349, %407 : vector<2x1xf32>
    %c0_204 = arith.constant 0 : index
    %c0_205 = arith.constant 0 : index
    %409 = vector.load %arg26[%c0_204, %c0_205] : memref<8x32xf32, #tpu.memory_space<vmem>>, vector<8x32xf32>
    %cst_206 = arith.constant dense<0.000000e+00> : vector<2x32xf32>
    %410 = tpu.matmul %405, %409, %cst_206 {dimension_numbers = #tpu.dot_dimension_numbers<[1], [0], [0], [1], [0, 0, 1, 1], [], []>} : vector<2x8xf32>, vector<8x32xf32>, vector<2x32xf32> -> vector<2x32xf32>
    %c0_207 = arith.constant 0 : index
    %c0_208 = arith.constant 0 : index
    %411 = vector.load %arg27[%c0_207, %c0_208] : memref<2x32xf32, #tpu.memory_space<vmem>>, vector<2x32xf32>
    %cst_209 = arith.constant dense<0.000000e+00> : vector<32xf32>
    %412 = vector.multi_reduction <add>, %410, %cst_209 [0] : vector<2x32xf32> to vector<32xf32>
    %413 = vector.shape_cast %412 : vector<32xf32> to vector<1x32xf32>
    %cst_210 = arith.constant 2.000000e+00 : f32
    %414 = vector.broadcast %cst_210 : f32 to vector<1x32xf32>
    %415 = arith.divf %413, %414 : vector<1x32xf32>
    %416 = arith.mulf %410, %410 : vector<2x32xf32>
    %cst_211 = arith.constant dense<0.000000e+00> : vector<32xf32>
    %417 = vector.multi_reduction <add>, %416, %cst_211 [0] : vector<2x32xf32> to vector<32xf32>
    %418 = vector.shape_cast %417 : vector<32xf32> to vector<1x32xf32>
    %cst_212 = arith.constant 2.000000e+00 : f32
    %419 = vector.broadcast %cst_212 : f32 to vector<1x32xf32>
    %420 = arith.divf %418, %419 : vector<1x32xf32>
    %421 = arith.mulf %415, %415 : vector<1x32xf32>
    %422 = arith.subf %420, %421 : vector<1x32xf32>
    %cst_213 = arith.constant 0.000000e+00 : f32
    %423 = vector.broadcast %cst_213 : f32 to vector<1x32xf32>
    %424 = arith.maximumf %422, %423 : vector<1x32xf32>
    %425 = vector.broadcast %415 : vector<1x32xf32> to vector<2x32xf32>
    %426 = arith.subf %410, %425 : vector<2x32xf32>
    %cst_214 = arith.constant 9.99999974E-6 : f32
    %427 = vector.broadcast %cst_214 : f32 to vector<1x32xf32>
    %428 = arith.addf %424, %427 : vector<1x32xf32>
    %429 = math.rsqrt %428 : vector<1x32xf32>
    %430 = vector.broadcast %429 : vector<1x32xf32> to vector<2x32xf32>
    %431 = arith.mulf %426, %430 : vector<2x32xf32>
    %432 = vector.extract_strided_slice %411 {offsets = [0, 0], sizes = [1, 32], strides = [1, 1]} : vector<2x32xf32> to vector<1x32xf32>
    %433 = vector.broadcast %432 : vector<1x32xf32> to vector<2x32xf32>
    %434 = arith.mulf %431, %433 : vector<2x32xf32>
    %435 = vector.extract_strided_slice %411 {offsets = [1, 0], sizes = [1, 32], strides = [1, 1]} : vector<2x32xf32> to vector<1x32xf32>
    %436 = vector.broadcast %435 : vector<1x32xf32> to vector<2x32xf32>
    %437 = arith.addf %434, %436 : vector<2x32xf32>
    %cst_215 = arith.constant 0.000000e+00 : f32
    %438 = vector.broadcast %cst_215 : f32 to vector<2x32xf32>
    %439 = arith.maximumf %437, %438 : vector<2x32xf32>
    %c0_216 = arith.constant 0 : index
    %c0_217 = arith.constant 0 : index
    %440 = vector.load %arg28[%c0_216, %c0_217] : memref<32x160xf32, #tpu.memory_space<vmem>>, vector<32x160xf32>
    %cst_218 = arith.constant dense<0.000000e+00> : vector<2x160xf32>
    %441 = tpu.matmul %439, %440, %cst_218 {dimension_numbers = #tpu.dot_dimension_numbers<[1], [0], [0], [1], [0, 0, 1, 1], [], []>} : vector<2x32xf32>, vector<32x160xf32>, vector<2x160xf32> -> vector<2x160xf32>
    %c0_219 = arith.constant 0 : index
    %c0_220 = arith.constant 0 : index
    %442 = vector.load %arg29[%c0_219, %c0_220] : memref<2x160xf32, #tpu.memory_space<vmem>>, vector<2x160xf32>
    %cst_221 = arith.constant dense<0.000000e+00> : vector<160xf32>
    %443 = vector.multi_reduction <add>, %441, %cst_221 [0] : vector<2x160xf32> to vector<160xf32>
    %444 = vector.shape_cast %443 : vector<160xf32> to vector<1x160xf32>
    %cst_222 = arith.constant 2.000000e+00 : f32
    %445 = vector.broadcast %cst_222 : f32 to vector<1x160xf32>
    %446 = arith.divf %444, %445 : vector<1x160xf32>
    %447 = arith.mulf %441, %441 : vector<2x160xf32>
    %cst_223 = arith.constant dense<0.000000e+00> : vector<160xf32>
    %448 = vector.multi_reduction <add>, %447, %cst_223 [0] : vector<2x160xf32> to vector<160xf32>
    %449 = vector.shape_cast %448 : vector<160xf32> to vector<1x160xf32>
    %cst_224 = arith.constant 2.000000e+00 : f32
    %450 = vector.broadcast %cst_224 : f32 to vector<1x160xf32>
    %451 = arith.divf %449, %450 : vector<1x160xf32>
    %452 = arith.mulf %446, %446 : vector<1x160xf32>
    %453 = arith.subf %451, %452 : vector<1x160xf32>
    %cst_225 = arith.constant 0.000000e+00 : f32
    %454 = vector.broadcast %cst_225 : f32 to vector<1x160xf32>
    %455 = arith.maximumf %453, %454 : vector<1x160xf32>
    %456 = vector.broadcast %446 : vector<1x160xf32> to vector<2x160xf32>
    %457 = arith.subf %441, %456 : vector<2x160xf32>
    %cst_226 = arith.constant 9.99999974E-6 : f32
    %458 = vector.broadcast %cst_226 : f32 to vector<1x160xf32>
    %459 = arith.addf %455, %458 : vector<1x160xf32>
    %460 = math.rsqrt %459 : vector<1x160xf32>
    %461 = vector.broadcast %460 : vector<1x160xf32> to vector<2x160xf32>
    %462 = arith.mulf %457, %461 : vector<2x160xf32>
    %463 = vector.extract_strided_slice %442 {offsets = [0, 0], sizes = [1, 160], strides = [1, 1]} : vector<2x160xf32> to vector<1x160xf32>
    %464 = vector.broadcast %463 : vector<1x160xf32> to vector<2x160xf32>
    %465 = arith.mulf %462, %464 : vector<2x160xf32>
    %466 = vector.extract_strided_slice %442 {offsets = [1, 0], sizes = [1, 160], strides = [1, 1]} : vector<2x160xf32> to vector<1x160xf32>
    %467 = vector.broadcast %466 : vector<1x160xf32> to vector<2x160xf32>
    %468 = arith.addf %465, %467 : vector<2x160xf32>
    %cst_227 = arith.constant 0.000000e+00 : f32
    %469 = vector.broadcast %cst_227 : f32 to vector<2x160xf32>
    %470 = arith.maximumf %468, %469 : vector<2x160xf32>
    %c0_228 = arith.constant 0 : index
    %c0_229 = arith.constant 0 : index
    %471 = vector.load %arg30[%c0_228, %c0_229] : memref<160x416xf32, #tpu.memory_space<vmem>>, vector<160x416xf32>
    %cst_230 = arith.constant dense<0.000000e+00> : vector<2x416xf32>
    %472 = tpu.matmul %470, %471, %cst_230 {dimension_numbers = #tpu.dot_dimension_numbers<[1], [0], [0], [1], [0, 0, 1, 1], [], []>} : vector<2x160xf32>, vector<160x416xf32>, vector<2x416xf32> -> vector<2x416xf32>
    %c0_231 = arith.constant 0 : index
    %c0_232 = arith.constant 0 : index
    %473 = vector.load %arg31[%c0_231, %c0_232] : memref<2x16xf32, #tpu.memory_space<vmem>>, vector<2x16xf32>
    %c0_233 = arith.constant 0 : index
    %c0_234 = arith.constant 0 : index
    %474 = vector.load %arg11[%c0_233, %c0_234] : memref<416x16xf32, #tpu.memory_space<vmem>>, vector<416x16xf32>
    %c0_235 = arith.constant 0 : index
    %c0_236 = arith.constant 0 : index
    %475 = vector.load %arg12[%c0_235, %c0_236] : memref<16x416xf32, #tpu.memory_space<vmem>>, vector<16x416xf32>
    %cst_237 = arith.constant dense<0.000000e+00> : vector<416xf32>
    %476 = vector.multi_reduction <add>, %472, %cst_237 [0] : vector<2x416xf32> to vector<416xf32>
    %477 = vector.shape_cast %476 : vector<416xf32> to vector<1x416xf32>
    %478 = arith.mulf %472, %472 : vector<2x416xf32>
    %cst_238 = arith.constant dense<0.000000e+00> : vector<416xf32>
    %479 = vector.multi_reduction <add>, %478, %cst_238 [0] : vector<2x416xf32> to vector<416xf32>
    %480 = vector.shape_cast %479 : vector<416xf32> to vector<1x416xf32>
    %481 = tpu.concatenate %477, %480 in 0 : vector<1x416xf32>, vector<1x416xf32> -> vector<2x416xf32>
    %cst_239 = arith.constant dense<0.000000e+00> : vector<2x16xf32>
    %482 = tpu.matmul %481, %474, %cst_239 {dimension_numbers = #tpu.dot_dimension_numbers<[1], [0], [0], [1], [0, 0, 1, 1], [], []>} : vector<2x416xf32>, vector<416x16xf32>, vector<2x16xf32> -> vector<2x16xf32>
    %483 = vector.extract_strided_slice %482 {offsets = [0, 0], sizes = [1, 16], strides = [1, 1]} : vector<2x16xf32> to vector<1x16xf32>
    %cst_240 = arith.constant 0.0192307699 : f32
    %484 = vector.broadcast %cst_240 : f32 to vector<1x16xf32>
    %485 = arith.mulf %483, %484 : vector<1x16xf32>
    %486 = vector.extract_strided_slice %482 {offsets = [1, 0], sizes = [1, 16], strides = [1, 1]} : vector<2x16xf32> to vector<1x16xf32>
    %cst_241 = arith.constant 0.0192307699 : f32
    %487 = vector.broadcast %cst_241 : f32 to vector<1x16xf32>
    %488 = arith.mulf %486, %487 : vector<1x16xf32>
    %489 = arith.mulf %485, %485 : vector<1x16xf32>
    %490 = arith.subf %488, %489 : vector<1x16xf32>
    %cst_242 = arith.constant 0.000000e+00 : f32
    %491 = vector.broadcast %cst_242 : f32 to vector<1x16xf32>
    %492 = arith.maximumf %490, %491 : vector<1x16xf32>
    %493 = vector.extract_strided_slice %473 {offsets = [0, 0], sizes = [1, 16], strides = [1, 1]} : vector<2x16xf32> to vector<1x16xf32>
    %cst_243 = arith.constant 9.99999974E-6 : f32
    %494 = vector.broadcast %cst_243 : f32 to vector<1x16xf32>
    %495 = arith.addf %492, %494 : vector<1x16xf32>
    %496 = math.rsqrt %495 : vector<1x16xf32>
    %497 = arith.mulf %493, %496 : vector<1x16xf32>
    %498 = vector.extract_strided_slice %473 {offsets = [1, 0], sizes = [1, 16], strides = [1, 1]} : vector<2x16xf32> to vector<1x16xf32>
    %499 = arith.mulf %485, %497 : vector<1x16xf32>
    %500 = arith.subf %498, %499 : vector<1x16xf32>
    %501 = tpu.concatenate %497, %500 in 0 : vector<1x16xf32>, vector<1x16xf32> -> vector<2x16xf32>
    %cst_244 = arith.constant dense<0.000000e+00> : vector<2x416xf32>
    %502 = tpu.matmul %501, %475, %cst_244 {dimension_numbers = #tpu.dot_dimension_numbers<[1], [0], [0], [1], [0, 0, 1, 1], [], []>} : vector<2x16xf32>, vector<16x416xf32>, vector<2x416xf32> -> vector<2x416xf32>
    %503 = vector.extract_strided_slice %502 {offsets = [0, 0], sizes = [1, 416], strides = [1, 1]} : vector<2x416xf32> to vector<1x416xf32>
    %504 = vector.broadcast %503 : vector<1x416xf32> to vector<2x416xf32>
    %505 = arith.mulf %472, %504 : vector<2x416xf32>
    %506 = vector.extract_strided_slice %502 {offsets = [1, 0], sizes = [1, 416], strides = [1, 1]} : vector<2x416xf32> to vector<1x416xf32>
    %507 = vector.broadcast %506 : vector<1x416xf32> to vector<2x416xf32>
    %508 = arith.addf %505, %507 : vector<2x416xf32>
    %cst_245 = arith.constant 0.000000e+00 : f32
    %509 = vector.broadcast %cst_245 : f32 to vector<2x416xf32>
    %510 = arith.maximumf %508, %509 : vector<2x416xf32>
    %c0_246 = arith.constant 0 : index
    %c0_247 = arith.constant 0 : index
    %511 = vector.load %arg32[%c0_246, %c0_247] : memref<416x960xf32, #tpu.memory_space<vmem>>, vector<416x960xf32>
    %cst_248 = arith.constant dense<0.000000e+00> : vector<2x960xf32>
    %512 = tpu.matmul %510, %511, %cst_248 {dimension_numbers = #tpu.dot_dimension_numbers<[1], [0], [0], [1], [0, 0, 1, 1], [], []>} : vector<2x416xf32>, vector<416x960xf32>, vector<2x960xf32> -> vector<2x960xf32>
    %c0_249 = arith.constant 0 : index
    %c0_250 = arith.constant 0 : index
    %513 = vector.load %arg33[%c0_249, %c0_250] : memref<2x32xf32, #tpu.memory_space<vmem>>, vector<2x32xf32>
    %c0_251 = arith.constant 0 : index
    %c0_252 = arith.constant 0 : index
    %514 = vector.load %arg9[%c0_251, %c0_252] : memref<960x32xf32, #tpu.memory_space<vmem>>, vector<960x32xf32>
    %c0_253 = arith.constant 0 : index
    %c0_254 = arith.constant 0 : index
    %515 = vector.load %arg10[%c0_253, %c0_254] : memref<32x960xf32, #tpu.memory_space<vmem>>, vector<32x960xf32>
    %cst_255 = arith.constant dense<0.000000e+00> : vector<960xf32>
    %516 = vector.multi_reduction <add>, %512, %cst_255 [0] : vector<2x960xf32> to vector<960xf32>
    %517 = vector.shape_cast %516 : vector<960xf32> to vector<1x960xf32>
    %518 = arith.mulf %512, %512 : vector<2x960xf32>
    %cst_256 = arith.constant dense<0.000000e+00> : vector<960xf32>
    %519 = vector.multi_reduction <add>, %518, %cst_256 [0] : vector<2x960xf32> to vector<960xf32>
    %520 = vector.shape_cast %519 : vector<960xf32> to vector<1x960xf32>
    %521 = tpu.concatenate %517, %520 in 0 : vector<1x960xf32>, vector<1x960xf32> -> vector<2x960xf32>
    %cst_257 = arith.constant dense<0.000000e+00> : vector<2x32xf32>
    %522 = tpu.matmul %521, %514, %cst_257 {dimension_numbers = #tpu.dot_dimension_numbers<[1], [0], [0], [1], [0, 0, 1, 1], [], []>} : vector<2x960xf32>, vector<960x32xf32>, vector<2x32xf32> -> vector<2x32xf32>
    %523 = vector.extract_strided_slice %522 {offsets = [0, 0], sizes = [1, 32], strides = [1, 1]} : vector<2x32xf32> to vector<1x32xf32>
    %cst_258 = arith.constant 0.0166666675 : f32
    %524 = vector.broadcast %cst_258 : f32 to vector<1x32xf32>
    %525 = arith.mulf %523, %524 : vector<1x32xf32>
    %526 = vector.extract_strided_slice %522 {offsets = [1, 0], sizes = [1, 32], strides = [1, 1]} : vector<2x32xf32> to vector<1x32xf32>
    %cst_259 = arith.constant 0.0166666675 : f32
    %527 = vector.broadcast %cst_259 : f32 to vector<1x32xf32>
    %528 = arith.mulf %526, %527 : vector<1x32xf32>
    %529 = arith.mulf %525, %525 : vector<1x32xf32>
    %530 = arith.subf %528, %529 : vector<1x32xf32>
    %cst_260 = arith.constant 0.000000e+00 : f32
    %531 = vector.broadcast %cst_260 : f32 to vector<1x32xf32>
    %532 = arith.maximumf %530, %531 : vector<1x32xf32>
    %533 = vector.extract_strided_slice %513 {offsets = [0, 0], sizes = [1, 32], strides = [1, 1]} : vector<2x32xf32> to vector<1x32xf32>
    %cst_261 = arith.constant 9.99999974E-6 : f32
    %534 = vector.broadcast %cst_261 : f32 to vector<1x32xf32>
    %535 = arith.addf %532, %534 : vector<1x32xf32>
    %536 = math.rsqrt %535 : vector<1x32xf32>
    %537 = arith.mulf %533, %536 : vector<1x32xf32>
    %538 = vector.extract_strided_slice %513 {offsets = [1, 0], sizes = [1, 32], strides = [1, 1]} : vector<2x32xf32> to vector<1x32xf32>
    %539 = arith.mulf %525, %537 : vector<1x32xf32>
    %540 = arith.subf %538, %539 : vector<1x32xf32>
    %541 = tpu.concatenate %537, %540 in 0 : vector<1x32xf32>, vector<1x32xf32> -> vector<2x32xf32>
    %cst_262 = arith.constant dense<0.000000e+00> : vector<2x960xf32>
    %542 = tpu.matmul %541, %515, %cst_262 {dimension_numbers = #tpu.dot_dimension_numbers<[1], [0], [0], [1], [0, 0, 1, 1], [], []>} : vector<2x32xf32>, vector<32x960xf32>, vector<2x960xf32> -> vector<2x960xf32>
    %543 = vector.extract_strided_slice %542 {offsets = [0, 0], sizes = [1, 960], strides = [1, 1]} : vector<2x960xf32> to vector<1x960xf32>
    %544 = vector.broadcast %543 : vector<1x960xf32> to vector<2x960xf32>
    %545 = arith.mulf %512, %544 : vector<2x960xf32>
    %546 = vector.extract_strided_slice %542 {offsets = [1, 0], sizes = [1, 960], strides = [1, 1]} : vector<2x960xf32> to vector<1x960xf32>
    %547 = vector.broadcast %546 : vector<1x960xf32> to vector<2x960xf32>
    %548 = arith.addf %545, %547 : vector<2x960xf32>
    %cst_263 = arith.constant 0.000000e+00 : f32
    %549 = vector.broadcast %cst_263 : f32 to vector<2x960xf32>
    %550 = arith.maximumf %548, %549 : vector<2x960xf32>
    %c0_264 = arith.constant 0 : index
    %c0_265 = arith.constant 0 : index
    %551 = vector.load %arg34[%c0_264, %c0_265] : memref<960x128xf32, #tpu.memory_space<vmem>>, vector<960x128xf32>
    %cst_266 = arith.constant dense<0.000000e+00> : vector<2x128xf32>
    %552 = tpu.matmul %550, %551, %cst_266 {dimension_numbers = #tpu.dot_dimension_numbers<[1], [0], [0], [1], [0, 0, 1, 1], [], []>} : vector<2x960xf32>, vector<960x128xf32>, vector<2x128xf32> -> vector<2x128xf32>
    %c0_267 = arith.constant 0 : index
    %c0_268 = arith.constant 0 : index
    %553 = vector.load %arg35[%c0_267, %c0_268] : memref<1x1xf32, #tpu.memory_space<vmem>>, vector<1x1xf32>
    %554 = vector.broadcast %553 : vector<1x1xf32> to vector<2x128xf32>
    %555 = arith.addf %552, %554 : vector<2x128xf32>
    %c0_269 = arith.constant 0 : index
    %c0_270 = arith.constant 0 : index
    %556 = vector.load %arg36[%c0_269, %c0_270] : memref<2x128xf32, #tpu.memory_space<vmem>>, vector<2x128xf32>
    tpu.vector_store %arg36[%c0_269, %c0_270], %555 {strides = array<i32>} : memref<2x128xf32, #tpu.memory_space<vmem>>, vector<2x128xf32>,
    %557 = tpu.concatenate %163, %164, %171, %405, %408 in 1 : vector<2x8xf32>, vector<2x8xf32>, vector<2x8xf32>, vector<2x8xf32>, vector<2x1xf32> -> vector<2x33xf32>
    %c0_271 = arith.constant 0 : index
    %c0_272 = arith.constant 0 : index
    %558 = vector.load %arg37[%c0_271, %c0_272] : memref<2x33xf32, #tpu.memory_space<vmem>>, vector<2x33xf32>
    tpu.vector_store %arg37[%c0_271, %c0_272], %557 {strides = array<i32>} : memref<2x33xf32, #tpu.memory_space<vmem>>, vector<2x33xf32>,
    return
  }
}

</mosaic_0001>

<bundles_post_ra>
// kernel: forward.1
= control target key start
LH: loop header
LB: loop body
LE: loop exit
PB: predicated region body
PF: predicated region fallthrough
CT: control target
= control target key end

     0   :  { %s6901_s3 = smov 3   ;;  %s6902_s10 = smov 9   ;;  %vm597_vm0 = vcmask 1041408   ;;  %vm719_vm1 = vcmask 1040384   ;;  %vm647_vm2 = vcmask 517120   ;;  %vm728_vm3 = vcmask 523264   ;;  %s9533_s0 = inlined_call_operand.smem [shape: u32[38], index: -1, kind: input, shape index: {}] }
   0x1   :  { %s6950_s6 = sld [smem:[%s9533_s0 + %s6901_s3]]   ;;  %s6903_s14 = smov 10   ;;  %vm920_vm7 = vcmask 261120   ;;  %vm2329_vm8 = vcmask 254976   ;;  %vm2484_vm12 = vcmask 130048  }
   0x2   :  { %s7031_s9 = sld [smem:[%s9533_s0]]   ;;  %s6904_s18 = smov 4  }
   0x3   :  { %s7082_s13 = sld [smem:[%s9533_s0 + %s6902_s10]]   ;;  %s6905_s22 = smov 5  }
   0x4   :  { %s7291_s17 = sld [smem:[%s9533_s0 + %s6903_s14]]   ;;  %s6906_s26 = smov 11  }
   0x5   :  { %s6400_s21 = sld [smem:[%s9533_s0 + %s6904_s18]]   ;;  %s6907_s30 = smov 12  }
   0x6   :  { %s7326_s25 = sld [smem:[%s9533_s0 + %s6905_s22]]   ;;  %s6908_s4 = smov 7  }
   0x7   :  { %v276_v0 = vld [vmem:[%s6950_s6 + $0x3c0] sm:$0xff]  ;;  %v278_v1 = vld [vmem:[%s6950_s6 + $0x3d0] sm:$0xff]  ;;  %v279_v2 = vld [vmem:[%s6950_s6 + $0x3d8] sm:$0xff]  ;;  %s7865_s29 = sld [smem:[%s9533_s0 + %s6906_s26]]   ;;  %s6909_s8 = smov 6  }
   0x8   :  { %284 = vmatpush.msra.mxu0 %v276_v0  ;;  %324 = vmatpush.msra.mxu2 %v278_v1  ;;  %v268_v3 = vld [vmem:[%s6950_s6 + $0x380] sm:$0xff]  ;;  %v277_v4 = vld [vmem:[%s6950_s6 + $0x3c8] sm:$0xff]  ;;  %v270_v5 = vld [vmem:[%s6950_s6 + $0x390] sm:$0xff]  ;;  %s7989_s3 = sld [smem:[%s9533_s0 + %s6907_s30]]   ;;  %s6910_s12 = smov 13  }
   0x9   :  { %344 = vmatpush.msra.mxu3 %v279_v2  ;;  %304 = vmatpush.msra.mxu1 %v277_v4  ;;  %v271_v6 = vld [vmem:[%s6950_s6 + $0x398] sm:$0xff]  ;;  %v260_v7 = vld [vmem:[%s6950_s6 + $0x340] sm:$0xff]  ;;  %v269_v8 = vld [vmem:[%s6950_s6 + $0x388] sm:$0xff]  ;;  %s8000_s7 = sld [smem:[%s9533_s0 + %s6908_s4]]   ;;  %s6911_s18 = smov 14  }
   0xa   :  { %285 = vmatpush.msra.mxu0 %v268_v3  ;;  %325 = vmatpush.msra.mxu2 %v270_v5  ;;  %v262_v9 = vld [vmem:[%s6950_s6 + $0x350] sm:$0xff]  ;;  %v263_v10 = vld [vmem:[%s6950_s6 + $0x358] sm:$0xff]  ;;  %v252_v11 = vld [vmem:[%s6950_s6 + $0x300] sm:$0xff]  ;;  %s6402_s11 = sld [smem:[%s9533_s0 + %s6909_s8]]   ;;  %s6912_s22 = smov 15  }
   0xb   :  { %345 = vmatpush.msra.mxu3 %v271_v6  ;;  %305 = vmatpush.msra.mxu1 %v269_v8  ;;  %v261_v12 = vld [vmem:[%s6950_s6 + $0x348] sm:$0xff]  ;;  %v254_v13 = vld [vmem:[%s6950_s6 + $0x310] sm:$0xff]  ;;  %v255_v14 = vld [vmem:[%s6950_s6 + $0x318] sm:$0xff]  ;;  %s8125_s16 = sld [smem:[%s9533_s0 + %s6910_s12]]   ;;  %s6913_s26 = smov 8  }
   0xc   :  { %286 = vmatpush.msra.mxu0 %v260_v7  ;;  %326 = vmatpush.msra.mxu2 %v262_v9  ;;  %v253_v15 = vld [vmem:[%s6950_s6 + $0x308] sm:$0xff]  ;;  %v244_v16 = vld [vmem:[%s6950_s6 + $0x2c0] sm:$0xff]  ;;  %v246_v17 = vld [vmem:[%s6950_s6 + $0x2d0] sm:$0xff]  ;;  %s6404_s30 = sld [smem:[%s9533_s0 + %s6913_s26]]   ;;  %s6914_s1 = smov 16  }
   0xd   :  { %346 = vmatpush.msra.mxu3 %v263_v10  ;;  %306 = vmatpush.msra.mxu1 %v261_v12  ;;  %v247_v18 = vld [vmem:[%s6950_s6 + $0x2d8] sm:$0xff]  ;;  %v245_v19 = vld [vmem:[%s6950_s6 + $0x2c8] sm:$0xff]  ;;  %v236_v20 = vld [vmem:[%s6950_s6 + $0x280] sm:$0xff]  ;;  %s8194_s5 = sld [smem:[%s9533_s0 + %s6914_s1]]   ;;  %s6917_s10 = smov 19  }
   0xe   :  { %287 = vmatpush.msra.mxu0 %v252_v11  ;;  %327 = vmatpush.msra.mxu2 %v254_v13  ;;  %v238_v21 = vld [vmem:[%s6950_s6 + $0x290] sm:$0xff]  ;;  %v239_v22 = vld [vmem:[%s6950_s6 + $0x298] sm:$0xff]  ;;  %v237_v23 = vld [vmem:[%s6950_s6 + $0x288] sm:$0xff]  ;;  %s8214_s14 = sld [smem:[%s9533_s0 + %s6917_s10]]   ;;  %s6919_s15 = smov 18  }
   0xf   :  { %347 = vmatpush.msra.mxu3 %v255_v14  ;;  %307 = vmatpush.msra.mxu1 %v253_v15  ;;  %v228_v24 = vld [vmem:[%s6950_s6 + $0x240] sm:$0xff]  ;;  %v230_v25 = vld [vmem:[%s6950_s6 + $0x250] sm:$0xff]  ;;  %v231_v26 = vld [vmem:[%s6950_s6 + $0x258] sm:$0xff]  ;;  %s6414_s19 = sld [smem:[%s9533_s0 + %s6919_s15]]   ;;  %s6920_s20 = smov 17  }
  0x10   :  { %288 = vmatpush.msra.mxu0 %v244_v16  ;;  %328 = vmatpush.msra.mxu2 %v246_v17  ;;  %v229_v27 = vld [vmem:[%s6950_s6 + $0x248] sm:$0xff]  ;;  %v220_v28 = vld [vmem:[%s6950_s6 + $0x200] sm:$0xff]  ;;  %v222_v29 = vld [vmem:[%s6950_s6 + $0x210] sm:$0xff]  ;;  %s6413_s23 = sld [smem:[%s9533_s0 + %s6920_s20]]   ;;  %s6921_s24 = smov 112  }
  0x11   :  { %348 = vmatpush.msra.mxu3 %v247_v18  ;;  %308 = vmatpush.msra.mxu1 %v245_v19  ;;  %v223_v30 = vld [vmem:[%s6950_s6 + $0x218] sm:$0xff]  ;;  %v221_v31 = vld [vmem:[%s6950_s6 + $0x208] sm:$0xff]  ;;  %v212_v32 = vld [vmem:[%s6950_s6 + $0x1c0] sm:$0xff]  ;;  %s6923_s27 = smov 20   ;;  %s6924_s4 = smov 2  }
  0x12   :  { %289 = vmatpush.msra.mxu0 %v236_v20  ;;  %329 = vmatpush.msra.mxu2 %v238_v21  ;;  %v214_v33 = vld [vmem:[%s6950_s6 + $0x1d0] sm:$0xff]  ;;  %v215_v34 = vld [vmem:[%s6950_s6 + $0x1d8] sm:$0xff]  ;;  %v213_v35 = vld [vmem:[%s6950_s6 + $0x1c8] sm:$0xff]  ;;  %s8239_s2 = sld [smem:[%s9533_s0 + %s6923_s27]]   ;;  %s6925_s8 = smov 21  }
  0x13   :  { %349 = vmatpush.msra.mxu3 %v239_v22  ;;  %309 = vmatpush.msra.mxu1 %v237_v23  ;;  %v204_v36 = vld [vmem:[%s6950_s6 + $0x180] sm:$0xff]  ;;  %v206_v37 = vld [vmem:[%s6950_s6 + $0x190] sm:$0xff]  ;;  %v207_v38 = vld [vmem:[%s6950_s6 + $0x198] sm:$0xff]  ;;  %s6926_s12 = smov 23   ;;  %s6929_s28 = smov 24  }
  0x14   :  { %290 = vmatpush.msra.mxu0 %v228_v24  ;;  %330 = vmatpush.msra.mxu2 %v230_v25  ;;  %v205_v39 = vld [vmem:[%s6950_s6 + $0x188] sm:$0xff]  ;;  %v196_v40 = vld [vmem:[%s6950_s6 + $0x140] sm:$0xff]  ;;  %v198_v41 = vld [vmem:[%s6950_s6 + $0x150] sm:$0xff]  ;;  %s6934_s20 = smov 27  }
  0x15   :  { %350 = vmatpush.msra.mxu3 %v231_v26  ;;  %310 = vmatpush.msra.mxu1 %v229_v27  ;;  %v199_v42 = vld [vmem:[%s6950_s6 + $0x158] sm:$0xff]  ;;  %v197_v43 = vld [vmem:[%s6950_s6 + $0x148] sm:$0xff]  ;;  %v188_v44 = vld [vmem:[%s6950_s6 + $0x100] sm:$0xff] }
  0x16   :  { %291 = vmatpush.msra.mxu0 %v220_v28  ;;  %331 = vmatpush.msra.mxu2 %v222_v29  ;;  %v190_v45 = vld [vmem:[%s6950_s6 + $0x110] sm:$0xff]  ;;  %v191_v46 = vld [vmem:[%s6950_s6 + $0x118] sm:$0xff]  ;;  %v189_v47 = vld [vmem:[%s6950_s6 + $0x108] sm:$0xff] }
  0x17   :  { %351 = vmatpush.msra.mxu3 %v223_v30  ;;  %311 = vmatpush.msra.mxu1 %v221_v31  ;;  %v180_v48 = vld [vmem:[%s6950_s6 + $0xc0] sm:$0xff]  ;;  %v182_v49 = vld [vmem:[%s6950_s6 + $0xd0] sm:$0xff]  ;;  %v183_v50 = vld [vmem:[%s6950_s6 + $0xd8] sm:$0xff] }
  0x18   :  { %292 = vmatpush.msra.mxu0 %v212_v32  ;;  %332 = vmatpush.msra.mxu2 %v214_v33  ;;  %v181_v51 = vld [vmem:[%s6950_s6 + $0xc8] sm:$0xff]  ;;  %v172_v52 = vld [vmem:[%s6950_s6 + $0x80] sm:$0xff]  ;;  %v174_v53 = vld [vmem:[%s6950_s6 + $0x90] sm:$0xff] }
  0x19   :  { %352 = vmatpush.msra.mxu3 %v215_v34  ;;  %312 = vmatpush.msra.mxu1 %v213_v35  ;;  %v175_v54 = vld [vmem:[%s6950_s6 + $0x98] sm:$0xff]  ;;  %v173_v55 = vld [vmem:[%s6950_s6 + $0x88] sm:$0xff]  ;;  %v164_v56 = vld [vmem:[%s6950_s6 + $0x40] sm:$0xff] }
  0x1a   :  { %293 = vmatpush.msra.mxu0 %v204_v36  ;;  %333 = vmatpush.msra.mxu2 %v206_v37  ;;  %v166_v57 = vld [vmem:[%s6950_s6 + $0x50] sm:$0xff]  ;;  %v167_v58 = vld [vmem:[%s6950_s6 + $0x58] sm:$0xff]  ;;  %v165_v59 = vld [vmem:[%s6950_s6 + $0x48] sm:$0xff] }
  0x1b   :  { %353 = vmatpush.msra.mxu3 %v207_v38  ;;  %313 = vmatpush.msra.mxu1 %v205_v39  ;;  %v156_v60 = vld [vmem:[%s6950_s6] sm:$0xff]  ;;  %v158_v61 = vld [vmem:[%s6950_s6 + $0x10] sm:$0xff]  ;;  %v159_v62 = vld [vmem:[%s6950_s6 + $0x18] sm:$0xff] }
  0x1c   :  { %294 = vmatpush.msra.mxu0 %v196_v40  ;;  %334 = vmatpush.msra.mxu2 %v198_v41  ;;  %v280_v63 = vld [vmem:[%s6950_s6 + $0x3e0] sm:$0xff]  ;;  %v282_v0 = vld [vmem:[%s6950_s6 + $0x3f0] sm:$0xff]  ;;  %v283_v1 = vld [vmem:[%s6950_s6 + $0x3f8] sm:$0xff] }
  0x1d   :  { %354 = vmatpush.msra.mxu3 %v199_v42  ;;  %314 = vmatpush.msra.mxu1 %v197_v43  ;;  %v157_v2 = vld [vmem:[%s6950_s6 + $0x8] sm:$0xff]  ;;  %v272_v3 = vld [vmem:[%s6950_s6 + $0x3a0] sm:$0xff]  ;;  %v274_v5 = vld [vmem:[%s6950_s6 + $0x3b0] sm:$0xff] }
  0x1e   :  { %295 = vmatpush.msra.mxu0 %v188_v44  ;;  %335 = vmatpush.msra.mxu2 %v190_v45  ;;  %v281_v4 = vld [vmem:[%s6950_s6 + $0x3e8] sm:$0xff]  ;;  %v275_v6 = vld [vmem:[%s6950_s6 + $0x3b8] sm:$0xff]  ;;  %v264_v7 = vld [vmem:[%s6950_s6 + $0x360] sm:$0xff] }
  0x1f   :  { %355 = vmatpush.msra.mxu3 %v191_v46  ;;  %315 = vmatpush.msra.mxu1 %v189_v47  ;;  %v273_v8 = vld [vmem:[%s6950_s6 + $0x3a8] sm:$0xff]  ;;  %v266_v9 = vld [vmem:[%s6950_s6 + $0x370] sm:$0xff]  ;;  %v267_v10 = vld [vmem:[%s6950_s6 + $0x378] sm:$0xff] }
  0x20   :  { %296 = vmatpush.msra.mxu0 %v180_v48  ;;  %336 = vmatpush.msra.mxu2 %v182_v49  ;;  %v256_v11 = vld [vmem:[%s6950_s6 + $0x320] sm:$0xff]  ;;  %v265_v12 = vld [vmem:[%s6950_s6 + $0x368] sm:$0xff]  ;;  %v258_v13 = vld [vmem:[%s6950_s6 + $0x330] sm:$0xff] }
  0x21   :  { %356 = vmatpush.msra.mxu3 %v183_v50  ;;  %316 = vmatpush.msra.mxu1 %v181_v51  ;;  %v259_v14 = vld [vmem:[%s6950_s6 + $0x338] sm:$0xff]  ;;  %v248_v15 = vld [vmem:[%s6950_s6 + $0x2e0] sm:$0xff]  ;;  %v257_v16 = vld [vmem:[%s6950_s6 + $0x328] sm:$0xff] }
  0x22   :  { %297 = vmatpush.msra.mxu0 %v172_v52  ;;  %337 = vmatpush.msra.mxu2 %v174_v53  ;;  %v250_v17 = vld [vmem:[%s6950_s6 + $0x2f0] sm:$0xff]  ;;  %v251_v18 = vld [vmem:[%s6950_s6 + $0x2f8] sm:$0xff]  ;;  %v240_v19 = vld [vmem:[%s6950_s6 + $0x2a0] sm:$0xff] }
  0x23   :  { %357 = vmatpush.msra.mxu3 %v175_v54  ;;  %317 = vmatpush.msra.mxu1 %v173_v55  ;;  %v249_v20 = vld [vmem:[%s6950_s6 + $0x2e8] sm:$0xff]  ;;  %v242_v21 = vld [vmem:[%s6950_s6 + $0x2b0] sm:$0xff]  ;;  %v243_v22 = vld [vmem:[%s6950_s6 + $0x2b8] sm:$0xff] }
  0x24   :  { %298 = vmatpush.msra.mxu0 %v164_v56  ;;  %338 = vmatpush.msra.mxu2 %v166_v57  ;;  %v232_v23 = vld [vmem:[%s6950_s6 + $0x260] sm:$0xff]  ;;  %v241_v24 = vld [vmem:[%s6950_s6 + $0x2a8] sm:$0xff]  ;;  %v234_v25 = vld [vmem:[%s6950_s6 + $0x270] sm:$0xff] }
  0x25   :  { %358 = vmatpush.msra.mxu3 %v167_v58  ;;  %318 = vmatpush.msra.mxu1 %v165_v59  ;;  %v235_v26 = vld [vmem:[%s6950_s6 + $0x278] sm:$0xff]  ;;  %v7049_v27 = vld [vmem:[%s7031_s9] sm:$0x3]  ;;  %v233_v29 = vld [vmem:[%s6950_s6 + $0x268] sm:$0xff] }
  0x26   :  { %299 = vmatpush.msra.mxu0 %v156_v60  ;;  %339 = vmatpush.msra.mxu2 %v158_v61  ;;  %v224_v28 = vld [vmem:[%s6950_s6 + $0x220] sm:$0xff]  ;;  %v226_v30 = vld [vmem:[%s6950_s6 + $0x230] sm:$0xff]  ;;  %v227_v31 = vld [vmem:[%s6950_s6 + $0x238] sm:$0xff] }
  0x27   :  { %359 = vmatpush.msra.mxu3 %v159_v62  ;;  %319 = vmatpush.msra.mxu1 %v157_v2  ;;  %v216_v32 = vld [vmem:[%s6950_s6 + $0x1e0] sm:$0xff]  ;;  %v225_v33 = vld [vmem:[%s6950_s6 + $0x228] sm:$0xff]  ;;  %v218_v34 = vld [vmem:[%s6950_s6 + $0x1f0] sm:$0xff] }
  0x28   :  { %364 = vmatpush.msrb.mxu0 %v280_v63  ;;  %404 = vmatpush.msrb.mxu2 %v282_v0  ;;  %v219_v35 = vld [vmem:[%s6950_s6 + $0x1f8] sm:$0xff]  ;;  %v208_v36 = vld [vmem:[%s6950_s6 + $0x1a0] sm:$0xff]  ;;  %v217_v37 = vld [vmem:[%s6950_s6 + $0x1e8] sm:$0xff] }
  0x29   :  { %424 = vmatpush.msrb.mxu3 %v283_v1  ;;  %384 = vmatpush.msrb.mxu1 %v281_v4  ;;  %v210_v38 = vld [vmem:[%s6950_s6 + $0x1b0] sm:$0xff]  ;;  %v211_v39 = vld [vmem:[%s6950_s6 + $0x1b8] sm:$0xff]  ;;  %v200_v40 = vld [vmem:[%s6950_s6 + $0x160] sm:$0xff] }
  0x2a   :  { %365 = vmatpush.msrb.mxu0 %v272_v3  ;;  %405 = vmatpush.msrb.mxu2 %v274_v5  ;;  %v209_v41 = vld [vmem:[%s6950_s6 + $0x1a8] sm:$0xff]  ;;  %v202_v42 = vld [vmem:[%s6950_s6 + $0x170] sm:$0xff]  ;;  %v203_v43 = vld [vmem:[%s6950_s6 + $0x178] sm:$0xff] }
  0x2b   :  { %425 = vmatpush.msrb.mxu3 %v275_v6  ;;  %385 = vmatpush.msrb.mxu1 %v273_v8  ;;  %v192_v44 = vld [vmem:[%s6950_s6 + $0x120] sm:$0xff]  ;;  %v201_v45 = vld [vmem:[%s6950_s6 + $0x168] sm:$0xff]  ;;  %v194_v46 = vld [vmem:[%s6950_s6 + $0x130] sm:$0xff] }
  0x2c   :  { %366 = vmatpush.msrb.mxu0 %v264_v7  ;;  %406 = vmatpush.msrb.mxu2 %v266_v9  ;;  %v195_v47 = vld [vmem:[%s6950_s6 + $0x138] sm:$0xff]  ;;  %v184_v48 = vld [vmem:[%s6950_s6 + $0xe0] sm:$0xff]  ;;  %v193_v49 = vld [vmem:[%s6950_s6 + $0x128] sm:$0xff] }
  0x2d   :  { %426 = vmatpush.msrb.mxu3 %v267_v10  ;;  %386 = vmatpush.msrb.mxu1 %v265_v12  ;;  %v186_v50 = vld [vmem:[%s6950_s6 + $0xf0] sm:$0xff]  ;;  %v187_v51 = vld [vmem:[%s6950_s6 + $0xf8] sm:$0xff]  ;;  %v176_v52 = vld [vmem:[%s6950_s6 + $0xa0] sm:$0xff] }
  0x2e   :  { %367 = vmatpush.msrb.mxu0 %v256_v11  ;;  %407 = vmatpush.msrb.mxu2 %v258_v13  ;;  %v185_v53 = vld [vmem:[%s6950_s6 + $0xe8] sm:$0xff]  ;;  %v178_v54 = vld [vmem:[%s6950_s6 + $0xb0] sm:$0xff]  ;;  %v179_v55 = vld [vmem:[%s6950_s6 + $0xb8] sm:$0xff] }
  0x2f   :  { %427 = vmatpush.msrb.mxu3 %v259_v14  ;;  %387 = vmatpush.msrb.mxu1 %v257_v16  ;;  %v168_v56 = vld [vmem:[%s6950_s6 + $0x60] sm:$0xff]  ;;  %v177_v57 = vld [vmem:[%s6950_s6 + $0xa8] sm:$0xff]  ;;  %v170_v58 = vld [vmem:[%s6950_s6 + $0x70] sm:$0xff] }
  0x30   :  { %368 = vmatpush.msrb.mxu0 %v248_v15  ;;  %408 = vmatpush.msrb.mxu2 %v250_v17  ;;  %v171_v59 = vld [vmem:[%s6950_s6 + $0x78] sm:$0xff]  ;;  %v160_v60 = vld [vmem:[%s6950_s6 + $0x20] sm:$0xff]  ;;  %v169_v61 = vld [vmem:[%s6950_s6 + $0x68] sm:$0xff] }
  0x31   :  { %428 = vmatpush.msrb.mxu3 %v251_v18  ;;  %388 = vmatpush.msrb.mxu1 %v249_v20  ;;  %v162_v62 = vld [vmem:[%s6950_s6 + $0x30] sm:$0xff]  ;;  %v163_v63 = vld [vmem:[%s6950_s6 + $0x38] sm:$0xff]  ;;  %v161_v0 = vld [vmem:[%s6950_s6 + $0x28] sm:$0xff]  ;;  %s6915_s6 = smov 1  }
  0x32   :  { %369 = vmatpush.msrb.mxu0 %v240_v19  ;;  %409 = vmatpush.msrb.mxu2 %v242_v21  ;;  %v460_v1 = vld [vmem:[%s7082_s13 + $0x78] sm:$0xff]  ;;  %v459_v3 = vld [vmem:[%s7082_s13 + $0x70] sm:$0xff]  ;;  %v458_v7 = vld [vmem:[%s7082_s13 + $0x68] sm:$0xff]  ;;  %s6397_s9 = sld [smem:[%s9533_s0 + %s6915_s6]]  }
  0x33   :  { %429 = vmatpush.msrb.mxu3 %v243_v22  ;;  %389 = vmatpush.msrb.mxu1 %v241_v24  ;;  %v492_v2 = vld [vmem:[%s7082_s13 + $0x178] sm:$0xff]  ;;  %v491_v5 = vld [vmem:[%s7082_s13 + $0x170] sm:$0xff]  ;;  %v490_v9 = vld [vmem:[%s7082_s13 + $0x168] sm:$0xff] }
  0x34   :  { %370 = vmatpush.msrb.mxu0 %v232_v23  ;;  %410 = vmatpush.msrb.mxu2 %v234_v25  ;;  %v476_v4 = vld [vmem:[%s7082_s13 + $0xf8] sm:$0xff]  ;;  %v475_v8 = vld [vmem:[%s7082_s13 + $0xf0] sm:$0xff]  ;;  %v457_v11 = vld [vmem:[%s7082_s13 + $0x60] sm:$0xff] }
  0x35   :  { %430 = vmatpush.msrb.mxu3 %v235_v26  ;;  %340 = vmatmul.f32.vlgmr.msra.gmra.mxu2 %v7049_v27  ;;  %v508_v6 = vld [vmem:[%s7082_s13 + $0x1f8] sm:$0xff]  ;;  %v507_v10 = vld [vmem:[%s7082_s13 + $0x1f0] sm:$0xff]  ;;  %v474_v12 = vld [vmem:[%s7082_s13 + $0xe8] sm:$0xff] }
  0x36   :  { %371 = vmatpush.msrb.mxu0 %v224_v28  ;;  %390 = vmatpush.msrb.mxu1 %v233_v29  ;;  %v489_v13 = vld [vmem:[%s7082_s13 + $0x160] sm:$0xff]  ;;  %v506_v14 = vld [vmem:[%s7082_s13 + $0x1e8] sm:$0xff]  ;;  %v456_v15 = vld [vmem:[%s7082_s13 + $0x58] sm:$0xff] }
  0x37   :  { %411 = vmatpush.msrb.mxu2 %v226_v30  ;;  %431 = vmatpush.msrb.mxu3 %v227_v31  ;;  %v473_v16 = vld [vmem:[%s7082_s13 + $0xe0] sm:$0xff]  ;;  %v488_v17 = vld [vmem:[%s7082_s13 + $0x158] sm:$0xff]  ;;  %v455_v19 = vld [vmem:[%s7082_s13 + $0x50] sm:$0xff] }
  0x38   :  { %360 = vmatmul.f32.vlgmr.msra.gmra.mxu3 %v7049_v27  ;;  %372 = vmatpush.msrb.mxu0 %v216_v32  ;;  %v505_v18 = vld [vmem:[%s7082_s13 + $0x1e0] sm:$0xff]  ;;  %v472_v20 = vld [vmem:[%s7082_s13 + $0xd8] sm:$0xff]  ;;  %v487_v21 = vld [vmem:[%s7082_s13 + $0x150] sm:$0xff] }
  0x39   :  { %391 = vmatpush.msrb.mxu1 %v225_v33  ;;  %412 = vmatpush.msrb.mxu2 %v218_v34  ;;  %v504_v22 = vld [vmem:[%s7082_s13 + $0x1d8] sm:$0xff]  ;;  %v454_v23 = vld [vmem:[%s7082_s13 + $0x48] sm:$0xff]  ;;  %v471_v24 = vld [vmem:[%s7082_s13 + $0xd0] sm:$0xff] }
  0x3a   :  { %432 = vmatpush.msrb.mxu3 %v219_v35  ;;  %373 = vmatpush.msrb.mxu0 %v208_v36  ;;  %v486_v25 = vld [vmem:[%s7082_s13 + $0x148] sm:$0xff]  ;;  %v503_v26 = vld [vmem:[%s7082_s13 + $0x1d0] sm:$0xff]  ;;  %v485_v29 = vld [vmem:[%s7082_s13 + $0x140] sm:$0xff] }
  0x3b   :  { %392 = vmatpush.msrb.mxu1 %v217_v37  ;;  %413 = vmatpush.msrb.mxu2 %v210_v38  ;;  %v470_v28 = vld [vmem:[%s7082_s13 + $0xc8] sm:$0xff]  ;;  %v452_v30 = vld [vmem:[%s7082_s13 + $0x38] sm:$0xff]  ;;  %v469_v31 = vld [vmem:[%s7082_s13 + $0xc0] sm:$0xff] }
  0x3c   :  { %433 = vmatpush.msrb.mxu3 %v211_v39  ;;  %374 = vmatpush.msrb.mxu0 %v200_v40  ;;  %v484_v32 = vld [vmem:[%s7082_s13 + $0x138] sm:$0xff]  ;;  %v451_v33 = vld [vmem:[%s7082_s13 + $0x30] sm:$0xff]  ;;  %v450_v36 = vld [vmem:[%s7082_s13 + $0x28] sm:$0xff] }
  0x3d   :  { %393 = vmatpush.msrb.mxu1 %v209_v41  ;;  %414 = vmatpush.msrb.mxu2 %v202_v42  ;;  %v468_v34 = vld [vmem:[%s7082_s13 + $0xb8] sm:$0xff]  ;;  %v483_v35 = vld [vmem:[%s7082_s13 + $0x130] sm:$0xff]  ;;  %v482_v38 = vld [vmem:[%s7082_s13 + $0x128] sm:$0xff] }
  0x3e   :  { %434 = vmatpush.msrb.mxu3 %v203_v43  ;;  %375 = vmatpush.msrb.mxu0 %v192_v44  ;;  %v467_v37 = vld [vmem:[%s7082_s13 + $0xb0] sm:$0xff]  ;;  %v449_v39 = vld [vmem:[%s7082_s13 + $0x20] sm:$0xff]  ;;  %v466_v40 = vld [vmem:[%s7082_s13 + $0xa8] sm:$0xff] }
  0x3f   :  { %394 = vmatpush.msrb.mxu1 %v201_v45  ;;  %415 = vmatpush.msrb.mxu2 %v194_v46  ;;  %v481_v41 = vld [vmem:[%s7082_s13 + $0x120] sm:$0xff]  ;;  %v448_v42 = vld [vmem:[%s7082_s13 + $0x18] sm:$0xff]  ;;  %v447_v45 = vld [vmem:[%s7082_s13 + $0x10] sm:$0xff] }
  0x40   :  { %435 = vmatpush.msrb.mxu3 %v195_v47  ;;  %300 = vmatmul.f32.vlgmr.msra.gmra.mxu0 %v7049_v27  ;;  %v465_v43 = vld [vmem:[%s7082_s13 + $0xa0] sm:$0xff]  ;;  %v480_v44 = vld [vmem:[%s7082_s13 + $0x118] sm:$0xff]  ;;  %v479_v47 = vld [vmem:[%s7082_s13 + $0x110] sm:$0xff] }
  0x41   :  { %320 = vmatmul.f32.vlgmr.msra.gmra.mxu1 %v7049_v27  ;;  %376 = vmatpush.msrb.mxu0 %v184_v48  ;;  %v464_v46 = vld [vmem:[%s7082_s13 + $0x98] sm:$0xff]  ;;  %v446_v48 = vld [vmem:[%s7082_s13 + $0x8] sm:$0xff] }
  0x42   :  { %395 = vmatpush.msrb.mxu1 %v193_v49  ;;  %416 = vmatpush.msrb.mxu2 %v186_v50  ;;  %v463_v49 = vld [vmem:[%s7082_s13 + $0x90] sm:$0xff]  ;;  %v445_v50 = vld [vmem:[%s7082_s13] sm:$0xff] }
  0x43   :  { %436 = vmatpush.msrb.mxu3 %v187_v51  ;;  %377 = vmatpush.msrb.mxu0 %v176_v52  ;;  %v462_v51 = vld [vmem:[%s7082_s13 + $0x88] sm:$0xff]  ;;  %v524_v52 = vld [vmem:[%s7082_s13 + $0x278] sm:$0xff] }
  0x44   :  { %396 = vmatpush.msrb.mxu1 %v185_v53  ;;  %417 = vmatpush.msrb.mxu2 %v178_v54  ;;  %v461_v53 = vld [vmem:[%s7082_s13 + $0x80] sm:$0xff]  ;;  %v502_v54 = vld [vmem:[%s7082_s13 + $0x1c8] sm:$0xff] }
  0x45   :  { %437 = vmatpush.msrb.mxu3 %v179_v55  ;;  %378 = vmatpush.msrb.mxu0 %v168_v56  ;;  %v523_v55 = vld [vmem:[%s7082_s13 + $0x270] sm:$0xff]  ;;  %v540_v56 = vld [vmem:[%s7082_s13 + $0x2f8] sm:$0xff] }
  0x46   :  { %397 = vmatpush.msrb.mxu1 %v177_v57  ;;  %418 = vmatpush.msrb.mxu2 %v170_v58  ;;  %v478_v57 = vld [vmem:[%s7082_s13 + $0x108] sm:$0xff]  ;;  %v501_v58 = vld [vmem:[%s7082_s13 + $0x1c0] sm:$0xff] }
  0x47   :  { %438 = vmatpush.msrb.mxu3 %v171_v59  ;;  %379 = vmatpush.msrb.mxu0 %v160_v60  ;;  %v522_v59 = vld [vmem:[%s7082_s13 + $0x268] sm:$0xff]  ;;  %v539_v60 = vld [vmem:[%s7082_s13 + $0x2f0] sm:$0xff] }
  0x48   :  { %398 = vmatpush.msrb.mxu1 %v169_v61  ;;  %419 = vmatpush.msrb.mxu2 %v162_v62  ;;  %v477_v61 = vld [vmem:[%s7082_s13 + $0x100] sm:$0xff]  ;;  %v500_v62 = vld [vmem:[%s7082_s13 + $0x1b8] sm:$0xff] }
  0x49   :  { %439 = vmatpush.msrb.mxu3 %v163_v63  ;;  %380 = vmatmul.f32.vlgmr.msrb.gmra.mxu0 %v7049_v27  ;;  %v521_v63 = vld [vmem:[%s7082_s13 + $0x260] sm:$0xff] }
  0x4a   :  { %420 = vmatmul.f32.vlgmr.msrb.gmra.mxu2 %v7049_v27  ;;  %440 = vmatmul.f32.vlgmr.msrb.gmra.mxu3 %v7049_v27 }
  0x4b   :  { %399 = vmatpush.msrb.mxu1 %v161_v0  ;;  %732 = vmatpush.msra.mxu0 %v460_v1  ;;  %v538_v0 = vld [vmem:[%s7082_s13 + $0x2e8] sm:$0xff]  ;;  %v556_v1 = vld [vmem:[%s7082_s13 + $0x378] sm:$0xff] }
  0x4c   :  { %400 = vmatmul.f32.vlgmr.msrb.gmra.mxu1 %v7049_v27  ;;  %772 = vmatpush.msra.mxu2 %v492_v2  ;;  %v453_v27 = vld [vmem:[%s7082_s13 + $0x40] sm:$0xff]  ;;  %v499_v2 = vld [vmem:[%s7082_s13 + $0x1b0] sm:$0xff] }
  0x4d   :  { %733 = vmatpush.msra.mxu0 %v459_v3  ;;  %752 = vmatpush.msra.mxu1 %v476_v4  ;;  %v520_v3 = vld [vmem:[%s7082_s13 + $0x258] sm:$0xff]  ;;  %v537_v4 = vld [vmem:[%s7082_s13 + $0x2e0] sm:$0xff] }
  0x4e   :  { %773 = vmatpush.msra.mxu2 %v491_v5  ;;  %792 = vmatpush.msra.mxu3 %v508_v6  ;;  %v555_v5 = vld [vmem:[%s7082_s13 + $0x370] sm:$0xff]  ;;  %v498_v6 = vld [vmem:[%s7082_s13 + $0x1a8] sm:$0xff] }
  0x4f   :  { %734 = vmatpush.msra.mxu0 %v458_v7  ;;  %753 = vmatpush.msra.mxu1 %v475_v8  ;;  %v519_v7 = vld [vmem:[%s7082_s13 + $0x250] sm:$0xff]  ;;  %v536_v8 = vld [vmem:[%s7082_s13 + $0x2d8] sm:$0xff] }
  0x50   :  { %774 = vmatpush.msra.mxu2 %v490_v9  ;;  %793 = vmatpush.msra.mxu3 %v507_v10  ;;  %v554_v9 = vld [vmem:[%s7082_s13 + $0x368] sm:$0xff]  ;;  %v497_v10 = vld [vmem:[%s7082_s13 + $0x1a0] sm:$0xff] }
  0x51   :  { %735 = vmatpush.msra.mxu0 %v457_v11  ;;  %754 = vmatpush.msra.mxu1 %v474_v12  ;;  %v518_v11 = vld [vmem:[%s7082_s13 + $0x248] sm:$0xff]  ;;  %v535_v12 = vld [vmem:[%s7082_s13 + $0x2d0] sm:$0xff] }
  0x52   :  { %775 = vmatpush.msra.mxu2 %v489_v13  ;;  %794 = vmatpush.msra.mxu3 %v506_v14  ;;  %v553_v13 = vld [vmem:[%s7082_s13 + $0x360] sm:$0xff]  ;;  %v496_v14 = vld [vmem:[%s7082_s13 + $0x198] sm:$0xff] }
  0x53   :  { %736 = vmatpush.msra.mxu0 %v456_v15  ;;  %755 = vmatpush.msra.mxu1 %v473_v16  ;;  %v517_v15 = vld [vmem:[%s7082_s13 + $0x240] sm:$0xff]  ;;  %v534_v16 = vld [vmem:[%s7082_s13 + $0x2c8] sm:$0xff] }
  0x54   :  { %776 = vmatpush.msra.mxu2 %v488_v17  ;;  %795 = vmatpush.msra.mxu3 %v505_v18  ;;  %v552_v17 = vld [vmem:[%s7082_s13 + $0x358] sm:$0xff]  ;;  %v495_v18 = vld [vmem:[%s7082_s13 + $0x190] sm:$0xff] }
  0x55   :  { %737 = vmatpush.msra.mxu0 %v455_v19  ;;  %756 = vmatpush.msra.mxu1 %v472_v20  ;;  %v516_v19 = vld [vmem:[%s7082_s13 + $0x238] sm:$0xff]  ;;  %v533_v20 = vld [vmem:[%s7082_s13 + $0x2c0] sm:$0xff] }
  0x56   :  { %777 = vmatpush.msra.mxu2 %v487_v21  ;;  %796 = vmatpush.msra.mxu3 %v504_v22  ;;  %v551_v21 = vld [vmem:[%s7082_s13 + $0x350] sm:$0xff]  ;;  %v494_v22 = vld [vmem:[%s7082_s13 + $0x188] sm:$0xff] }
  0x57   :  { %738 = vmatpush.msra.mxu0 %v454_v23  ;;  %757 = vmatpush.msra.mxu1 %v471_v24  ;;  %v515_v23 = vld [vmem:[%s7082_s13 + $0x230] sm:$0xff]  ;;  %v532_v24 = vld [vmem:[%s7082_s13 + $0x2b8] sm:$0xff] }
  0x58   :  { %778 = vmatpush.msra.mxu2 %v486_v25  ;;  %797 = vmatpush.msra.mxu3 %v503_v26  ;;  %v550_v25 = vld [vmem:[%s7082_s13 + $0x348] sm:$0xff]  ;;  %v493_v26 = vld [vmem:[%s7082_s13 + $0x180] sm:$0xff] }
  0x59   :  { %739 = vmatpush.msra.mxu0 %v453_v27  ;;  %758 = vmatpush.msra.mxu1 %v470_v28  ;;  %v514_v27 = vld [vmem:[%s7082_s13 + $0x228] sm:$0xff]  ;;  %v531_v28 = vld [vmem:[%s7082_s13 + $0x2b0] sm:$0xff] }
  0x5a   :  { %779 = vmatpush.msra.mxu2 %v485_v29  ;;  %798 = vmatpush.msra.mxu3 %v502_v54  ;;  %v549_v29 = vld [vmem:[%s7082_s13 + $0x340] sm:$0xff] }
  0x5b   :  { %740 = vmatpush.msra.mxu0 %v452_v30  ;;  %759 = vmatpush.msra.mxu1 %v469_v31  ;;  %v513_v30 = vld [vmem:[%s7082_s13 + $0x220] sm:$0xff]  ;;  %v530_v31 = vld [vmem:[%s7082_s13 + $0x2a8] sm:$0xff] }
  0x5c   :  { %780 = vmatpush.msra.mxu2 %v484_v32  ;;  %799 = vmatpush.msra.mxu3 %v501_v58  ;;  %v548_v32 = vld [vmem:[%s7082_s13 + $0x338] sm:$0xff] }
  0x5d   :  { %741 = vmatpush.msra.mxu0 %v451_v33  ;;  %760 = vmatpush.msra.mxu1 %v468_v34  ;;  %v564_v33 = vld [vmem:[%s7082_s13 + $0x3b8] sm:$0xff] }
  0x5e   :  { %781 = vmatpush.msra.mxu2 %v483_v35  ;;  %800 = vmatpush.msra.mxu3 %v500_v62  ;;  %v512_v35 = vld [vmem:[%s7082_s13 + $0x218] sm:$0xff] }
  0x5f   :  { %742 = vmatpush.msra.mxu0 %v450_v36  ;;  %761 = vmatpush.msra.mxu1 %v467_v37  ;;  %v529_v36 = vld [vmem:[%s7082_s13 + $0x2a0] sm:$0xff]  ;;  %v547_v37 = vld [vmem:[%s7082_s13 + $0x330] sm:$0xff] }
  0x60   :  { %782 = vmatpush.msra.mxu2 %v482_v38  ;;  %801 = vmatpush.msra.mxu3 %v499_v2 }
  0x61   :  { %743 = vmatpush.msra.mxu0 %v449_v39  ;;  %762 = vmatpush.msra.mxu1 %v466_v40  ;;  %v563_v40 = vld [vmem:[%s7082_s13 + $0x3b0] sm:$0xff] }
  0x62   :  { %783 = vmatpush.msra.mxu2 %v481_v41  ;;  %802 = vmatpush.msra.mxu3 %v498_v6  ;;  %v511_v41 = vld [vmem:[%s7082_s13 + $0x210] sm:$0xff] }
  0x63   :  { %744 = vmatpush.msra.mxu0 %v448_v42  ;;  %763 = vmatpush.msra.mxu1 %v465_v43  ;;  %v528_v42 = vld [vmem:[%s7082_s13 + $0x298] sm:$0xff] }
  0x64   :  { %784 = vmatpush.msra.mxu2 %v480_v44  ;;  %803 = vmatpush.msra.mxu3 %v497_v10  ;;  %v546_v44 = vld [vmem:[%s7082_s13 + $0x328] sm:$0xff] }
  0x65   :  { %745 = vmatpush.msra.mxu0 %v447_v45  ;;  %764 = vmatpush.msra.mxu1 %v464_v46  ;;  %v562_v45 = vld [vmem:[%s7082_s13 + $0x3a8] sm:$0xff] }
  0x66   :  { %785 = vmatpush.msra.mxu2 %v479_v47  ;;  %804 = vmatpush.msra.mxu3 %v496_v14  ;;  %v510_v46 = vld [vmem:[%s7082_s13 + $0x208] sm:$0xff] }
  0x67   :  { %746 = vmatpush.msra.mxu0 %v446_v48  ;;  %765 = vmatpush.msra.mxu1 %v463_v49  ;;  %v527_v49 = vld [vmem:[%s7082_s13 + $0x290] sm:$0xff] }
  0x68   :  { %786 = vmatpush.msra.mxu2 %v478_v57  ;;  %805 = vmatpush.msra.mxu3 %v495_v18  ;;  %v526_v57 = vld [vmem:[%s7082_s13 + $0x288] sm:$0xff] }
  0x69   :  { %747 = vmatpush.msra.mxu0 %v445_v50  ;;  %766 = vmatpush.msra.mxu1 %v462_v51  ;;  %v545_v50 = vld [vmem:[%s7082_s13 + $0x320] sm:$0xff]  ;;  %v542_v18 = vld [vmem:[%s7082_s13 + $0x308] sm:$0xff] }
  0x6a   :  { %787 = vmatpush.msra.mxu2 %v477_v61  ;;  %806 = vmatpush.msra.mxu3 %v494_v22  ;;  %v561_v51 = vld [vmem:[%s7082_s13 + $0x3a0] sm:$0xff]  ;;  %v560_v61 = vld [vmem:[%s7082_s13 + $0x398] sm:$0xff] }
  0x6b   :  { %812 = vmatpush.msrb.mxu0 %v524_v52  ;;  %767 = vmatpush.msra.mxu1 %v461_v53 }
  0x6c   :  { %852 = vmatpush.msrb.mxu2 %v556_v1  ;;  %807 = vmatpush.msra.mxu3 %v493_v26 }
  0x6d   :  { %813 = vmatpush.msrb.mxu0 %v523_v55  ;;  %832 = vmatpush.msrb.mxu1 %v540_v56  ;;  %v509_v56 = vld [vmem:[%s7082_s13 + $0x200] sm:$0xff] }
  0x6e   :  { %853 = vmatpush.msrb.mxu2 %v555_v5  ;;  %880 = vmatpush.msrb.mxu3 %v564_v33 }
  0x6f   :  { %814 = vmatpush.msrb.mxu0 %v522_v59  ;;  %833 = vmatpush.msrb.mxu1 %v539_v60  ;;  %v544_v60 = vld [vmem:[%s7082_s13 + $0x318] sm:$0xff] }
  0x70   :  { %854 = vmatpush.msrb.mxu2 %v554_v9  ;;  %881 = vmatpush.msrb.mxu3 %v563_v40  ;;  %v559_v9 = vld [vmem:[%s7082_s13 + $0x390] sm:$0xff] }
  0x71   :  { %815 = vmatpush.msrb.mxu0 %v521_v63  ;;  %834 = vmatpush.msrb.mxu1 %v538_v0 }
  0x72   :  { %855 = vmatpush.msrb.mxu2 %v553_v13  ;;  %882 = vmatpush.msrb.mxu3 %v562_v45 }
  0x73   :  { %816 = vmatpush.msrb.mxu0 %v520_v3  ;;  %835 = vmatpush.msrb.mxu1 %v537_v4  ;;  %v525_v3 = vld [vmem:[%s7082_s13 + $0x280] sm:$0xff] }
  0x74   :  { %856 = vmatpush.msrb.mxu2 %v552_v17  ;;  %883 = vmatpush.msrb.mxu3 %v561_v51 }
  0x75   :  { %817 = vmatpush.msrb.mxu0 %v519_v7  ;;  %836 = vmatpush.msrb.mxu1 %v536_v8  ;;  %v543_v8 = vld [vmem:[%s7082_s13 + $0x310] sm:$0xff] }
  0x76   :  { %857 = vmatpush.msrb.mxu2 %v551_v21  ;;  %884 = vmatpush.msrb.mxu3 %v560_v61 }
  0x77   :  { %818 = vmatpush.msrb.mxu0 %v518_v11  ;;  %837 = vmatpush.msrb.mxu1 %v535_v12 }
  0x78   :  { %858 = vmatpush.msrb.mxu2 %v550_v25  ;;  %885 = vmatpush.msrb.mxu3 %v559_v9 }
  0x79   :  { %819 = vmatpush.msrb.mxu0 %v517_v15  ;;  %838 = vmatpush.msrb.mxu1 %v534_v16 }
  0x7a   :  { %859 = vmatpush.msrb.mxu2 %v549_v29 }
  0x7b   :  { %820 = vmatpush.msrb.mxu0 %v516_v19  ;;  %839 = vmatpush.msrb.mxu1 %v533_v20 }
  0x7c   :  { %860 = vmatpush.msrb.mxu2 %v548_v32  ;;  %v557_v32 = vld [vmem:[%s7082_s13 + $0x380] sm:$0xff] }
  0x7d   :  { %821 = vmatpush.msrb.mxu0 %v515_v23  ;;  %840 = vmatpush.msrb.mxu1 %v532_v24  ;;  %v558_v23 = vld [vmem:[%s7082_s13 + $0x388] sm:$0xff] }
  0x7e   :  { %861 = vmatpush.msrb.mxu2 %v547_v37  ;;  %886 = vmatpush.msrb.mxu3 %v558_v23 }
  0x7f   :  { %822 = vmatpush.msrb.mxu0 %v514_v27  ;;  %841 = vmatpush.msrb.mxu1 %v531_v28  ;;  %v541_v28 = vld [vmem:[%s7082_s13 + $0x300] sm:$0xff] }
  0x80   :  { %862 = vmatpush.msrb.mxu2 %v546_v44  ;;  %887 = vmatpush.msrb.mxu3 %v557_v32 }
  0x81   :  { %823 = vmatpush.msrb.mxu0 %v513_v30  ;;  %842 = vmatpush.msrb.mxu1 %v530_v31 }
  0x82   :  { %863 = vmatpush.msrb.mxu2 %v545_v50 }
  0x83   :  { %824 = vmatpush.msrb.mxu0 %v512_v35  ;;  %843 = vmatpush.msrb.mxu1 %v529_v36 }
  0x84   :  { %864 = vmatpush.msrb.mxu2 %v544_v60 }
  0x85   :  { %825 = vmatpush.msrb.mxu0 %v511_v41  ;;  %844 = vmatpush.msrb.mxu1 %v528_v42 }
  0x86   :  { %865 = vmatpush.msrb.mxu2 %v543_v8 }
  0x87   :  { %826 = vmatpush.msrb.mxu0 %v510_v46  ;;  %845 = vmatpush.msrb.mxu1 %v527_v49 }
  0x88   :  { %866 = vmatpush.msrb.mxu2 %v542_v18 }
  0x89   :  { %827 = vmatpush.msrb.mxu0 %v509_v56  ;;  %846 = vmatpush.msrb.mxu1 %v526_v57 }
  0x8a   :  { %867 = vmatpush.msrb.mxu2 %v541_v28 }
  0x8b   :  { %847 = vmatpush.msrb.mxu1 %v525_v3 }
  0xb8   :  { %v7198_v34 = vpop.f32.mrf.mxu2 }
  0xb9   :  { %v612_v38 = vsel %vm597_vm0, %v7198_v34, 0.0  ;;  %v657_v39 = vmul.f32 %v7198_v34, %v7198_v34 }
  0xba   :  { %v613_v43 = vrot.slane %v612_v38, 4 }
  0xbb   :  { %v677_v47 = vsel %vm597_vm0, %v657_v39, 0.0  ;;  %v7214_v48 = vpop.f32.mrf.mxu3 }
  0xbc   :  { %v614_v52 = vadd.f32 %v613_v43, %v612_v38  ;;  %v678_v53 = vrot.slane %v677_v47, 4  ;;  %v619_v54 = vsel %vm597_vm0, %v7214_v48, 0.0  ;;  %v658_v55 = vmul.f32 %v7214_v48, %v7214_v48 }
  0xbd   :  { %v620_v58 = vrot.slane %v619_v54, 4  ;;  %v7225_v59 = vpop.f32.mrf.mxu0 }
  0xbe   :  { %v615_v62 = vrot.slane %v614_v52, 2  ;;  %v679_v63 = vadd.f32 %v678_v53, %v677_v47  ;;  %v684_v0 = vsel %vm597_vm0, %v658_v55, 0.0  ;;  %v598_v1 = vsel %vm597_vm0, %v7225_v59, 0.0  ;;  %v7232_v2 = vpop.f32.mrf.mxu1 }
  0xbf   :  { %v621_v4 = vadd.f32 %v620_v58, %v619_v54  ;;  %v685_v5 = vrot.slane %v684_v0, 4  ;;  %v599_v6 = vrot.slane %v598_v1, 4  ;;  %v655_v7 = vmul.f32 %v7225_v59, %v7225_v59 }
  0xc0   :  { %v616_v10 = vadd.f32 %v615_v62, %v614_v52  ;;  %v680_v11 = vrot.slane %v679_v63, 2  ;;  %v605_v12 = vsel %vm597_vm0, %v7232_v2, 0.0  ;;  %v656_v13 = vmul.f32 %v7232_v2, %v7232_v2 }
  0xc1   :  { %v622_v14 = vrot.slane %v621_v4, 2  ;;  %v686_v15 = vadd.f32 %v685_v5, %v684_v0  ;;  %v600_v16 = vadd.f32 %v599_v6, %v598_v1  ;;  %v663_v17 = vsel %vm597_vm0, %v655_v7, 0.0 }
  0xc2   :  { %v664_v19 = vrot.slane %v663_v17, 4  ;;  %v606_v20 = vrot.slane %v605_v12, 4  ;;  %v670_v21 = vsel %vm597_vm0, %v656_v13, 0.0  ;;  %v617_v22 = vrot.slane %v616_v10, 1 }
  0xc3   :  { %v623_v24 = vadd.f32 %v622_v14, %v621_v4  ;;  %v687_v25 = vrot.slane %v686_v15, 2  ;;  %v601_v26 = vrot.slane %v600_v16, 2  ;;  %v671_v27 = vrot.slane %v670_v21, 4 }
  0xc4   :  { %v665_v29 = vadd.f32 %v664_v19, %v663_v17  ;;  %v607_v30 = vadd.f32 %v606_v20, %v605_v12  ;;  %v681_v31 = vadd.f32 %v680_v11, %v679_v63  ;;  %v618_v41 = vadd.f32 %v617_v22, %v616_v10 }
  0xc5   :  { %v602_v33 = vadd.f32 %v601_v26, %v600_v16  ;;  %v672_v35 = vadd.f32 %v671_v27, %v670_v21  ;;  %v624_v36 = vrot.slane %v623_v24, 1  ;;  %v688_v37 = vadd.f32 %v687_v25, %v686_v15 }
  0xc6   :  { %v666_v38 = vrot.slane %v665_v29, 2  ;;  %v608_v39 = vrot.slane %v607_v30, 2  ;;  %v7249_v40 = vpop.f32.mrf.mxu0  ;;  %v682_v42 = vrot.slane %v681_v31, 1 }
  0xc7   :  { %v673_v43 = vrot.slane %v672_v35, 2  ;;  %v626_v44 = vsel %vm597_vm0, %v7249_v40, 0.0  ;;  %v659_v45 = vmul.f32 %v7249_v40, %v7249_v40  ;;  %v625_v46 = vadd.f32 %v624_v36, %v623_v24 }
  0xc8   :  { %v609_v47 = vadd.f32 %v608_v39, %v607_v30  ;;  %v627_v49 = vrot.slane %v626_v44, 4  ;;  %v683_v50 = vadd.f32 %v682_v42, %v681_v31  ;;  %v689_v51 = vrot.slane %v688_v37, 1 }
  0xc9   :  { %v691_v52 = vsel %vm597_vm0, %v659_v45, 0.0  ;;  %v7256_v53 = vpop.f32.mrf.mxu1  ;;  %v603_v54 = vrot.slane %v602_v33, 1  ;;  %v667_v55 = vadd.f32 %v666_v38, %v665_v29  ;;  %v674_v56 = vadd.f32 %v673_v43, %v672_v35 }
  0xca   :  { %v628_v57 = vadd.f32 %v627_v49, %v626_v44  ;;  %v692_v58 = vrot.slane %v691_v52, 4  ;;  %v633_v60 = vsel %vm597_vm0, %v7256_v53, 0.0  ;;  %v660_v61 = vmul.f32 %v7256_v53, %v7256_v53 }
  0xcb   :  { %v634_v62 = vrot.slane %v633_v60, 4  ;;  %v722_v63 = vsel %vm719_vm1, %v618_v41, %v683_v50  ;;  %v690_v0 = vadd.f32 %v689_v51, %v688_v37  ;;  %v604_v1 = vadd.f32 %v603_v54, %v602_v33 }
  0xcc   :  { %v629_v3 = vrot.slane %v628_v57, 2  ;;  %v693_v4 = vadd.f32 %v692_v58, %v691_v52  ;;  %v698_v5 = vsel %vm597_vm0, %v660_v61, 0.0  ;;  %788 = vmatmul.f32.vlgmr.msra.gmra.mxu2 %v722_v63  ;;  %v668_v6 = vrot.slane %v667_v55, 1 }
  0xcd   :  { %v635_v7 = vadd.f32 %v634_v62, %v633_v60  ;;  %v699_v8 = vrot.slane %v698_v5, 4  ;;  %v7264_v9 = vpop.f32.mrf.mxu2  ;;  %v7266_v10 = vpop.f32.mrf.mxu3  ;;  %v723_v11 = vsel %vm719_vm1, %v625_v46, %v690_v0  ;;  %v610_v12 = vrot.slane %v609_v47, 1 }
  0xce   :  { %v630_v13 = vadd.f32 %v629_v3, %v628_v57  ;;  %v694_v14 = vrot.slane %v693_v4, 2  ;;  %v640_v15 = vsel %vm597_vm0, %v7264_v9, 0.0  ;;  %v661_v16 = vmul.f32 %v7264_v9, %v7264_v9  ;;  %808 = vmatmul.f32.vlgmr.msra.gmra.mxu3 %v723_v11 }
  0xcf   :  { %v636_v17 = vrot.slane %v635_v7, 2  ;;  %v700_v18 = vadd.f32 %v699_v8, %v698_v5  ;;  %v641_v19 = vrot.slane %v640_v15, 4  ;;  %v648_v20 = vsel %vm647_vm2, %v7266_v10, 0.0 }
  0xd0   :  { %v705_v21 = vsel %vm597_vm0, %v661_v16, 0.0  ;;  %v649_v22 = vrot.slane %v648_v20, 4  ;;  %v662_v23 = vmul.f32 %v7266_v10, %v7266_v10  ;;  %v669_v24 = vadd.f32 %v668_v6, %v667_v55 }
  0xd1   :  { %v637_v25 = vadd.f32 %v636_v17, %v635_v7  ;;  %v701_v26 = vrot.slane %v700_v18, 2  ;;  %v642_v27 = vadd.f32 %v641_v19, %v640_v15  ;;  %v706_v28 = vrot.slane %v705_v21, 4 }
  0xd2   :  { %v650_v29 = vadd.f32 %v649_v22, %v648_v20  ;;  %v712_v30 = vsel %vm647_vm2, %v662_v23, 0.0  ;;  %v720_v31 = vsel %vm719_vm1, %v604_v1, %v669_v24  ;;  %v611_v32 = vadd.f32 %v610_v12, %v609_v47 }
  0xd3   :  { %v643_v33 = vrot.slane %v642_v27, 2  ;;  %v707_v35 = vadd.f32 %v706_v28, %v705_v21  ;;  %v713_v36 = vrot.slane %v712_v30, 4  ;;  %748 = vmatmul.f32.vlgmr.msra.gmra.mxu0 %v720_v31  ;;  %v675_v37 = vrot.slane %v674_v56, 1 }
  0xd4   :  { %v651_v38 = vrot.slane %v650_v29, 2  ;;  %v631_v39 = vrot.slane %v630_v13, 1  ;;  %v695_v41 = vadd.f32 %v694_v14, %v693_v4  ;;  %v638_v42 = vrot.slane %v637_v25, 1 }
  0xd5   :  { %v644_v43 = vadd.f32 %v643_v33, %v642_v27  ;;  %v708_v44 = vrot.slane %v707_v35, 2  ;;  %v714_v45 = vadd.f32 %v713_v36, %v712_v30  ;;  %v676_v46 = vadd.f32 %v675_v37, %v674_v56  ;;  %v589_v33 = vld [vmem:[%s7291_s17 + $0xc0] sm:$0xff]  ;;  %v595_v37 = vld [vmem:[%s7291_s17 + $0xf0] sm:$0xff] }
  0xd6   :  { %v652_v49 = vadd.f32 %v651_v38, %v650_v29  ;;  %v632_v50 = vadd.f32 %v631_v39, %v630_v13  ;;  %v696_v51 = vrot.slane %v695_v41, 1  ;;  %v702_v47 = vadd.f32 %v701_v26, %v700_v18  ;;  %v593_v36 = vld [vmem:[%s7291_s17 + $0xe0] sm:$0xff]  ;;  %936 = vmatpush.msra.mxu3 %v589_v33  ;;  %v584_v39 = vld [vmem:[%s7291_s17 + $0x98] sm:$0xff]  ;;  %1056 = vmatpush.msra.mxu0 %v595_v37  ;;  %v567_v33 = vld [vmem:[%s7291_s17 + $0x10] sm:$0xff] }
  0xd7   :  { %v715_v52 = vrot.slane %v714_v45, 2  ;;  %v721_v54 = vsel %vm719_vm1, %v611_v32, %v676_v46  ;;  %v645_v57 = vrot.slane %v644_v43, 1  ;;  %v709_v58 = vadd.f32 %v708_v44, %v707_v35  ;;  %v592_v35 = vld [vmem:[%s7291_s17 + $0xd8] sm:$0xff]  ;;  %v581_v38 = vld [vmem:[%s7291_s17 + $0x80] sm:$0xff]  ;;  %1016 = vmatpush.msra.mxu2 %v593_v36  ;;  %v594_v36 = vld [vmem:[%s7291_s17 + $0xe8] sm:$0xff] }
  0xd8   :  { %768 = vmatmul.f32.vlgmr.msra.gmra.mxu1 %v721_v54  ;;  %v697_v55 = vadd.f32 %v696_v51, %v695_v41  ;;  %v653_v60 = vrot.slane %v652_v49, 1  ;;  %v639_v62 = vadd.f32 %v638_v42, %v637_v25  ;;  %v703_v63 = vrot.slane %v702_v47, 1  ;;  %v585_v42 = vld [vmem:[%s7291_s17 + $0xa0] sm:$0xff]  ;;  %937 = vmatpush.msra.mxu3 %v581_v38  ;;  %v568_v51 = vld [vmem:[%s7291_s17 + $0x18] sm:$0xff]  ;;  %v571_v54 = vld [vmem:[%s7291_s17 + $0x30] sm:$0xff] }
  0xd9   :  { %v716_v61 = vadd.f32 %v715_v52, %v714_v45  ;;  %v710_v1 = vrot.slane %v709_v58, 1  ;;  %v646_v4 = vadd.f32 %v645_v57, %v644_v43  ;;  %996 = vmatpush.msra.mxu1 %v592_v35  ;;  %v587_v43 = vld [vmem:[%s7291_s17 + $0xb0] sm:$0xff]  ;;  %v573_v44 = vld [vmem:[%s7291_s17 + $0x40] sm:$0xff]  ;;  %v576_v45 = vld [vmem:[%s7291_s17 + $0x58] sm:$0xff]  ;;  %1017 = vmatpush.msra.mxu2 %v585_v42 }
  0xda   :  { %v724_v0 = vsel %vm719_vm1, %v632_v50, %v697_v55  ;;  %v704_v56 = vadd.f32 %v703_v63, %v702_v47  ;;  %v654_v7 = vadd.f32 %v653_v60, %v652_v49  ;;  %v577_v46 = vld [vmem:[%s7291_s17 + $0x60] sm:$0xff]  ;;  %v579_v49 = vld [vmem:[%s7291_s17 + $0x70] sm:$0xff]  ;;  %1057 = vmatpush.msra.mxu0 %v587_v43  ;;  %938 = vmatpush.msra.mxu3 %v573_v44  ;;  %v590_v47 = vld [vmem:[%s7291_s17 + $0xc8] sm:$0xff] }
  0xdb   :  { %828 = vmatmul.f32.vlgmr.msrb.gmra.mxu0 %v724_v0  ;;  %v717_v3 = vrot.slane %v716_v61, 1  ;;  %v711_v5 = vadd.f32 %v710_v1, %v709_v58  ;;  %997 = vmatpush.msra.mxu1 %v584_v39  ;;  %v565_v50 = vld [vmem:[%s7291_s17] sm:$0xff]  ;;  %v596_v55 = vld [vmem:[%s7291_s17 + $0xf8] sm:$0xff]  ;;  %v582_v57 = vld [vmem:[%s7291_s17 + $0x88] sm:$0xff] }
  0xdc   :  { %v725_v6 = vsel %vm719_vm1, %v639_v62, %v704_v56  ;;  %v569_v52 = vld [vmem:[%s7291_s17 + $0x20] sm:$0xff]  ;;  %1018 = vmatpush.msra.mxu2 %v577_v46  ;;  %1058 = vmatpush.msra.mxu0 %v579_v49  ;;  %v588_v58 = vld [vmem:[%s7291_s17 + $0xb8] sm:$0xff]  ;;  %v566_v0 = vld [vmem:[%s7291_s17 + $0x8] sm:$0xff] }
  0xdd   :  { %v718_v8 = vadd.f32 %v717_v3, %v716_v61  ;;  %v726_v11 = vsel %vm719_vm1, %v646_v4, %v711_v5  ;;  %998 = vmatpush.msra.mxu1 %v576_v45  ;;  %939 = vmatpush.msra.mxu3 %v565_v50  ;;  %v574_v61 = vld [vmem:[%s7291_s17 + $0x48] sm:$0xff]  ;;  %v580_v62 = vld [vmem:[%s7291_s17 + $0x78] sm:$0xff]  ;;  %v1156_v35 = vld [vmem:[%s7326_s25 + $0x100] sm:$0xff] }
  0xde   :  { %868 = vmatmul.f32.vlgmr.msrb.gmra.mxu2 %v726_v11  ;;  %1059 = vmatpush.msra.mxu0 %v571_v54  ;;  %v572_v1 = vld [vmem:[%s7291_s17 + $0x38] sm:$0xff]  ;;  %v1364_v37 = vld [vmem:[%s7326_s25 + $0x780] sm:$0xff]  ;;  %v578_v45 = vld [vmem:[%s7291_s17 + $0x68] sm:$0xff] }
  0xdf   :  { %v727_v12 = vsel %vm719_vm1, %v654_v7, %v718_v8  ;;  %999 = vmatpush.msra.mxu1 %v568_v51  ;;  %1019 = vmatpush.msra.mxu2 %v569_v52  ;;  %v1152_v38 = vld [vmem:[%s7326_s25 + $0xe0] sm:$0xff]  ;;  %v570_v52 = vld [vmem:[%s7291_s17 + $0x28] sm:$0xff] }
  0xe0   :  { %848 = vmatmul.f32.vlgmr.msrb.gmra.mxu1 %v725_v6  ;;  %6434 = vmatmul.msk.f32.vlgmr.msrb.gmra.mxu3 %vm728_vm3, %v727_v12  ;;  %v444_v6 = vld [vmem:[%s6400_s21] sm:$0x3]  ;;  %s6410_s21 = sld [smem:[%s9533_s0 + %s6911_s18]]   ;;  %s6927_s18 = smov 22  }
  0xe1   :  { %956 = vmatpush.msrb.mxu3 %v590_v47  ;;  %1076 = vmatpush.msrb.mxu1 %v596_v55  ;;  %v1184_v12 = vld [vmem:[%s7326_s25 + $0x1e0] sm:$0xff] }
  0xe2   :  { %1607 = vmatpush.msrb.mxu2 %v1184_v12  ;;  %v1296_v39 = vld [vmem:[%s7326_s25 + $0x560] sm:$0xff] }
  0xe3   :  { %957 = vmatpush.msrb.mxu3 %v582_v57  ;;  %1077 = vmatpush.msrb.mxu1 %v588_v58  ;;  %v1360_v42 = vld [vmem:[%s7326_s25 + $0x760] sm:$0xff] }
  0xe4   :  { %v1148_v43 = vld [vmem:[%s7326_s25 + $0xc0] sm:$0xff] }
  0xe5   :  { %958 = vmatpush.msrb.mxu3 %v574_v61  ;;  %1078 = vmatpush.msrb.mxu1 %v580_v62  ;;  %v1292_v44 = vld [vmem:[%s7326_s25 + $0x540] sm:$0xff] }
  0xe6   :  { %v1356_v46 = vld [vmem:[%s7326_s25 + $0x740] sm:$0xff] }
  0xe7   :  { %959 = vmatpush.msrb.mxu3 %v566_v0  ;;  %1079 = vmatpush.msrb.mxu1 %v572_v1  ;;  %v1144_v49 = vld [vmem:[%s7326_s25 + $0xa0] sm:$0xff] }
  0xe8   :  { %v1288_v50 = vld [vmem:[%s7326_s25 + $0x520] sm:$0xff] }
  0xe9   :  { %v1352_v51 = vld [vmem:[%s7326_s25 + $0x720] sm:$0xff] }
  0xea   :  { %v1140_v54 = vld [vmem:[%s7326_s25 + $0x80] sm:$0xff] }
  0xeb   :  { %v1248_v47 = vld [vmem:[%s7326_s25 + $0x3e0] sm:$0xff] }
  0xec   :  { %v1348_v55 = vld [vmem:[%s7326_s25 + $0x700] sm:$0xff] }
  0xed   :  { %v1136_v57 = vld [vmem:[%s7326_s25 + $0x60] sm:$0xff] }
  0xee   :  { %v1284_v58 = vld [vmem:[%s7326_s25 + $0x500] sm:$0xff] }
  0xef   :  { %v1344_v61 = vld [vmem:[%s7326_s25 + $0x6e0] sm:$0xff] }
  0xf0   :  { %v1132_v62 = vld [vmem:[%s7326_s25 + $0x40] sm:$0xff] }
  0xf1   :  { %v1240_v0 = vld [vmem:[%s7326_s25 + $0x3a0] sm:$0xff] }
  0xf2   :  { %v1340_v1 = vld [vmem:[%s7326_s25 + $0x6c0] sm:$0xff] }
  0xf3   :  { %v1272_v12 = vld [vmem:[%s7326_s25 + $0x4a0] sm:$0xff] }
 0x14f   :  { %v789_v15 = vpop.f32.mrf.mxu2 }
 0x150   :  { %v749_v13 = vpop.f32.mrf.mxu0 }
 0x151   :  { %v809_v18 = vpop.f32.mrf.mxu3 }
 0x155   :  { %v769_v14 = vpop.f32.mrf.mxu1 }
 0x156   :  { %v770_v16 = vadd.f32 %v769_v14, %v749_v13  ;;  %v1180_v13 = vld [vmem:[%s7326_s25 + $0x1c0] sm:$0xff] }
 0x157   :  { %1608 = vmatpush.msrb.mxu2 %v1180_v13  ;;  %v1436_v13 = vld [vmem:[%s7326_s25 + $0x9c0] sm:$0xff] }
 0x158   :  { %v790_v17 = vadd.f32 %v789_v15, %v770_v16  ;;  %v829_v19 = vpop.f32.mrf.mxu0  ;;  %v1176_v15 = vld [vmem:[%s7326_s25 + $0x1a0] sm:$0xff] }
 0x159   :  { %1609 = vmatpush.msrb.mxu2 %v1176_v15  ;;  %v1228_v15 = vld [vmem:[%s7326_s25 + $0x340] sm:$0xff] }
 0x15a   :  { %v810_v20 = vadd.f32 %v809_v18, %v790_v17  ;;  %v1172_v17 = vld [vmem:[%s7326_s25 + $0x180] sm:$0xff] }
 0x15b   :  { %1610 = vmatpush.msrb.mxu2 %v1172_v17  ;;  %v1432_v17 = vld [vmem:[%s7326_s25 + $0x9a0] sm:$0xff] }
 0x15c   :  { %v830_v21 = vadd.f32 %v829_v19, %v810_v20  ;;  %v1312_v19 = vld [vmem:[%s7326_s25 + $0x5e0] sm:$0xff] }
 0x15d   :  { %v849_v22 = vpop.f32.mrf.mxu1  ;;  %1647 = vmatpush.msrb.mxu0 %v1312_v19  ;;  %v1224_v19 = vld [vmem:[%s7326_s25 + $0x320] sm:$0xff] }
 0x15e   :  { %v850_v23 = vadd.f32 %v849_v22, %v830_v21  ;;  %v591_v21 = vld [vmem:[%s7291_s17 + $0xd0] sm:$0xff]  ;;  %v1168_v22 = vld [vmem:[%s7326_s25 + $0x160] sm:$0xff] }
 0x15f   :  { %1611 = vmatpush.msrb.mxu2 %v1168_v22  ;;  %v1320_v22 = vld [vmem:[%s7326_s25 + $0x620] sm:$0xff] }
 0x161   :  { %v869_v24 = vpop.f32.mrf.mxu2 }
 0x162   :  { %v870_v25 = vadd.f32 %v869_v24, %v850_v23  ;;  %v1376_v23 = vld [vmem:[%s7326_s25 + $0x7e0] sm:$0xff] }
 0x163   :  { %v889_v26 = vpop.f32.mrf.mxu3  ;;  %v1308_v24 = vld [vmem:[%s7326_s25 + $0x5c0] sm:$0xff] }
 0x164   :  { %v890_v27 = vadd.f32 %v889_v26, %v870_v25  ;;  %v583_v25 = vld [vmem:[%s7291_s17 + $0x90] sm:$0xff]  ;;  %v1164_v26 = vld [vmem:[%s7326_s25 + $0x140] sm:$0xff]  ;;  %1648 = vmatpush.msrb.mxu0 %v1308_v24 }
 0x165   :  { %1612 = vmatpush.msrb.mxu2 %v1164_v26  ;;  %v1260_v24 = vld [vmem:[%s7326_s25 + $0x440] sm:$0xff] }
 0x166   :  { %v7286_v28 = vmul.f32 0.016666668, %v890_v27  ;;  %v1372_v27 = vld [vmem:[%s7326_s25 + $0x7c0] sm:$0xff] }
 0x167   :  { %v1316_v26 = vld [vmem:[%s7326_s25 + $0x600] sm:$0xff] }
 0x168   :  { %v893_v29 = vmul.f32 %v7286_v28, %v7286_v28 }
 0x16a   :  { %v895_v30 = vrot.slane %v893_v29, 7  ;;  %v575_v29 = vld [vmem:[%s7291_s17 + $0x50] sm:$0xff] }
 0x16c   :  { %v897_v31 = vsub.f32 %v7286_v28, %v895_v30  ;;  %v1160_v30 = vld [vmem:[%s7326_s25 + $0x120] sm:$0xff] }
 0x16d   :  { %1613 = vmatpush.msrb.mxu2 %v1160_v30  ;;  %v1256_v30 = vld [vmem:[%s7326_s25 + $0x420] sm:$0xff] }
 0x16e   :  { %v898_v32 = vmax.f32 %v897_v31, 0.0  ;;  %v1368_v31 = vld [vmem:[%s7326_s25 + $0x7a0] sm:$0xff] }
 0x16f   :  { %1614 = vmatpush.msrb.mxu2 %v1156_v35  ;;  %v1252_v35 = vld [vmem:[%s7326_s25 + $0x400] sm:$0xff] }
 0x170   :  { %v899_v41 = vadd.f32 1e-05, %v898_v32  ;;  %v1300_v32 = vld [vmem:[%s7326_s25 + $0x580] sm:$0xff] }
 0x171   :  { %1615 = vmatpush.msrb.mxu2 %v1152_v38  ;;  %v1412_v38 = vld [vmem:[%s7326_s25 + $0x900] sm:$0xff] }
 0x172   :  { %6627 = vrsqrt.f32 %v899_v41  ;;  %vm906_vm5 = vweird.f32 %v899_v41 }
 0x173   :  { %1616 = vmatpush.msrb.mxu2 %v1148_v43  ;;  %v1192_v43 = vld [vmem:[%s7326_s25 + $0x220] sm:$0xff] }
 0x175   :  { %1617 = vmatpush.msrb.mxu2 %v1144_v49  ;;  %v1496_v49 = vld [vmem:[%s7326_s25 + $0xba0] sm:$0xff] }
 0x177   :  { %1618 = vmatpush.msrb.mxu2 %v1140_v54  ;;  %v1568_v54 = vld [vmem:[%s7326_s25 + $0xde0] sm:$0xff] }
 0x178   :  { %v6628_v60 = vpop.eup %6627 }
 0x179   :  { %v901_v63 = vmul.f32 %v6628_v60, %v899_v41  ;;  %vm907_vm4 = vweird.f32 %v6628_v60  ;;  %v586_v41 = vld [vmem:[%s7291_s17 + $0xa8] sm:$0xff]  ;;  %1619 = vmatpush.msrb.mxu2 %v1136_v57  ;;  %v1484_v57 = vld [vmem:[%s7326_s25 + $0xb40] sm:$0xff] }
 0x17a   :  { %vm908_vm6 = vmor %vm906_vm5, %vm907_vm4  ;;  %vm2981_vm4 = vcmask 64512  }
 0x17b   :  { %v902_v56 = vmul.f32 %v6628_v60, %v901_v63  ;;  %v1280_v63 = vld [vmem:[%s7326_s25 + $0x4e0] sm:$0xff]  ;;  %1620 = vmatpush.msrb.mxu2 %v1132_v62 }
 0x17c   :  { %v1480_v62 = vld [vmem:[%s7326_s25 + $0xb20] sm:$0xff] }
 0x17d   :  { %v903_v3 = vmul.f32 0.5, %v902_v56  ;;  %v1128_v56 = vld [vmem:[%s7326_s25 + $0x20] sm:$0xff] }
 0x17e   :  { %1621 = vmatpush.msrb.mxu2 %v1128_v56  ;;  %v1476_v56 = vld [vmem:[%s7326_s25 + $0xb00] sm:$0xff] }
 0x17f   :  { %v904_v4 = vsub.f32 1.5, %v903_v3  ;;  %v1276_v3 = vld [vmem:[%s7326_s25 + $0x4c0] sm:$0xff] }
 0x181   :  { %v905_v5 = vmul.f32 %v6628_v60, %v904_v4  ;;  %v1336_v4 = vld [vmem:[%s7326_s25 + $0x6a0] sm:$0xff] }
 0x183   :  { %v909_v7 = vsel %vm908_vm6, %v6628_v60, %v905_v5  ;;  %v1244_v60 = vld [vmem:[%s7326_s25 + $0x3c0] sm:$0xff] }
 0x184   :  { %v911_v8 = vrot.slane %v909_v7, 1  ;;  %v1236_v5 = vld [vmem:[%s7326_s25 + $0x380] sm:$0xff] }
 0x185   :  { %v1440_v7 = vld [vmem:[%s7326_s25 + $0x9e0] sm:$0xff] }
 0x186   :  { %v913_v11 = vmul.f32 %v911_v8, %v444_v6  ;;  %v1332_v8 = vld [vmem:[%s7326_s25 + $0x680] sm:$0xff] }
 0x188   :  { %v914_v14 = vmul.f32 %v913_v11, %v7286_v28  ;;  %v1304_v28 = vld [vmem:[%s7326_s25 + $0x5a0] sm:$0xff] }
 0x189   :  { %1649 = vmatpush.msrb.mxu0 %v1304_v28  ;;  %v1600_v28 = vld [vmem:[%s7326_s25 + $0xee0] sm:$0xff] }
 0x18a   :  { %v916_v16 = vrot.slane %v914_v14, 7  ;;  %v1328_v14 = vld [vmem:[%s7326_s25 + $0x660] sm:$0xff] }
 0x18b   :  { %1650 = vmatpush.msrb.mxu0 %v1300_v32  ;;  %v1596_v32 = vld [vmem:[%s7326_s25 + $0xec0] sm:$0xff] }
 0x18c   :  { %v918_v18 = vsub.f32 %v444_v6, %v916_v16  ;;  %v1124_v6 = vld [vmem:[%s7326_s25] sm:$0xff] }
 0x18d   :  { %1651 = vmatpush.msrb.mxu0 %v1296_v39  ;;  %1622 = vmatpush.msrb.mxu2 %v1124_v6  ;;  %v1268_v16 = vld [vmem:[%s7326_s25 + $0x480] sm:$0xff] }
 0x18e   :  { %v7335_v20 = vsel %vm719_vm1, %v913_v11, %v918_v18  ;;  %v1232_v11 = vld [vmem:[%s7326_s25 + $0x360] sm:$0xff] }
 0x18f   :  { %6435 = vmatmul.msk.f32.vlgmr.msra.gmra.mxu3 %vm920_vm7, %v7335_v20  ;;  %6438 = vmatmul.msk.f32.vlgmr.msra.gmra.mxu1 %vm920_vm7, %v7335_v20  ;;  %v1324_v18 = vld [vmem:[%s7326_s25 + $0x640] sm:$0xff] }
 0x190   :  { %6439 = vmatmul.msk.f32.vlgmr.msra.gmra.mxu2 %vm920_vm7, %v7335_v20  ;;  %6441 = vmatmul.msk.f32.vlgmr.msra.gmra.mxu0 %vm920_vm7, %v7335_v20  ;;  %v1204_v39 = vld [vmem:[%s7326_s25 + $0x280] sm:$0xff] }
 0x191   :  { %976 = vmatpush.msra.mxu3 %v591_v21  ;;  %1667 = vmatpush.msra.mxu1 %v1376_v23  ;;  %v1428_v21 = vld [vmem:[%s7326_s25 + $0x980] sm:$0xff] }
 0x192   :  { %1652 = vmatpush.msrb.mxu0 %v1292_v44  ;;  %1687 = vmatpush.msra.mxu2 %v1440_v7  ;;  %v1220_v23 = vld [vmem:[%s7326_s25 + $0x300] sm:$0xff] }
 0x193   :  { %977 = vmatpush.msra.mxu3 %v583_v25  ;;  %1668 = vmatpush.msra.mxu1 %v1372_v27  ;;  %v1424_v25 = vld [vmem:[%s7326_s25 + $0x960] sm:$0xff] }
 0x194   :  { %1653 = vmatpush.msrb.mxu0 %v1288_v50  ;;  %1688 = vmatpush.msra.mxu2 %v1436_v13  ;;  %v1216_v27 = vld [vmem:[%s7326_s25 + $0x2e0] sm:$0xff] }
 0x195   :  { %978 = vmatpush.msra.mxu3 %v575_v29  ;;  %1669 = vmatpush.msra.mxu1 %v1368_v31  ;;  %v1420_v29 = vld [vmem:[%s7326_s25 + $0x940] sm:$0xff] }
 0x196   :  { %1654 = vmatpush.msrb.mxu0 %v1284_v58  ;;  %1689 = vmatpush.msra.mxu2 %v1432_v17  ;;  %v1212_v31 = vld [vmem:[%s7326_s25 + $0x2c0] sm:$0xff] }
 0x197   :  { %6436 = vmatmul.msk.f32.vlgmr.msrb.gmra.mxu3 %vm920_vm7, %v7335_v20  ;;  %6442 = vmatmul.msk.f32.vlgmr.msrb.gmra.mxu1 %vm920_vm7, %v7335_v20  ;;  %v1188_v44 = vld [vmem:[%s7326_s25 + $0x200] sm:$0xff] }
 0x198   :  { %979 = vmatpush.msra.mxu3 %v567_v33  ;;  %1670 = vmatpush.msra.mxu1 %v1364_v37  ;;  %v1416_v33 = vld [vmem:[%s7326_s25 + $0x920] sm:$0xff] }
 0x199   :  { %1655 = vmatpush.msrb.mxu0 %v1280_v63  ;;  %1690 = vmatpush.msra.mxu2 %v1428_v21  ;;  %v1592_v37 = vld [vmem:[%s7326_s25 + $0xea0] sm:$0xff] }
 0x19a   :  { %1036 = vmatpush.msrb.mxu3 %v594_v36  ;;  %1671 = vmatpush.msra.mxu1 %v1360_v42  ;;  %v1208_v36 = vld [vmem:[%s7326_s25 + $0x2a0] sm:$0xff] }
 0x19b   :  { %1656 = vmatpush.msrb.mxu0 %v1276_v3  ;;  %1691 = vmatpush.msra.mxu2 %v1424_v25  ;;  %v1196_v42 = vld [vmem:[%s7326_s25 + $0x240] sm:$0xff] }
 0x19c   :  { %1037 = vmatpush.msrb.mxu3 %v586_v41  ;;  %1672 = vmatpush.msra.mxu1 %v1356_v46  ;;  %v1200_v41 = vld [vmem:[%s7326_s25 + $0x260] sm:$0xff] }
 0x19d   :  { %1657 = vmatpush.msrb.mxu0 %v1272_v12  ;;  %1692 = vmatpush.msra.mxu2 %v1420_v29  ;;  %v1500_v46 = vld [vmem:[%s7326_s25 + $0xbc0] sm:$0xff] }
 0x19e   :  { %1038 = vmatpush.msrb.mxu3 %v578_v45  ;;  %1673 = vmatpush.msra.mxu1 %v1352_v51  ;;  %v1504_v45 = vld [vmem:[%s7326_s25 + $0xbe0] sm:$0xff] }
 0x19f   :  { %6437 = vmatmul.msk.f32.vlgmr.msra.gmra.mxu3 %vm920_vm7, %v7335_v20  ;;  %1658 = vmatpush.msrb.mxu0 %v1268_v16  ;;  %v1492_v50 = vld [vmem:[%s7326_s25 + $0xb80] sm:$0xff] }
 0x1a0   :  { %1039 = vmatpush.msrb.mxu3 %v570_v52  ;;  %1674 = vmatpush.msra.mxu1 %v1348_v55  ;;  %v1408_v51 = vld [vmem:[%s7326_s25 + $0x8e0] sm:$0xff] }
 0x1a1   :  { %1693 = vmatpush.msra.mxu2 %v1416_v33  ;;  %v1488_v52 = vld [vmem:[%s7326_s25 + $0xb60] sm:$0xff] }
 0x1a2   :  { %1627 = vmatpush.msra.mxu3 %v1248_v47  ;;  %1675 = vmatpush.msra.mxu1 %v1344_v61  ;;  %v1588_v47 = vld [vmem:[%s7326_s25 + $0xe80] sm:$0xff] }
 0x1a3   :  { %1694 = vmatpush.msra.mxu2 %v1412_v38  ;;  %v1404_v55 = vld [vmem:[%s7326_s25 + $0x8c0] sm:$0xff] }
 0x1a4   :  { %1628 = vmatpush.msra.mxu3 %v1244_v60  ;;  %1676 = vmatpush.msra.mxu1 %v1340_v1  ;;  %v1564_v58 = vld [vmem:[%s7326_s25 + $0xdc0] sm:$0xff] }
 0x1a5   :  { %1695 = vmatpush.msra.mxu2 %v1408_v51  ;;  %v1584_v60 = vld [vmem:[%s7326_s25 + $0xe60] sm:$0xff] }
 0x1a6   :  { %1629 = vmatpush.msra.mxu3 %v1240_v0  ;;  %1677 = vmatpush.msra.mxu1 %v1336_v4  ;;  %v1400_v61 = vld [vmem:[%s7326_s25 + $0x8a0] sm:$0xff] }
 0x1a7   :  { %6440 = vmatmul.msk.f32.vlgmr.msrb.gmra.mxu3 %vm920_vm7, %v7335_v20  ;;  %v1264_v20 = vld [vmem:[%s7326_s25 + $0x460] sm:$0xff]  ;;  %1696 = vmatpush.msra.mxu2 %v1404_v55 }
 0x1a8   :  { %1630 = vmatpush.msra.mxu3 %v1236_v5  ;;  %1678 = vmatpush.msra.mxu1 %v1332_v8  ;;  %v1560_v63 = vld [vmem:[%s7326_s25 + $0xda0] sm:$0xff] }
 0x1a9   :  { %1659 = vmatpush.msrb.mxu0 %v1264_v20  ;;  %v1580_v0 = vld [vmem:[%s7326_s25 + $0xe40] sm:$0xff]  ;;  %1697 = vmatpush.msra.mxu2 %v1400_v61 }
 0x1aa   :  { %1631 = vmatpush.msra.mxu3 %v1232_v11  ;;  %1679 = vmatpush.msra.mxu1 %v1328_v14  ;;  %v1396_v1 = vld [vmem:[%s7326_s25 + $0x880] sm:$0xff] }
 0x1ab   :  { %1660 = vmatpush.msrb.mxu0 %v1260_v24  ;;  %v1556_v3 = vld [vmem:[%s7326_s25 + $0xd80] sm:$0xff]  ;;  %1698 = vmatpush.msra.mxu2 %v1396_v1  ;;  %v1245_v1 = vld [vmem:[%s7326_s25 + $0x3c8] sm:$0xff] }
 0x1ac   :  { %1632 = vmatpush.msra.mxu3 %v1228_v15  ;;  %1680 = vmatpush.msra.mxu1 %v1324_v18  ;;  %v1576_v4 = vld [vmem:[%s7326_s25 + $0xe20] sm:$0xff] }
 0x1ad   :  { %1661 = vmatpush.msrb.mxu0 %v1256_v30  ;;  %v1392_v5 = vld [vmem:[%s7326_s25 + $0x860] sm:$0xff] }
 0x1ae   :  { %1633 = vmatpush.msra.mxu3 %v1224_v19  ;;  %1681 = vmatpush.msra.mxu1 %v1320_v22  ;;  %v1472_v6 = vld [vmem:[%s7326_s25 + $0xae0] sm:$0xff] }
 0x1af   :  { %1662 = vmatpush.msrb.mxu0 %v1252_v35  ;;  %v1552_v7 = vld [vmem:[%s7326_s25 + $0xd60] sm:$0xff]  ;;  %1699 = vmatpush.msra.mxu2 %v1392_v5  ;;  %v1241_v5 = vld [vmem:[%s7326_s25 + $0x3a8] sm:$0xff] }
 0x1b0   :  { %1634 = vmatpush.msra.mxu3 %v1220_v23  ;;  %1682 = vmatpush.msra.mxu1 %v1316_v26  ;;  %v1572_v8 = vld [vmem:[%s7326_s25 + $0xe00] sm:$0xff] }
 0x1b1   :  { %1727 = vmatpush.msra.mxu0 %v1568_v54  ;;  %v1388_v11 = vld [vmem:[%s7326_s25 + $0x840] sm:$0xff] }
 0x1b2   :  { %1635 = vmatpush.msra.mxu3 %v1216_v27  ;;  %1755 = vmatpush.msrb.mxu1 %v1600_v28  ;;  %v1468_v12 = vld [vmem:[%s7326_s25 + $0xac0] sm:$0xff] }
 0x1b3   :  { %1728 = vmatpush.msra.mxu0 %v1564_v58  ;;  %v1548_v13 = vld [vmem:[%s7326_s25 + $0xd40] sm:$0xff]  ;;  %1700 = vmatpush.msra.mxu2 %v1388_v11  ;;  %v1173_v58 = vld [vmem:[%s7326_s25 + $0x188] sm:$0xff] }
 0x1b4   :  { %1636 = vmatpush.msra.mxu3 %v1212_v31  ;;  %1756 = vmatpush.msrb.mxu1 %v1596_v32  ;;  %v1384_v14 = vld [vmem:[%s7326_s25 + $0x820] sm:$0xff] }
 0x1b5   :  { %1729 = vmatpush.msra.mxu0 %v1560_v63  ;;  %v1464_v15 = vld [vmem:[%s7326_s25 + $0xaa0] sm:$0xff]  ;;  %1701 = vmatpush.msra.mxu2 %v1384_v14 }
 0x1b6   :  { %1637 = vmatpush.msra.mxu3 %v1208_v36  ;;  %1757 = vmatpush.msrb.mxu1 %v1592_v37  ;;  %v1544_v16 = vld [vmem:[%s7326_s25 + $0xd20] sm:$0xff] }
 0x1b7   :  { %1730 = vmatpush.msra.mxu0 %v1556_v3  ;;  %v1380_v17 = vld [vmem:[%s7326_s25 + $0x800] sm:$0xff] }
 0x1b8   :  { %1638 = vmatpush.msra.mxu3 %v1204_v39  ;;  %1758 = vmatpush.msrb.mxu1 %v1588_v47  ;;  %v1460_v18 = vld [vmem:[%s7326_s25 + $0xa80] sm:$0xff]  ;;  %v1177_v47 = vld [vmem:[%s7326_s25 + $0x1a8] sm:$0xff] }
 0x1b9   :  { %1731 = vmatpush.msra.mxu0 %v1552_v7  ;;  %v1540_v19 = vld [vmem:[%s7326_s25 + $0xd00] sm:$0xff]  ;;  %1702 = vmatpush.msra.mxu2 %v1380_v17  ;;  %v1161_v7 = vld [vmem:[%s7326_s25 + $0x128] sm:$0xff] }
 0x1ba   :  { %1639 = vmatpush.msra.mxu3 %v1200_v41  ;;  %1759 = vmatpush.msrb.mxu1 %v1584_v60  ;;  %v1456_v20 = vld [vmem:[%s7326_s25 + $0xa60] sm:$0xff]  ;;  %v1249_v60 = vld [vmem:[%s7326_s25 + $0x3e8] sm:$0xff] }
 0x1bb   :  { %1732 = vmatpush.msra.mxu0 %v1548_v13  ;;  %v1536_v21 = vld [vmem:[%s7326_s25 + $0xce0] sm:$0xff]  ;;  %v1233_v13 = vld [vmem:[%s7326_s25 + $0x368] sm:$0xff] }
 0x1bc   :  { %1640 = vmatpush.msra.mxu3 %v1196_v42  ;;  %1760 = vmatpush.msrb.mxu1 %v1580_v0  ;;  %v1452_v22 = vld [vmem:[%s7326_s25 + $0xa40] sm:$0xff]  ;;  %v1169_v0 = vld [vmem:[%s7326_s25 + $0x168] sm:$0xff] }
 0x1bd   :  { %1733 = vmatpush.msra.mxu0 %v1544_v16  ;;  %v1532_v23 = vld [vmem:[%s7326_s25 + $0xcc0] sm:$0xff] }
 0x1be   :  { %1641 = vmatpush.msra.mxu3 %v1192_v43  ;;  %1761 = vmatpush.msrb.mxu1 %v1576_v4  ;;  %v1448_v24 = vld [vmem:[%s7326_s25 + $0xa20] sm:$0xff]  ;;  %v1185_v43 = vld [vmem:[%s7326_s25 + $0x1e8] sm:$0xff] }
 0x1bf   :  { %1734 = vmatpush.msra.mxu0 %v1540_v19  ;;  %v1528_v25 = vld [vmem:[%s7326_s25 + $0xca0] sm:$0xff]  ;;  %v1165_v4 = vld [vmem:[%s7326_s25 + $0x148] sm:$0xff] }
 0x1c0   :  { %1642 = vmatpush.msra.mxu3 %v1188_v44  ;;  %1762 = vmatpush.msrb.mxu1 %v1572_v8  ;;  %v1444_v26 = vld [vmem:[%s7326_s25 + $0xa00] sm:$0xff]  ;;  %v1237_v8 = vld [vmem:[%s7326_s25 + $0x388] sm:$0xff] }
 0x1c1   :  { %1735 = vmatpush.msra.mxu0 %v1536_v21  ;;  %v1524_v27 = vld [vmem:[%s7326_s25 + $0xc80] sm:$0xff]  ;;  %v1229_v19 = vld [vmem:[%s7326_s25 + $0x348] sm:$0xff] }
 0x1c2   :  { %1707 = vmatpush.msrb.mxu3 %v1504_v45  ;;  %v1520_v28 = vld [vmem:[%s7326_s25 + $0xc60] sm:$0xff] }
 0x1c3   :  { %1736 = vmatpush.msra.mxu0 %v1532_v23  ;;  %v1516_v29 = vld [vmem:[%s7326_s25 + $0xc40] sm:$0xff]  ;;  %v1149_v23 = vld [vmem:[%s7326_s25 + $0xc8] sm:$0xff] }
 0x1c4   :  { %1708 = vmatpush.msrb.mxu3 %v1500_v46  ;;  %v1512_v32 = vld [vmem:[%s7326_s25 + $0xc20] sm:$0xff] }
 0x1c5   :  { %1737 = vmatpush.msra.mxu0 %v1528_v25  ;;  %v1508_v36 = vld [vmem:[%s7326_s25 + $0xc00] sm:$0xff] }
 0x1c6   :  { %1709 = vmatpush.msrb.mxu3 %v1496_v49 }
 0x1c7   :  { %1738 = vmatpush.msra.mxu0 %v1524_v27 }
 0x1c8   :  { %1710 = vmatpush.msrb.mxu3 %v1492_v50  ;;  %v1181_v50 = vld [vmem:[%s7326_s25 + $0x1c8] sm:$0xff] }
 0x1c9   :  { %1739 = vmatpush.msra.mxu0 %v1520_v28  ;;  %v1145_v28 = vld [vmem:[%s7326_s25 + $0xa8] sm:$0xff] }
 0x1ca   :  { %1711 = vmatpush.msrb.mxu3 %v1488_v52 }
 0x1cb   :  { %1740 = vmatpush.msra.mxu0 %v1516_v29  ;;  %v1221_v29 = vld [vmem:[%s7326_s25 + $0x308] sm:$0xff] }
 0x1cc   :  { %1712 = vmatpush.msrb.mxu3 %v1484_v57 }
 0x1cd   :  { %1741 = vmatpush.msra.mxu0 %v1512_v32  ;;  %v1217_v32 = vld [vmem:[%s7326_s25 + $0x2e8] sm:$0xff] }
 0x1ce   :  { %1713 = vmatpush.msrb.mxu3 %v1480_v62 }
 0x1cf   :  { %1742 = vmatpush.msra.mxu0 %v1508_v36  ;;  %v1297_v36 = vld [vmem:[%s7326_s25 + $0x568] sm:$0xff] }
 0x1d0   :  { %1714 = vmatpush.msrb.mxu3 %v1476_v56 }
 0x1d2   :  { %1715 = vmatpush.msrb.mxu3 %v1472_v6 }
 0x1d4   :  { %1716 = vmatpush.msrb.mxu3 %v1468_v12  ;;  %v1157_v12 = vld [vmem:[%s7326_s25 + $0x108] sm:$0xff] }
 0x1d6   :  { %1717 = vmatpush.msrb.mxu3 %v1464_v15  ;;  %v1313_v15 = vld [vmem:[%s7326_s25 + $0x5e8] sm:$0xff] }
 0x1d8   :  { %1718 = vmatpush.msrb.mxu3 %v1460_v18  ;;  %v1153_v18 = vld [vmem:[%s7326_s25 + $0xe8] sm:$0xff] }
 0x1da   :  { %1719 = vmatpush.msrb.mxu3 %v1456_v20  ;;  %v1309_v20 = vld [vmem:[%s7326_s25 + $0x5c8] sm:$0xff] }
 0x1dc   :  { %1720 = vmatpush.msrb.mxu3 %v1452_v22 }
 0x1de   :  { %1721 = vmatpush.msrb.mxu3 %v1448_v24  ;;  %v1225_v24 = vld [vmem:[%s7326_s25 + $0x328] sm:$0xff] }
 0x1e0   :  { %1722 = vmatpush.msrb.mxu3 %v1444_v26  ;;  %v1305_v26 = vld [vmem:[%s7326_s25 + $0x5a8] sm:$0xff] }
 0x20c   :  { %v1001_v30 = vpop.f32.mrf.mxu1 }
 0x20d   :  { %v1087_v31 = vperm.slane %v1001_v30, 0  ;;  %v1103_v35 = vperm.slane %v1001_v30, 1  ;;  %v1061_v16 = vpop.f32.mrf.mxu0 }
 0x20e   :  { %v1090_v25 = vperm.slane %v1061_v16, 0 }
 0x20f   :  { %v1095_v33 = vmul.f32 %v1087_v31, %v7214_v48  ;;  %v1141_v31 = vld [vmem:[%s7326_s25 + $0x88] sm:$0xff] }
 0x211   :  { %v1111_v37 = vadd.f32 %v1103_v35, %v1095_v33  ;;  %v1098_v33 = vmul.f32 %v1090_v25, %v7264_v9  ;;  %v1373_v9 = vld [vmem:[%s7326_s25 + $0x7c8] sm:$0xff] }
 0x212   :  { %v941_v38 = vpop.f32.mrf.mxu3  ;;  %v1257_v25 = vld [vmem:[%s7326_s25 + $0x428] sm:$0xff] }
 0x213   :  { %v7477_v39 = vmax.f32 %v1111_v37, 0.0  ;;  %v1084_v41 = vperm.slane %v941_v38, 0  ;;  %v1021_v42 = vpop.f32.mrf.mxu2  ;;  %v1100_v46 = vperm.slane %v941_v38, 1  ;;  %v1377_v37 = vld [vmem:[%s7326_s25 + $0x7e8] sm:$0xff] }
 0x214   :  { %v1081_v44 = vpop.f32.mrf.mxu1  ;;  %v1088_v48 = vperm.slane %v1021_v42, 0  ;;  %v1104_v62 = vperm.slane %v1021_v42, 1  ;;  %v1213_v42 = vld [vmem:[%s7326_s25 + $0x2c8] sm:$0xff] }
 0x215   :  { %v1092_v45 = vmul.f32 %v1084_v41, %v7225_v59  ;;  %v1091_v49 = vperm.slane %v1081_v44, 0  ;;  %1683 = vmatmul.f32.vlgmr.msra.gmra.mxu1 %v7477_v39  ;;  %v1107_v54 = vperm.slane %v1081_v44, 1  ;;  %v1137_v41 = vld [vmem:[%s7326_s25 + $0x68] sm:$0xff] }
 0x216   :  { %1767 = vmatpush.msra.mxu1 %v1185_v43  ;;  %v1096_v59 = vmul.f32 %v1088_v48, %v7249_v40  ;;  %v1106_v43 = vperm.slane %v1061_v16, 1  ;;  %v1293_v44 = vld [vmem:[%s7326_s25 + $0x548] sm:$0xff] }
 0x217   :  { %v1108_v51 = vadd.f32 %v1100_v46, %v1092_v45  ;;  %v1099_v52 = vmul.f32 %v1091_v49, %v7266_v10  ;;  %v1133_v48 = vld [vmem:[%s7326_s25 + $0x48] sm:$0xff] }
 0x218   :  { %1768 = vmatpush.msra.mxu1 %v1181_v50  ;;  %v1112_v40 = vadd.f32 %v1104_v62, %v1096_v59  ;;  %v1209_v49 = vld [vmem:[%s7326_s25 + $0x2a8] sm:$0xff]  ;;  %v1114_v50 = vadd.f32 %v1106_v43, %v1098_v33 }
 0x219   :  { %v7485_v55 = vmax.f32 %v1108_v51, 0.0  ;;  %v1115_v57 = vadd.f32 %v1107_v54, %v1099_v52  ;;  %v1289_v51 = vld [vmem:[%s7326_s25 + $0x528] sm:$0xff] }
 0x21a   :  { %1769 = vmatpush.msra.mxu1 %v1177_v47  ;;  %v961_v61 = vpop.f32.mrf.mxu3  ;;  %v7502_v11 = vmax.f32 %v1112_v40, 0.0  ;;  %v1369_v52 = vld [vmem:[%s7326_s25 + $0x7a8] sm:$0xff] }
 0x21b   :  { %v7490_v63 = vmax.f32 %v1115_v57, 0.0  ;;  %v1085_v10 = vperm.slane %v961_v61, 0  ;;  %1623 = vmatmul.f32.vlgmr.msrb.gmra.mxu2 %v7485_v55  ;;  %v1101_v3 = vperm.slane %v961_v61, 1  ;;  %v1129_v47 = vld [vmem:[%s7326_s25 + $0x28] sm:$0xff] }
 0x21c   :  { %1770 = vmatpush.msra.mxu1 %v1173_v58  ;;  %1787 = vmatpush.msrb.mxu2 %v1249_v60  ;;  %v1285_v59 = vld [vmem:[%s7326_s25 + $0x508] sm:$0xff]  ;;  %v7544_v60 = vmax.f32 %v1114_v50, 0.0 }
 0x21d   :  { %v1093_v56 = vmul.f32 %v1085_v10, %v7232_v2  ;;  %6443 = vmatmul.msk.f32.vlgmr.msrb.gmra.mxu1 %vm728_vm3, %v7490_v63  ;;  %v1365_v57 = vld [vmem:[%s7326_s25 + $0x788] sm:$0xff] }
 0x21e   :  { %1771 = vmatpush.msra.mxu1 %v1169_v0  ;;  %1788 = vmatpush.msrb.mxu2 %v1245_v1  ;;  %v1125_v61 = vld [vmem:[%s7326_s25 + $0x8] sm:$0xff] }
 0x21f   :  { %v1109_v6 = vadd.f32 %v1101_v3, %v1093_v56  ;;  %v1201_v62 = vld [vmem:[%s7326_s25 + $0x268] sm:$0xff] }
 0x220   :  { %1772 = vmatpush.msra.mxu1 %v1165_v4  ;;  %1789 = vmatpush.msrb.mxu2 %v1241_v5  ;;  %v1281_v10 = vld [vmem:[%s7326_s25 + $0x4e8] sm:$0xff] }
 0x221   :  { %v7504_v2 = vmax.f32 %v1109_v6, 0.0  ;;  %v1361_v0 = vld [vmem:[%s7326_s25 + $0x768] sm:$0xff] }
 0x222   :  { %1773 = vmatpush.msra.mxu1 %v1161_v7  ;;  %1790 = vmatpush.msrb.mxu2 %v1237_v8  ;;  %v981_v14 = vpop.f32.mrf.mxu3  ;;  %v1197_v1 = vld [vmem:[%s7326_s25 + $0x248] sm:$0xff] }
 0x223   :  { %v1086_v17 = vperm.slane %v981_v14, 0  ;;  %1643 = vmatmul.f32.vlgmr.msra.gmra.mxu3 %v7504_v2  ;;  %1703 = vmatmul.f32.vlgmr.msra.gmra.mxu2 %v7502_v11  ;;  %v1102_v22 = vperm.slane %v981_v14, 1  ;;  %v1441_v40 = vld [vmem:[%s7326_s25 + $0x9e8] sm:$0xff] }
 0x224   :  { %1774 = vmatpush.msra.mxu1 %v1157_v12  ;;  %1791 = vmatpush.msrb.mxu2 %v1233_v13  ;;  %v1277_v56 = vld [vmem:[%s7326_s25 + $0x4c8] sm:$0xff] }
 0x225   :  { %v1094_v21 = vmul.f32 %v1086_v17, %v7198_v34  ;;  %1807 = vmatpush.msra.mxu3 %v1313_v15  ;;  %v1301_v34 = vld [vmem:[%s7326_s25 + $0x588] sm:$0xff] }
 0x226   :  { %1775 = vmatpush.msra.mxu1 %v1153_v18  ;;  %1792 = vmatpush.msrb.mxu2 %v1229_v19  ;;  %v1357_v3 = vld [vmem:[%s7326_s25 + $0x748] sm:$0xff] }
 0x227   :  { %v1110_v27 = vadd.f32 %v1102_v22, %v1094_v21  ;;  %1808 = vmatpush.msra.mxu3 %v1309_v20  ;;  %v1193_v4 = vld [vmem:[%s7326_s25 + $0x228] sm:$0xff] }
 0x228   :  { %1776 = vmatpush.msra.mxu1 %v1149_v23  ;;  %1793 = vmatpush.msrb.mxu2 %v1225_v24  ;;  %v1437_v5 = vld [vmem:[%s7326_s25 + $0x9c8] sm:$0xff] }
 0x229   :  { %v7521_v30 = vmax.f32 %v1110_v27, 0.0  ;;  %1809 = vmatpush.msra.mxu3 %v1305_v26  ;;  %v1273_v6 = vld [vmem:[%s7326_s25 + $0x4a8] sm:$0xff] }
 0x22a   :  { %1777 = vmatpush.msra.mxu1 %v1145_v28  ;;  %1794 = vmatpush.msrb.mxu2 %v1221_v29  ;;  %v1041_v35 = vpop.f32.mrf.mxu3  ;;  %v1353_v7 = vld [vmem:[%s7326_s25 + $0x728] sm:$0xff] }
 0x22b   :  { %1810 = vmatpush.msra.mxu3 %v1301_v34  ;;  %v1089_v38 = vperm.slane %v1041_v35, 0  ;;  %1663 = vmatmul.f32.vlgmr.msrb.gmra.mxu0 %v7521_v30  ;;  %v1105_v46 = vperm.slane %v1041_v35, 1  ;;  %v1189_v8 = vld [vmem:[%s7326_s25 + $0x208] sm:$0xff] }
 0x22c   :  { %1778 = vmatpush.msra.mxu1 %v1141_v31  ;;  %1795 = vmatpush.msrb.mxu2 %v1217_v32  ;;  %v1433_v12 = vld [vmem:[%s7326_s25 + $0x9a8] sm:$0xff] }
 0x22d   :  { %v1097_v45 = vmul.f32 %v1089_v38, %v7256_v53  ;;  %1811 = vmatpush.msra.mxu3 %v1297_v36  ;;  %1827 = vmatpush.msrb.mxu0 %v1377_v37  ;;  %v1205_v53 = vld [vmem:[%s7326_s25 + $0x288] sm:$0xff] }
 0x22e   :  { %1779 = vmatpush.msra.mxu1 %v1137_v41  ;;  %1796 = vmatpush.msrb.mxu2 %v1213_v42  ;;  %v1269_v13 = vld [vmem:[%s7326_s25 + $0x488] sm:$0xff] }
 0x22f   :  { %v1113_v54 = vadd.f32 %v1105_v46, %v1097_v45  ;;  %1812 = vmatpush.msra.mxu3 %v1293_v44  ;;  %1828 = vmatpush.msrb.mxu0 %v1373_v9  ;;  %v1349_v14 = vld [vmem:[%s7326_s25 + $0x708] sm:$0xff] }
 0x230   :  { %1780 = vmatpush.msra.mxu1 %v1133_v48  ;;  %1797 = vmatpush.msrb.mxu2 %v1209_v49  ;;  %v1429_v15 = vld [vmem:[%s7326_s25 + $0x988] sm:$0xff] }
 0x231   :  { %v7542_v58 = vmax.f32 %v1113_v54, 0.0  ;;  %1813 = vmatpush.msra.mxu3 %v1289_v51  ;;  %1829 = vmatpush.msrb.mxu0 %v1369_v52  ;;  %v1505_v16 = vld [vmem:[%s7326_s25 + $0xbe8] sm:$0xff] }
 0x232   :  { %1781 = vmatpush.msra.mxu1 %v1129_v47  ;;  %1798 = vmatpush.msrb.mxu2 %v1205_v53  ;;  %v1265_v17 = vld [vmem:[%s7326_s25 + $0x468] sm:$0xff] }
 0x233   :  { %1814 = vmatpush.msra.mxu3 %v1285_v59  ;;  %1830 = vmatpush.msrb.mxu0 %v1365_v57  ;;  %v1345_v18 = vld [vmem:[%s7326_s25 + $0x6e8] sm:$0xff] }
 0x234   :  { %1723 = vmatmul.f32.vlgmr.msrb.gmra.mxu3 %v7542_v58  ;;  %1743 = vmatmul.f32.vlgmr.msra.gmra.mxu0 %v7544_v60  ;;  %v1425_v19 = vld [vmem:[%s7326_s25 + $0x968] sm:$0xff] }
 0x235   :  { %1782 = vmatpush.msra.mxu1 %v1125_v61  ;;  %1799 = vmatpush.msrb.mxu2 %v1201_v62  ;;  %v1501_v20 = vld [vmem:[%s7326_s25 + $0xbc8] sm:$0xff] }
 0x236   :  { %1815 = vmatpush.msra.mxu3 %v1281_v10  ;;  %1831 = vmatpush.msrb.mxu0 %v1361_v0  ;;  %v1261_v21 = vld [vmem:[%s7326_s25 + $0x448] sm:$0xff] }
 0x237   :  { %1783 = vmatmul.f32.vlgmr.msra.gmra.mxu1 %v7485_v55  ;;  %1800 = vmatpush.msrb.mxu2 %v1197_v1  ;;  %v1341_v22 = vld [vmem:[%s7326_s25 + $0x6c8] sm:$0xff] }
 0x238   :  { %1847 = vmatpush.msrb.mxu1 %v1441_v40  ;;  %1816 = vmatpush.msra.mxu3 %v1277_v56  ;;  %v1421_v23 = vld [vmem:[%s7326_s25 + $0x948] sm:$0xff] }
 0x239   :  { %1832 = vmatpush.msrb.mxu0 %v1357_v3  ;;  %1801 = vmatpush.msrb.mxu2 %v1193_v4  ;;  %v1497_v24 = vld [vmem:[%s7326_s25 + $0xba8] sm:$0xff] }
 0x23a   :  { %1848 = vmatpush.msrb.mxu1 %v1437_v5  ;;  %1817 = vmatpush.msra.mxu3 %v1273_v6  ;;  %v1337_v26 = vld [vmem:[%s7326_s25 + $0x6a8] sm:$0xff] }
 0x23b   :  { %1833 = vmatpush.msrb.mxu0 %v1353_v7  ;;  %1802 = vmatpush.msrb.mxu2 %v1189_v8  ;;  %v1417_v27 = vld [vmem:[%s7326_s25 + $0x928] sm:$0xff] }
 0x23c   :  { %1849 = vmatpush.msrb.mxu1 %v1433_v12  ;;  %1818 = vmatpush.msra.mxu3 %v1269_v13  ;;  %v1493_v28 = vld [vmem:[%s7326_s25 + $0xb88] sm:$0xff]  ;;  %v1250_v12 = vld [vmem:[%s7326_s25 + $0x3f0] sm:$0xff] }
 0x23d   :  { %1834 = vmatpush.msrb.mxu0 %v1349_v14  ;;  %1803 = vmatmul.f32.vlgmr.msrb.gmra.mxu2 %v7504_v2  ;;  %v1253_v29 = vld [vmem:[%s7326_s25 + $0x408] sm:$0xff] }
 0x23e   :  { %1850 = vmatpush.msrb.mxu1 %v1429_v15  ;;  %1867 = vmatpush.msra.mxu2 %v1505_v16  ;;  %v1333_v34 = vld [vmem:[%s7326_s25 + $0x688] sm:$0xff]  ;;  %v1246_v16 = vld [vmem:[%s7326_s25 + $0x3d0] sm:$0xff] }
 0x23f   :  { %1819 = vmatpush.msra.mxu3 %v1265_v17  ;;  %1835 = vmatpush.msrb.mxu0 %v1345_v18  ;;  %v1413_v31 = vld [vmem:[%s7326_s25 + $0x908] sm:$0xff] }
 0x240   :  { %1851 = vmatpush.msrb.mxu1 %v1425_v19  ;;  %1868 = vmatpush.msra.mxu2 %v1501_v20  ;;  %v1489_v32 = vld [vmem:[%s7326_s25 + $0xb68] sm:$0xff]  ;;  %v1242_v20 = vld [vmem:[%s7326_s25 + $0x3b0] sm:$0xff] }
 0x241   :  { %1820 = vmatpush.msra.mxu3 %v1261_v21  ;;  %1836 = vmatpush.msrb.mxu0 %v1341_v22  ;;  %v1569_v33 = vld [vmem:[%s7326_s25 + $0xde8] sm:$0xff] }
 0x242   :  { %1852 = vmatpush.msrb.mxu1 %v1421_v23  ;;  %1869 = vmatpush.msra.mxu2 %v1497_v24  ;;  %v1329_v35 = vld [vmem:[%s7326_s25 + $0x668] sm:$0xff]  ;;  %v1238_v23 = vld [vmem:[%s7326_s25 + $0x390] sm:$0xff] }
 0x243   :  { %1821 = vmatpush.msra.mxu3 %v1257_v25  ;;  %1837 = vmatpush.msrb.mxu0 %v1337_v26  ;;  %v1409_v36 = vld [vmem:[%s7326_s25 + $0x8e8] sm:$0xff]  ;;  %v1186_v24 = vld [vmem:[%s7326_s25 + $0x1f0] sm:$0xff] }
 0x244   :  { %1853 = vmatpush.msrb.mxu1 %v1417_v27  ;;  %1870 = vmatpush.msra.mxu2 %v1493_v28  ;;  %v1485_v37 = vld [vmem:[%s7326_s25 + $0xb48] sm:$0xff]  ;;  %v1314_v25 = vld [vmem:[%s7326_s25 + $0x5f0] sm:$0xff] }
 0x245   :  { %1822 = vmatpush.msra.mxu3 %v1253_v29  ;;  %1838 = vmatpush.msrb.mxu0 %v1333_v34  ;;  %v1565_v38 = vld [vmem:[%s7326_s25 + $0xdc8] sm:$0xff]  ;;  %v1234_v27 = vld [vmem:[%s7326_s25 + $0x370] sm:$0xff] }
 0x246   :  { %1823 = vmatmul.f32.vlgmr.msra.gmra.mxu3 %v7521_v30  ;;  %1854 = vmatpush.msrb.mxu1 %v1413_v31  ;;  %v1325_v41 = vld [vmem:[%s7326_s25 + $0x648] sm:$0xff]  ;;  %v1182_v28 = vld [vmem:[%s7326_s25 + $0x1d0] sm:$0xff] }
 0x247   :  { %1871 = vmatpush.msra.mxu2 %v1489_v32  ;;  %1887 = vmatpush.msrb.mxu3 %v1569_v33  ;;  %v1405_v42 = vld [vmem:[%s7326_s25 + $0x8c8] sm:$0xff]  ;;  %v1310_v29 = vld [vmem:[%s7326_s25 + $0x5d0] sm:$0xff] }
 0x248   :  { %1839 = vmatpush.msrb.mxu0 %v1329_v35  ;;  %1855 = vmatpush.msrb.mxu1 %v1409_v36  ;;  %v1481_v43 = vld [vmem:[%s7326_s25 + $0xb28] sm:$0xff]  ;;  %v1230_v31 = vld [vmem:[%s7326_s25 + $0x350] sm:$0xff] }
 0x249   :  { %v1561_v44 = vld [vmem:[%s7326_s25 + $0xda8] sm:$0xff]  ;;  %1872 = vmatpush.msra.mxu2 %v1485_v37  ;;  %1888 = vmatpush.msrb.mxu3 %v1565_v38  ;;  %v1178_v32 = vld [vmem:[%s7326_s25 + $0x1b0] sm:$0xff] }
 0x24a   :  { %v1321_v9 = vld [vmem:[%s7326_s25 + $0x628] sm:$0xff]  ;;  %1840 = vmatpush.msrb.mxu0 %v1325_v41  ;;  %1856 = vmatpush.msrb.mxu1 %v1405_v42  ;;  %v1306_v33 = vld [vmem:[%s7326_s25 + $0x5b0] sm:$0xff] }
 0x24b   :  { %v1401_v45 = vld [vmem:[%s7326_s25 + $0x8a8] sm:$0xff]  ;;  %1873 = vmatpush.msra.mxu2 %v1481_v43  ;;  %1889 = vmatpush.msrb.mxu3 %v1561_v44  ;;  %v1226_v36 = vld [vmem:[%s7326_s25 + $0x330] sm:$0xff] }
 0x24c   :  { %v1477_v46 = vld [vmem:[%s7326_s25 + $0xb08] sm:$0xff]  ;;  %1841 = vmatpush.msrb.mxu0 %v1321_v9  ;;  %1857 = vmatpush.msrb.mxu1 %v1401_v45  ;;  %v1174_v37 = vld [vmem:[%s7326_s25 + $0x190] sm:$0xff] }
 0x24d   :  { %v1557_v48 = vld [vmem:[%s7326_s25 + $0xd88] sm:$0xff]  ;;  %1874 = vmatpush.msra.mxu2 %v1477_v46  ;;  %v1302_v38 = vld [vmem:[%s7326_s25 + $0x590] sm:$0xff] }
 0x24e   :  { %v1317_v49 = vld [vmem:[%s7326_s25 + $0x608] sm:$0xff]  ;;  %1890 = vmatpush.msrb.mxu3 %v1557_v48  ;;  %v1222_v42 = vld [vmem:[%s7326_s25 + $0x310] sm:$0xff] }
 0x24f   :  { %v1397_v50 = vld [vmem:[%s7326_s25 + $0x888] sm:$0xff]  ;;  %1842 = vmatpush.msrb.mxu0 %v1317_v49  ;;  %v1170_v43 = vld [vmem:[%s7326_s25 + $0x170] sm:$0xff] }
 0x250   :  { %v1473_v51 = vld [vmem:[%s7326_s25 + $0xae8] sm:$0xff]  ;;  %1858 = vmatpush.msrb.mxu1 %v1397_v50  ;;  %1843 = vmatmul.f32.vlgmr.msrb.gmra.mxu0 %v7477_v39  ;;  %v1298_v44 = vld [vmem:[%s7326_s25 + $0x570] sm:$0xff] }
 0x251   :  { %v1553_v52 = vld [vmem:[%s7326_s25 + $0xd68] sm:$0xff]  ;;  %1875 = vmatpush.msra.mxu2 %v1473_v51  ;;  %v1378_v9 = vld [vmem:[%s7326_s25 + $0x7f0] sm:$0xff] }
 0x252   :  { %v1601_v54 = vld [vmem:[%s7326_s25 + $0xee8] sm:$0xff]  ;;  %1891 = vmatpush.msrb.mxu3 %v1553_v52  ;;  %v1166_v45 = vld [vmem:[%s7326_s25 + $0x150] sm:$0xff] }
 0x253   :  { %v1393_v47 = vld [vmem:[%s7326_s25 + $0x868] sm:$0xff]  ;;  %1915 = vmatpush.msra.mxu0 %v1601_v54  ;;  %v1218_v46 = vld [vmem:[%s7326_s25 + $0x2f0] sm:$0xff] }
 0x254   :  { %v1469_v53 = vld [vmem:[%s7326_s25 + $0xac8] sm:$0xff]  ;;  %1859 = vmatpush.msrb.mxu1 %v1393_v47  ;;  %v1294_v48 = vld [vmem:[%s7326_s25 + $0x550] sm:$0xff] }
 0x255   :  { %v1549_v59 = vld [vmem:[%s7326_s25 + $0xd48] sm:$0xff]  ;;  %1876 = vmatpush.msra.mxu2 %v1469_v53  ;;  %v1374_v49 = vld [vmem:[%s7326_s25 + $0x7d0] sm:$0xff] }
 0x256   :  { %v1597_v57 = vld [vmem:[%s7326_s25 + $0xec8] sm:$0xff]  ;;  %1892 = vmatpush.msrb.mxu3 %v1549_v59  ;;  %v1162_v50 = vld [vmem:[%s7326_s25 + $0x130] sm:$0xff] }
 0x257   :  { %v1389_v61 = vld [vmem:[%s7326_s25 + $0x848] sm:$0xff]  ;;  %1916 = vmatpush.msra.mxu0 %v1597_v57  ;;  %v1214_v51 = vld [vmem:[%s7326_s25 + $0x2d0] sm:$0xff] }
 0x258   :  { %v1465_v62 = vld [vmem:[%s7326_s25 + $0xaa8] sm:$0xff]  ;;  %1860 = vmatpush.msrb.mxu1 %v1389_v61  ;;  %v1290_v52 = vld [vmem:[%s7326_s25 + $0x530] sm:$0xff] }
 0x259   :  { %v1545_v10 = vld [vmem:[%s7326_s25 + $0xd28] sm:$0xff]  ;;  %1877 = vmatpush.msra.mxu2 %v1465_v62  ;;  %v1370_v54 = vld [vmem:[%s7326_s25 + $0x7b0] sm:$0xff] }
 0x25a   :  { %v1593_v0 = vld [vmem:[%s7326_s25 + $0xea8] sm:$0xff]  ;;  %1893 = vmatpush.msrb.mxu3 %v1545_v10  ;;  %v1158_v47 = vld [vmem:[%s7326_s25 + $0x110] sm:$0xff] }
 0x25b   :  { %v1385_v1 = vld [vmem:[%s7326_s25 + $0x828] sm:$0xff]  ;;  %1917 = vmatpush.msra.mxu0 %v1593_v0  ;;  %v1210_v53 = vld [vmem:[%s7326_s25 + $0x2b0] sm:$0xff] }
 0x25c   :  { %v1461_v40 = vld [vmem:[%s7326_s25 + $0xa88] sm:$0xff]  ;;  %1861 = vmatpush.msrb.mxu1 %v1385_v1  ;;  %v1286_v59 = vld [vmem:[%s7326_s25 + $0x510] sm:$0xff] }
 0x25d   :  { %v1541_v56 = vld [vmem:[%s7326_s25 + $0xd08] sm:$0xff]  ;;  %1878 = vmatpush.msra.mxu2 %v1461_v40  ;;  %v1366_v57 = vld [vmem:[%s7326_s25 + $0x790] sm:$0xff] }
 0x25e   :  { %v1589_v3 = vld [vmem:[%s7326_s25 + $0xe88] sm:$0xff]  ;;  %1894 = vmatpush.msrb.mxu3 %v1541_v56  ;;  %v1154_v61 = vld [vmem:[%s7326_s25 + $0xf0] sm:$0xff] }
 0x25f   :  { %v1381_v4 = vld [vmem:[%s7326_s25 + $0x808] sm:$0xff]  ;;  %1918 = vmatpush.msra.mxu0 %v1589_v3  ;;  %v1206_v62 = vld [vmem:[%s7326_s25 + $0x290] sm:$0xff] }
 0x260   :  { %v1457_v5 = vld [vmem:[%s7326_s25 + $0xa68] sm:$0xff]  ;;  %1862 = vmatpush.msrb.mxu1 %v1381_v4  ;;  %v1282_v10 = vld [vmem:[%s7326_s25 + $0x4f0] sm:$0xff] }
 0x261   :  { %v1537_v6 = vld [vmem:[%s7326_s25 + $0xce8] sm:$0xff]  ;;  %1879 = vmatpush.msra.mxu2 %v1457_v5  ;;  %1863 = vmatmul.f32.vlgmr.msrb.gmra.mxu1 %v7502_v11  ;;  %v1362_v0 = vld [vmem:[%s7326_s25 + $0x770] sm:$0xff] }
 0x262   :  { %v1585_v7 = vld [vmem:[%s7326_s25 + $0xe68] sm:$0xff]  ;;  %1895 = vmatpush.msrb.mxu3 %v1537_v6  ;;  %1947 = vmatpush.msra.mxu1 %v1250_v12  ;;  %v1150_v1 = vld [vmem:[%s7326_s25 + $0xd0] sm:$0xff] }
 0x263   :  { %v1453_v8 = vld [vmem:[%s7326_s25 + $0xa48] sm:$0xff]  ;;  %1919 = vmatpush.msra.mxu0 %v1585_v7  ;;  %v1202_v40 = vld [vmem:[%s7326_s25 + $0x270] sm:$0xff] }
 0x264   :  { %v1533_v13 = vld [vmem:[%s7326_s25 + $0xcc8] sm:$0xff]  ;;  %1880 = vmatpush.msra.mxu2 %v1453_v8  ;;  %1948 = vmatpush.msra.mxu1 %v1246_v16  ;;  %v1278_v56 = vld [vmem:[%s7326_s25 + $0x4d0] sm:$0xff] }
 0x265   :  { %v1581_v14 = vld [vmem:[%s7326_s25 + $0xe48] sm:$0xff]  ;;  %1896 = vmatpush.msrb.mxu3 %v1533_v13  ;;  %v1358_v3 = vld [vmem:[%s7326_s25 + $0x750] sm:$0xff] }
 0x266   :  { %v1449_v15 = vld [vmem:[%s7326_s25 + $0xa28] sm:$0xff]  ;;  %1920 = vmatpush.msra.mxu0 %v1581_v14  ;;  %1949 = vmatpush.msra.mxu1 %v1242_v20  ;;  %v1146_v4 = vld [vmem:[%s7326_s25 + $0xb0] sm:$0xff] }
 0x267   :  { %v1529_v17 = vld [vmem:[%s7326_s25 + $0xca8] sm:$0xff]  ;;  %1881 = vmatpush.msra.mxu2 %v1449_v15  ;;  %v1198_v5 = vld [vmem:[%s7326_s25 + $0x250] sm:$0xff] }
 0x268   :  { %v1577_v18 = vld [vmem:[%s7326_s25 + $0xe28] sm:$0xff]  ;;  %1897 = vmatpush.msrb.mxu3 %v1529_v17  ;;  %1950 = vmatpush.msra.mxu1 %v1238_v23  ;;  %v1274_v6 = vld [vmem:[%s7326_s25 + $0x4b0] sm:$0xff] }
 0x269   :  { %v1445_v19 = vld [vmem:[%s7326_s25 + $0xa08] sm:$0xff]  ;;  %1921 = vmatpush.msra.mxu0 %v1577_v18  ;;  %v1354_v7 = vld [vmem:[%s7326_s25 + $0x730] sm:$0xff] }
 0x26a   :  { %v1525_v21 = vld [vmem:[%s7326_s25 + $0xc88] sm:$0xff]  ;;  %1882 = vmatpush.msra.mxu2 %v1445_v19  ;;  %1951 = vmatpush.msra.mxu1 %v1234_v27  ;;  %v1142_v8 = vld [vmem:[%s7326_s25 + $0x90] sm:$0xff] }
 0x26b   :  { %v1573_v22 = vld [vmem:[%s7326_s25 + $0xe08] sm:$0xff]  ;;  %1898 = vmatpush.msrb.mxu3 %v1525_v21  ;;  %1883 = vmatmul.f32.vlgmr.msra.gmra.mxu2 %v7542_v58  ;;  %v1194_v12 = vld [vmem:[%s7326_s25 + $0x230] sm:$0xff] }
 0x26c   :  { %1922 = vmatpush.msra.mxu0 %v1573_v22  ;;  %v1521_v26 = vld [vmem:[%s7326_s25 + $0xc68] sm:$0xff]  ;;  %1967 = vmatpush.msrb.mxu2 %v1314_v25  ;;  %v1270_v13 = vld [vmem:[%s7326_s25 + $0x490] sm:$0xff] }
 0x26d   :  { %6444 = vmatmul.msk.f32.vlgmr.msra.gmra.mxu0 %vm728_vm3, %v7490_v63  ;;  %v1517_v34 = vld [vmem:[%s7326_s25 + $0xc48] sm:$0xff]  ;;  %1899 = vmatpush.msrb.mxu3 %v1521_v26  ;;  %v1350_v14 = vld [vmem:[%s7326_s25 + $0x710] sm:$0xff] }
 0x26e   :  { %1927 = vmatpush.msrb.mxu0 %v1186_v24  ;;  %1968 = vmatpush.msrb.mxu2 %v1310_v29  ;;  %v1513_v35 = vld [vmem:[%s7326_s25 + $0xc28] sm:$0xff]  ;;  %v1138_v15 = vld [vmem:[%s7326_s25 + $0x70] sm:$0xff] }
 0x26f   :  { %1900 = vmatpush.msrb.mxu3 %v1517_v34  ;;  %1952 = vmatpush.msra.mxu1 %v1230_v31  ;;  %v1509_v41 = vld [vmem:[%s7326_s25 + $0xc08] sm:$0xff]  ;;  %v1190_v16 = vld [vmem:[%s7326_s25 + $0x210] sm:$0xff] }
 0x270   :  { %1928 = vmatpush.msrb.mxu0 %v1182_v28  ;;  %1969 = vmatpush.msrb.mxu2 %v1306_v33  ;;  %v1266_v17 = vld [vmem:[%s7326_s25 + $0x470] sm:$0xff] }
 0x271   :  { %1901 = vmatpush.msrb.mxu3 %v1513_v35  ;;  %1953 = vmatpush.msra.mxu1 %v1226_v36  ;;  %v1346_v18 = vld [vmem:[%s7326_s25 + $0x6f0] sm:$0xff] }
 0x272   :  { %1929 = vmatpush.msrb.mxu0 %v1178_v32  ;;  %1970 = vmatpush.msrb.mxu2 %v1302_v38  ;;  %v1134_v19 = vld [vmem:[%s7326_s25 + $0x50] sm:$0xff] }
 0x273   :  { %1902 = vmatpush.msrb.mxu3 %v1509_v41  ;;  %1954 = vmatpush.msra.mxu1 %v1222_v42  ;;  %v1506_v20 = vld [vmem:[%s7326_s25 + $0xbf0] sm:$0xff] }
 0x274   :  { %1930 = vmatpush.msrb.mxu0 %v1174_v37  ;;  %1903 = vmatmul.f32.vlgmr.msrb.gmra.mxu3 %v7544_v60  ;;  %v1262_v21 = vld [vmem:[%s7326_s25 + $0x450] sm:$0xff] }
 0x275   :  { %1971 = vmatpush.msrb.mxu2 %v1298_v44  ;;  %1987 = vmatpush.msra.mxu3 %v1378_v9  ;;  %v1342_v22 = vld [vmem:[%s7326_s25 + $0x6d0] sm:$0xff] }
 0x276   :  { %1931 = vmatpush.msrb.mxu0 %v1170_v43  ;;  %1955 = vmatpush.msra.mxu1 %v1218_v46  ;;  %v1130_v23 = vld [vmem:[%s7326_s25 + $0x30] sm:$0xff] }
 0x277   :  { %1972 = vmatpush.msrb.mxu2 %v1294_v48  ;;  %1988 = vmatpush.msra.mxu3 %v1374_v49  ;;  %v1502_v24 = vld [vmem:[%s7326_s25 + $0xbd0] sm:$0xff] }
 0x278   :  { %1932 = vmatpush.msrb.mxu0 %v1166_v45  ;;  %1956 = vmatpush.msra.mxu1 %v1214_v51  ;;  %v1258_v25 = vld [vmem:[%s7326_s25 + $0x430] sm:$0xff] }
 0x279   :  { %1973 = vmatpush.msrb.mxu2 %v1290_v52  ;;  %1989 = vmatpush.msra.mxu3 %v1370_v54  ;;  %v1338_v26 = vld [vmem:[%s7326_s25 + $0x6b0] sm:$0xff] }
 0x27a   :  { %1933 = vmatpush.msrb.mxu0 %v1162_v50  ;;  %1957 = vmatpush.msra.mxu1 %v1210_v53  ;;  %v1126_v27 = vld [vmem:[%s7326_s25 + $0x10] sm:$0xff] }
 0x27b   :  { %1974 = vmatpush.msrb.mxu2 %v1286_v59  ;;  %1990 = vmatpush.msra.mxu3 %v1366_v57  ;;  %v1498_v28 = vld [vmem:[%s7326_s25 + $0xbb0] sm:$0xff] }
 0x27c   :  { %1934 = vmatpush.msrb.mxu0 %v1158_v47  ;;  %1958 = vmatpush.msra.mxu1 %v1206_v62  ;;  %v1254_v29 = vld [vmem:[%s7326_s25 + $0x410] sm:$0xff] }
 0x27d   :  { %1975 = vmatpush.msrb.mxu2 %v1282_v10  ;;  %1991 = vmatpush.msra.mxu3 %v1362_v0  ;;  %v1334_v34 = vld [vmem:[%s7326_s25 + $0x690] sm:$0xff] }
 0x27e   :  { %1935 = vmatpush.msrb.mxu0 %v1154_v61  ;;  %1959 = vmatpush.msra.mxu1 %v1202_v40  ;;  %v1442_v31 = vld [vmem:[%s7326_s25 + $0x9f0] sm:$0xff] }
 0x27f   :  { %1976 = vmatpush.msrb.mxu2 %v1278_v56  ;;  %1992 = vmatpush.msra.mxu3 %v1358_v3  ;;  %v1494_v32 = vld [vmem:[%s7326_s25 + $0xb90] sm:$0xff] }
 0x280   :  { %1936 = vmatpush.msrb.mxu0 %v1150_v1  ;;  %1960 = vmatpush.msra.mxu1 %v1198_v5  ;;  %v1570_v33 = vld [vmem:[%s7326_s25 + $0xdf0] sm:$0xff] }
 0x281   :  { %1977 = vmatpush.msrb.mxu2 %v1274_v6  ;;  %1993 = vmatpush.msra.mxu3 %v1354_v7  ;;  %v1330_v35 = vld [vmem:[%s7326_s25 + $0x670] sm:$0xff] }
 0x282   :  { %1937 = vmatpush.msrb.mxu0 %v1146_v4  ;;  %1961 = vmatpush.msra.mxu1 %v1194_v12  ;;  %v1438_v36 = vld [vmem:[%s7326_s25 + $0x9d0] sm:$0xff] }
 0x283   :  { %1978 = vmatpush.msrb.mxu2 %v1270_v13  ;;  %1994 = vmatpush.msra.mxu3 %v1350_v14  ;;  %v1490_v37 = vld [vmem:[%s7326_s25 + $0xb70] sm:$0xff] }
 0x284   :  { %1938 = vmatpush.msrb.mxu0 %v1142_v8  ;;  %1962 = vmatpush.msra.mxu1 %v1190_v16  ;;  %v1566_v38 = vld [vmem:[%s7326_s25 + $0xdd0] sm:$0xff] }
 0x285   :  { %1979 = vmatpush.msrb.mxu2 %v1266_v17  ;;  %1995 = vmatpush.msra.mxu3 %v1346_v18  ;;  %v1326_v41 = vld [vmem:[%s7326_s25 + $0x650] sm:$0xff] }
 0x286   :  { %1939 = vmatpush.msrb.mxu0 %v1138_v15  ;;  %1963 = vmatmul.f32.vlgmr.msra.gmra.mxu1 %v7504_v2  ;;  %v1434_v42 = vld [vmem:[%s7326_s25 + $0x9b0] sm:$0xff] }
 0x287   :  { %2027 = vmatpush.msrb.mxu1 %v1506_v20  ;;  %1980 = vmatpush.msrb.mxu2 %v1262_v21  ;;  %v1486_v43 = vld [vmem:[%s7326_s25 + $0xb50] sm:$0xff] }
 0x288   :  { %1940 = vmatpush.msrb.mxu0 %v1134_v19  ;;  %1996 = vmatpush.msra.mxu3 %v1342_v22  ;;  %v1562_v44 = vld [vmem:[%s7326_s25 + $0xdb0] sm:$0xff] }
 0x289   :  { %2028 = vmatpush.msrb.mxu1 %v1502_v24  ;;  %1981 = vmatpush.msrb.mxu2 %v1258_v25  ;;  %v1322_v9 = vld [vmem:[%s7326_s25 + $0x630] sm:$0xff]  ;;  %v1187_v24 = vld [vmem:[%s7326_s25 + $0x1f8] sm:$0xff] }
 0x28a   :  { %1941 = vmatpush.msrb.mxu0 %v1130_v23  ;;  %1997 = vmatpush.msra.mxu3 %v1338_v26  ;;  %v1430_v45 = vld [vmem:[%s7326_s25 + $0x990] sm:$0xff] }
 0x28b   :  { %2029 = vmatpush.msrb.mxu1 %v1498_v28  ;;  %1982 = vmatpush.msrb.mxu2 %v1254_v29  ;;  %v1482_v46 = vld [vmem:[%s7326_s25 + $0xb30] sm:$0xff]  ;;  %v1315_v28 = vld [vmem:[%s7326_s25 + $0x5f8] sm:$0xff] }
 0x28c   :  { %1942 = vmatpush.msrb.mxu0 %v1126_v27  ;;  %1998 = vmatpush.msra.mxu3 %v1334_v34  ;;  %v1558_v48 = vld [vmem:[%s7326_s25 + $0xd90] sm:$0xff]  ;;  %v1183_v27 = vld [vmem:[%s7326_s25 + $0x1d8] sm:$0xff] }
 0x28d   :  { %1943 = vmatmul.f32.vlgmr.msrb.gmra.mxu0 %v7485_v55  ;;  %1983 = vmatmul.f32.vlgmr.msrb.gmra.mxu2 %v7521_v30  ;;  %v1318_v49 = vld [vmem:[%s7326_s25 + $0x610] sm:$0xff] }
 0x28e   :  { %2007 = vmatpush.msra.mxu0 %v1442_v31  ;;  %2030 = vmatpush.msrb.mxu1 %v1494_v32  ;;  %v1426_v50 = vld [vmem:[%s7326_s25 + $0x970] sm:$0xff]  ;;  %v1179_v31 = vld [vmem:[%s7326_s25 + $0x1b8] sm:$0xff] }
 0x28f   :  { %2047 = vmatpush.msra.mxu2 %v1570_v33  ;;  %1999 = vmatpush.msra.mxu3 %v1330_v35  ;;  %v1478_v51 = vld [vmem:[%s7326_s25 + $0xb10] sm:$0xff]  ;;  %v1311_v32 = vld [vmem:[%s7326_s25 + $0x5d8] sm:$0xff] }
 0x290   :  { %2008 = vmatpush.msra.mxu0 %v1438_v36  ;;  %2031 = vmatpush.msrb.mxu1 %v1490_v37  ;;  %v1554_v52 = vld [vmem:[%s7326_s25 + $0xd70] sm:$0xff]  ;;  %v1175_v36 = vld [vmem:[%s7326_s25 + $0x198] sm:$0xff] }
 0x291   :  { %2048 = vmatpush.msra.mxu2 %v1566_v38  ;;  %2000 = vmatpush.msra.mxu3 %v1326_v41  ;;  %v1602_v54 = vld [vmem:[%s7326_s25 + $0xef0] sm:$0xff]  ;;  %v1307_v37 = vld [vmem:[%s7326_s25 + $0x5b8] sm:$0xff] }
 0x292   :  { %2009 = vmatpush.msra.mxu0 %v1434_v42  ;;  %2032 = vmatpush.msrb.mxu1 %v1486_v43  ;;  %v1422_v47 = vld [vmem:[%s7326_s25 + $0x950] sm:$0xff]  ;;  %v1171_v42 = vld [vmem:[%s7326_s25 + $0x178] sm:$0xff] }
 0x293   :  { %2049 = vmatpush.msra.mxu2 %v1562_v44  ;;  %2001 = vmatpush.msra.mxu3 %v1322_v9  ;;  %v1474_v53 = vld [vmem:[%s7326_s25 + $0xaf0] sm:$0xff]  ;;  %v1251_v43 = vld [vmem:[%s7326_s25 + $0x3f8] sm:$0xff] }
 0x294   :  { %2010 = vmatpush.msra.mxu0 %v1430_v45  ;;  %2033 = vmatpush.msrb.mxu1 %v1482_v46  ;;  %v1550_v59 = vld [vmem:[%s7326_s25 + $0xd50] sm:$0xff]  ;;  %v1303_v44 = vld [vmem:[%s7326_s25 + $0x598] sm:$0xff] }
 0x295   :  { %2050 = vmatpush.msra.mxu2 %v1558_v48  ;;  %2002 = vmatpush.msra.mxu3 %v1318_v49  ;;  %v1598_v57 = vld [vmem:[%s7326_s25 + $0xed0] sm:$0xff]  ;;  %v1379_v9 = vld [vmem:[%s7326_s25 + $0x7f8] sm:$0xff] }
 0x296   :  { %2011 = vmatpush.msra.mxu0 %v1426_v50  ;;  %2003 = vmatmul.f32.vlgmr.msra.gmra.mxu3 %v7477_v39  ;;  %v1418_v61 = vld [vmem:[%s7326_s25 + $0x930] sm:$0xff]  ;;  %v1167_v45 = vld [vmem:[%s7326_s25 + $0x158] sm:$0xff] }
 0x297   :  { %2034 = vmatpush.msrb.mxu1 %v1478_v51  ;;  %2051 = vmatpush.msra.mxu2 %v1554_v52  ;;  %v1470_v62 = vld [vmem:[%s7326_s25 + $0xad0] sm:$0xff]  ;;  %v1247_v46 = vld [vmem:[%s7326_s25 + $0x3d8] sm:$0xff] }
 0x298   :  { %2075 = vmatpush.msrb.mxu3 %v1602_v54  ;;  %2012 = vmatpush.msra.mxu0 %v1422_v47  ;;  %v1546_v10 = vld [vmem:[%s7326_s25 + $0xd30] sm:$0xff]  ;;  %v1299_v48 = vld [vmem:[%s7326_s25 + $0x578] sm:$0xff] }
 0x299   :  { %2035 = vmatpush.msrb.mxu1 %v1474_v53  ;;  %v1594_v0 = vld [vmem:[%s7326_s25 + $0xeb0] sm:$0xff]  ;;  %2052 = vmatpush.msra.mxu2 %v1550_v59  ;;  %v1375_v49 = vld [vmem:[%s7326_s25 + $0x7d8] sm:$0xff] }
 0x29a   :  { %2076 = vmatpush.msrb.mxu3 %v1598_v57  ;;  %v1414_v1 = vld [vmem:[%s7326_s25 + $0x910] sm:$0xff]  ;;  %2013 = vmatpush.msra.mxu0 %v1418_v61  ;;  %v1163_v50 = vld [vmem:[%s7326_s25 + $0x138] sm:$0xff] }
 0x29b   :  { %v1466_v40 = vld [vmem:[%s7326_s25 + $0xab0] sm:$0xff]  ;;  %2036 = vmatpush.msrb.mxu1 %v1470_v62  ;;  %2053 = vmatpush.msra.mxu2 %v1546_v10  ;;  %v1243_v51 = vld [vmem:[%s7326_s25 + $0x3b8] sm:$0xff] }
 0x29c   :  { %v1542_v56 = vld [vmem:[%s7326_s25 + $0xd10] sm:$0xff]  ;;  %2077 = vmatpush.msrb.mxu3 %v1594_v0  ;;  %2014 = vmatpush.msra.mxu0 %v1414_v1  ;;  %v1295_v52 = vld [vmem:[%s7326_s25 + $0x558] sm:$0xff] }
 0x29d   :  { %v1590_v3 = vld [vmem:[%s7326_s25 + $0xe90] sm:$0xff]  ;;  %2037 = vmatpush.msrb.mxu1 %v1466_v40  ;;  %2054 = vmatpush.msra.mxu2 %v1542_v56  ;;  %v1371_v54 = vld [vmem:[%s7326_s25 + $0x7b8] sm:$0xff] }
 0x29e   :  { %v1410_v4 = vld [vmem:[%s7326_s25 + $0x8f0] sm:$0xff]  ;;  %2078 = vmatpush.msrb.mxu3 %v1590_v3  ;;  %v1159_v47 = vld [vmem:[%s7326_s25 + $0x118] sm:$0xff] }
 0x29f   :  { %v1462_v5 = vld [vmem:[%s7326_s25 + $0xa90] sm:$0xff]  ;;  %2015 = vmatpush.msra.mxu0 %v1410_v4  ;;  %v1239_v53 = vld [vmem:[%s7326_s25 + $0x398] sm:$0xff] }
 0x2a0   :  { %v1538_v6 = vld [vmem:[%s7326_s25 + $0xcf0] sm:$0xff]  ;;  %2038 = vmatpush.msrb.mxu1 %v1462_v5  ;;  %v1291_v59 = vld [vmem:[%s7326_s25 + $0x538] sm:$0xff] }
 0x2a1   :  { %v1586_v7 = vld [vmem:[%s7326_s25 + $0xe70] sm:$0xff]  ;;  %2055 = vmatpush.msra.mxu2 %v1538_v6  ;;  %v1367_v57 = vld [vmem:[%s7326_s25 + $0x798] sm:$0xff] }
 0x2a2   :  { %v1406_v8 = vld [vmem:[%s7326_s25 + $0x8d0] sm:$0xff]  ;;  %2079 = vmatpush.msrb.mxu3 %v1586_v7  ;;  %v1155_v61 = vld [vmem:[%s7326_s25 + $0xf8] sm:$0xff] }
 0x2a3   :  { %v1458_v12 = vld [vmem:[%s7326_s25 + $0xa70] sm:$0xff]  ;;  %2016 = vmatpush.msra.mxu0 %v1406_v8  ;;  %v1235_v62 = vld [vmem:[%s7326_s25 + $0x378] sm:$0xff] }
 0x2a4   :  { %v1534_v13 = vld [vmem:[%s7326_s25 + $0xcd0] sm:$0xff]  ;;  %2039 = vmatpush.msrb.mxu1 %v1458_v12  ;;  %v1287_v10 = vld [vmem:[%s7326_s25 + $0x518] sm:$0xff] }
 0x2a5   :  { %v1582_v14 = vld [vmem:[%s7326_s25 + $0xe50] sm:$0xff]  ;;  %2056 = vmatpush.msra.mxu2 %v1534_v13  ;;  %v1363_v0 = vld [vmem:[%s7326_s25 + $0x778] sm:$0xff] }
 0x2a6   :  { %v1402_v15 = vld [vmem:[%s7326_s25 + $0x8b0] sm:$0xff]  ;;  %2080 = vmatpush.msrb.mxu3 %v1582_v14  ;;  %v1151_v1 = vld [vmem:[%s7326_s25 + $0xd8] sm:$0xff] }
 0x2a7   :  { %v1454_v16 = vld [vmem:[%s7326_s25 + $0xa50] sm:$0xff]  ;;  %2017 = vmatpush.msra.mxu0 %v1402_v15  ;;  %v1231_v40 = vld [vmem:[%s7326_s25 + $0x358] sm:$0xff] }
 0x2a8   :  { %v1530_v17 = vld [vmem:[%s7326_s25 + $0xcb0] sm:$0xff]  ;;  %2040 = vmatpush.msrb.mxu1 %v1454_v16  ;;  %v1283_v56 = vld [vmem:[%s7326_s25 + $0x4f8] sm:$0xff] }
 0x2a9   :  { %v1578_v18 = vld [vmem:[%s7326_s25 + $0xe30] sm:$0xff]  ;;  %2057 = vmatpush.msra.mxu2 %v1530_v17  ;;  %v1359_v3 = vld [vmem:[%s7326_s25 + $0x758] sm:$0xff] }
 0x2aa   :  { %v1398_v19 = vld [vmem:[%s7326_s25 + $0x890] sm:$0xff]  ;;  %2081 = vmatpush.msrb.mxu3 %v1578_v18  ;;  %v1147_v4 = vld [vmem:[%s7326_s25 + $0xb8] sm:$0xff] }
 0x2ab   :  { %v1450_v20 = vld [vmem:[%s7326_s25 + $0xa30] sm:$0xff]  ;;  %2018 = vmatpush.msra.mxu0 %v1398_v19  ;;  %v1227_v5 = vld [vmem:[%s7326_s25 + $0x338] sm:$0xff] }
 0x2ac   :  { %v1526_v21 = vld [vmem:[%s7326_s25 + $0xc90] sm:$0xff]  ;;  %2041 = vmatpush.msrb.mxu1 %v1450_v20  ;;  %v1279_v6 = vld [vmem:[%s7326_s25 + $0x4d8] sm:$0xff] }
 0x2ad   :  { %v1574_v22 = vld [vmem:[%s7326_s25 + $0xe10] sm:$0xff]  ;;  %2058 = vmatpush.msra.mxu2 %v1526_v21  ;;  %v1355_v7 = vld [vmem:[%s7326_s25 + $0x738] sm:$0xff] }
 0x2ae   :  { %v1394_v23 = vld [vmem:[%s7326_s25 + $0x870] sm:$0xff]  ;;  %2082 = vmatpush.msrb.mxu3 %v1574_v22  ;;  %v1143_v8 = vld [vmem:[%s7326_s25 + $0x98] sm:$0xff] }
 0x2af   :  { %v1446_v25 = vld [vmem:[%s7326_s25 + $0xa10] sm:$0xff]  ;;  %6445 = vmatmul.msk.f32.vlgmr.msrb.gmra.mxu3 %vm728_vm3, %v7490_v63  ;;  %2019 = vmatpush.msra.mxu0 %v1394_v23  ;;  %v1223_v12 = vld [vmem:[%s7326_s25 + $0x318] sm:$0xff] }
 0x2b0   :  { %v1522_v26 = vld [vmem:[%s7326_s25 + $0xc70] sm:$0xff]  ;;  %2087 = vmatpush.msra.mxu3 %v1187_v24  ;;  %2042 = vmatpush.msrb.mxu1 %v1446_v25  ;;  %v1275_v13 = vld [vmem:[%s7326_s25 + $0x4b8] sm:$0xff] }
 0x2b1   :  { %v1390_v29 = vld [vmem:[%s7326_s25 + $0x850] sm:$0xff]  ;;  %2059 = vmatpush.msra.mxu2 %v1522_v26  ;;  %2043 = vmatmul.f32.vlgmr.msrb.gmra.mxu1 %v7542_v58  ;;  %v1351_v14 = vld [vmem:[%s7326_s25 + $0x718] sm:$0xff] }
 0x2b2   :  { %v1518_v34 = vld [vmem:[%s7326_s25 + $0xc50] sm:$0xff]  ;;  %2088 = vmatpush.msra.mxu3 %v1183_v27  ;;  %2127 = vmatpush.msra.mxu1 %v1315_v28  ;;  %v1139_v15 = vld [vmem:[%s7326_s25 + $0x78] sm:$0xff] }
 0x2b3   :  { %v1386_v33 = vld [vmem:[%s7326_s25 + $0x830] sm:$0xff]  ;;  %2020 = vmatpush.msra.mxu0 %v1390_v29  ;;  %2060 = vmatpush.msra.mxu2 %v1518_v34  ;;  %v1219_v16 = vld [vmem:[%s7326_s25 + $0x2f8] sm:$0xff] }
 0x2b4   :  { %v1514_v35 = vld [vmem:[%s7326_s25 + $0xc30] sm:$0xff]  ;;  %2089 = vmatpush.msra.mxu3 %v1179_v31  ;;  %2128 = vmatpush.msra.mxu1 %v1311_v32  ;;  %v1271_v17 = vld [vmem:[%s7326_s25 + $0x498] sm:$0xff]  ;;  %v1644_v31 = vpop.f32.mrf.mxu3 }
 0x2b5   :  { %v1382_v38 = vld [vmem:[%s7326_s25 + $0x810] sm:$0xff]  ;;  %2021 = vmatpush.msra.mxu0 %v1386_v33  ;;  %2061 = vmatpush.msra.mxu2 %v1514_v35  ;;  %v1347_v18 = vld [vmem:[%s7326_s25 + $0x6f8] sm:$0xff] }
 0x2b6   :  { %v1510_v41 = vld [vmem:[%s7326_s25 + $0xc10] sm:$0xff]  ;;  %2090 = vmatpush.msra.mxu3 %v1175_v36  ;;  %2129 = vmatpush.msra.mxu1 %v1307_v37  ;;  %v1135_v19 = vld [vmem:[%s7326_s25 + $0x58] sm:$0xff]  ;;  %v1624_v36 = vpop.f32.mrf.mxu2 }
 0x2b7   :  { %2022 = vmatpush.msra.mxu0 %v1382_v38  ;;  %2062 = vmatpush.msra.mxu2 %v1510_v41  ;;  %v1215_v20 = vld [vmem:[%s7326_s25 + $0x2d8] sm:$0xff]  ;;  %v1645_v38 = vadd.f32 %v1644_v31, %v1624_v36 }
 0x2b8   :  { %2023 = vmatmul.f32.vlgmr.msra.gmra.mxu0 %v7502_v11  ;;  %2063 = vmatmul.f32.vlgmr.msra.gmra.mxu2 %v7544_v60  ;;  %v1267_v21 = vld [vmem:[%s7326_s25 + $0x478] sm:$0xff] }
 0x2b9   :  { %2091 = vmatpush.msra.mxu3 %v1171_v42  ;;  %2107 = vmatpush.msrb.mxu0 %v1251_v43  ;;  %v1343_v22 = vld [vmem:[%s7326_s25 + $0x6d8] sm:$0xff]  ;;  %v1664_v43 = vpop.f32.mrf.mxu0 }
 0x2ba   :  { %2130 = vmatpush.msra.mxu1 %v1303_v44  ;;  %2147 = vmatpush.msrb.mxu2 %v1379_v9  ;;  %v1131_v23 = vld [vmem:[%s7326_s25 + $0x38] sm:$0xff] }
 0x2bb   :  { %2092 = vmatpush.msra.mxu3 %v1167_v45  ;;  %2108 = vmatpush.msrb.mxu0 %v1247_v46  ;;  %v1211_v24 = vld [vmem:[%s7326_s25 + $0x2b8] sm:$0xff] }
 0x2bc   :  { %2131 = vmatpush.msra.mxu1 %v1299_v48  ;;  %2148 = vmatpush.msrb.mxu2 %v1375_v49  ;;  %v1263_v25 = vld [vmem:[%s7326_s25 + $0x458] sm:$0xff]  ;;  %v1665_v49 = vadd.f32 %v1664_v43, %v1645_v38  ;;  %v2262_v43 = vld [vmem:[%s7865_s29 + $0x70] sm:$0xff] }
 0x2bd   :  { %2093 = vmatpush.msra.mxu3 %v1163_v50  ;;  %2109 = vmatpush.msrb.mxu0 %v1243_v51  ;;  %v1339_v26 = vld [vmem:[%s7326_s25 + $0x6b8] sm:$0xff] }
 0x2be   :  { %2132 = vmatpush.msra.mxu1 %v1295_v52  ;;  %2149 = vmatpush.msrb.mxu2 %v1371_v54  ;;  %v1127_v27 = vld [vmem:[%s7326_s25 + $0x18] sm:$0xff]  ;;  %v1684_v54 = vpop.f32.mrf.mxu1 }
 0x2bf   :  { %2094 = vmatpush.msra.mxu3 %v1159_v47  ;;  %2110 = vmatpush.msrb.mxu0 %v1239_v53  ;;  %v1207_v28 = vld [vmem:[%s7326_s25 + $0x298] sm:$0xff] }
 0x2c0   :  { %2133 = vmatpush.msra.mxu1 %v1291_v59  ;;  %2150 = vmatpush.msrb.mxu2 %v1367_v57  ;;  %v1259_v29 = vld [vmem:[%s7326_s25 + $0x438] sm:$0xff]  ;;  %v1685_v59 = vadd.f32 %v1684_v54, %v1665_v49 }
 0x2c1   :  { %2095 = vmatpush.msra.mxu3 %v1155_v61  ;;  %2111 = vmatpush.msrb.mxu0 %v1235_v62  ;;  %v1335_v34 = vld [vmem:[%s7326_s25 + $0x698] sm:$0xff] }
 0x2c2   :  { %2134 = vmatpush.msra.mxu1 %v1287_v10  ;;  %2151 = vmatpush.msrb.mxu2 %v1363_v0  ;;  %v1203_v32 = vld [vmem:[%s7326_s25 + $0x278] sm:$0xff] }
 0x2c3   :  { %2096 = vmatpush.msra.mxu3 %v1151_v1  ;;  %2112 = vmatpush.msrb.mxu0 %v1231_v40  ;;  %v1443_v33 = vld [vmem:[%s7326_s25 + $0x9f8] sm:$0xff]  ;;  %v1704_v40 = vpop.f32.mrf.mxu2 }
 0x2c4   :  { %2135 = vmatpush.msra.mxu1 %v1283_v56  ;;  %2152 = vmatpush.msrb.mxu2 %v1359_v3  ;;  %v1255_v35 = vld [vmem:[%s7326_s25 + $0x418] sm:$0xff]  ;;  %v1724_v56 = vpop.f32.mrf.mxu3 }
 0x2c5   :  { %2097 = vmatpush.msra.mxu3 %v1147_v4  ;;  %2113 = vmatpush.msrb.mxu0 %v1227_v5  ;;  %v1331_v37 = vld [vmem:[%s7326_s25 + $0x678] sm:$0xff]  ;;  %v1705_v4 = vadd.f32 %v1704_v40, %v1685_v59 }
 0x2c6   :  { %2136 = vmatpush.msra.mxu1 %v1279_v6  ;;  %2153 = vmatpush.msrb.mxu2 %v1355_v7  ;;  %v1439_v41 = vld [vmem:[%s7326_s25 + $0x9d8] sm:$0xff] }
 0x2c7   :  { %2098 = vmatpush.msra.mxu3 %v1143_v8  ;;  %2114 = vmatpush.msrb.mxu0 %v1223_v12  ;;  %v1571_v42 = vld [vmem:[%s7326_s25 + $0xdf8] sm:$0xff]  ;;  %v1725_v8 = vadd.f32 %v1724_v56, %v1705_v4  ;;  %v2278_v56 = vld [vmem:[%s7865_s29 + $0xf0] sm:$0xff] }
 0x2c8   :  { %2137 = vmatpush.msra.mxu1 %v1275_v13  ;;  %2154 = vmatpush.msrb.mxu2 %v1351_v14  ;;  %v1199_v44 = vld [vmem:[%s7326_s25 + $0x258] sm:$0xff] }
 0x2c9   :  { %2099 = vmatpush.msra.mxu3 %v1139_v15  ;;  %2115 = vmatpush.msrb.mxu0 %v1219_v16  ;;  %v1327_v9 = vld [vmem:[%s7326_s25 + $0x658] sm:$0xff] }
 0x2ca   :  { %2138 = vmatpush.msra.mxu1 %v1271_v17  ;;  %2155 = vmatpush.msrb.mxu2 %v1347_v18  ;;  %v1435_v45 = vld [vmem:[%s7326_s25 + $0x9b8] sm:$0xff]  ;;  %v1744_v18 = vpop.f32.mrf.mxu0 }
 0x2cb   :  { %2100 = vmatpush.msra.mxu3 %v1135_v19  ;;  %2116 = vmatpush.msrb.mxu0 %v1215_v20  ;;  %v1567_v46 = vld [vmem:[%s7326_s25 + $0xdd8] sm:$0xff] }
 0x2cc   :  { %2139 = vmatpush.msra.mxu1 %v1267_v21  ;;  %2156 = vmatpush.msrb.mxu2 %v1343_v22  ;;  %v1323_v48 = vld [vmem:[%s7326_s25 + $0x638] sm:$0xff]  ;;  %v1745_v21 = vadd.f32 %v1744_v18, %v1725_v8  ;;  %v2254_v18 = vld [vmem:[%s7865_s29 + $0x30] sm:$0xff] }
 0x2cd   :  { %2101 = vmatpush.msra.mxu3 %v1131_v23  ;;  %2117 = vmatpush.msrb.mxu0 %v1211_v24  ;;  %v1431_v50 = vld [vmem:[%s7326_s25 + $0x998] sm:$0xff] }
 0x2ce   :  { %2140 = vmatpush.msra.mxu1 %v1263_v25  ;;  %2157 = vmatpush.msrb.mxu2 %v1339_v26  ;;  %v1563_v51 = vld [vmem:[%s7326_s25 + $0xdb8] sm:$0xff] }
 0x2cf   :  { %2102 = vmatpush.msra.mxu3 %v1127_v27  ;;  %2118 = vmatpush.msrb.mxu0 %v1207_v28  ;;  %v1191_v52 = vld [vmem:[%s7326_s25 + $0x218] sm:$0xff]  ;;  %v1764_v28 = vpop.f32.mrf.mxu1 }
 0x2d0   :  { %2141 = vmatpush.msra.mxu1 %v1259_v29  ;;  %2158 = vmatpush.msrb.mxu2 %v1335_v34  ;;  %v1427_v47 = vld [vmem:[%s7326_s25 + $0x978] sm:$0xff]  ;;  %v7877_v31 = vadd.f32 %v1764_v28, %v1745_v21  ;;  %v2274_v21 = vld [vmem:[%s7865_s29 + $0xd0] sm:$0xff] }
 0x2d1   :  { %2103 = vmatmul.f32.vlgmr.msra.gmra.mxu3 %v7485_v55  ;;  %2119 = vmatpush.msrb.mxu0 %v1203_v32  ;;  %v1195_v55 = vld [vmem:[%s7326_s25 + $0x238] sm:$0xff] }
 0x2d2   :  { %2167 = vmatpush.msrb.mxu3 %v1443_v33  ;;  %2142 = vmatpush.msra.mxu1 %v1255_v35  ;;  %v1507_v53 = vld [vmem:[%s7326_s25 + $0xbf8] sm:$0xff]  ;;  %v1844_v8 = vpop.f32.mrf.mxu0 }
 0x2d3   :  { %2159 = vmatpush.msrb.mxu2 %v1331_v37  ;;  %2143 = vmatmul.f32.vlgmr.msra.gmra.mxu1 %v7521_v30  ;;  %v1319_v30 = vld [vmem:[%s7326_s25 + $0x618] sm:$0xff] }
 0x2d4   :  { %2168 = vmatpush.msrb.mxu3 %v1439_v41  ;;  %2207 = vmatpush.msrb.mxu1 %v1571_v42  ;;  %v1559_v57 = vld [vmem:[%s7326_s25 + $0xd98] sm:$0xff]  ;;  %v2337_v42 = vmul.f32 %v7877_v31, %v7877_v31 }
 0x2d5   :  { %2120 = vmatpush.msrb.mxu0 %v1199_v44  ;;  %2160 = vmatpush.msrb.mxu2 %v1327_v9  ;;  %v1603_v61 = vld [vmem:[%s7326_s25 + $0xef8] sm:$0xff] }
 0x2d6   :  { %2169 = vmatpush.msrb.mxu3 %v1435_v45  ;;  %2208 = vmatpush.msrb.mxu1 %v1567_v46  ;;  %v1423_v62 = vld [vmem:[%s7326_s25 + $0x958] sm:$0xff]  ;;  %v2261_v46 = vld [vmem:[%s7865_s29 + $0x68] sm:$0xff]  ;;  %v2341_v49 = vsel %vm597_vm0, %v2337_v42, 0.0  ;;  %v2270_v42 = vld [vmem:[%s7865_s29 + $0xb0] sm:$0xff] }
 0x2d7   :  { %2121 = vmatpush.msrb.mxu0 %v1195_v55  ;;  %2161 = vmatpush.msrb.mxu2 %v1323_v48  ;;  %v1503_v10 = vld [vmem:[%s7326_s25 + $0xbd8] sm:$0xff]  ;;  %v2342_v59 = vrot.slane %v2341_v49, 4 }
 0x2d8   :  { %2170 = vmatpush.msrb.mxu3 %v1431_v50  ;;  %2209 = vmatpush.msrb.mxu1 %v1563_v51  ;;  %v1555_v0 = vld [vmem:[%s7326_s25 + $0xd78] sm:$0xff]  ;;  %v2260_v50 = vld [vmem:[%s7865_s29 + $0x60] sm:$0xff] }
 0x2d9   :  { %2122 = vmatpush.msrb.mxu0 %v1191_v52  ;;  %2162 = vmatpush.msrb.mxu2 %v1319_v30  ;;  %v1599_v1 = vld [vmem:[%s7326_s25 + $0xed8] sm:$0xff]  ;;  %v2308_v30 = vsel %vm597_vm0, %v7877_v31, 0.0 }
 0x2da   :  { %2123 = vmatmul.f32.vlgmr.msrb.gmra.mxu0 %v7504_v2  ;;  %2163 = vmatmul.f32.vlgmr.msrb.gmra.mxu2 %v7477_v39  ;;  %v1419_v3 = vld [vmem:[%s7326_s25 + $0x938] sm:$0xff] }
 0x2db   :  { %2171 = vmatpush.msrb.mxu3 %v1427_v47  ;;  %2187 = vmatpush.msra.mxu0 %v1507_v53  ;;  %v1499_v2 = vld [vmem:[%s7326_s25 + $0xbb8] sm:$0xff]  ;;  %v1784_v53 = vpop.f32.mrf.mxu1 }
 0x2dc   :  { %2210 = vmatpush.msrb.mxu1 %v1559_v57  ;;  %2235 = vmatpush.msra.mxu2 %v1603_v61  ;;  %v1551_v39 = vld [vmem:[%s7326_s25 + $0xd58] sm:$0xff]  ;;  %v1804_v57 = vpop.f32.mrf.mxu2 }
 0x2dd   :  { %2172 = vmatpush.msrb.mxu3 %v1423_v62  ;;  %2188 = vmatpush.msra.mxu0 %v1503_v10  ;;  %v1595_v5 = vld [vmem:[%s7326_s25 + $0xeb8] sm:$0xff]  ;;  %v2258_v10 = vld [vmem:[%s7865_s29 + $0x50] sm:$0xff] }
 0x2de   :  { %2211 = vmatpush.msrb.mxu1 %v1555_v0  ;;  %2236 = vmatpush.msra.mxu2 %v1599_v1  ;;  %v1415_v6 = vld [vmem:[%s7326_s25 + $0x918] sm:$0xff]  ;;  %v2309_v0 = vrot.slane %v2308_v30, 4  ;;  %v1824_v1 = vpop.f32.mrf.mxu3 }
 0x2df   :  { %v1495_v7 = vld [vmem:[%s7326_s25 + $0xb98] sm:$0xff]  ;;  %2173 = vmatpush.msrb.mxu3 %v1419_v3  ;;  %2189 = vmatpush.msra.mxu0 %v1499_v2  ;;  %v1805_v3 = vadd.f32 %v1804_v57, %v1784_v53  ;;  %v2257_v2 = vld [vmem:[%s7865_s29 + $0x48] sm:$0xff] }
 0x2e0   :  { %v1547_v12 = vld [vmem:[%s7326_s25 + $0xd38] sm:$0xff]  ;;  %2212 = vmatpush.msrb.mxu1 %v1551_v39  ;;  %2237 = vmatpush.msra.mxu2 %v1595_v5  ;;  %v2343_v39 = vadd.f32 %v2342_v59, %v2341_v49  ;;  %v2266_v59 = vld [vmem:[%s7865_s29 + $0x90] sm:$0xff] }
 0x2e1   :  { %v1591_v13 = vld [vmem:[%s7326_s25 + $0xe98] sm:$0xff]  ;;  %2174 = vmatpush.msrb.mxu3 %v1415_v6  ;;  %2190 = vmatpush.msra.mxu0 %v1495_v7  ;;  %v1825_v5 = vadd.f32 %v1824_v1, %v1805_v3  ;;  %v2256_v6 = vld [vmem:[%s7865_s29 + $0x40] sm:$0xff]  ;;  %v2310_v7 = vadd.f32 %v2309_v0, %v2308_v30 }
 0x2e2   :  { %v1411_v14 = vld [vmem:[%s7326_s25 + $0x8f8] sm:$0xff]  ;;  %2213 = vmatpush.msrb.mxu1 %v1547_v12  ;;  %2238 = vmatpush.msra.mxu2 %v1591_v13  ;;  %v2276_v13 = vld [vmem:[%s7865_s29 + $0xe0] sm:$0xff] }
 0x2e3   :  { %v1491_v15 = vld [vmem:[%s7326_s25 + $0xb78] sm:$0xff]  ;;  %2175 = vmatpush.msrb.mxu3 %v1411_v14 }
 0x2e4   :  { %v1543_v16 = vld [vmem:[%s7326_s25 + $0xd18] sm:$0xff]  ;;  %2191 = vmatpush.msra.mxu0 %v1491_v15 }
 0x2e5   :  { %v1587_v17 = vld [vmem:[%s7326_s25 + $0xe78] sm:$0xff]  ;;  %2214 = vmatpush.msrb.mxu1 %v1543_v16  ;;  %v2344_v16 = vrot.slane %v2343_v39, 2 }
 0x2e6   :  { %v1407_v19 = vld [vmem:[%s7326_s25 + $0x8d8] sm:$0xff]  ;;  %2239 = vmatpush.msra.mxu2 %v1587_v17  ;;  %v1845_v17 = vadd.f32 %v1844_v8, %v1825_v5  ;;  %v2292_v5 = vld [vmem:[%s7865_s29 + $0x160] sm:$0xff]  ;;  %v2289_v8 = vld [vmem:[%s7865_s29 + $0x148] sm:$0xff] }
 0x2e7   :  { %v1487_v20 = vld [vmem:[%s7326_s25 + $0xb58] sm:$0xff]  ;;  %2176 = vmatpush.msrb.mxu3 %v1407_v19 }
 0x2e8   :  { %v1539_v22 = vld [vmem:[%s7326_s25 + $0xcf8] sm:$0xff]  ;;  %2192 = vmatpush.msra.mxu0 %v1487_v20  ;;  %v2311_v20 = vrot.slane %v2310_v7, 2 }
 0x2e9   :  { %v1583_v23 = vld [vmem:[%s7326_s25 + $0xe58] sm:$0xff]  ;;  %2215 = vmatpush.msrb.mxu1 %v1539_v22 }
 0x2ea   :  { %v1403_v24 = vld [vmem:[%s7326_s25 + $0x8b8] sm:$0xff]  ;;  %2240 = vmatpush.msra.mxu2 %v1583_v23  ;;  %v2253_v23 = vld [vmem:[%s7865_s29 + $0x28] sm:$0xff]  ;;  %v2312_v28 = vadd.f32 %v2311_v20, %v2310_v7  ;;  %v2290_v7 = vld [vmem:[%s7865_s29 + $0x150] sm:$0xff] }
 0x2eb   :  { %v1483_v25 = vld [vmem:[%s7326_s25 + $0xb38] sm:$0xff]  ;;  %2177 = vmatpush.msrb.mxu3 %v1403_v24  ;;  %v2345_v24 = vadd.f32 %v2344_v16, %v2343_v39  ;;  %v2293_v39 = vld [vmem:[%s7865_s29 + $0x168] sm:$0xff] }
 0x2ec   :  { %v1535_v26 = vld [vmem:[%s7326_s25 + $0xcd8] sm:$0xff]  ;;  %2193 = vmatpush.msra.mxu0 %v1483_v25  ;;  %v2273_v25 = vld [vmem:[%s7865_s29 + $0xc8] sm:$0xff] }
 0x2ed   :  { %v1579_v27 = vld [vmem:[%s7326_s25 + $0xe38] sm:$0xff]  ;;  %2216 = vmatpush.msrb.mxu1 %v1535_v26  ;;  %v2252_v26 = vld [vmem:[%s7865_s29 + $0x20] sm:$0xff] }
 0x2ee   :  { %v1399_v29 = vld [vmem:[%s7326_s25 + $0x898] sm:$0xff]  ;;  %2241 = vmatpush.msra.mxu2 %v1579_v27  ;;  %v1884_v19 = vpop.f32.mrf.mxu2 }
 0x2ef   :  { %v1479_v34 = vld [vmem:[%s7326_s25 + $0xb18] sm:$0xff]  ;;  %2178 = vmatpush.msrb.mxu3 %v1399_v29  ;;  %v2272_v29 = vld [vmem:[%s7865_s29 + $0xc0] sm:$0xff] }
 0x2f0   :  { %v1531_v32 = vld [vmem:[%s7326_s25 + $0xcb8] sm:$0xff]  ;;  %2194 = vmatpush.msra.mxu0 %v1479_v34 }
 0x2f1   :  { %v1575_v33 = vld [vmem:[%s7326_s25 + $0xe18] sm:$0xff]  ;;  %2217 = vmatpush.msrb.mxu1 %v1531_v32 }
 0x2f2   :  { %v1395_v35 = vld [vmem:[%s7326_s25 + $0x878] sm:$0xff]  ;;  %2242 = vmatpush.msra.mxu2 %v1575_v33  ;;  %v1924_v33 = vpop.f32.mrf.mxu0 }
 0x2f3   :  { %v2263_v36 = vld [vmem:[%s7865_s29 + $0x78] sm:$0xff]  ;;  %6446 = vmatmul.msk.f32.vlgmr.msra.gmra.mxu2 %vm728_vm3, %v7490_v63  ;;  %2179 = vmatpush.msrb.mxu3 %v1395_v35  ;;  %v2346_v35 = vrot.slane %v2345_v24, 1 }
 0x2f4   :  { %v1475_v37 = vld [vmem:[%s7326_s25 + $0xaf8] sm:$0xff]  ;;  %2376 = vmatpush.msrb.mxu2 %v2263_v36 }
 0x2f5   :  { %v1527_v38 = vld [vmem:[%s7326_s25 + $0xc98] sm:$0xff]  ;;  %2195 = vmatpush.msra.mxu0 %v1475_v37  ;;  %v2250_v37 = vld [vmem:[%s7865_s29 + $0x10] sm:$0xff] }
 0x2f6   :  { %v1391_v41 = vld [vmem:[%s7326_s25 + $0x858] sm:$0xff]  ;;  %2218 = vmatpush.msrb.mxu1 %v1527_v38  ;;  %2377 = vmatpush.msrb.mxu2 %v2262_v43  ;;  %v2249_v43 = vld [vmem:[%s7865_s29 + $0x8] sm:$0xff] }
 0x2f7   :  { %v1471_v44 = vld [vmem:[%s7326_s25 + $0xad8] sm:$0xff]  ;;  %2180 = vmatpush.msrb.mxu3 %v1391_v41  ;;  %v2313_v41 = vrot.slane %v2312_v28, 1 }
 0x2f8   :  { %v1523_v9 = vld [vmem:[%s7326_s25 + $0xc78] sm:$0xff]  ;;  %2196 = vmatpush.msra.mxu0 %v1471_v44  ;;  %2378 = vmatpush.msrb.mxu2 %v2261_v46  ;;  %v2347_v46 = vadd.f32 %v2346_v35, %v2345_v24 }
 0x2f9   :  { %v1387_v45 = vld [vmem:[%s7326_s25 + $0x838] sm:$0xff]  ;;  %2219 = vmatpush.msrb.mxu1 %v1523_v9 }
 0x2fa   :  { %v1467_v55 = vld [vmem:[%s7326_s25 + $0xab8] sm:$0xff]  ;;  %2181 = vmatpush.msrb.mxu3 %v1387_v45  ;;  %2379 = vmatpush.msrb.mxu2 %v2260_v50 }
 0x2fb   :  { %v1519_v48 = vld [vmem:[%s7326_s25 + $0xc58] sm:$0xff]  ;;  %2197 = vmatpush.msra.mxu0 %v1467_v55  ;;  %v2269_v55 = vld [vmem:[%s7865_s29 + $0xa8] sm:$0xff] }
 0x2fc   :  { %v1383_v63 = vld [vmem:[%s7326_s25 + $0x818] sm:$0xff]  ;;  %2220 = vmatpush.msrb.mxu1 %v1519_v48  ;;  %v2248_v48 = vld [vmem:[%s7865_s29] sm:$0xff] }
 0x2fd   :  { %v1463_v51 = vld [vmem:[%s7326_s25 + $0xa98] sm:$0xff]  ;;  %2182 = vmatpush.msrb.mxu3 %v1383_v63 }
 0x2fe   :  { %v1515_v52 = vld [vmem:[%s7326_s25 + $0xc38] sm:$0xff]  ;;  %2198 = vmatpush.msra.mxu0 %v1463_v51  ;;  %2183 = vmatmul.f32.vlgmr.msrb.gmra.mxu3 %v7502_v11  ;;  %v2277_v11 = vld [vmem:[%s7865_s29 + $0xe8] sm:$0xff]  ;;  %v2314_v51 = vadd.f32 %v2313_v41, %v2312_v28 }
 0x2ff   :  { %v2259_v54 = vld [vmem:[%s7865_s29 + $0x58] sm:$0xff]  ;;  %2221 = vmatpush.msrb.mxu1 %v1515_v52  ;;  %v2268_v52 = vld [vmem:[%s7865_s29 + $0xa0] sm:$0xff] }
 0x300   :  { %v1459_v47 = vld [vmem:[%s7326_s25 + $0xa78] sm:$0xff]  ;;  %2380 = vmatpush.msrb.mxu2 %v2259_v54 }
 0x301   :  { %v1511_v61 = vld [vmem:[%s7326_s25 + $0xc18] sm:$0xff]  ;;  %2199 = vmatpush.msra.mxu0 %v1459_v47  ;;  %v2369_v47 = vsel %vm719_vm1, %v2314_v51, %v2347_v46 }
 0x302   :  { %v2279_v62 = vld [vmem:[%s7865_s29 + $0xf8] sm:$0xff]  ;;  %2222 = vmatpush.msrb.mxu1 %v1511_v61  ;;  %2381 = vmatpush.msrb.mxu2 %v2258_v10 }
 0x303   :  { %v1455_v40 = vld [vmem:[%s7326_s25 + $0xa58] sm:$0xff]  ;;  %2396 = vmatpush.msra.mxu3 %v2279_v62  ;;  %2223 = vmatmul.f32.vlgmr.msrb.gmra.mxu1 %v7544_v60  ;;  %v1864_v60 = vpop.f32.mrf.mxu1  ;;  %v2265_v62 = vld [vmem:[%s7865_s29 + $0x88] sm:$0xff] }
 0x304   :  { %v1451_v4 = vld [vmem:[%s7326_s25 + $0xa38] sm:$0xff]  ;;  %2200 = vmatpush.msra.mxu0 %v1455_v40  ;;  %2382 = vmatpush.msrb.mxu2 %v2257_v2  ;;  %v1865_v22 = vadd.f32 %v1864_v60, %v1845_v17  ;;  %v2264_v40 = vld [vmem:[%s7865_s29 + $0x80] sm:$0xff]  ;;  %v2285_v60 = vld [vmem:[%s7865_s29 + $0x128] sm:$0xff] }
 0x305   :  { %2397 = vmatpush.msra.mxu3 %v2278_v56  ;;  %v1447_v12 = vld [vmem:[%s7326_s25 + $0xa18] sm:$0xff]  ;;  %s8170_s25 = sld [smem:[%s9533_s0 + %s6912_s22]]   ;;  %s6928_s22 = smov 25  }
 0x306   :  { %2201 = vmatpush.msra.mxu0 %v1451_v4  ;;  %v2255_v14 = vld [vmem:[%s7865_s29 + $0x38] sm:$0xff]  ;;  %2383 = vmatpush.msrb.mxu2 %v2256_v6  ;;  %v1885_v27 = vadd.f32 %v1884_v19, %v1865_v22  ;;  %v2294_v4 = vld [vmem:[%s7865_s29 + $0x170] sm:$0xff]  ;;  %v2281_v22 = vld [vmem:[%s7865_s29 + $0x108] sm:$0xff]  ;;  %s8283_s27 = sld [smem:[%s9533_s0 + %s6928_s22]]  }
 0x307   :  { %2398 = vmatpush.msra.mxu3 %v2277_v11  ;;  %v2275_v15 = vld [vmem:[%s7865_s29 + $0xd8] sm:$0xff] }
 0x308   :  { %2202 = vmatpush.msra.mxu0 %v1447_v12  ;;  %2384 = vmatpush.msrb.mxu2 %v2255_v14  ;;  %v2251_v34 = vld [vmem:[%s7865_s29 + $0x18] sm:$0xff]  ;;  %v2288_v12 = vld [vmem:[%s7865_s29 + $0x140] sm:$0xff]  ;;  %v2286_v14 = vld [vmem:[%s7865_s29 + $0x130] sm:$0xff] }
 0x309   :  { %2399 = vmatpush.msra.mxu3 %v2276_v13  ;;  %2203 = vmatmul.f32.vlgmr.msra.gmra.mxu0 %v7542_v58  ;;  %v1904_v58 = vpop.f32.mrf.mxu3  ;;  %v2271_v36 = vld [vmem:[%s7865_s29 + $0xb8] sm:$0xff] }
 0x30a   :  { %2385 = vmatpush.msrb.mxu2 %v2254_v18  ;;  %v1905_v32 = vadd.f32 %v1904_v58, %v1885_v27  ;;  %v2267_v53 = vld [vmem:[%s7865_s29 + $0x98] sm:$0xff]  ;;  %v1944_v17 = vpop.f32.mrf.mxu0  ;;  %v2282_v18 = vld [vmem:[%s7865_s29 + $0x110] sm:$0xff] }
 0x30b   :  { %2400 = vmatpush.msra.mxu3 %v2275_v15  ;;  %v2295_v1 = vld [vmem:[%s7865_s29 + $0x178] sm:$0xff]  ;;  %v2284_v15 = vld [vmem:[%s7865_s29 + $0x120] sm:$0xff]  ;;  %v1964_v19 = vpop.f32.mrf.mxu1 }
 0x30c   :  { %2386 = vmatpush.msrb.mxu2 %v2253_v23  ;;  %v7931_v38 = vadd.f32 %v1924_v33, %v1905_v32  ;;  %2416 = vmatpush.msrb.mxu0 %v2295_v1  ;;  %v2291_v6 = vld [vmem:[%s7865_s29 + $0x158] sm:$0xff] }
 0x30d   :  { %2401 = vmatpush.msra.mxu3 %v2274_v21  ;;  %v2287_v13 = vld [vmem:[%s7865_s29 + $0x138] sm:$0xff]  ;;  %v1965_v21 = vadd.f32 %v1964_v19, %v1944_v17 }
 0x30e   :  { %2387 = vmatpush.msrb.mxu2 %v2252_v26  ;;  %v2315_v44 = vsel %vm597_vm0, %v7931_v38, 0.0  ;;  %v2338_v9 = vmul.f32 %v7931_v38, %v7931_v38  ;;  %2417 = vmatpush.msrb.mxu0 %v2294_v4  ;;  %v2283_v16 = vld [vmem:[%s7865_s29 + $0x118] sm:$0xff] }
 0x30f   :  { %2402 = vmatpush.msra.mxu3 %v2273_v25  ;;  %v2316_v45 = vrot.slane %v2315_v44, 4  ;;  %v2280_v25 = vld [vmem:[%s7865_s29 + $0x100] sm:$0xff] }
 0x310   :  { %2388 = vmatpush.msrb.mxu2 %v2251_v34  ;;  %v2348_v63 = vsel %vm597_vm0, %v2338_v9, 0.0  ;;  %2418 = vmatpush.msrb.mxu0 %v2293_v39  ;;  %v1984_v20 = vpop.f32.mrf.mxu2 }
 0x311   :  { %2403 = vmatpush.msra.mxu3 %v2272_v29  ;;  %v2317_v49 = vadd.f32 %v2316_v45, %v2315_v44  ;;  %v2349_v50 = vrot.slane %v2348_v63, 4  ;;  %v1985_v24 = vadd.f32 %v1984_v20, %v1965_v21 }
 0x312   :  { %2389 = vmatpush.msrb.mxu2 %v2250_v37  ;;  %2419 = vmatpush.msrb.mxu0 %v2292_v5 }
 0x313   :  { %2404 = vmatpush.msra.mxu3 %v2271_v36  ;;  %v2318_v30 = vrot.slane %v2317_v49, 2  ;;  %v2350_v54 = vadd.f32 %v2349_v50, %v2348_v63 }
 0x314   :  { %2390 = vmatpush.msrb.mxu2 %v2249_v43  ;;  %2420 = vmatpush.msrb.mxu0 %v2291_v6 }
 0x315   :  { %2405 = vmatpush.msra.mxu3 %v2270_v42  ;;  %v2319_v57 = vadd.f32 %v2318_v30, %v2317_v49  ;;  %v2351_v61 = vrot.slane %v2350_v54, 2  ;;  %v2299_v30 = vld [vmem:[%s7865_s29 + $0x198] sm:$0xff] }
 0x316   :  { %2391 = vmatpush.msrb.mxu2 %v2248_v48  ;;  %2421 = vmatpush.msrb.mxu0 %v2290_v7 }
 0x317   :  { %2406 = vmatpush.msra.mxu3 %v2269_v55  ;;  %2392 = vmatmul.f32.vlgmr.msrb.gmra.mxu2 %v2369_v47  ;;  %v2320_v10 = vrot.slane %v2319_v57, 1  ;;  %v2352_v0 = vadd.f32 %v2351_v61, %v2350_v54  ;;  %v2298_v54 = vld [vmem:[%s7865_s29 + $0x190] sm:$0xff]  ;;  %v2297_v47 = vld [vmem:[%s7865_s29 + $0x188] sm:$0xff] }
 0x318   :  { %2422 = vmatpush.msrb.mxu0 %v2289_v8  ;;  %2448 = vmatpush.msra.mxu1 %v2299_v30  ;;  %v2650_v30 = vld [vmem:[%s8000_s7 + $0x1f0] sm:$0xff] }
 0x319   :  { %2407 = vmatpush.msra.mxu3 %v2268_v52  ;;  %v2353_v56 = vrot.slane %v2352_v0, 1  ;;  %v2321_v3 = vadd.f32 %v2320_v10, %v2319_v57  ;;  %v2004_v23 = vpop.f32.mrf.mxu3  ;;  %v2296_v57 = vld [vmem:[%s7865_s29 + $0x180] sm:$0xff] }
 0x31a   :  { %2423 = vmatpush.msrb.mxu0 %v2288_v12  ;;  %v2005_v26 = vadd.f32 %v2004_v23, %v1985_v24  ;;  %2449 = vmatpush.msra.mxu1 %v2298_v54 }
 0x31b   :  { %2408 = vmatpush.msra.mxu3 %v2267_v53  ;;  %v2354_v2 = vadd.f32 %v2353_v56, %v2352_v0 }
 0x31c   :  { %2424 = vmatpush.msrb.mxu0 %v2287_v13  ;;  %2450 = vmatpush.msra.mxu1 %v2297_v47  ;;  %v2614_v47 = vld [vmem:[%s8000_s7 + $0xd0] sm:$0xff] }
 0x31d   :  { %2409 = vmatpush.msra.mxu3 %v2266_v59  ;;  %v2370_v11 = vsel %vm719_vm1, %v2321_v3, %v2354_v2 }
 0x31e   :  { %2425 = vmatpush.msrb.mxu0 %v2286_v14  ;;  %2451 = vmatpush.msra.mxu1 %v2296_v57  ;;  %v2247_v57 = vld [vmem:[%s6402_s11] sm:$0x3]  ;;  %s8248_s11 = sld [smem:[%s9533_s0 + %s6925_s8]]  }
 0x31f   :  { %2410 = vmatpush.msra.mxu3 %v2265_v62 }
 0x320   :  { %2426 = vmatpush.msrb.mxu0 %v2285_v60 }
 0x321   :  { %2411 = vmatpush.msra.mxu3 %v2264_v40 }
 0x322   :  { %2412 = vmatmul.f32.vlgmr.msra.gmra.mxu3 %v2370_v11  ;;  %2427 = vmatpush.msrb.mxu0 %v2284_v15 }
 0x324   :  { %2428 = vmatpush.msrb.mxu0 %v2283_v16 }
 0x326   :  { %2429 = vmatpush.msrb.mxu0 %v2282_v18 }
 0x328   :  { %2430 = vmatpush.msrb.mxu0 %v2281_v22 }
 0x32a   :  { %2431 = vmatpush.msrb.mxu0 %v2280_v25 }
 0x32c   :  { %2715 = vmatpush.msra.mxu0 %v2650_v30  ;;  %v2641_v30 = vld [vmem:[%s8000_s7 + $0x1a8] sm:$0xff] }
 0x32e   :  { %v2044_v28 = vpop.f32.mrf.mxu1 }
 0x332   :  { %v2084_v33 = vpop.f32.mrf.mxu3 }
 0x335   :  { %v2024_v27 = vpop.f32.mrf.mxu0 }
 0x336   :  { %v2025_v58 = vadd.f32 %v2024_v27, %v2005_v26 }
 0x338   :  { %v2045_v29 = vadd.f32 %v2044_v28, %v2025_v58 }
 0x33b   :  { %v2064_v34 = vpop.f32.mrf.mxu2 }
 0x33c   :  { %v2065_v32 = vadd.f32 %v2064_v34, %v2045_v29 }
 0x33e   :  { %v7965_v35 = vadd.f32 %v2084_v33, %v2065_v32 }
 0x340   :  { %v2322_v36 = vsel %vm597_vm0, %v7965_v35, 0.0  ;;  %v2339_v37 = vmul.f32 %v7965_v35, %v7965_v35 }
 0x341   :  { %v2323_v41 = vrot.slane %v2322_v36, 4 }
 0x342   :  { %v2355_v42 = vsel %vm597_vm0, %v2339_v37, 0.0  ;;  %v2307_v37 = vld [vmem:[%s7989_s3 + $0x38] sm:$0xff] }
 0x343   :  { %v2324_v43 = vadd.f32 %v2323_v41, %v2322_v36  ;;  %v2356_v44 = vrot.slane %v2355_v42, 4  ;;  %v2304_v36 = vld [vmem:[%s7989_s3 + $0x20] sm:$0xff]  ;;  %2562 = vmatpush.msra.mxu2 %v2307_v37  ;;  %v2613_v37 = vld [vmem:[%s8000_s7 + $0xc8] sm:$0xff] }
 0x344   :  { %2502 = vmatpush.msrb.mxu1 %v2304_v36  ;;  %v2626_v36 = vld [vmem:[%s8000_s7 + $0x130] sm:$0xff] }
 0x345   :  { %v2325_v9 = vrot.slane %v2324_v43, 2  ;;  %v2357_v45 = vadd.f32 %v2356_v44, %v2355_v42  ;;  %v2300_v42 = vld [vmem:[%s7989_s3] sm:$0xff] }
 0x346   :  { %2503 = vmatpush.msrb.mxu1 %v2300_v42  ;;  %v2678_v42 = vld [vmem:[%s8000_s7 + $0x2d0] sm:$0xff] }
 0x347   :  { %v2326_v46 = vadd.f32 %v2325_v9, %v2324_v43  ;;  %v2358_v55 = vrot.slane %v2357_v45, 2  ;;  %v2303_v43 = vld [vmem:[%s7989_s3 + $0x18] sm:$0xff]  ;;  %v2305_v9 = vld [vmem:[%s7989_s3 + $0x28] sm:$0xff] }
 0x348   :  { %2563 = vmatpush.msra.mxu2 %v2303_v43  ;;  %v2624_v43 = vld [vmem:[%s8000_s7 + $0x120] sm:$0xff] }
 0x349   :  { %v2327_v48 = vrot.slane %v2326_v46, 1  ;;  %v2359_v63 = vadd.f32 %v2358_v55, %v2357_v45  ;;  %v2301_v45 = vld [vmem:[%s7989_s3 + $0x8] sm:$0xff] }
 0x34b   :  { %v2360_v49 = vrot.slane %v2359_v63, 1  ;;  %v2328_v50 = vadd.f32 %v2327_v48, %v2326_v46 }
 0x34d   :  { %v2361_v51 = vadd.f32 %v2360_v49, %v2359_v63 }
 0x34f   :  { %v2371_v52 = vsel %vm719_vm1, %v2328_v50, %v2361_v51  ;;  %v2618_v51 = vld [vmem:[%s8000_s7 + $0xf0] sm:$0xff] }
 0x350   :  { %2432 = vmatmul.f32.vlgmr.msrb.gmra.mxu0 %v2371_v52  ;;  %v2144_v62 = vpop.f32.mrf.mxu1  ;;  %v2616_v52 = vld [vmem:[%s8000_s7 + $0xe0] sm:$0xff]  ;;  %2695 = vmatpush.msrb.mxu3 %v2618_v51  ;;  %v2643_v51 = vld [vmem:[%s8000_s7 + $0x1b8] sm:$0xff] }
 0x352   :  { %2696 = vmatpush.msrb.mxu3 %v2616_v52  ;;  %v2679_v52 = vld [vmem:[%s8000_s7 + $0x2d8] sm:$0xff] }
 0x354   :  { %v2104_v59 = vpop.f32.mrf.mxu3  ;;  %2697 = vmatpush.msrb.mxu3 %v2614_v47  ;;  %v2676_v47 = vld [vmem:[%s8000_s7 + $0x2c0] sm:$0xff] }
 0x357   :  { %v2124_v53 = vpop.f32.mrf.mxu0 }
 0x358   :  { %v2125_v61 = vadd.f32 %v2124_v53, %v2104_v59  ;;  %v2648_v53 = vld [vmem:[%s8000_s7 + $0x1e0] sm:$0xff]  ;;  %v2646_v59 = vld [vmem:[%s8000_s7 + $0x1d0] sm:$0xff] }
 0x359   :  { %2716 = vmatpush.msra.mxu0 %v2648_v53  ;;  %v2611_v53 = vld [vmem:[%s8000_s7 + $0xb8] sm:$0xff] }
 0x35a   :  { %v2145_v0 = vadd.f32 %v2144_v62, %v2125_v61  ;;  %v2612_v62 = vld [vmem:[%s8000_s7 + $0xc0] sm:$0xff] }
 0x35b   :  { %2717 = vmatpush.msra.mxu0 %v2646_v59  ;;  %2698 = vmatpush.msrb.mxu3 %v2612_v62  ;;  %v2637_v59 = vld [vmem:[%s8000_s7 + $0x188] sm:$0xff] }
 0x35c   :  { %v2609_v62 = vld [vmem:[%s8000_s7 + $0xa8] sm:$0xff] }
 0x35d   :  { %v2164_v10 = vpop.f32.mrf.mxu2 }
 0x35e   :  { %v2165_v1 = vadd.f32 %v2164_v10, %v2145_v0  ;;  %v2644_v0 = vld [vmem:[%s8000_s7 + $0x1c0] sm:$0xff] }
 0x35f   :  { %2718 = vmatpush.msra.mxu0 %v2644_v0  ;;  %v2675_v0 = vld [vmem:[%s8000_s7 + $0x2b8] sm:$0xff] }
 0x376   :  { %v2244_v39 = vpop.f32.mrf.mxu2 }
 0x380   :  { %v2224_v4 = vpop.f32.mrf.mxu1 }
 0x381   :  { %v2184_v40 = vpop.f32.mrf.mxu3 }
 0x382   :  { %v2185_v56 = vadd.f32 %v2184_v40, %v2165_v1  ;;  %v2610_v1 = vld [vmem:[%s8000_s7 + $0xb0] sm:$0xff] }
 0x383   :  { %2699 = vmatpush.msrb.mxu3 %v2610_v1  ;;  %v2672_v1 = vld [vmem:[%s8000_s7 + $0x2a0] sm:$0xff] }
 0x386   :  { %v2204_v3 = vpop.f32.mrf.mxu0 }
 0x387   :  { %v2205_v2 = vadd.f32 %v2204_v3, %v2185_v56  ;;  %v2642_v56 = vld [vmem:[%s8000_s7 + $0x1b0] sm:$0xff]  ;;  %v2608_v3 = vld [vmem:[%s8000_s7 + $0xa0] sm:$0xff] }
 0x388   :  { %2719 = vmatpush.msra.mxu0 %v2642_v56  ;;  %2700 = vmatpush.msrb.mxu3 %v2608_v3  ;;  %v2633_v56 = vld [vmem:[%s8000_s7 + $0x168] sm:$0xff] }
 0x389   :  { %v2225_v11 = vadd.f32 %v2224_v4, %v2205_v2  ;;  %v2640_v4 = vld [vmem:[%s8000_s7 + $0x1a0] sm:$0xff]  ;;  %v2673_v3 = vld [vmem:[%s8000_s7 + $0x2a8] sm:$0xff] }
 0x38a   :  { %2720 = vmatpush.msra.mxu0 %v2640_v4  ;;  %v2605_v4 = vld [vmem:[%s8000_s7 + $0x88] sm:$0xff] }
 0x38b   :  { %v7977_v5 = vadd.f32 %v2244_v39, %v2225_v11  ;;  %v2690_v11 = vld [vmem:[%s8000_s7 + $0x330] sm:$0xff] }
 0x38c   :  { %v2606_v39 = vld [vmem:[%s8000_s7 + $0x90] sm:$0xff]  ;;  %2767 = vmatpush.msrb.mxu2 %v2690_v11  ;;  %v2631_v11 = vld [vmem:[%s8000_s7 + $0x158] sm:$0xff] }
 0x38d   :  { %v2330_v6 = vsel %vm2329_vm8, %v7977_v5, 0.0  ;;  %v2340_v7 = vmul.f32 %v7977_v5, %v7977_v5  ;;  %2701 = vmatpush.msrb.mxu3 %v2606_v39  ;;  %v2671_v39 = vld [vmem:[%s8000_s7 + $0x298] sm:$0xff] }
 0x38e   :  { %v2331_v8 = vrot.slane %v2330_v6, 4 }
 0x38f   :  { %v2362_v12 = vsel %vm2329_vm8, %v2340_v7, 0.0 }
 0x390   :  { %v2332_v13 = vadd.f32 %v2331_v8, %v2330_v6  ;;  %v2363_v14 = vrot.slane %v2362_v12, 4  ;;  %v2688_v6 = vld [vmem:[%s8000_s7 + $0x320] sm:$0xff]  ;;  %v2638_v8 = vld [vmem:[%s8000_s7 + $0x190] sm:$0xff] }
 0x391   :  { %2768 = vmatpush.msrb.mxu2 %v2688_v6  ;;  %2721 = vmatpush.msra.mxu0 %v2638_v8  ;;  %v2668_v6 = vld [vmem:[%s8000_s7 + $0x280] sm:$0xff]  ;;  %v2629_v8 = vld [vmem:[%s8000_s7 + $0x148] sm:$0xff] }
 0x392   :  { %v2333_v60 = vrot.slane %v2332_v13, 2  ;;  %v2364_v15 = vadd.f32 %v2363_v14, %v2362_v12  ;;  %v2686_v12 = vld [vmem:[%s8000_s7 + $0x310] sm:$0xff] }
 0x393   :  { %2769 = vmatpush.msrb.mxu2 %v2686_v12  ;;  %v2669_v12 = vld [vmem:[%s8000_s7 + $0x288] sm:$0xff] }
 0x394   :  { %v2334_v16 = vadd.f32 %v2333_v60, %v2332_v13  ;;  %v2365_v17 = vrot.slane %v2364_v15, 2  ;;  %v2604_v13 = vld [vmem:[%s8000_s7 + $0x80] sm:$0xff]  ;;  %v2306_v60 = vld [vmem:[%s7989_s3 + $0x30] sm:$0xff] }
 0x395   :  { %2702 = vmatpush.msrb.mxu3 %v2604_v13  ;;  %v2666_v13 = vld [vmem:[%s8000_s7 + $0x270] sm:$0xff] }
 0x396   :  { %v2335_v18 = vrot.slane %v2334_v16, 1  ;;  %v2366_v19 = vadd.f32 %v2365_v17, %v2364_v15  ;;  %v2602_v15 = vld [vmem:[%s8000_s7 + $0x70] sm:$0xff]  ;;  %v2636_v17 = vld [vmem:[%s8000_s7 + $0x180] sm:$0xff] }
 0x397   :  { %2703 = vmatpush.msrb.mxu3 %v2602_v15  ;;  %2722 = vmatpush.msra.mxu0 %v2636_v17  ;;  %v2667_v15 = vld [vmem:[%s8000_s7 + $0x278] sm:$0xff] }
 0x398   :  { %v2367_v20 = vrot.slane %v2366_v19, 1  ;;  %v2336_v21 = vadd.f32 %v2335_v18, %v2334_v16  ;;  %v2684_v18 = vld [vmem:[%s8000_s7 + $0x300] sm:$0xff]  ;;  %v2599_v17 = vld [vmem:[%s8000_s7 + $0x58] sm:$0xff] }
 0x399   :  { %2770 = vmatpush.msrb.mxu2 %v2684_v18  ;;  %v2625_v18 = vld [vmem:[%s8000_s7 + $0x128] sm:$0xff] }
 0x39a   :  { %v2368_v22 = vadd.f32 %v2367_v20, %v2366_v19  ;;  %v2393_v25 = vpop.f32.mrf.mxu2  ;;  %v2302_v19 = vld [vmem:[%s7989_s3 + $0x10] sm:$0xff]  ;;  %v2600_v20 = vld [vmem:[%s8000_s7 + $0x60] sm:$0xff] }
 0x39b   :  { %2704 = vmatpush.msrb.mxu3 %v2600_v20  ;;  %v2662_v20 = vld [vmem:[%s8000_s7 + $0x250] sm:$0xff] }
 0x39c   :  { %v2372_v23 = vsel %vm719_vm1, %v2336_v21, %v2368_v22  ;;  %v2634_v21 = vld [vmem:[%s8000_s7 + $0x170] sm:$0xff]  ;;  %v2619_v22 = vld [vmem:[%s8000_s7 + $0xf8] sm:$0xff] }
 0x39d   :  { %6447 = vmatmul.msk.f32.vlgmr.msra.gmra.mxu1 %vm920_vm7, %v2372_v23  ;;  %v2598_v23 = vld [vmem:[%s8000_s7 + $0x50] sm:$0xff]  ;;  %2723 = vmatpush.msra.mxu0 %v2634_v21  ;;  %v2597_v21 = vld [vmem:[%s8000_s7 + $0x48] sm:$0xff] }
 0x39e   :  { %2522 = vmatpush.msra.mxu1 %v2305_v9  ;;  %2705 = vmatpush.msrb.mxu3 %v2598_v23  ;;  %v2651_v9 = vld [vmem:[%s8000_s7 + $0x1f8] sm:$0xff] }
 0x39f   :  { %v2663_v23 = vld [vmem:[%s8000_s7 + $0x258] sm:$0xff] }
 0x3a0   :  { %2523 = vmatpush.msra.mxu1 %v2301_v45  ;;  %v2622_v45 = vld [vmem:[%s8000_s7 + $0x110] sm:$0xff] }
 0x3a5   :  { %v2413_v24 = vpop.f32.mrf.mxu3 }
 0x3a6   :  { %v2414_v27 = vadd.f32 %v2413_v24, %v2393_v25  ;;  %v2632_v24 = vld [vmem:[%s8000_s7 + $0x160] sm:$0xff]  ;;  %v2617_v25 = vld [vmem:[%s8000_s7 + $0xe8] sm:$0xff] }
 0x3a7   :  { %2724 = vmatpush.msra.mxu0 %v2632_v24  ;;  %v2660_v24 = vld [vmem:[%s8000_s7 + $0x240] sm:$0xff] }
 0x3cd   :  { %v2433_v26 = vpop.f32.mrf.mxu0 }
 0x3ce   :  { %v2434_v58 = vadd.f32 %v2433_v26, %v2414_v27  ;;  %v2596_v26 = vld [vmem:[%s8000_s7 + $0x40] sm:$0xff]  ;;  %v2630_v27 = vld [vmem:[%s8000_s7 + $0x150] sm:$0xff] }
 0x3cf   :  { %2706 = vmatpush.msrb.mxu3 %v2596_v26  ;;  %2725 = vmatpush.msra.mxu0 %v2630_v27  ;;  %v2621_v26 = vld [vmem:[%s8000_s7 + $0x108] sm:$0xff] }
 0x3d0   :  { %v2661_v27 = vld [vmem:[%s8000_s7 + $0x248] sm:$0xff] }
 0x41a   :  { %v2453_v28 = vpop.f32.mrf.mxu1 }
 0x41b   :  { %v2454_v29 = vadd.f32 %v2453_v28, %v2434_v58  ;;  %v2594_v58 = vld [vmem:[%s8000_s7 + $0x30] sm:$0xff] }
 0x41c   :  { %v2682_v28 = vld [vmem:[%s8000_s7 + $0x2f0] sm:$0xff]  ;;  %2707 = vmatpush.msrb.mxu3 %v2594_v58 }
 0x41d   :  { %v2456_v34 = vmul.f32 0.01923077, %v2454_v29  ;;  %v2628_v29 = vld [vmem:[%s8000_s7 + $0x140] sm:$0xff]  ;;  %v2658_v58 = vld [vmem:[%s8000_s7 + $0x230] sm:$0xff] }
 0x41e   :  { %2726 = vmatpush.msra.mxu0 %v2628_v29  ;;  %v2659_v29 = vld [vmem:[%s8000_s7 + $0x238] sm:$0xff] }
 0x41f   :  { %v2457_v32 = vmul.f32 %v2456_v34, %v2456_v34 }
 0x420   :  { %2727 = vmatpush.msra.mxu0 %v2626_v36  ;;  %v2654_v36 = vld [vmem:[%s8000_s7 + $0x210] sm:$0xff] }
 0x421   :  { %v2459_v33 = vrot.slane %v2457_v32, 7  ;;  %v2592_v32 = vld [vmem:[%s8000_s7 + $0x20] sm:$0xff] }
 0x422   :  { %2708 = vmatpush.msrb.mxu3 %v2592_v32  ;;  %2728 = vmatpush.msra.mxu0 %v2624_v43  ;;  %v2591_v32 = vld [vmem:[%s8000_s7 + $0x18] sm:$0xff]  ;;  %v2653_v43 = vld [vmem:[%s8000_s7 + $0x208] sm:$0xff] }
 0x423   :  { %v2461_v41 = vsub.f32 %v2456_v34, %v2459_v33  ;;  %v2680_v33 = vld [vmem:[%s8000_s7 + $0x2e0] sm:$0xff] }
 0x424   :  { %2729 = vmatpush.msra.mxu0 %v2622_v45  ;;  %v2687_v45 = vld [vmem:[%s8000_s7 + $0x318] sm:$0xff] }
 0x425   :  { %v2462_v44 = vmax.f32 %v2461_v41, 0.0  ;;  %v2590_v41 = vld [vmem:[%s8000_s7 + $0x10] sm:$0xff] }
 0x426   :  { %2709 = vmatpush.msrb.mxu3 %v2590_v41  ;;  %v2655_v41 = vld [vmem:[%s8000_s7 + $0x218] sm:$0xff] }
 0x427   :  { %v2463_v46 = vadd.f32 1e-05, %v2462_v44  ;;  %v2588_v44 = vld [vmem:[%s8000_s7] sm:$0xff] }
 0x428   :  { %2710 = vmatpush.msrb.mxu3 %v2588_v44  ;;  %v2691_v44 = vld [vmem:[%s8000_s7 + $0x338] sm:$0xff] }
 0x429   :  { %6629 = vrsqrt.f32 %v2463_v46  ;;  %vm2470_vm10 = vweird.f32 %v2463_v46 }
 0x42a   :  { %2795 = vmatpush.msra.mxu3 %v2651_v9  ;;  %v2689_v9 = vld [vmem:[%s8000_s7 + $0x328] sm:$0xff] }
 0x42f   :  { %v6630_v55 = vpop.eup %6629 }
 0x430   :  { %v2465_v48 = vmul.f32 %v6630_v55, %v2463_v46  ;;  %vm2471_vm9 = vweird.f32 %v6630_v55  ;;  %v2649_v46 = vld [vmem:[%s8000_s7 + $0x1e8] sm:$0xff] }
 0x431   :  { %vm2472_vm11 = vmor %vm2470_vm10, %vm2471_vm9  ;;  %2796 = vmatpush.msra.mxu3 %v2649_v46  ;;  %v2685_v46 = vld [vmem:[%s8000_s7 + $0x308] sm:$0xff] }
 0x432   :  { %v2466_v63 = vmul.f32 %v6630_v55, %v2465_v48  ;;  %v2647_v48 = vld [vmem:[%s8000_s7 + $0x1d8] sm:$0xff] }
 0x433   :  { %2797 = vmatpush.msra.mxu3 %v2647_v48 }
 0x434   :  { %v2467_v49 = vmul.f32 0.5, %v2466_v63  ;;  %v2683_v63 = vld [vmem:[%s8000_s7 + $0x2f8] sm:$0xff] }
 0x436   :  { %v2468_v50 = vsub.f32 1.5, %v2467_v49  ;;  %v2645_v49 = vld [vmem:[%s8000_s7 + $0x1c8] sm:$0xff] }
 0x437   :  { %2798 = vmatpush.msra.mxu3 %v2645_v49 }
 0x438   :  { %v2469_v54 = vmul.f32 %v6630_v55, %v2468_v50  ;;  %v2681_v50 = vld [vmem:[%s8000_s7 + $0x2e8] sm:$0xff] }
 0x439   :  { %2799 = vmatpush.msra.mxu3 %v2643_v51 }
 0x43a   :  { %v2473_v61 = vsel %vm2472_vm11, %v6630_v55, %v2469_v54  ;;  %v2620_v55 = vld [vmem:[%s8000_s7 + $0x100] sm:$0xff]  ;;  %v2639_v54 = vld [vmem:[%s8000_s7 + $0x198] sm:$0xff] }
 0x43b   :  { %v2475_v10 = vrot.slane %v2473_v61, 1  ;;  %2730 = vmatpush.msra.mxu0 %v2620_v55  ;;  %2800 = vmatpush.msra.mxu3 %v2641_v30  ;;  %v2674_v61 = vld [vmem:[%s8000_s7 + $0x2b0] sm:$0xff] }
 0x43d   :  { %v2477_v40 = vmul.f32 %v2475_v10, %v2247_v57  ;;  %2815 = vmatpush.msrb.mxu0 %v2683_v63  ;;  %2801 = vmatpush.msra.mxu3 %v2639_v54  ;;  %v2635_v10 = vld [vmem:[%s8000_s7 + $0x178] sm:$0xff] }
 0x43f   :  { %v2478_v2 = vmul.f32 %v2477_v40, %v2456_v34  ;;  %v2615_v34 = vld [vmem:[%s8000_s7 + $0xd8] sm:$0xff]  ;;  %2816 = vmatpush.msrb.mxu0 %v2681_v50  ;;  %2802 = vmatpush.msra.mxu3 %v2637_v59 }
 0x441   :  { %v2480_v7 = vrot.slane %v2478_v2, 7  ;;  %2817 = vmatpush.msrb.mxu0 %v2679_v52  ;;  %2803 = vmatpush.msra.mxu3 %v2635_v10  ;;  %v2670_v2 = vld [vmem:[%s8000_s7 + $0x290] sm:$0xff] }
 0x443   :  { %v2482_v14 = vsub.f32 %v2247_v57, %v2480_v7  ;;  %v2677_v57 = vld [vmem:[%s8000_s7 + $0x2c8] sm:$0xff]  ;;  %2804 = vmatpush.msra.mxu3 %v2633_v56  ;;  %v2603_v7 = vld [vmem:[%s8000_s7 + $0x78] sm:$0xff] }
 0x444   :  { %2818 = vmatpush.msrb.mxu0 %v2677_v57 }
 0x445   :  { %v2483_v16 = vsel %vm719_vm1, %v2477_v40, %v2482_v14  ;;  %v2607_v40 = vld [vmem:[%s8000_s7 + $0x98] sm:$0xff]  ;;  %2805 = vmatpush.msra.mxu3 %v2631_v11  ;;  %v2601_v14 = vld [vmem:[%s8000_s7 + $0x68] sm:$0xff]  ;;  %v2868_v11 = vld [vmem:[%s8125_s16 + $0x60] sm:$0xff] }
 0x446   :  { %6448 = vmatmul.msk.f32.vlgmr.msrb.gmra.mxu1 %vm2484_vm12, %v2483_v16  ;;  %6451 = vmatmul.msk.f32.vlgmr.msra.gmra.mxu2 %vm2484_vm12, %v2483_v16 }
 0x447   :  { %2542 = vmatpush.msrb.mxu1 %v2306_v60  ;;  %2775 = vmatpush.msra.mxu2 %v2619_v22  ;;  %v2627_v60 = vld [vmem:[%s8000_s7 + $0x138] sm:$0xff] }
 0x448   :  { %2819 = vmatpush.msrb.mxu0 %v2675_v0  ;;  %2806 = vmatpush.msra.mxu3 %v2629_v8  ;;  %v2623_v22 = vld [vmem:[%s8000_s7 + $0x118] sm:$0xff]  ;;  %v2864_v8 = vld [vmem:[%s8125_s16 + $0x40] sm:$0xff] }
 0x449   :  { %2543 = vmatpush.msrb.mxu1 %v2302_v19  ;;  %2776 = vmatpush.msra.mxu2 %v2617_v25  ;;  %v2665_v19 = vld [vmem:[%s8000_s7 + $0x268] sm:$0xff]  ;;  %v2595_v25 = vld [vmem:[%s8000_s7 + $0x38] sm:$0xff] }
 0x44a   :  { %2820 = vmatpush.msrb.mxu0 %v2673_v3  ;;  %2807 = vmatpush.msra.mxu3 %v2627_v60  ;;  %v2860_v60 = vld [vmem:[%s8125_s16 + $0x20] sm:$0xff] }
 0x44b   :  { %2777 = vmatpush.msra.mxu2 %v2615_v34  ;;  %v2656_v34 = vld [vmem:[%s8000_s7 + $0x220] sm:$0xff] }
 0x44c   :  { %2821 = vmatpush.msrb.mxu0 %v2671_v39  ;;  %2808 = vmatpush.msra.mxu3 %v2625_v18  ;;  %v2867_v39 = vld [vmem:[%s8125_s16 + $0x58] sm:$0xff]  ;;  %v2856_v18 = vld [vmem:[%s8125_s16] sm:$0xff] }
 0x44d   :  { %2778 = vmatpush.msra.mxu2 %v2613_v37  ;;  %v2589_v37 = vld [vmem:[%s8000_s7 + $0x8] sm:$0xff] }
 0x44e   :  { %6449 = vmatmul.msk.f32.vlgmr.msra.gmra.mxu1 %vm2484_vm12, %v2483_v16  ;;  %2822 = vmatpush.msrb.mxu0 %v2669_v12  ;;  %v2863_v12 = vld [vmem:[%s8125_s16 + $0x38] sm:$0xff] }
 0x44f   :  { %2735 = vmatpush.msra.mxu1 %v2682_v28  ;;  %2779 = vmatpush.msra.mxu2 %v2611_v53  ;;  %v2593_v28 = vld [vmem:[%s8000_s7 + $0x28] sm:$0xff] }
 0x450   :  { %2823 = vmatpush.msrb.mxu0 %v2667_v15  ;;  %2809 = vmatpush.msra.mxu3 %v2623_v22  ;;  %v2859_v15 = vld [vmem:[%s8125_s16 + $0x18] sm:$0xff]  ;;  %v2872_v22 = vld [vmem:[%s8125_s16 + $0x80] sm:$0xff] }
 0x451   :  { %2736 = vmatpush.msra.mxu1 %v2680_v33  ;;  %2780 = vmatpush.msra.mxu2 %v2609_v62  ;;  %v2657_v33 = vld [vmem:[%s8000_s7 + $0x228] sm:$0xff] }
 0x452   :  { %2824 = vmatpush.msrb.mxu0 %v2665_v19  ;;  %2810 = vmatpush.msra.mxu3 %v2621_v26  ;;  %v2875_v19 = vld [vmem:[%s8125_s16 + $0x98] sm:$0xff] }
 0x453   :  { %2737 = vmatpush.msra.mxu1 %v2678_v42  ;;  %2781 = vmatpush.msra.mxu2 %v2607_v40  ;;  %v2652_v42 = vld [vmem:[%s8000_s7 + $0x200] sm:$0xff] }
 0x454   :  { %2825 = vmatpush.msrb.mxu0 %v2663_v23 }
 0x455   :  { %2738 = vmatpush.msra.mxu1 %v2676_v47  ;;  %2782 = vmatpush.msra.mxu2 %v2605_v4  ;;  %v2869_v4 = vld [vmem:[%s8125_s16 + $0x68] sm:$0xff] }
 0x456   :  { %6450 = vmatmul.msk.f32.vlgmr.msrb.gmra.mxu1 %vm2484_vm12, %v2483_v16  ;;  %v2664_v16 = vld [vmem:[%s8000_s7 + $0x260] sm:$0xff]  ;;  %2826 = vmatpush.msrb.mxu0 %v2661_v27  ;;  %s6398_s7 = sld [smem:[%s9533_s0 + %s6924_s4]]   ;;  %s6936_s4 = smov 29  }
 0x457   :  { %2739 = vmatpush.msra.mxu1 %v2674_v61  ;;  %2783 = vmatpush.msra.mxu2 %v2603_v7  ;;  %v2865_v7 = vld [vmem:[%s8125_s16 + $0x48] sm:$0xff]  ;;  %s6425_s6 = sld [smem:[%s9533_s0 + %s6936_s4]]  }
 0x458   :  { %2827 = vmatpush.msrb.mxu0 %v2659_v29 }
 0x459   :  { %2740 = vmatpush.msra.mxu1 %v2672_v1  ;;  %2784 = vmatpush.msra.mxu2 %v2601_v14  ;;  %v2861_v14 = vld [vmem:[%s8125_s16 + $0x28] sm:$0xff] }
 0x45a   :  { %2828 = vmatpush.msrb.mxu0 %v2657_v33 }
 0x45b   :  { %2741 = vmatpush.msra.mxu1 %v2670_v2  ;;  %2785 = vmatpush.msra.mxu2 %v2599_v17  ;;  %v2857_v17 = vld [vmem:[%s8125_s16 + $0x8] sm:$0xff] }
 0x45c   :  { %2829 = vmatpush.msrb.mxu0 %v2655_v41 }
 0x45d   :  { %2742 = vmatpush.msra.mxu1 %v2668_v6  ;;  %2786 = vmatpush.msra.mxu2 %v2597_v21  ;;  %v2866_v6 = vld [vmem:[%s8125_s16 + $0x50] sm:$0xff]  ;;  %v2873_v21 = vld [vmem:[%s8125_s16 + $0x88] sm:$0xff] }
 0x45e   :  { %2830 = vmatpush.msrb.mxu0 %v2653_v43 }
 0x45f   :  { %2743 = vmatpush.msra.mxu1 %v2666_v13  ;;  %2787 = vmatpush.msra.mxu2 %v2595_v25  ;;  %v2862_v13 = vld [vmem:[%s8125_s16 + $0x30] sm:$0xff] }
 0x461   :  { %2744 = vmatpush.msra.mxu1 %v2664_v16  ;;  %2788 = vmatpush.msra.mxu2 %v2593_v28  ;;  %v2858_v16 = vld [vmem:[%s8125_s16 + $0x10] sm:$0xff] }
 0x463   :  { %2745 = vmatpush.msra.mxu1 %v2662_v20  ;;  %2789 = vmatpush.msra.mxu2 %v2591_v32  ;;  %v2874_v20 = vld [vmem:[%s8125_s16 + $0x90] sm:$0xff] }
 0x465   :  { %2746 = vmatpush.msra.mxu1 %v2660_v24  ;;  %2790 = vmatpush.msra.mxu2 %v2589_v37 }
 0x467   :  { %2747 = vmatpush.msra.mxu1 %v2658_v58 }
 0x469   :  { %2748 = vmatpush.msra.mxu1 %v2656_v34 }
 0x46b   :  { %2749 = vmatpush.msra.mxu1 %v2654_v36 }
 0x46d   :  { %2750 = vmatpush.msra.mxu1 %v2652_v42 }
 0x46f   :  { %2847 = vmatpush.msrb.mxu1 %v2691_v44 }
 0x471   :  { %2848 = vmatpush.msrb.mxu1 %v2689_v9 }
 0x473   :  { %2849 = vmatpush.msrb.mxu1 %v2687_v45 }
 0x475   :  { %2850 = vmatpush.msrb.mxu1 %v2685_v46 }
 0x4c3   :  { %v2505_v55 = vpop.f32.mrf.mxu1 }
 0x4c4   :  { %v2568_v48 = vperm.slane %v2505_v55, 0  ;;  %v2576_v49 = vperm.slane %v2505_v55, 1 }
 0x4c6   :  { %v2572_v63 = vmul.f32 %v2568_v48, %v7877_v31 }
 0x4c8   :  { %v2580_v50 = vadd.f32 %v2576_v49, %v2572_v63 }
 0x4c9   :  { %v2565_v51 = vpop.f32.mrf.mxu2 }
 0x4ca   :  { %v2584_v52 = vmax.f32 %v2580_v50, 0.0  ;;  %v2571_v30 = vperm.slane %v2565_v51, 0  ;;  %v2579_v53 = vperm.slane %v2565_v51, 1 }
 0x4cb   :  { %v2525_v54 = vpop.f32.mrf.mxu1 }
 0x4cc   :  { %v2575_v47 = vmul.f32 %v2571_v30, %v7977_v5  ;;  %v2569_v59 = vperm.slane %v2525_v54, 0  ;;  %2711 = vmatmul.f32.vlgmr.msrb.gmra.mxu3 %v2584_v52  ;;  %v2577_v62 = vperm.slane %v2525_v54, 1 }
 0x4ce   :  { %v2583_v57 = vadd.f32 %v2579_v53, %v2575_v47  ;;  %v2573_v61 = vmul.f32 %v2569_v59, %v7931_v38  ;;  %v2871_v38 = vld [vmem:[%s8125_s16 + $0x78] sm:$0xff] }
 0x4d0   :  { %v2587_v10 = vmax.f32 %v2583_v57, 0.0  ;;  %v2581_v0 = vadd.f32 %v2577_v62, %v2573_v61 }
 0x4d2   :  { %v2585_v1 = vmax.f32 %v2581_v0, 0.0  ;;  %6452 = vmatmul.msk.f32.vlgmr.msrb.gmra.mxu2 %vm920_vm7, %v2587_v10 }
 0x4d3   :  { %v2545_v31 = vpop.f32.mrf.mxu1  ;;  %2945 = vmatpush.msrb.mxu2 %v2875_v19 }
 0x4d4   :  { %v2570_v40 = vperm.slane %v2545_v31, 0  ;;  %2731 = vmatmul.f32.vlgmr.msra.gmra.mxu0 %v2585_v1  ;;  %2811 = vmatmul.f32.vlgmr.msra.gmra.mxu3 %v2585_v1  ;;  %v2578_v3 = vperm.slane %v2545_v31, 1 }
 0x4d5   :  { %2946 = vmatpush.msrb.mxu2 %v2874_v20  ;;  %v3048_v20 = vld [vmem:[%s8170_s25 + $0x68] sm:$0xff] }
 0x4d6   :  { %v2574_v56 = vmul.f32 %v2570_v40, %v7965_v35  ;;  %v2870_v35 = vld [vmem:[%s8125_s16 + $0x70] sm:$0xff]  ;;  %s8260_s16 = sld [smem:[%s9533_s0 + %s6926_s12]]  }
 0x4d7   :  { %2947 = vmatpush.msrb.mxu2 %v2873_v21 }
 0x4d8   :  { %v2582_v5 = vadd.f32 %v2578_v3, %v2574_v56 }
 0x4d9   :  { %2948 = vmatpush.msrb.mxu2 %v2872_v22  ;;  %v3047_v22 = vld [vmem:[%s8170_s25 + $0x60] sm:$0xff] }
 0x4da   :  { %v2586_v2 = vmax.f32 %v2582_v5, 0.0  ;;  %2791 = vmatmul.f32.vlgmr.msra.gmra.mxu2 %v2584_v52 }
 0x4dc   :  { %2751 = vmatmul.f32.vlgmr.msra.gmra.mxu1 %v2586_v2  ;;  %2831 = vmatmul.f32.vlgmr.msrb.gmra.mxu0 %v2586_v2 }
 0x4dd   :  { %2913 = vmatpush.msra.mxu1 %v2871_v38 }
 0x4df   :  { %2914 = vmatpush.msra.mxu1 %v2870_v35 }
 0x4e1   :  { %2915 = vmatpush.msra.mxu1 %v2869_v4 }
 0x4e3   :  { %2916 = vmatpush.msra.mxu1 %v2868_v11 }
 0x4e4   :  { %6453 = vmatmul.msk.f32.vlgmr.msrb.gmra.mxu1 %vm920_vm7, %v2587_v10 }
 0x4e5   :  { %2917 = vmatpush.msra.mxu1 %v2867_v39 }
 0x4e7   :  { %2918 = vmatpush.msra.mxu1 %v2866_v6 }
 0x4e9   :  { %2919 = vmatpush.msra.mxu1 %v2865_v7 }
 0x4eb   :  { %2920 = vmatpush.msra.mxu1 %v2864_v8 }
 0x4ed   :  { %2921 = vmatpush.msra.mxu1 %v2863_v12 }
 0x4ef   :  { %2922 = vmatpush.msra.mxu1 %v2862_v13  ;;  %v2876_v13 = vld [vmem:[%s6410_s21] sm:$0xff] }
 0x4f0   :  { %3000 = vmatpush.msra.mxu2 %v2876_v13 }
 0x4f1   :  { %2923 = vmatpush.msra.mxu1 %v2861_v14 }
 0x4f3   :  { %2924 = vmatpush.msra.mxu1 %v2860_v60  ;;  %v2877_v60 = vld [vmem:[%s6410_s21 + $0x8] sm:$0xff]  ;;  %s8265_s21 = sld [smem:[%s9533_s0 + %s6927_s18]]  }
 0x4f5   :  { %2925 = vmatpush.msra.mxu1 %v2859_v15 }
 0x4f7   :  { %2926 = vmatpush.msra.mxu1 %v2858_v16  ;;  %v3050_v16 = vld [vmem:[%s8170_s25 + $0x78] sm:$0xff] }
 0x4f8   :  { %3069 = vmatpush.msrb.mxu3 %v3050_v16 }
 0x4f9   :  { %2927 = vmatpush.msra.mxu1 %v2857_v17  ;;  %v3049_v17 = vld [vmem:[%s8170_s25 + $0x70] sm:$0xff] }
 0x4fa   :  { %3070 = vmatpush.msrb.mxu3 %v3049_v17 }
 0x4fb   :  { %2928 = vmatpush.msra.mxu1 %v2856_v18 }
 0x4fc   :  { %3071 = vmatpush.msrb.mxu3 %v3048_v20 }
 0x4fe   :  { %3072 = vmatpush.msrb.mxu3 %v3047_v22 }
 0x54f   :  { %v2712_v23 = vpop.f32.mrf.mxu3 }
 0x551   :  { %v2732_v24 = vpop.f32.mrf.mxu0 }
 0x552   :  { %v2733_v26 = vadd.f32 %v2732_v24, %v2712_v23  ;;  %v3046_v24 = vld [vmem:[%s8170_s25 + $0x58] sm:$0xff] }
 0x553   :  { %3073 = vmatpush.msrb.mxu3 %v3046_v24 }
 0x555   :  { %v2772_v25 = vpop.f32.mrf.mxu2 }
 0x557   :  { %v2812_v29 = vpop.f32.mrf.mxu3 }
 0x559   :  { %v2752_v27 = vpop.f32.mrf.mxu1  ;;  %v2832_v41 = vpop.f32.mrf.mxu0 }
 0x55a   :  { %v2753_v58 = vadd.f32 %v2752_v27, %v2733_v26  ;;  %v3045_v26 = vld [vmem:[%s8170_s25 + $0x50] sm:$0xff] }
 0x55b   :  { %3074 = vmatpush.msrb.mxu3 %v3045_v26 }
 0x55c   :  { %v8147_v28 = vadd.f32 %v2772_v25, %v2753_v58  ;;  %v3044_v58 = vld [vmem:[%s8170_s25 + $0x48] sm:$0xff] }
 0x55d   :  { %v2792_v34 = vpop.f32.mrf.mxu2  ;;  %3075 = vmatpush.msrb.mxu3 %v3044_v58 }
 0x55e   :  { %v2878_v32 = vsel %vm597_vm0, %v8147_v28, 0.0  ;;  %v2892_v33 = vmul.f32 %v8147_v28, %v8147_v28  ;;  %v2813_v36 = vadd.f32 %v2812_v29, %v2792_v34  ;;  %v2855_v29 = vld [vmem:[%s6404_s30] sm:$0x3] }
 0x55f   :  { %v2879_v37 = vrot.slane %v2878_v32, 4 }
 0x560   :  { %v2894_v42 = vsel %vm597_vm0, %v2892_v33, 0.0  ;;  %v2833_v43 = vadd.f32 %v2832_v41, %v2813_v36  ;;  %v3042_v36 = vld [vmem:[%s8170_s25 + $0x38] sm:$0xff]  ;;  %v3041_v41 = vld [vmem:[%s8170_s25 + $0x30] sm:$0xff] }
 0x561   :  { %v2880_v44 = vadd.f32 %v2879_v37, %v2878_v32  ;;  %v2895_v9 = vrot.slane %v2894_v42, 4  ;;  %v2852_v45 = vpop.f32.mrf.mxu1  ;;  %v3043_v32 = vld [vmem:[%s8170_s25 + $0x40] sm:$0xff] }
 0x562   :  { %v8154_v46 = vadd.f32 %v2852_v45, %v2833_v43  ;;  %3076 = vmatpush.msrb.mxu3 %v3043_v32  ;;  %v3040_v43 = vld [vmem:[%s8170_s25 + $0x28] sm:$0xff] }
 0x563   :  { %v2881_v55 = vrot.slane %v2880_v44, 2  ;;  %v2896_v48 = vadd.f32 %v2895_v9, %v2894_v42 }
 0x564   :  { %v2885_v63 = vsel %vm2329_vm8, %v8154_v46, 0.0  ;;  %v2893_v49 = vmul.f32 %v8154_v46, %v8154_v46  ;;  %3077 = vmatpush.msrb.mxu3 %v3042_v36  ;;  %v3155_v36 = vld [vmem:[%s6414_s19] sm:$0xff] }
 0x565   :  { %v2886_v50 = vrot.slane %v2885_v63, 4  ;;  %v2882_v51 = vadd.f32 %v2881_v55, %v2880_v44  ;;  %v2897_v52 = vrot.slane %v2896_v48, 2  ;;  %v3039_v55 = vld [vmem:[%s8170_s25 + $0x20] sm:$0xff] }
 0x566   :  { %v2901_v30 = vsel %vm2329_vm8, %v2893_v49, 0.0  ;;  %3078 = vmatpush.msrb.mxu3 %v3041_v41  ;;  %v3036_v49 = vld [vmem:[%s8170_s25 + $0x8] sm:$0xff] }
 0x567   :  { %v2887_v54 = vadd.f32 %v2886_v50, %v2885_v63  ;;  %v2902_v47 = vrot.slane %v2901_v30, 4  ;;  %v2883_v53 = vrot.slane %v2882_v51, 1  ;;  %v2898_v59 = vadd.f32 %v2897_v52, %v2896_v48  ;;  %v3038_v48 = vld [vmem:[%s8170_s25 + $0x18] sm:$0xff]  ;;  %v3037_v63 = vld [vmem:[%s8170_s25 + $0x10] sm:$0xff]  ;;  %v3035_v50 = vld [vmem:[%s8170_s25] sm:$0xff] }
 0x568   :  { %3079 = vmatpush.msrb.mxu3 %v3040_v43  ;;  %v3053_v52 = vld [vmem:[%s8170_s25 + $0x90] sm:$0xff] }
 0x569   :  { %v2888_v57 = vrot.slane %v2887_v54, 2  ;;  %v2903_v61 = vadd.f32 %v2902_v47, %v2901_v30  ;;  %v2899_v62 = vrot.slane %v2898_v59, 1  ;;  %v2884_v1 = vadd.f32 %v2883_v53, %v2882_v51  ;;  %v3054_v51 = vld [vmem:[%s8170_s25 + $0x98] sm:$0xff]  ;;  %v3052_v30 = vld [vmem:[%s8170_s25 + $0x88] sm:$0xff]  ;;  %v3055_v47 = vld [vmem:[%s6397_s9] sm:$0x3] }
 0x56a   :  { %3080 = vmatpush.msrb.mxu3 %v3039_v55  ;;  %3101 = vmatpush.msra.mxu0 %v3054_v51  ;;  %v6916_v53 = vmov 0  }
 0x56b   :  { %v2889_v10 = vadd.f32 %v2888_v57, %v2887_v54  ;;  %v2904_v0 = vrot.slane %v2903_v61, 2  ;;  %v2900_v31 = vadd.f32 %v2899_v62, %v2898_v59  ;;  %v3051_v54 = vld [vmem:[%s8170_s25 + $0x80] sm:$0xff]  ;;  %6610 = vset.pattern.permute.xlu0 %v6916_v53  ;;  %6611 = vset.pattern.permute.xlu2 %v6916_v53  ;;  %s6922_s25 = smov 120  }
 0x56c   :  { %3081 = vmatpush.msrb.mxu3 %v3038_v48  ;;  %3102 = vmatpush.msra.mxu0 %v3053_v52 }
 0x56d   :  { %v2890_v40 = vrot.slane %v2889_v10, 1  ;;  %v2905_v56 = vadd.f32 %v2904_v0, %v2903_v61  ;;  %v2908_v3 = vsel %vm719_vm1, %v2884_v1, %v2900_v31  ;;  %3059 = vperm.xlu0 %6610, %v3055_v47  }
 0x56e   :  { %2929 = vmatmul.f32.vlgmr.msra.gmra.mxu1 %v2908_v3  ;;  %3082 = vmatpush.msrb.mxu3 %v3037_v63  ;;  %v3109_v63 = vld [vmem:[%s6413_s23] sm:$0x3]  ;;  %s6423_s23 = sld [smem:[%s9533_s0 + %s6934_s20]]  }
 0x56f   :  { %v2906_v5 = vrot.slane %v2905_v56, 1  ;;  %v2891_v2 = vadd.f32 %v2890_v40, %v2889_v10  ;;  %3103 = vmatpush.msra.mxu0 %v3052_v30  ;;  %v3150_v52 = vperm.slane %v3109_v63, 0  ;;  %v3152_v47 = vperm.slane %v3109_v63, 1 }
 0x570   :  { %3083 = vmatpush.msrb.mxu3 %v3036_v49 }
 0x571   :  { %v2907_v38 = vadd.f32 %v2906_v5, %v2905_v56  ;;  %3104 = vmatpush.msra.mxu0 %v3051_v54 }
 0x572   :  { %3084 = vmatpush.msrb.mxu3 %v3035_v50 }
 0x573   :  { %v2909_v35 = vsel %vm719_vm1, %v2891_v2, %v2907_v38  ;;  %v6612_v2 = vld [vmem:[%s8194_s5] ss:$0 sm:$0xff]  ;;  %s8288_s5 = sld [smem:[%s9533_s0 + %s6929_s28]]  }
 0x574   :  { %6454 = vmatmul.msk.f32.vlgmr.msrb.gmra.mxu2 %vm920_vm7, %v2909_v35 }
 0x575   :  { %3020 = vmatpush.msrb.mxu2 %v2877_v60 }
 0x5df   :  { %v3060_v38 = vpop.permute.xlu0 %3059 }
 0x5eb   :  { %v2930_v4 = vpop.f32.mrf.mxu1 }
 0x5f7   :  { %v2950_v11 = vpop.f32.mrf.mxu2 }
 0x5f8   :  { %v2951_v39 = vadd.f32 %v2950_v11, %v2930_v4  ;;  %v3065_v4 = vmul.f32 %v6612_v2, %v3060_v38  ;;  %v3242_v2 = vld [vmem:[%s8265_s21 + $0x38] sm:$0xff]  ;;  %v3241_v38 = vld [vmem:[%s8265_s21 + $0x30] sm:$0xff] }
 0x5f9   :  { %3258 = vmatpush.msrb.mxu1 %v3242_v2  ;;  %v6470_v2 = vld [vmem:[%s8265_s21 + $0x50] sm:$0xff] }
 0x5fa   :  { %v2953_v6 = vmul.f32 0.025, %v2951_v39 }
 0x5fb   :  { %3259 = vmatpush.msrb.mxu1 %v3241_v38  ;;  %v6469_v38 = vld [vmem:[%s8265_s21 + $0x48] sm:$0xff] }
 0x5fc   :  { %v2954_v7 = vmul.f32 %v2953_v6, %v2953_v6 }
 0x5fe   :  { %v2956_v8 = vrot.slane %v2954_v7, 7 }
 0x600   :  { %v2958_v12 = vsub.f32 %v2953_v6, %v2956_v8 }
 0x602   :  { %v2959_v14 = vmax.f32 %v2958_v12, 0.0 }
 0x604   :  { %v2960_v15 = vadd.f32 1e-05, %v2959_v14 }
 0x606   :  { %6631 = vrsqrt.f32 %v2960_v15  ;;  %vm2967_vm14 = vweird.f32 %v2960_v15 }
 0x60c   :  { %v6632_v18 = vpop.eup %6631 }
 0x60d   :  { %v2962_v19 = vmul.f32 %v6632_v18, %v2960_v15  ;;  %vm2968_vm13 = vweird.f32 %v6632_v18 }
 0x60e   :  { %vm2969_vm15 = vmor %vm2967_vm14, %vm2968_vm13 }
 0x60f   :  { %v2963_v21 = vmul.f32 %v6632_v18, %v2962_v19 }
 0x611   :  { %v2964_v23 = vmul.f32 0.5, %v2963_v21 }
 0x613   :  { %v2965_v25 = vsub.f32 1.5, %v2964_v23 }
 0x615   :  { %v2966_v27 = vmul.f32 %v6632_v18, %v2965_v25  ;;  %v3158_v25 = vld [vmem:[%s6414_s19 + $0x18] sm:$0xff] }
 0x617   :  { %v2970_v34 = vsel %vm2969_vm15, %v6632_v18, %v2966_v27 }
 0x618   :  { %v2972_v33 = vrot.slane %v2970_v34, 1 }
 0x61a   :  { %v2974_v37 = vmul.f32 %v2972_v33, %v2855_v29  ;;  %v3156_v33 = vld [vmem:[%s6414_s19 + $0x8] sm:$0xff] }
 0x61c   :  { %v2975_v42 = vmul.f32 %v2974_v37, %v2953_v6 }
 0x61e   :  { %v2977_v44 = vrot.slane %v2975_v42, 7 }
 0x620   :  { %v2979_v9 = vsub.f32 %v2855_v29, %v2977_v44  ;;  %v3157_v29 = vld [vmem:[%s6414_s19 + $0x10] sm:$0xff] }
 0x622   :  { %v2980_v45 = vsel %vm719_vm1, %v2974_v37, %v2979_v9 }
 0x623   :  { %6455 = vmatmul.msk.f32.vlgmr.msra.gmra.mxu2 %vm2981_vm4, %v2980_v45 }
 0x624   :  { %3178 = vmatpush.msra.mxu2 %v3158_v25  ;;  %v3277_v25 = vld [vmem:[%s8288_s5 + $0x8] sm:$0xff] }
 0x626   :  { %3179 = vmatpush.msra.mxu2 %v3157_v29 }
 0x628   :  { %3180 = vmatpush.msra.mxu2 %v3156_v33 }
 0x62a   :  { %3181 = vmatpush.msra.mxu2 %v3155_v36 }
 0x62b   :  { %6456 = vmatmul.msk.f32.vlgmr.msrb.gmra.mxu2 %vm2981_vm4, %v2980_v45 }
 0x6a6   :  { %v3002_v59 = vpop.f32.mrf.mxu2 }
 0x6a7   :  { %v3025_v57 = vperm.slane %v3002_v59, 0  ;;  %v3029_v62 = vperm.slane %v3002_v59, 1 }
 0x6a9   :  { %v3027_v61 = vmul.f32 %v3025_v57, %v8147_v28  ;;  %v6918_v28 = vmov 2.0  }
 0x6aa   :  { %6633 = vrcp.f32 %v6918_v28 }
 0x6ab   :  { %v3031_v10 = vadd.f32 %v3029_v62, %v3027_v61  ;;  %v6613_v61 = vld [vmem:[%s8214_s14] ss:$0 sm:$0xff] }
 0x6ad   :  { %v3033_v0 = vmax.f32 %v3031_v10, 0.0 }
 0x6ae   :  { %v3022_v1 = vpop.f32.mrf.mxu2 }
 0x6af   :  { %v3026_v31 = vperm.slane %v3022_v1, 0  ;;  %3085 = vmatmul.f32.vlgmr.msrb.gmra.mxu3 %v3033_v0  ;;  %v3030_v56 = vperm.slane %v3022_v1, 1 }
 0x6b0   :  { %v6634_v35 = vpop.eup %6633 }
 0x6b1   :  { %v3028_v40 = vmul.f32 %v3026_v31, %v8154_v46  ;;  %v3118_v11 = vmul.f32 2.0, %v6634_v35  ;;  %vm3122_vm5 = vweird.f32 %v6634_v35 }
 0x6b3   :  { %v3032_v3 = vadd.f32 %v3030_v56, %v3028_v40  ;;  %v3119_v8 = vsub.f32 1.0, %v3118_v11  ;;  %v3196_v40 = vld [vmem:[%s8239_s2] sm:$0xff]  ;;  %v3238_v11 = vld [vmem:[%s8265_s21 + $0x18] sm:$0xff] }
 0x6b4   :  { %3219 = vmatpush.msrb.mxu0 %v3196_v40  ;;  %v3186_v56 = vld [vmem:[%s6398_s7] sm:$0x3]  ;;  %v6474_v40 = vld [vmem:[%s8265_s21 + $0x70] sm:$0xff] }
 0x6b5   :  { %v3034_v5 = vmax.f32 %v3032_v3, 0.0  ;;  %v3120_v60 = vmul.f32 %v6634_v35, %v3119_v8 }
 0x6b7   :  { %6457 = vmatmul.msk.f32.vlgmr.msra.gmra.mxu0 %vm920_vm7, %v3034_v5  ;;  %v3121_v20 = vadd.f32 %v6634_v35, %v3120_v60 }
 0x6b9   :  { %v8222_v26 = vsel %vm3122_vm5, %v6634_v35, %v3121_v20  ;;  %v3240_v35 = vld [vmem:[%s8265_s21 + $0x28] sm:$0xff]  ;;  %v3282_v20 = vld [vmem:[%s8288_s5 + $0x30] sm:$0xff] }
 0x6ba   :  { %3260 = vmatpush.msrb.mxu1 %v3240_v35  ;;  %v6468_v35 = vld [vmem:[%s8265_s21 + $0x40] sm:$0xff] }
 0x732   :  { %v3086_v39 = vpop.f32.mrf.mxu3 }
 0x733   :  { %v3087_v46 = vadd.f32 %v3086_v39, %v3065_v4  ;;  %v3239_v4 = vld [vmem:[%s8265_s21 + $0x20] sm:$0xff]  ;;  %v3237_v39 = vld [vmem:[%s8265_s21 + $0x10] sm:$0xff] }
 0x734   :  { %v3106_v6 = vpop.f32.mrf.mxu0  ;;  %3261 = vmatpush.msrb.mxu1 %v3239_v4  ;;  %v6617_v4 = vld [vmem:[%s8248_s11 + $0x1] ss:$0 sm:$0xff] }
 0x735   :  { %v3107_v7 = vadd.f32 %v3106_v6, %v3087_v46  ;;  %v3236_v46 = vld [vmem:[%s8265_s21 + $0x8] sm:$0xff]  ;;  %v3235_v6 = vld [vmem:[%s8265_s21] sm:$0xff] }
 0x736   :  { %3262 = vmatpush.msrb.mxu1 %v3238_v11 }
 0x737   :  { %v3110_v12 = vsel %vm2329_vm8, %v3107_v7, 0.0  ;;  %v3125_v13 = vmul.f32 %v3107_v7, %v3107_v7 }
 0x738   :  { %v3111_v14 = vrot.slane %v3110_v12, 4  ;;  %3263 = vmatpush.msrb.mxu1 %v3237_v39 }
 0x739   :  { %v3126_v15 = vsel %vm2329_vm8, %v3125_v13, 0.0 }
 0x73a   :  { %v3112_v16 = vadd.f32 %v3111_v14, %v3110_v12  ;;  %v3127_v17 = vrot.slane %v3126_v15, 4  ;;  %3264 = vmatpush.msrb.mxu1 %v3236_v46 }
 0x73c   :  { %v3113_v18 = vrot.slane %v3112_v16, 2  ;;  %v3128_v19 = vadd.f32 %v3127_v17, %v3126_v15  ;;  %3265 = vmatpush.msrb.mxu1 %v3235_v6 }
 0x73e   :  { %v3114_v21 = vadd.f32 %v3113_v18, %v3112_v16  ;;  %v3129_v22 = vrot.slane %v3128_v19, 2 }
 0x740   :  { %v3115_v23 = vrot.slane %v3114_v21, 1  ;;  %v3130_v24 = vadd.f32 %v3129_v22, %v3128_v19  ;;  %v3283_v19 = vld [vmem:[%s8288_s5 + $0x38] sm:$0xff]  ;;  %v3280_v22 = vld [vmem:[%s8288_s5 + $0x20] sm:$0xff] }
 0x741   :  { %3299 = vmatpush.msrb.mxu2 %v3283_v19  ;;  %v6481_v19 = vld [vmem:[%s8288_s5 + $0x50] sm:$0xff] }
 0x742   :  { %v3116_v27 = vadd.f32 %v3115_v23, %v3114_v21  ;;  %v3131_v58 = vrot.slane %v3130_v24, 1  ;;  %v3281_v21 = vld [vmem:[%s8288_s5 + $0x28] sm:$0xff]  ;;  %v3279_v23 = vld [vmem:[%s8288_s5 + $0x18] sm:$0xff] }
 0x743   :  { %3300 = vmatpush.msrb.mxu2 %v3282_v20  ;;  %v6480_v20 = vld [vmem:[%s8288_s5 + $0x48] sm:$0xff] }
 0x744   :  { %v3124_v34 = vmul.f32 %v8222_v26, %v3116_v27  ;;  %v3132_v32 = vadd.f32 %v3131_v58, %v3130_v24  ;;  %v3278_v24 = vld [vmem:[%s8288_s5 + $0x10] sm:$0xff]  ;;  %v3276_v27 = vld [vmem:[%s8288_s5] sm:$0xff] }
 0x745   :  { %3301 = vmatpush.msrb.mxu2 %v3281_v21  ;;  %v6615_v58 = vld [vmem:[%s8260_s16] ss:$0 sm:$0xff] }
 0x746   :  { %v3133_v37 = vmul.f32 %v3132_v32, %v8222_v26  ;;  %v3134_v41 = vmul.f32 %v3124_v34, %v3124_v34  ;;  %v3137_v51 = vsub.f32 %v3107_v7, %v3124_v34  ;;  %v6614_v7 = vld [vmem:[%s8248_s11] ss:$0 sm:$0xff] }
 0x747   :  { %3302 = vmatpush.msrb.mxu2 %v3280_v22  ;;  %v6479_v21 = vld [vmem:[%s8288_s5 + $0x40] sm:$0xff] }
 0x748   :  { %v3135_v42 = vsub.f32 %v3133_v37, %v3134_v41  ;;  %v6618_v22 = vld [vmem:[%s8260_s16 + $0x1] ss:$0 sm:$0xff] }
 0x749   :  { %3303 = vmatpush.msrb.mxu2 %v3279_v23 }
 0x74a   :  { %v3136_v43 = vmax.f32 %v3135_v42, 0.0  ;;  %v6616_v42 = vld [vmem:[%s8283_s27] ss:$0 sm:$0xff] }
 0x74b   :  { %3304 = vmatpush.msrb.mxu2 %v3278_v24 }
 0x74c   :  { %v3138_v44 = vadd.f32 1e-05, %v3136_v43 }
 0x74d   :  { %3305 = vmatpush.msrb.mxu2 %v3277_v25 }
 0x74e   :  { %6635 = vrsqrt.f32 %v3138_v44  ;;  %vm3145_vm9 = vweird.f32 %v3138_v44 }
 0x74f   :  { %3306 = vmatpush.msrb.mxu2 %v3276_v27 }
 0x754   :  { %v6636_v9 = vpop.eup %6635 }
 0x755   :  { %v3140_v45 = vmul.f32 %v6636_v9, %v3138_v44  ;;  %vm3146_vm6 = vweird.f32 %v6636_v9 }
 0x756   :  { %vm3147_vm10 = vmor %vm3145_vm9, %vm3146_vm6 }
 0x757   :  { %v3141_v55 = vmul.f32 %v6636_v9, %v3140_v45 }
 0x759   :  { %v3142_v48 = vmul.f32 0.5, %v3141_v55 }
 0x75b   :  { %v3143_v49 = vsub.f32 1.5, %v3142_v48 }
 0x75d   :  { %v3144_v50 = vmul.f32 %v6636_v9, %v3143_v49  ;;  %v6464_v49 = vld [vmem:[%s8239_s2 + $0x8] sm:$0xff] }
 0x75e   :  { %3369 = vmatpush.msra.mxu0 %v6464_v49 }
 0x75f   :  { %v3148_v30 = vsel %vm3147_vm10, %v6636_v9, %v3144_v50 }
 0x760   :  { %v3149_v54 = vmul.f32 %v3148_v30, %v3137_v51 }
 0x762   :  { %v3151_v53 = vmul.f32 %v3150_v52, %v3149_v54 }
 0x764   :  { %v3153_v59 = vadd.f32 %v3152_v47, %v3151_v53 }
 0x766   :  { %v3154_v57 = vmax.f32 %v3153_v59, 0.0 }
 0x768   :  { %6458 = vmatmul.msk.f32.vlgmr.msra.gmra.mxu2 %vm920_vm7, %v3154_v57 }
 0x7eb   :  { %v3183_v62 = vpop.f32.mrf.mxu2 }
 0x7ec   :  { %v8231_v10 = vadd.f32 %v6613_v61, %v3183_v62 }
 0x7ee   :  { %v3187_v0 = vmul.f32 0.5, %v8231_v10  ;;  %3231 = vrot.lane.b32.xlu1 %v8231_v10, %s6921_s24  ;;  %s6935_s24 = smov 30  }
 0x7ef   :  { %s8448_s30 = sld [smem:[%s9533_s0 + %s6935_s24]]  }
 0x7f0   :  { %v3188_v1 = vmul.f32 1.442695, %v3187_v0 }
 0x7f2   :  { %6637 = vpow2.f32 %v3188_v1 }
 0x7f8   :  { %v6638_v31 = vpop.eup %6637 }
 0x7f9   :  { %3191 = vrot.lane.b32.xlu0 %v6638_v31, %s6922_s25  ;;  %v6475_v31 = vld [vmem:[%s8265_s21 + $0x78] sm:$0xff] }
 0x860   :  { %v8276_v16 = vpop.permute.xlu1 %3231 }
 0x86b   :  { %v3192_v3 = vpop.permute.xlu0 %3191 }
 0x86c   :  { %v3194_v5 = vmul.f32 %v3192_v3, %v3186_v56  ;;  %v6473_v56 = vld [vmem:[%s8265_s21 + $0x68] sm:$0xff]  ;;  %v6472_v3 = vld [vmem:[%s8265_s21 + $0x60] sm:$0xff] }
 0x86e   :  { %v8251_v28 = vadd.f32 %v3194_v5, %v8231_v10  ;;  %v6471_v5 = vld [vmem:[%s8265_s21 + $0x58] sm:$0xff] }
 0x870   :  { %3322 = vrot.lane.b32.xlu1 %v8251_v28, %s6913_s26  ;;  %6459 = vmatmul.msk.f32.vlgmr.msrb.gmra.mxu0 %vm2981_vm4, %v8251_v28 }
 0x871   :  { %3406 = vmatpush.msrb.mxu0 %v6475_v31  ;;  %v6495_v31 = vld [vmem:[%s8265_s21 + $0x90] sm:$0xff] }
 0x873   :  { %3407 = vmatpush.msrb.mxu0 %v6474_v40  ;;  %v6494_v40 = vld [vmem:[%s8265_s21 + $0x88] sm:$0xff] }
 0x875   :  { %3408 = vmatpush.msrb.mxu0 %v6473_v56  ;;  %v6493_v56 = vld [vmem:[%s8265_s21 + $0x80] sm:$0xff] }
 0x877   :  { %3409 = vmatpush.msrb.mxu0 %v6472_v3  ;;  %v6620_v3 = vld [vmem:[%s8248_s11 + $0x2] ss:$0 sm:$0xff] }
 0x879   :  { %3410 = vmatpush.msrb.mxu0 %v6471_v5 }
 0x87b   :  { %3411 = vmatpush.msrb.mxu0 %v6470_v2 }
 0x87d   :  { %3412 = vmatpush.msrb.mxu0 %v6469_v38 }
 0x87f   :  { %3413 = vmatpush.msrb.mxu0 %v6468_v35 }
 0x8e2   :  { %v3323_v59 = vpop.permute.xlu1 %3322 }
 0x8ed   :  { %v3221_v8 = vpop.f32.mrf.mxu0 }
 0x8ee   :  { %v3222_v12 = vadd.f32 %v6614_v7, %v3221_v8 }
 0x8f0   :  { %v3225_v13 = vmin.f32 %v3222_v12, 0.0  ;;  %vm3224_vm11 = vcmp.gt.f32.partialorder %v3222_v12, 0.0 }
 0x8f2   :  { %v3226_v14 = vmul.f32 1.442695, %v3225_v13 }
 0x8f4   :  { %6639 = vpow2.f32 %v3226_v14  ;;  %v6486_v14 = vld [vmem:[%s8288_s5 + $0x78] sm:$0xff] }
 0x8f5   :  { %3449 = vmatpush.msra.mxu1 %v6486_v14  ;;  %v6506_v14 = vld [vmem:[%s8288_s5 + $0x90] sm:$0xff] }
 0x8fa   :  { %v6640_v60 = vpop.eup %6639 }
 0x8fb   :  { %v6460_v15 = vadd.f32 -1.0, %v6640_v60  ;;  %v6485_v60 = vld [vmem:[%s8288_s5 + $0x70] sm:$0xff] }
 0x8fc   :  { %3450 = vmatpush.msra.mxu1 %v6485_v60  ;;  %v6505_v60 = vld [vmem:[%s8288_s5 + $0x88] sm:$0xff] }
 0x8fd   :  { %v3229_v17 = vsel %vm3224_vm11, %v3222_v12, %v6460_v15  ;;  %v6484_v15 = vld [vmem:[%s8288_s5 + $0x68] sm:$0xff]  ;;  %vm3337_vm11 = vcmask 58368  }
 0x8fe   :  { %v3234_v18 = vadd.f32 %v8276_v16, %v3229_v17  ;;  %3451 = vmatpush.msra.mxu1 %v6484_v15  ;;  %v6483_v17 = vld [vmem:[%s8288_s5 + $0x60] sm:$0xff] }
 0x8ff   :  { %v6504_v15 = vld [vmem:[%s8288_s5 + $0x80] sm:$0xff] }
 0x900   :  { %6461 = vmatmul.msk.f32.vlgmr.msrb.gmra.mxu1 %vm728_vm3, %v3234_v18  ;;  %v6482_v18 = vld [vmem:[%s8288_s5 + $0x58] sm:$0xff] }
 0x901   :  { %3452 = vmatpush.msra.mxu1 %v6483_v17  ;;  %v6621_v17 = vld [vmem:[%s8260_s16 + $0x2] ss:$0 sm:$0xff] }
 0x903   :  { %3453 = vmatpush.msra.mxu1 %v6482_v18 }
 0x905   :  { %3454 = vmatpush.msra.mxu1 %v6481_v19 }
 0x907   :  { %3455 = vmatpush.msra.mxu1 %v6480_v20 }
 0x909   :  { %3456 = vmatpush.msra.mxu1 %v6479_v21 }
 0x97d   :  { %v3267_v29 = vpop.f32.mrf.mxu1 }
 0x97e   :  { %v3268_v34 = vadd.f32 %v6615_v58, %v3267_v29 }
 0x980   :  { %v3271_v32 = vmin.f32 %v3268_v34, 0.0  ;;  %vm3270_vm13 = vcmp.gt.f32.partialorder %v3268_v34, 0.0 }
 0x982   :  { %v3272_v33 = vmul.f32 1.442695, %v3271_v32  ;;  %v6619_v32 = vld [vmem:[%s8283_s27 + $0x1] ss:$0 sm:$0xff] }
 0x984   :  { %6641 = vpow2.f32 %v3272_v33 }
 0x98a   :  { %v6642_v36 = vpop.eup %6641 }
 0x98b   :  { %v6462_v37 = vadd.f32 -1.0, %v6642_v36 }
 0x98d   :  { %v3275_v41 = vsel %vm3270_vm13, %v3268_v34, %v6462_v37  ;;  %vm6387_vm13 = vcmask 263168  }
 0x98e   :  { %6463 = vmatmul.msk.f32.vlgmr.msrb.gmra.mxu2 %vm728_vm3, %v3275_v41 }
 0xa11   :  { %v3308_v43 = vpop.f32.mrf.mxu2 }
 0xa12   :  { %v3309_v44 = vadd.f32 %v6616_v42, %v3308_v43 }
 0xa14   :  { %3328 = vrot.lane.b32.xlu2 %v3309_v44, %s6913_s26  ;;  %v3312_v9 = vand.u32 2147483647, %v3309_v44  ;;  %v3311_v52 = vmin.f32 %v3309_v44, 0.0 }
 0xa16   :  { %v3313_v45 = vsub.f32 0.0, %v3312_v9  ;;  %v6489_v9 = vld [vmem:[%s8239_s2 + $0x10] sm:$0xff] }
 0xa17   :  { %3515 = vmatpush.msra.mxu2 %v6489_v9  ;;  %v6514_v9 = vld [vmem:[%s8239_s2 + $0x18] sm:$0xff]  ;;  %s6930_s2 = smov 35  }
 0xa18   :  { %v3314_v55 = vmul.f32 1.442695, %v3313_v45  ;;  %s6431_s8 = sld [smem:[%s9533_s0 + %s6930_s2]]  }
 0xa1a   :  { %6643 = vpow2.f32 %v3314_v55 }
 0xa20   :  { %v6644_v48 = vpop.eup %6643 }
 0xa21   :  { %v3316_v63 = vadd.f32 1.0, %v6644_v48 }
 0xa23   :  { %6645 = vlog2.f32 %v3316_v63 }
 0xa29   :  { %v6646_v50 = vpop.eup %6645 }
 0xa2a   :  { %v3318_v51 = vmul.f32 0.6931472, %v6646_v50 }
 0xa2c   :  { %v8303_v30 = vsub.f32 %v3311_v52, %v3318_v51 }
 0xa2e   :  { %v3320_v54 = vmul.f32 1.442695, %v8303_v30 }
 0xa30   :  { %6647 = vpow2.f32 %v3320_v54 }
 0xa36   :  { %v6648_v47 = vpop.eup %6647 }
 0xa37   :  { %v3326_v53 = vsub.f32 1.0, %v6648_v47  ;;  %v3325_v61 = vmul.f32 %v6648_v47, %v3323_v59 }
 0xa6e   :  { %v3329_v57 = vpop.permute.xlu2 %3328 }
 0xa6f   :  { %v3331_v62 = vmul.f32 %v3329_v57, %v3326_v53  ;;  %v6500_v57 = vld [vmem:[%s8265_s21 + $0xb8] sm:$0xff] }
 0xa70   :  { %3552 = vmatpush.msra.mxu3 %v6500_v57  ;;  %v6521_v57 = vld [vmem:[%s8265_s21 + $0xd8] sm:$0xff] }
 0xa71   :  { %v8306_v0 = vadd.f32 %v3331_v62, %v3325_v61  ;;  %v6499_v61 = vld [vmem:[%s8265_s21 + $0xb0] sm:$0xff]  ;;  %v6498_v62 = vld [vmem:[%s8265_s21 + $0xa8] sm:$0xff] }
 0xa72   :  { %3553 = vmatpush.msra.mxu3 %v6499_v61  ;;  %v6520_v61 = vld [vmem:[%s8265_s21 + $0xd0] sm:$0xff] }
 0xa73   :  { %3350 = vrot.lane.b32.xlu2 %v8306_v0, %s6922_s25 }
 0xa74   :  { %3554 = vmatpush.msra.mxu3 %v6498_v62  ;;  %v6518_v62 = vld [vmem:[%s8265_s21 + $0xc0] sm:$0xff] }
 0xacd   :  { %v3351_v1 = vpop.permute.xlu2 %3350 }
 0xace   :  { %6466 = vmatmul.msk.f32.vlgmr.msra.gmra.mxu0 %vm2981_vm4, %v3351_v1  ;;  %v6496_v1 = vld [vmem:[%s8265_s21 + $0x98] sm:$0xff] }
 0xacf   :  { %3661 = vmatpush.msra.mxu0 %v6514_v9 }
 0xb4b   :  { %v3371_v11 = vpop.f32.mrf.mxu0 }
 0xb4c   :  { %v3372_v39 = vadd.f32 %v6617_v4, %v3371_v11 }
 0xb4e   :  { %v3375_v46 = vmin.f32 %v3372_v39, 0.0  ;;  %vm3374_vm14 = vcmp.gt.f32.partialorder %v3372_v39, 0.0 }
 0xb50   :  { %v3376_v6 = vmul.f32 1.442695, %v3375_v46 }
 0xb52   :  { %6649 = vpow2.f32 %v3376_v6  ;;  %v6511_v6 = vld [vmem:[%s8288_s5 + $0xb8] sm:$0xff] }
 0xb53   :  { %3595 = vmatpush.msrb.mxu2 %v6511_v6  ;;  %v6531_v6 = vld [vmem:[%s8288_s5 + $0xd0] sm:$0xff] }
 0xb58   :  { %v6650_v7 = vpop.eup %6649 }
 0xb59   :  { %v6467_v8 = vadd.f32 -1.0, %v6650_v7  ;;  %v6510_v7 = vld [vmem:[%s8288_s5 + $0xb0] sm:$0xff] }
 0xb5a   :  { %3596 = vmatpush.msrb.mxu2 %v6510_v7  ;;  %v6530_v7 = vld [vmem:[%s8288_s5 + $0xc8] sm:$0xff] }
 0xb5b   :  { %v3379_v12 = vsel %vm3374_vm14, %v3372_v39, %v6467_v8  ;;  %v6509_v8 = vld [vmem:[%s8288_s5 + $0xa8] sm:$0xff] }
 0xb5c   :  { %v3380_v13 = vadd.f32 %v3379_v12, %v8276_v16  ;;  %3597 = vmatpush.msrb.mxu2 %v6509_v8  ;;  %v6508_v12 = vld [vmem:[%s8288_s5 + $0xa0] sm:$0xff] }
 0xb5d   :  { %v6624_v8 = vld [vmem:[%s8260_s16 + $0x3] ss:$0 sm:$0xff] }
 0xb5e   :  { %6477 = vmatmul.msk.f32.vlgmr.msrb.gmra.mxu0 %vm728_vm3, %v3380_v13  ;;  %3598 = vmatpush.msrb.mxu2 %v6508_v12  ;;  %v6507_v13 = vld [vmem:[%s8288_s5 + $0x98] sm:$0xff] }
 0xb60   :  { %3599 = vmatpush.msrb.mxu2 %v6507_v13 }
 0xb62   :  { %3600 = vmatpush.msrb.mxu2 %v6506_v14 }
 0xb64   :  { %3601 = vmatpush.msrb.mxu2 %v6505_v60 }
 0xb66   :  { %3602 = vmatpush.msrb.mxu2 %v6504_v15 }
 0xbdb   :  { %v3415_v23 = vpop.f32.mrf.mxu0 }
 0xbdc   :  { %v3416_v24 = vadd.f32 %v6618_v22, %v3415_v23 }
 0xbde   :  { %v3419_v25 = vmin.f32 %v3416_v24, 0.0  ;;  %vm3418_vm15 = vcmp.gt.f32.partialorder %v3416_v24, 0.0 }
 0xbe0   :  { %v3420_v27 = vmul.f32 1.442695, %v3419_v25  ;;  %v6622_v25 = vld [vmem:[%s8283_s27 + $0x2] ss:$0 sm:$0xff] }
 0xbe2   :  { %6651 = vpow2.f32 %v3420_v27 }
 0xbe8   :  { %v6652_v58 = vpop.eup %6651 }
 0xbe9   :  { %v6478_v29 = vadd.f32 -1.0, %v6652_v58 }
 0xbeb   :  { %v3423_v34 = vsel %vm3418_vm15, %v3416_v24, %v6478_v29 }
 0xbec   :  { %6488 = vmatmul.msk.f32.vlgmr.msra.gmra.mxu1 %vm728_vm3, %v3423_v34 }
 0xc69   :  { %v3458_v33 = vpop.f32.mrf.mxu1 }
 0xc6a   :  { %v3459_v36 = vadd.f32 %v6619_v32, %v3458_v33 }
 0xc6c   :  { %3475 = vrot.lane.b32.xlu0 %v3459_v36, %s6913_s26  ;;  %v3462_v37 = vand.u32 2147483647, %v3459_v36  ;;  %v3461_v48 = vmin.f32 %v3459_v36, 0.0 }
 0xc6e   :  { %v3463_v41 = vsub.f32 0.0, %v3462_v37 }
 0xc70   :  { %v3464_v42 = vmul.f32 1.442695, %v3463_v41 }
 0xc72   :  { %6653 = vpow2.f32 %v3464_v42 }
 0xc78   :  { %v6654_v43 = vpop.eup %6653 }
 0xc79   :  { %v3466_v44 = vadd.f32 1.0, %v6654_v43 }
 0xc7b   :  { %6655 = vlog2.f32 %v3466_v44 }
 0xc81   :  { %v6656_v45 = vpop.eup %6655 }
 0xc82   :  { %v3468_v55 = vmul.f32 0.6931472, %v6656_v45 }
 0xc84   :  { %v8335_v63 = vsub.f32 %v3461_v48, %v3468_v55 }
 0xc86   :  { %v3470_v49 = vmul.f32 1.442695, %v8335_v63 }
 0xc88   :  { %6657 = vpow2.f32 %v3470_v49 }
 0xc8e   :  { %v6658_v50 = vpop.eup %6657 }
 0xc8f   :  { %v3473_v51 = vsub.f32 1.0, %v6658_v50  ;;  %v3472_v54 = vmul.f32 %v6658_v50, %v8306_v0  ;;  %v6497_v0 = vld [vmem:[%s8265_s21 + $0xa0] sm:$0xff] }
 0xc90   :  { %3555 = vmatpush.msra.mxu3 %v6497_v0  ;;  %v6623_v0 = vld [vmem:[%s8248_s11 + $0x3] ss:$0 sm:$0xff] }
 0xc92   :  { %3556 = vmatpush.msra.mxu3 %v6496_v1 }
 0xc94   :  { %3557 = vmatpush.msra.mxu3 %v6495_v31 }
 0xc96   :  { %3558 = vmatpush.msra.mxu3 %v6494_v40 }
 0xc98   :  { %3559 = vmatpush.msra.mxu3 %v6493_v56 }
 0xcde   :  { %v3476_v52 = vpop.permute.xlu0 %3475 }
 0xcdf   :  { %v3478_v47 = vmul.f32 %v3476_v52, %v3473_v51 }
 0xce1   :  { %v8339_v53 = vadd.f32 %v3478_v47, %v3472_v54  ;;  %v6525_v54 = vld [vmem:[%s8265_s21 + $0xf8] sm:$0xff]  ;;  %v6524_v47 = vld [vmem:[%s8265_s21 + $0xf0] sm:$0xff] }
 0xce2   :  { %3698 = vmatpush.msrb.mxu1 %v6525_v54 }
 0xce3   :  { %3496 = vrot.lane.b32.xlu1 %v8339_v53, %s6922_s25 }
 0xce4   :  { %3699 = vmatpush.msrb.mxu1 %v6524_v47 }
 0xd55   :  { %v3497_v59 = vpop.permute.xlu1 %3496 }
 0xd56   :  { %6491 = vmatmul.msk.f32.vlgmr.msra.gmra.mxu2 %vm2981_vm4, %v3497_v59  ;;  %v6522_v59 = vld [vmem:[%s8265_s21 + $0xe0] sm:$0xff] }
 0xdd9   :  { %v3517_v5 = vpop.f32.mrf.mxu2 }
 0xdda   :  { %v3518_v2 = vadd.f32 %v6620_v3, %v3517_v5 }
 0xddc   :  { %v3521_v38 = vmin.f32 %v3518_v2, 0.0  ;;  %vm3520_vm5 = vcmp.gt.f32.partialorder %v3518_v2, 0.0 }
 0xdde   :  { %v3522_v35 = vmul.f32 1.442695, %v3521_v38 }
 0xde0   :  { %6659 = vpow2.f32 %v3522_v35  ;;  %v6536_v35 = vld [vmem:[%s8288_s5 + $0xf8] sm:$0xff] }
 0xde1   :  { %3741 = vmatpush.msrb.mxu3 %v6536_v35 }
 0xde6   :  { %v6660_v4 = vpop.eup %6659 }
 0xde7   :  { %v6492_v11 = vadd.f32 -1.0, %v6660_v4  ;;  %v6535_v4 = vld [vmem:[%s8288_s5 + $0xf0] sm:$0xff] }
 0xde8   :  { %3742 = vmatpush.msrb.mxu3 %v6535_v4 }
 0xde9   :  { %v3525_v39 = vsel %vm3520_vm5, %v3518_v2, %v6492_v11  ;;  %v6534_v11 = vld [vmem:[%s8288_s5 + $0xe8] sm:$0xff] }
 0xdea   :  { %v3526_v46 = vadd.f32 %v3525_v39, %v8276_v16  ;;  %3743 = vmatpush.msrb.mxu3 %v6534_v11  ;;  %v6533_v39 = vld [vmem:[%s8288_s5 + $0xe0] sm:$0xff] }
 0xdec   :  { %6502 = vmatmul.msk.f32.vlgmr.msra.gmra.mxu3 %vm728_vm3, %v3526_v46  ;;  %v6532_v46 = vld [vmem:[%s8288_s5 + $0xd8] sm:$0xff] }
 0xded   :  { %3744 = vmatpush.msrb.mxu3 %v6533_v39 }
 0xdef   :  { %3745 = vmatpush.msrb.mxu3 %v6532_v46 }
 0xdf1   :  { %3746 = vmatpush.msrb.mxu3 %v6531_v6 }
 0xdf3   :  { %3747 = vmatpush.msrb.mxu3 %v6530_v7 }
 0xe6f   :  { %v3561_v18 = vpop.f32.mrf.mxu3 }
 0xe70   :  { %v3562_v19 = vadd.f32 %v6621_v17, %v3561_v18 }
 0xe72   :  { %v3565_v20 = vmin.f32 %v3562_v19, 0.0  ;;  %vm3564_vm6 = vcmp.gt.f32.partialorder %v3562_v19, 0.0 }
 0xe74   :  { %v3566_v21 = vmul.f32 1.442695, %v3565_v20 }
 0xe76   :  { %6661 = vpow2.f32 %v3566_v21 }
 0xe7c   :  { %v6662_v22 = vpop.eup %6661 }
 0xe7d   :  { %v6503_v23 = vadd.f32 -1.0, %v6662_v22 }
 0xe7f   :  { %v3569_v24 = vsel %vm3564_vm6, %v3562_v19, %v6503_v23  ;;  %v6625_v19 = vld [vmem:[%s8283_s27 + $0x3] ss:$0 sm:$0xff] }
 0xe80   :  { %6513 = vmatmul.msk.f32.vlgmr.msrb.gmra.mxu2 %vm728_vm3, %v3569_v24 }
 0xf03   :  { %v3604_v27 = vpop.f32.mrf.mxu2 }
 0xf04   :  { %v3605_v58 = vadd.f32 %v6622_v25, %v3604_v27 }
 0xf06   :  { %3621 = vrot.lane.b32.xlu2 %v3605_v58, %s6913_s26  ;;  %v3608_v29 = vand.u32 2147483647, %v3605_v58  ;;  %v3607_v42 = vmin.f32 %v3605_v58, 0.0 }
 0xf08   :  { %v3609_v34 = vsub.f32 0.0, %v3608_v29 }
 0xf0a   :  { %v3610_v32 = vmul.f32 1.442695, %v3609_v34 }
 0xf0c   :  { %6663 = vpow2.f32 %v3610_v32 }
 0xf12   :  { %v6664_v33 = vpop.eup %6663 }
 0xf13   :  { %v3612_v36 = vadd.f32 1.0, %v6664_v33 }
 0xf15   :  { %6665 = vlog2.f32 %v3612_v36 }
 0xf1b   :  { %v6666_v37 = vpop.eup %6665 }
 0xf1c   :  { %v3614_v41 = vmul.f32 0.6931472, %v6666_v37 }
 0xf1e   :  { %v3615_v43 = vsub.f32 %v3607_v42, %v3614_v41  ;;  %v81_v41 = vstv %s6431_s8 }
 0xf1f   :  { %82 = vst [vmem:[#allocation2] sm:$0x1] %v81_v41 }
 0xf20   :  { %v3616_v44 = vmul.f32 1.442695, %v3615_v43 }
 0xf22   :  { %6667 = vpow2.f32 %v3616_v44 }
 0xf28   :  { %v6668_v45 = vpop.eup %6667 }
 0xf29   :  { %v3619_v55 = vsub.f32 1.0, %v6668_v45  ;;  %v3618_v49 = vmul.f32 %v6668_v45, %v8339_v53  ;;  %v6523_v53 = vld [vmem:[%s8265_s21 + $0xe8] sm:$0xff] }
 0xf2a   :  { %3700 = vmatpush.msrb.mxu1 %v6523_v53 }
 0xf2c   :  { %3701 = vmatpush.msrb.mxu1 %v6522_v59 }
 0xf2e   :  { %3702 = vmatpush.msrb.mxu1 %v6521_v57 }
 0xf30   :  { %3703 = vmatpush.msrb.mxu1 %v6520_v61 }
 0xf60   :  { %v3622_v48 = vpop.permute.xlu2 %3621 }
 0xf61   :  { %v3624_v50 = vmul.f32 %v3622_v48, %v3619_v55  ;;  %v6626_v48 = vld [vmem:[#allocation2] ss:$0 sm:$0xff] }
 0xf63   :  { %v8369_v51 = vadd.f32 %v3624_v50, %v3618_v49 }
 0xf65   :  { %3642 = vrot.lane.b32.xlu0 %v8369_v51, %s6922_s25 }
 0xf6d   :  { %3334 = vrot.lane.b32.xlu0 %v8303_v30, %s6922_s25  ;;  %v6519_v30 = vld [vmem:[%s8265_s21 + $0xc8] sm:$0xff] }
 0xf6e   :  { %3704 = vmatpush.msrb.mxu1 %v6519_v30 }
 0xf70   :  { %3705 = vmatpush.msrb.mxu1 %v6518_v62 }
 0xf75   :  { %3627 = vrot.lane.b32.xlu0 %v3615_v43, %s6922_s25 }
 0xfd7   :  { %v3643_v52 = vpop.permute.xlu0 %3642 }
 0xfd8   :  { %6516 = vmatmul.msk.f32.vlgmr.msra.gmra.mxu0 %vm2981_vm4, %v3643_v52 }
 0xfdf   :  { %v3335_v22 = vpop.permute.xlu0 %3334 }
 0xfe0   :  { %v3338_v23 = vsel %vm3337_vm11, %v3335_v22, 0.0 }
 0xfe7   :  { %v3628_v50 = vpop.permute.xlu0 %3627 }
0x1055   :  { %v3663_v1 = vpop.f32.mrf.mxu0 }
0x1056   :  { %v3664_v31 = vadd.f32 %v6623_v0, %v3663_v1 }
0x1058   :  { %v3667_v40 = vmin.f32 %v3664_v31, 0.0  ;;  %vm3666_vm9 = vcmp.gt.f32.partialorder %v3664_v31, 0.0 }
0x105a   :  { %v3668_v56 = vmul.f32 1.442695, %v3667_v40 }
0x105c   :  { %6669 = vpow2.f32 %v3668_v56 }
0x1062   :  { %v6670_v3 = vpop.eup %6669 }
0x1063   :  { %v6517_v5 = vadd.f32 -1.0, %v6670_v3 }
0x1065   :  { %v3671_v2 = vsel %vm3666_vm9, %v3664_v31, %v6517_v5 }
0x1066   :  { %v3672_v38 = vadd.f32 %v3671_v2, %v8276_v16  ;;  %v6529_v16 = vld [vmem:[%s8288_s5 + $0xc0] sm:$0xff] }
0x1067   :  { %3748 = vmatpush.msrb.mxu3 %v6529_v16 }
0x1068   :  { %6527 = vmatmul.msk.f32.vlgmr.msrb.gmra.mxu1 %vm728_vm3, %v3672_v38 }
0x10e5   :  { %v3707_v12 = vpop.f32.mrf.mxu1 }
0x10e6   :  { %v3708_v13 = vadd.f32 %v6624_v8, %v3707_v12 }
0x10e8   :  { %v3711_v14 = vmin.f32 %v3708_v13, 0.0  ;;  %vm3710_vm10 = vcmp.gt.f32.partialorder %v3708_v13, 0.0 }
0x10ea   :  { %v3712_v60 = vmul.f32 1.442695, %v3711_v14 }
0x10ec   :  { %6671 = vpow2.f32 %v3712_v60 }
0x10f2   :  { %v6672_v15 = vpop.eup %6671 }
0x10f3   :  { %v6528_v17 = vadd.f32 -1.0, %v6672_v15 }
0x10f5   :  { %v3715_v18 = vsel %vm3710_vm10, %v3708_v13, %v6528_v17 }
0x10f6   :  { %6538 = vmatmul.msk.f32.vlgmr.msrb.gmra.mxu3 %vm728_vm3, %v3715_v18 }
0x1179   :  { %v3750_v20 = vpop.f32.mrf.mxu3 }
0x117a   :  { %v3751_v21 = vadd.f32 %v6625_v19, %v3750_v20 }
0x117c   :  { %3767 = vrot.lane.b32.xlu1 %v3751_v21, %s6913_s26  ;;  %v3754_v24 = vand.u32 2147483647, %v3751_v21  ;;  %v3753_v33 = vmin.f32 %v3751_v21, 0.0  ;;  %s6931_s26 = smov 26  }
0x117d   :  { %s6422_s11 = sld [smem:[%s9533_s0 + %s6931_s26]]   ;;  %s6938_s26 = smov 31  }
0x117e   :  { %v3755_v25 = vsub.f32 0.0, %v3754_v24 }
0x1180   :  { %v3756_v27 = vmul.f32 1.442695, %v3755_v25 }
0x1182   :  { %6673 = vpow2.f32 %v3756_v27 }
0x1183   :  { %v3780_v49 = vld [vmem:[%s6422_s11] sm:$0xff]  ;;  %s8685_s11 = sld [smem:[%s9533_s0 + %s6938_s26]]  }
0x1184   :  { %3801 = vmatpush.msrb.mxu0 %v3780_v49 }
0x1188   :  { %v6674_v58 = vpop.eup %6673 }
0x1189   :  { %v3758_v29 = vadd.f32 1.0, %v6674_v58 }
0x118b   :  { %6675 = vlog2.f32 %v3758_v29 }
0x1191   :  { %v6676_v34 = vpop.eup %6675 }
0x1192   :  { %v3760_v32 = vmul.f32 0.6931472, %v6676_v34 }
0x1194   :  { %v3761_v36 = vsub.f32 %v3753_v33, %v3760_v32 }
0x1196   :  { %v3762_v37 = vmul.f32 1.442695, %v3761_v36 }
0x1198   :  { %6677 = vpow2.f32 %v3762_v37 }
0x119e   :  { %v6678_v42 = vpop.eup %6677 }
0x119f   :  { %v3765_v43 = vsub.f32 1.0, %v6678_v42  ;;  %v3764_v9 = vmul.f32 %v6678_v42, %v8369_v51  ;;  %v3630_v51 = vsel %vm3337_vm11, %v3628_v50, 0.0  ;;  %v3806_v42 = vld [vmem:[%s6423_s23] sm:$0x3] }
0x11a0   :  { %v3842_v49 = vperm.slane %v3806_v42, 1 }
0x11a6   :  { %3339 = vadd.xlane.f32.xlu1 %v3338_v23 }
0x11ee   :  { %v3768_v44 = vpop.permute.xlu1 %3767 }
0x11ef   :  { %v3770_v45 = vmul.f32 %v3768_v44, %v3765_v43 }
0x11f1   :  { %v3771_v55 = vadd.f32 %v3770_v45, %v3764_v9  ;;  %v3840_v45 = vperm.slane %v3806_v42, 0  ;;  %v4047_v42 = vld [vmem:[%s8448_s30 + $0x208] sm:$0xff] }
0x11f3   :  { %3782 = vrot.lane.b32.xlu2 %v3771_v55, %s6922_s25 }
0x11fb   :  { %3481 = vrot.lane.b32.xlu2 %v8335_v63, %s6922_s25 }
0x1203   :  { %3773 = vrot.lane.b32.xlu2 %v3761_v36, %s6922_s25  ;;  %s6932_s25 = smov 28  }
0x1204   :  { %s6424_s15 = sld [smem:[%s9533_s0 + %s6932_s25]]  }
0x120a   :  { %v3851_v2 = vld [vmem:[%s6424_s15 + $0x30] sm:$0xff]  ;;  %v3852_v38 = vld [vmem:[%s6424_s15 + $0x38] sm:$0xff]  ;;  %v3849_v11 = vld [vmem:[%s6424_s15 + $0x20] sm:$0xff] }
0x120b   :  { %6210 = vperm.xlu2 %6611, %v6626_v48   ;;  %3868 = vmatpush.msra.mxu2 %v3851_v2  ;;  %v3850_v39 = vld [vmem:[%s6424_s15 + $0x28] sm:$0xff]  ;;  %v3847_v7 = vld [vmem:[%s6424_s15 + $0x10] sm:$0xff]  ;;  %v3848_v16 = vld [vmem:[%s6424_s15 + $0x18] sm:$0xff] }
0x120c   :  { %3888 = vmatpush.msra.mxu0 %v3852_v38  ;;  %v3845_v14 = vld [vmem:[%s6424_s15] sm:$0xff]  ;;  %v3846_v60 = vld [vmem:[%s6424_s15 + $0x8] sm:$0xff]  ;;  %s6940_s15 = smov 33  }
0x120d   :  { %3869 = vmatpush.msra.mxu2 %v3849_v11  ;;  %v4026_v2 = vld [vmem:[%s8448_s30 + $0x160] sm:$0xff]  ;;  %v4027_v38 = vld [vmem:[%s8448_s30 + $0x168] sm:$0xff]  ;;  %s6429_s18 = sld [smem:[%s9533_s0 + %s6940_s15]]  }
0x120e   :  { %3889 = vmatpush.msra.mxu0 %v3850_v39  ;;  %v4022_v39 = vld [vmem:[%s8448_s30 + $0x140] sm:$0xff] }
0x120f   :  { %3870 = vmatpush.msra.mxu2 %v3847_v7 }
0x1210   :  { %3890 = vmatpush.msra.mxu0 %v3848_v16 }
0x1211   :  { %3871 = vmatpush.msra.mxu2 %v3845_v14  ;;  %v4024_v14 = vld [vmem:[%s8448_s30 + $0x150] sm:$0xff] }
0x1212   :  { %3891 = vmatpush.msra.mxu0 %v3846_v60 }
0x1219   :  { %v3340_v8 = vpop.xlane.xlu1 %3339 }
0x1234   :  { %3631 = vadd.xlane.f32.xlu2 %v3630_v51 }
0x124d   :  { %v3783_v52 = vpop.permute.xlu2 %3782 }
0x124e   :  { %6539 = vmatmul.msk.f32.vlgmr.msrb.gmra.mxu0 %vm2981_vm4, %v3783_v52  ;;  %vm6384_vm4 = vcmask 195584   ;;  %v4058_v52 = vld [vmem:[%s8448_s30 + $0x260] sm:$0xff] }
0x124f   :  { %4097 = vmatpush.msrb.mxu2 %v4058_v52  ;;  %v4002_v52 = vld [vmem:[%s8448_s30 + $0xa0] sm:$0xff] }
0x1255   :  { %v3482_v54 = vpop.permute.xlu2 %3481 }
0x1256   :  { %v3484_v63 = vsel %vm3337_vm11, %v3482_v54, 0.0  ;;  %v4054_v54 = vld [vmem:[%s8448_s30 + $0x240] sm:$0xff] }
0x1257   :  { %3485 = vadd.xlane.f32.xlu0 %v3484_v63  ;;  %4098 = vmatpush.msrb.mxu2 %v4054_v54  ;;  %v4050_v63 = vld [vmem:[%s8448_s30 + $0x220] sm:$0xff]  ;;  %v4003_v54 = vld [vmem:[%s8448_s30 + $0xa8] sm:$0xff] }
0x1259   :  { %4099 = vmatpush.msrb.mxu2 %v4050_v63  ;;  %v4008_v63 = vld [vmem:[%s8448_s30 + $0xd0] sm:$0xff] }
0x125d   :  { %v3774_v47 = vpop.permute.xlu2 %3773 }
0x125e   :  { %v3776_v53 = vsel %vm3337_vm11, %v3774_v47, 0.0  ;;  %v4042_v47 = vld [vmem:[%s8448_s30 + $0x1e0] sm:$0xff] }
0x125f   :  { %3777 = vadd.xlane.f32.xlu1 %v3776_v53  ;;  %v4043_v53 = vld [vmem:[%s8448_s30 + $0x1e8] sm:$0xff]  ;;  %4065 = vmatpush.msra.mxu1 %v4042_v47 }
0x1260   :  { %4105 = vmatpush.msra.mxu3 %v4043_v53 }
0x1265   :  { %v8431_v17 = vpop.permute.xlu2 %6210 }
0x126b   :  { %6380 = vrot.lane.b32.xlu0 %v3771_v55, %s6914_s1 }
0x1278   :  { %6377 = vrot.lane.b32.xlu1 %v8251_v28, %s6914_s1  ;;  %s6933_s1 = smov 37  }
0x1279   :  { %s6433_s19 = sld [smem:[%s9533_s0 + %s6933_s1]]  }
0x12a7   :  { %v3632_v23 = vpop.xlane.xlu2 %3631 }
0x12ca   :  { %v3486_v20 = vpop.xlane.xlu0 %3485 }
0x12cb   :  { %v8419_v59 = vpop.f32.mrf.mxu0  ;;  %v3487_v22 = vadd.f32 %v3486_v20, %v3340_v8  ;;  %v4059_v8 = vld [vmem:[%s8448_s30 + $0x268] sm:$0xff] }
0x12cc   :  { %v3807_v57 = vsel %vm2329_vm8, %v8419_v59, 0.0  ;;  %v3815_v61 = vmul.f32 %v8419_v59, %v8419_v59  ;;  %4137 = vmatpush.msrb.mxu0 %v4059_v8 }
0x12cd   :  { %v3808_v30 = vrot.slane %v3807_v57, 4  ;;  %v3633_v25 = vadd.f32 %v3632_v23, %v3487_v22  ;;  %v4014_v22 = vld [vmem:[%s8448_s30 + $0x100] sm:$0xff]  ;;  %v4015_v23 = vld [vmem:[%s8448_s30 + $0x108] sm:$0xff] }
0x12ce   :  { %v3816_v62 = vsel %vm2329_vm8, %v3815_v61, 0.0  ;;  %v4039_v61 = vld [vmem:[%s8448_s30 + $0x1c8] sm:$0xff] }
0x12cf   :  { %v3809_v0 = vadd.f32 %v3808_v30, %v3807_v57  ;;  %v3817_v1 = vrot.slane %v3816_v62, 4  ;;  %v4038_v57 = vld [vmem:[%s8448_s30 + $0x1c0] sm:$0xff]  ;;  %v4044_v30 = vld [vmem:[%s8448_s30 + $0x1f0] sm:$0xff]  ;;  %4106 = vmatpush.msra.mxu3 %v4039_v61 }
0x12d0   :  { %4066 = vmatpush.msra.mxu1 %v4038_v57 }
0x12d1   :  { %v3810_v31 = vrot.slane %v3809_v0, 2  ;;  %v3818_v28 = vadd.f32 %v3817_v1, %v3816_v62  ;;  %v4034_v62 = vld [vmem:[%s8448_s30 + $0x1a0] sm:$0xff]  ;;  %v4040_v1 = vld [vmem:[%s8448_s30 + $0x1d0] sm:$0xff] }
0x12d2   :  { %v3778_v21 = vpop.xlane.xlu1 %3777  ;;  %4067 = vmatpush.msra.mxu1 %v4034_v62  ;;  %v3999_v62 = vld [vmem:[%s8448_s30 + $0x88] sm:$0xff] }
0x12d3   :  { %v3811_v40 = vadd.f32 %v3810_v31, %v3809_v0  ;;  %v3819_v56 = vrot.slane %v3818_v28, 2  ;;  %v3779_v29 = vadd.f32 %v3778_v21, %v3633_v25  ;;  %v4035_v0 = vld [vmem:[%s8448_s30 + $0x1a8] sm:$0xff]  ;;  %v4030_v31 = vld [vmem:[%s8448_s30 + $0x180] sm:$0xff] }
0x12d4   :  { %4107 = vmatpush.msra.mxu3 %v4035_v0  ;;  %4068 = vmatpush.msra.mxu1 %v4030_v31  ;;  %v4004_v0 = vld [vmem:[%s8448_s30 + $0xb0] sm:$0xff] }
0x12d5   :  { %v3812_v3 = vrot.slane %v3811_v40, 1  ;;  %v3820_v5 = vadd.f32 %v3819_v56, %v3818_v28  ;;  %v4031_v28 = vld [vmem:[%s8448_s30 + $0x188] sm:$0xff] }
0x12d6   :  { %4108 = vmatpush.msra.mxu3 %v4031_v28  ;;  %4069 = vmatpush.msra.mxu1 %v4026_v2  ;;  %v4052_v28 = vld [vmem:[%s8448_s30 + $0x230] sm:$0xff]  ;;  %v3995_v2 = vld [vmem:[%s8448_s30 + $0x68] sm:$0xff] }
0x12d7   :  { %v3813_v35 = vadd.f32 %v3812_v3, %v3811_v40  ;;  %v3821_v4 = vrot.slane %v3820_v5, 1  ;;  %v4036_v40 = vld [vmem:[%s8448_s30 + $0x1b0] sm:$0xff] }
0x12d8   :  { %4109 = vmatpush.msra.mxu3 %v4027_v38  ;;  %4070 = vmatpush.msra.mxu1 %v4022_v39  ;;  %v4000_v38 = vld [vmem:[%s8448_s30 + $0x90] sm:$0xff] }
0x12d9   :  { %v3814_v46 = vmul.f32 %v3813_v35, %v8222_v26  ;;  %v3822_v6 = vadd.f32 %v3821_v4, %v3820_v5  ;;  %v4032_v35 = vld [vmem:[%s8448_s30 + $0x190] sm:$0xff] }
0x12db   :  { %v3823_v12 = vmul.f32 %v3822_v6, %v8222_v26  ;;  %v3824_v13 = vmul.f32 %v3814_v46, %v3814_v46  ;;  %v3827_v9 = vsub.f32 %v8419_v59, %v3814_v46  ;;  %v4046_v59 = vld [vmem:[%s8448_s30 + $0x200] sm:$0xff]  ;;  %v4023_v46 = vld [vmem:[%s8448_s30 + $0x148] sm:$0xff]  ;;  %v4028_v6 = vld [vmem:[%s8448_s30 + $0x170] sm:$0xff] }
0x12dc   :  { %4100 = vmatpush.msrb.mxu2 %v4046_v59  ;;  %4110 = vmatpush.msra.mxu3 %v4023_v46  ;;  %v4056_v59 = vld [vmem:[%s8448_s30 + $0x250] sm:$0xff]  ;;  %v3990_v46 = vld [vmem:[%s8448_s30 + $0x40] sm:$0xff] }
0x12dd   :  { %v3825_v15 = vsub.f32 %v3823_v12, %v3824_v13  ;;  %v6381_v34 = vpop.permute.xlu0 %6380  ;;  %v4018_v12 = vld [vmem:[%s8448_s30 + $0x120] sm:$0xff]  ;;  %v4019_v13 = vld [vmem:[%s8448_s30 + $0x128] sm:$0xff] }
0x12de   :  { %4071 = vmatpush.msra.mxu1 %v4018_v12  ;;  %4111 = vmatpush.msra.mxu3 %v4019_v13  ;;  %v3986_v13 = vld [vmem:[%s8448_s30 + $0x20] sm:$0xff] }
0x12df   :  { %v3826_v18 = vmax.f32 %v3825_v15, 0.0 }
0x12e0   :  { %4072 = vmatpush.msra.mxu1 %v4014_v22  ;;  %4112 = vmatpush.msra.mxu3 %v4015_v23  ;;  %v3983_v22 = vld [vmem:[%s8448_s30 + $0x8] sm:$0xff]  ;;  %v3988_v23 = vld [vmem:[%s8448_s30 + $0x30] sm:$0xff] }
0x12e1   :  { %v3828_v19 = vadd.f32 1e-05, %v3826_v18 }
0x12e3   :  { %6679 = vrsqrt.f32 %v3828_v19  ;;  %vm3835_vm15 = vweird.f32 %v3828_v19 }
0x12e9   :  { %v6680_v24 = vpop.eup %6679 }
0x12ea   :  { %v3830_v27 = vmul.f32 %v6680_v24, %v3828_v19  ;;  %v6378_v58 = vpop.permute.xlu1 %6377  ;;  %vm3836_vm14 = vweird.f32 %v6680_v24  ;;  %v4055_v19 = vld [vmem:[%s8448_s30 + $0x248] sm:$0xff] }
0x12eb   :  { %v6383_v32 = vsel %vm2484_vm12, %v8231_v10, %v6378_v58  ;;  %vm3837_vm5 = vmor %vm3835_vm15, %vm3836_vm14  ;;  %4138 = vmatpush.msrb.mxu0 %v4055_v19 }
0x12ec   :  { %v3831_v33 = vmul.f32 %v6680_v24, %v3830_v27  ;;  %v6385_v36 = vsel %vm6384_vm4, %v6383_v32, %v6381_v34  ;;  %v4010_v32 = vld [vmem:[%s8448_s30 + $0xe0] sm:$0xff] }
0x12ed   :  { %v6386_v37 = vsel %vm920_vm7, %v6385_v36, %v3779_v29  ;;  %v4051_v29 = vld [vmem:[%s8448_s30 + $0x228] sm:$0xff]  ;;  %v4016_v36 = vld [vmem:[%s8448_s30 + $0x110] sm:$0xff]  ;;  %4073 = vmatpush.msra.mxu1 %v4010_v32 }
0x12ee   :  { %v3832_v41 = vmul.f32 0.5, %v3831_v33  ;;  %6388 = vst.msk [vmem:[%s6433_s19] sm:$0x3] %vm6387_vm13, %v6386_v37  ;;  %4139 = vmatpush.msrb.mxu0 %v4051_v29  ;;  %v4011_v33 = vld [vmem:[%s8448_s30 + $0xe8] sm:$0xff]  ;;  %v4057_v29 = vld [vmem:[%s8448_s30 + $0x258] sm:$0xff] }
0x12ef   :  { %4113 = vmatpush.msra.mxu3 %v4011_v33 }
0x12f0   :  { %v3833_v43 = vsub.f32 1.5, %v3832_v41  ;;  %4140 = vmatpush.msrb.mxu0 %v4047_v42  ;;  %v4049_v42 = vld [vmem:[%s8448_s30 + $0x218] sm:$0xff] }
0x12f2   :  { %v3834_v44 = vmul.f32 %v6680_v24, %v3833_v43 }
0x12f4   :  { %v3838_v55 = vsel %vm3837_vm5, %v6680_v24, %v3834_v44  ;;  %v4020_v24 = vld [vmem:[%s8448_s30 + $0x130] sm:$0xff] }
0x12f5   :  { %v3839_v48 = vmul.f32 %v3838_v55, %v3827_v9  ;;  %v4006_v9 = vld [vmem:[%s8448_s30 + $0xc0] sm:$0xff]  ;;  %v4012_v55 = vld [vmem:[%s8448_s30 + $0xf0] sm:$0xff] }
0x12f6   :  { %4074 = vmatpush.msra.mxu1 %v4006_v9 }
0x12f7   :  { %v3841_v50 = vmul.f32 %v3840_v45, %v3839_v48  ;;  %v4007_v45 = vld [vmem:[%s8448_s30 + $0xc8] sm:$0xff] }
0x12f8   :  { %4114 = vmatpush.msra.mxu3 %v4007_v45  ;;  %4075 = vmatpush.msra.mxu1 %v4002_v52  ;;  %v6693_v45 = vld [vmem:[%s7865_s29 + $0x58] sm:$0xff] }
0x12f9   :  { %v3843_v10 = vadd.f32 %v3842_v49, %v3841_v50  ;;  %v4060_v50 = vld [vmem:[%s8448_s30 + $0x270] sm:$0xff] }
0x12fa   :  { %4115 = vmatpush.msra.mxu3 %v4003_v54  ;;  %v6695_v54 = vld [vmem:[%s7865_s29 + $0x48] sm:$0xff] }
0x12fb   :  { %v3844_v51 = vmax.f32 %v3843_v10, 0.0 }
0x12fc   :  { %4116 = vmatpush.msra.mxu3 %v3999_v62 }
0x12fd   :  { %6540 = vmatmul.msk.f32.vlgmr.msra.gmra.mxu2 %vm920_vm7, %v3844_v51  ;;  %6541 = vmatmul.msk.f32.vlgmr.msra.gmra.mxu0 %vm920_vm7, %v3844_v51 }
0x12fe   :  { %4145 = vmatpush.msra.mxu2 %v4044_v30  ;;  %4177 = vmatpush.msra.mxu0 %v4060_v50  ;;  %v3998_v30 = vld [vmem:[%s8448_s30 + $0x80] sm:$0xff] }
0x12ff   :  { %4076 = vmatpush.msra.mxu1 %v3998_v30  ;;  %4117 = vmatpush.msra.mxu3 %v3995_v2 }
0x1300   :  { %4146 = vmatpush.msra.mxu2 %v4040_v1  ;;  %4178 = vmatpush.msra.mxu0 %v4056_v59 }
0x1302   :  { %4147 = vmatpush.msra.mxu2 %v4036_v40  ;;  %4179 = vmatpush.msra.mxu0 %v4052_v28 }
0x1304   :  { %4148 = vmatpush.msra.mxu2 %v4032_v35 }
0x1306   :  { %4149 = vmatpush.msra.mxu2 %v4028_v6  ;;  %v3991_v6 = vld [vmem:[%s8448_s30 + $0x48] sm:$0xff] }
0x1307   :  { %4118 = vmatpush.msra.mxu3 %v3991_v6  ;;  %v6700_v6 = vld [vmem:[%s7865_s29 + $0x20] sm:$0xff] }
0x1308   :  { %4150 = vmatpush.msra.mxu2 %v4024_v14  ;;  %v3987_v14 = vld [vmem:[%s8448_s30 + $0x28] sm:$0xff] }
0x1309   :  { %4119 = vmatpush.msra.mxu3 %v3987_v14  ;;  %v6702_v14 = vld [vmem:[%s7865_s29 + $0x18] sm:$0xff] }
0x130a   :  { %4151 = vmatpush.msra.mxu2 %v4020_v24  ;;  %v6689_v24 = vld [vmem:[%s7865_s29 + $0x78] sm:$0xff] }
0x130b   :  { %4120 = vmatpush.msra.mxu3 %v3983_v22  ;;  %v6705_v22 = vld [vmem:[%s7865_s29 + $0x168] sm:$0xff] }
0x130c   :  { %4152 = vmatpush.msra.mxu2 %v4016_v36  ;;  %v4053_v36 = vld [vmem:[%s8448_s30 + $0x238] sm:$0xff] }
0x130d   :  { %4293 = vmatpush.msrb.mxu3 %v6689_v24  ;;  %v4025_v24 = vld [vmem:[%s8448_s30 + $0x158] sm:$0xff] }
0x130e   :  { %4153 = vmatpush.msra.mxu2 %v4012_v55 }
0x1310   :  { %4154 = vmatpush.msra.mxu2 %v4008_v63 }
0x1312   :  { %4155 = vmatpush.msra.mxu2 %v4004_v0 }
0x1314   :  { %4156 = vmatpush.msra.mxu2 %v4000_v38  ;;  %v6699_v38 = vld [vmem:[%s7865_s29 + $0x28] sm:$0xff] }
0x137a   :  { %v8465_v56 = vpop.f32.mrf.mxu0 }
0x137b   :  { %v3904_v3 = vsel %vm2329_vm8, %v8465_v56, 0.0  ;;  %v3914_v5 = vmul.f32 %v8465_v56, %v8465_v56 }
0x137c   :  { %v3905_v4 = vrot.slane %v3904_v3, 4 }
0x137d   :  { %v3922_v11 = vsel %vm2329_vm8, %v3914_v5, 0.0  ;;  %v3994_v5 = vld [vmem:[%s8448_s30 + $0x60] sm:$0xff] }
0x137e   :  { %v3906_v7 = vadd.f32 %v3905_v4, %v3904_v3  ;;  %v3923_v16 = vrot.slane %v3922_v11, 4  ;;  %4077 = vmatpush.msra.mxu1 %v3994_v5  ;;  %v4048_v4 = vld [vmem:[%s8448_s30 + $0x210] sm:$0xff] }
0x137f   :  { %4180 = vmatpush.msra.mxu0 %v4048_v4 }
0x1380   :  { %v3907_v60 = vrot.slane %v3906_v7, 2  ;;  %v3924_v15 = vadd.f32 %v3923_v16, %v3922_v11  ;;  %v8482_v18 = vpop.f32.mrf.mxu2  ;;  %4078 = vmatpush.msra.mxu1 %v3990_v46  ;;  %v4045_v46 = vld [vmem:[%s8448_s30 + $0x1f8] sm:$0xff] }
0x1381   :  { %v3897_v20 = vsel %vm597_vm0, %v8482_v18, 0.0  ;;  %v3913_v21 = vmul.f32 %v8482_v18, %v8482_v18 }
0x1382   :  { %v3908_v25 = vadd.f32 %v3907_v60, %v3906_v7  ;;  %v3925_v27 = vrot.slane %v3924_v15, 2  ;;  %v3898_v58 = vrot.slane %v3897_v20, 4  ;;  %v3996_v7 = vld [vmem:[%s8448_s30 + $0x70] sm:$0xff]  ;;  %4079 = vmatpush.msra.mxu1 %v3986_v13  ;;  %v4037_v13 = vld [vmem:[%s8448_s30 + $0x1b8] sm:$0xff] }
0x1383   :  { %v3915_v34 = vsel %vm597_vm0, %v3913_v21, 0.0  ;;  %4157 = vmatpush.msra.mxu2 %v3996_v7  ;;  %v3992_v60 = vld [vmem:[%s8448_s30 + $0x50] sm:$0xff]  ;;  %v3982_v21 = vld [vmem:[%s8448_s30] sm:$0xff] }
0x1384   :  { %v3909_v37 = vrot.slane %v3908_v25, 1  ;;  %v3926_v41 = vadd.f32 %v3925_v27, %v3924_v15  ;;  %v3899_v43 = vadd.f32 %v3898_v58, %v3897_v20  ;;  %v3916_v44 = vrot.slane %v3915_v34, 4  ;;  %4080 = vmatpush.msra.mxu1 %v3982_v21  ;;  %v4061_v27 = vld [vmem:[%s8448_s30 + $0x278] sm:$0xff] }
0x1385   :  { %4158 = vmatpush.msra.mxu2 %v3992_v60  ;;  %v4033_v21 = vld [vmem:[%s8448_s30 + $0x198] sm:$0xff] }
0x1386   :  { %v3910_v48 = vadd.f32 %v3909_v37, %v3908_v25  ;;  %v3927_v49 = vrot.slane %v3926_v41, 1  ;;  %v3900_v10 = vrot.slane %v3899_v43, 2  ;;  %v3917_v51 = vadd.f32 %v3916_v44, %v3915_v34  ;;  %v3984_v25 = vld [vmem:[%s8448_s30 + $0x10] sm:$0xff]  ;;  %4217 = vmatpush.msrb.mxu1 %v4061_v27  ;;  %v6691_v37 = vld [vmem:[%s7865_s29 + $0x68] sm:$0xff]  ;;  %v3896_v44 = vld [vmem:[%s6425_s6] sm:$0xf] }
0x1387   :  { %4159 = vmatpush.msra.mxu2 %v3988_v23  ;;  %v6690_v34 = vld [vmem:[%s7865_s29 + $0x70] sm:$0xff]  ;;  %v3964_v28 = vperm.slane %v3896_v44, 0  ;;  %v6706_v23 = vld [vmem:[%s7865_s29 + $0x8] sm:$0xff]  ;;  %v6708_v27 = vld [vmem:[%s7865_s29 + $0x160] sm:$0xff] }
0x1388   :  { %v8506_v47 = vmul.f32 %v3910_v48, %v8222_v26  ;;  %v3928_v53 = vadd.f32 %v3927_v49, %v3926_v41  ;;  %v3901_v57 = vadd.f32 %v3900_v10, %v3899_v43  ;;  %v3918_v61 = vrot.slane %v3917_v51, 2  ;;  %4294 = vmatpush.msrb.mxu3 %v6690_v34  ;;  %4218 = vmatpush.msrb.mxu1 %v4057_v29  ;;  %v6692_v43 = vld [vmem:[%s7865_s29 + $0x60] sm:$0xff]  ;;  %v6694_v49 = vld [vmem:[%s7865_s29 + $0x50] sm:$0xff] }
0x1389   :  { %4160 = vmatpush.msra.mxu2 %v3984_v25  ;;  %v3965_v48 = vperm.slane %v3896_v44, 2  ;;  %v3968_v4 = vperm.slane %v3964_v28, 0  ;;  %v6707_v25 = vld [vmem:[%s7865_s29 + $0xf8] sm:$0xff]  ;;  %v6709_v29 = vld [vmem:[%s7865_s29 + $0xf0] sm:$0xff]  ;;  %v6710_v34 = vld [vmem:[%s7865_s29] sm:$0xff] }
0x138a   :  { %v3930_v1 = vmul.f32 %v3928_v53, %v8222_v26  ;;  %v3932_v31 = vmul.f32 %v8506_v47, %v8506_v47  ;;  %v3902_v40 = vrot.slane %v3901_v57, 1  ;;  %v3919_v3 = vadd.f32 %v3918_v61, %v3917_v51  ;;  %4295 = vmatpush.msrb.mxu3 %v6691_v37  ;;  %4219 = vmatpush.msrb.mxu1 %v4053_v36  ;;  %v6696_v61 = vld [vmem:[%s7865_s29 + $0x40] sm:$0xff]  ;;  %v6712_v36 = vld [vmem:[%s7865_s29 + $0xe8] sm:$0xff] }
0x138b   :  { %v3973_v51 = vperm.slane %v3896_v44, 3  ;;  %v3938_v53 = vsub.f32 %v8465_v56, %v8506_v47  ;;  %v3969_v59 = vperm.slane %v3965_v48, 0  ;;  %v6698_v56 = vld [vmem:[%s7865_s29 + $0x30] sm:$0xff]  ;;  %v3972_v47 = vperm.slane %v3896_v44, 1  ;;  %v6713_v37 = vld [vmem:[%s7989_s3 + $0x28] sm:$0xff]  ;;  %v6716_v44 = vld [vmem:[%s7865_s29 + $0xe0] sm:$0xff] }
0x138c   :  { %v3934_v35 = vsub.f32 %v3930_v1, %v3932_v31  ;;  %v3903_v11 = vadd.f32 %v3902_v40, %v3901_v57  ;;  %v3920_v39 = vrot.slane %v3919_v3, 1  ;;  %4296 = vmatpush.msrb.mxu3 %v6692_v43  ;;  %4220 = vmatpush.msrb.mxu1 %v4049_v42  ;;  %v6697_v31 = vld [vmem:[%s7865_s29 + $0x38] sm:$0xff]  ;;  %v6715_v43 = vld [vmem:[%s7989_s3 + $0x8] sm:$0xff] }
0x138d   :  { %v3977_v0 = vperm.slane %v3973_v51, 1  ;;  %v4013_v42 = vld [vmem:[%s8448_s30 + $0xf8] sm:$0xff]  ;;  %v6730_v28 = vld [vmem:[%s7865_s29 + $0xa8] sm:$0xff] }
0x138e   :  { %v3936_v16 = vmax.f32 %v3934_v35, 0.0  ;;  %v8524_v8 = vmul.f32 %v3903_v11, %v8222_v26  ;;  %v3921_v12 = vadd.f32 %v3920_v39, %v3919_v3  ;;  %4297 = vmatpush.msrb.mxu3 %v6693_v45  ;;  %v6717_v45 = vld [vmem:[%s7865_s29 + $0x148] sm:$0xff]  ;;  %v4005_v48 = vld [vmem:[%s8448_s30 + $0xb8] sm:$0xff] }
0x138f   :  { %v6721_v51 = vld [vmem:[%s7865_s29 + $0x138] sm:$0xff] }
0x1390   :  { %v3940_v15 = vadd.f32 1e-05, %v3936_v16  ;;  %v3929_v19 = vmul.f32 %v3921_v12, %v8222_v26  ;;  %v3931_v20 = vmul.f32 %v8524_v8, %v8524_v8  ;;  %4298 = vmatpush.msrb.mxu3 %v6694_v49  ;;  %v3937_v35 = vsub.f32 %v8482_v18, %v8524_v8  ;;  %v4041_v12 = vld [vmem:[%s8448_s30 + $0x1d8] sm:$0xff]  ;;  %v6719_v49 = vld [vmem:[%s7865_s29 + $0x140] sm:$0xff] }
0x1391   :  { %v3976_v16 = vperm.slane %v3972_v47, 1  ;;  %v6701_v8 = vld [vmem:[%s7865_s29 + $0x178] sm:$0xff] }
0x1392   :  { %6681 = vrsqrt.f32 %v3940_v15  ;;  %v3933_v26 = vsub.f32 %v3929_v19, %v3931_v20  ;;  %4299 = vmatpush.msrb.mxu3 %v6695_v54  ;;  %vm3957_vm9 = vweird.f32 %v3940_v15  ;;  %v6704_v19 = vld [vmem:[%s7865_s29 + $0x10] sm:$0xff]  ;;  %v3997_v54 = vld [vmem:[%s8448_s30 + $0x78] sm:$0xff] }
0x1393   :  { %v6734_v47 = vld [vmem:[%s7865_s29 + $0x98] sm:$0xff] }
0x1394   :  { %v3935_v58 = vmax.f32 %v3933_v26, 0.0  ;;  %4300 = vmatpush.msrb.mxu3 %v6696_v61  ;;  %v4029_v26 = vld [vmem:[%s8448_s30 + $0x178] sm:$0xff] }
0x1395   :  { %v6726_v61 = vld [vmem:[%s7865_s29 + $0xb8] sm:$0xff] }
0x1396   :  { %v3939_v32 = vadd.f32 1e-05, %v3935_v58  ;;  %4301 = vmatpush.msrb.mxu3 %v6697_v31  ;;  %v4021_v58 = vld [vmem:[%s8448_s30 + $0x138] sm:$0xff] }
0x1397   :  { %v6729_v31 = vld [vmem:[%s7865_s29 + $0x118] sm:$0xff] }
0x1398   :  { %v6682_v33 = vpop.eup %6681  ;;  %6683 = vrsqrt.f32 %v3939_v32  ;;  %4302 = vmatpush.msrb.mxu3 %v6698_v56  ;;  %vm3947_vm4 = vweird.f32 %v3939_v32  ;;  %v6733_v56 = vld [vmem:[%s7865_s29 + $0x108] sm:$0xff] }
0x1399   :  { %v3952_v41 = vmul.f32 %v6682_v33, %v3940_v15  ;;  %vm3958_vm6 = vweird.f32 %v6682_v33  ;;  %v6703_v15 = vld [vmem:[%s7865_s29 + $0x170] sm:$0xff] }
0x139a   :  { %vm3959_vm10 = vmor %vm3957_vm9, %vm3958_vm6  ;;  %4303 = vmatpush.msrb.mxu3 %v6699_v38  ;;  %v6737_v38 = vld [vmem:[%s7865_s29 + $0x90] sm:$0xff] }
0x139b   :  { %v3953_v9 = vmul.f32 %v6682_v33, %v3952_v41  ;;  %v6714_v41 = vld [vmem:[%s7865_s29 + $0x150] sm:$0xff] }
0x139c   :  { %4304 = vmatpush.msrb.mxu3 %v6700_v6  ;;  %v6743_v6 = vld [vmem:[%s7989_s3 + $0x20] sm:$0xff] }
0x139d   :  { %v3954_v55 = vmul.f32 0.5, %v3953_v9  ;;  %v4009_v9 = vld [vmem:[%s8448_s30 + $0xd8] sm:$0xff] }
0x139e   :  { %v6684_v50 = vpop.eup %6683  ;;  %4305 = vmatpush.msrb.mxu3 %v6702_v14 }
0x139f   :  { %v3955_v10 = vsub.f32 1.5, %v3954_v55  ;;  %v3942_v52 = vmul.f32 %v6684_v50, %v3939_v32  ;;  %vm3948_vm11 = vweird.f32 %v6684_v50  ;;  %v6711_v32 = vld [vmem:[%s7865_s29 + $0x158] sm:$0xff] }
0x13a0   :  { %vm3949_vm13 = vmor %vm3947_vm4, %vm3948_vm11  ;;  %4306 = vmatpush.msrb.mxu3 %v6704_v19  ;;  %v6718_v55 = vld [vmem:[%s7865_s29 + $0xd8] sm:$0xff] }
0x13a1   :  { %v3956_v63 = vmul.f32 %v6682_v33, %v3955_v10  ;;  %v3943_v57 = vmul.f32 %v6684_v50, %v3942_v52  ;;  %v4001_v10 = vld [vmem:[%s8448_s30 + $0x98] sm:$0xff]  ;;  %v6722_v52 = vld [vmem:[%s7865_s29 + $0xc8] sm:$0xff] }
0x13a2   :  { %4307 = vmatpush.msrb.mxu3 %v6706_v23 }
0x13a3   :  { %v3960_v30 = vsel %vm3959_vm10, %v6682_v33, %v3956_v63  ;;  %v3944_v1 = vmul.f32 0.5, %v3943_v57  ;;  %v4017_v33 = vld [vmem:[%s8448_s30 + $0x118] sm:$0xff]  ;;  %v6723_v63 = vld [vmem:[%s7865_s29 + $0x130] sm:$0xff]  ;;  %v6725_v57 = vld [vmem:[%s7865_s29 + $0x128] sm:$0xff] }
0x13a4   :  { %v3962_v62 = vmul.f32 %v3960_v30, %v3938_v53  ;;  %4308 = vmatpush.msrb.mxu3 %v6710_v34  ;;  %v6724_v53 = vld [vmem:[%s7865_s29 + $0xc0] sm:$0xff]  ;;  %v3989_v30 = vld [vmem:[%s8448_s30 + $0x38] sm:$0xff] }
0x13a5   :  { %v3945_v3 = vsub.f32 1.5, %v3944_v1  ;;  %v3985_v1 = vld [vmem:[%s8448_s30 + $0x18] sm:$0xff] }
0x13a6   :  { %v3971_v40 = vmul.f32 %v3969_v59, %v3962_v62  ;;  %v3993_v59 = vld [vmem:[%s8448_s30 + $0x58] sm:$0xff]  ;;  %v6727_v62 = vld [vmem:[%s7865_s29 + $0x120] sm:$0xff] }
0x13a7   :  { %v3946_v2 = vmul.f32 %v6684_v50, %v3945_v3  ;;  %v6732_v3 = vld [vmem:[%s7865_s29 + $0xa0] sm:$0xff] }
0x13a8   :  { %v3979_v5 = vadd.f32 %v3977_v0, %v3971_v40  ;;  %v6728_v0 = vld [vmem:[%s7865_s29 + $0xb0] sm:$0xff] }
0x13a9   :  { %v3950_v39 = vsel %vm3949_vm13, %v6684_v50, %v3946_v2  ;;  %v6720_v50 = vld [vmem:[%s7865_s29 + $0xd0] sm:$0xff]  ;;  %v6736_v2 = vld [vmem:[%s7865_s29 + $0x100] sm:$0xff] }
0x13aa   :  { %v3981_v11 = vmax.f32 %v3979_v5, 0.0  ;;  %v3961_v7 = vmul.f32 %v3950_v39, %v3937_v35  ;;  %v6731_v40 = vld [vmem:[%s7865_s29 + $0x110] sm:$0xff]  ;;  %v6735_v5 = vld [vmem:[%s7865_s29 + $0x198] sm:$0xff]  ;;  %v6741_v39 = vld [vmem:[%s7865_s29 + $0x80] sm:$0xff] }
0x13ab   :  { %v6738_v35 = vld [vmem:[%s7865_s29 + $0x190] sm:$0xff] }
0x13ac   :  { %6542 = vmatmul.msk.f32.vlgmr.msrb.gmra.mxu2 %vm920_vm7, %v3981_v11  ;;  %6543 = vmatmul.msk.f32.vlgmr.msrb.gmra.mxu0 %vm920_vm7, %v3981_v11  ;;  %v3970_v18 = vmul.f32 %v3968_v4, %v3961_v7  ;;  %v6739_v4 = vld [vmem:[%s7865_s29 + $0x88] sm:$0xff]  ;;  %v6744_v7 = vld [vmem:[%s7989_s3 + $0x38] sm:$0xff] }
0x13ad   :  { %4185 = vmatpush.msrb.mxu0 %v4045_v46  ;;  %4333 = vmatpush.msrb.mxu2 %v6701_v8  ;;  %v6742_v46 = vld [vmem:[%s7865_s29 + $0x180] sm:$0xff] }
0x13ae   :  { %v3978_v60 = vadd.f32 %v3976_v16, %v3970_v18  ;;  %v6745_v16 = vld [vmem:[%s7989_s3] sm:$0xff] }
0x13af   :  { %4186 = vmatpush.msrb.mxu0 %v4041_v12  ;;  %4334 = vmatpush.msrb.mxu2 %v6703_v15  ;;  %v6746_v12 = vld [vmem:[%s7989_s3 + $0x18] sm:$0xff] }
0x13b0   :  { %v8568_v20 = vmax.f32 %v3978_v60, 0.0 }
0x13b1   :  { %4187 = vmatpush.msrb.mxu0 %v4037_v13  ;;  %4335 = vmatpush.msrb.mxu2 %v6705_v22 }
0x13b2   :  { %4081 = vmatmul.f32.vlgmr.msra.gmra.mxu1 %v8568_v20  ;;  %4121 = vmatmul.f32.vlgmr.msra.gmra.mxu3 %v8568_v20 }
0x13b3   :  { %4188 = vmatpush.msrb.mxu0 %v4033_v21  ;;  %4313 = vmatpush.msra.mxu1 %v6707_v25 }
0x13b4   :  { %4161 = vmatmul.f32.vlgmr.msra.gmra.mxu2 %v8568_v20  ;;  %6544 = vmatmul.msk.f32.vlgmr.msra.gmra.mxu0 %vm920_vm7, %v3981_v11 }
0x13b5   :  { %4189 = vmatpush.msrb.mxu0 %v4029_v26  ;;  %4336 = vmatpush.msrb.mxu2 %v6708_v27 }
0x13b6   :  { %4314 = vmatpush.msra.mxu1 %v6709_v29  ;;  %4438 = vmatpush.msra.mxu3 %v6713_v37 }
0x13b7   :  { %4190 = vmatpush.msrb.mxu0 %v4025_v24  ;;  %4337 = vmatpush.msrb.mxu2 %v6711_v32 }
0x13b8   :  { %4315 = vmatpush.msra.mxu1 %v6712_v36  ;;  %4439 = vmatpush.msra.mxu3 %v6715_v43 }
0x13b9   :  { %4191 = vmatpush.msrb.mxu0 %v4021_v58  ;;  %4338 = vmatpush.msrb.mxu2 %v6714_v41 }
0x13ba   :  { %6545 = vmatmul.msk.f32.vlgmr.msrb.gmra.mxu1 %vm920_vm7, %v3981_v11  ;;  %v6740_v11 = vld [vmem:[%s7865_s29 + $0x188] sm:$0xff]  ;;  %s6937_s29 = smov 32  }
0x13bb   :  { %4192 = vmatpush.msrb.mxu0 %v4017_v33  ;;  %4316 = vmatpush.msra.mxu1 %v6716_v44  ;;  %s8674_s8 = sld [smem:[%s9533_s0 + %s6937_s29]]  }
0x13bc   :  { %4339 = vmatpush.msrb.mxu2 %v6717_v45 }
0x13bd   :  { %4193 = vmatpush.msrb.mxu0 %v4013_v42  ;;  %4317 = vmatpush.msra.mxu1 %v6718_v55 }
0x13be   :  { %4340 = vmatpush.msrb.mxu2 %v6719_v49 }
0x13bf   :  { %4194 = vmatpush.msrb.mxu0 %v4009_v9  ;;  %4318 = vmatpush.msra.mxu1 %v6720_v50 }
0x13c0   :  { %4341 = vmatpush.msrb.mxu2 %v6721_v51 }
0x13c1   :  { %4195 = vmatpush.msrb.mxu0 %v4005_v48  ;;  %4319 = vmatpush.msra.mxu1 %v6722_v52 }
0x13c2   :  { %4342 = vmatpush.msrb.mxu2 %v6723_v63 }
0x13c3   :  { %4196 = vmatpush.msrb.mxu0 %v4001_v10  ;;  %4320 = vmatpush.msra.mxu1 %v6724_v53 }
0x13c4   :  { %4343 = vmatpush.msrb.mxu2 %v6725_v57 }
0x13c5   :  { %4197 = vmatpush.msrb.mxu0 %v3997_v54  ;;  %4321 = vmatpush.msra.mxu1 %v6726_v61 }
0x13c6   :  { %4344 = vmatpush.msrb.mxu2 %v6727_v62 }
0x13c7   :  { %4198 = vmatpush.msrb.mxu0 %v3993_v59  ;;  %4322 = vmatpush.msra.mxu1 %v6728_v0 }
0x13c8   :  { %4345 = vmatpush.msrb.mxu2 %v6729_v31 }
0x13c9   :  { %4199 = vmatpush.msrb.mxu0 %v3989_v30  ;;  %4323 = vmatpush.msra.mxu1 %v6730_v28 }
0x13ca   :  { %4346 = vmatpush.msrb.mxu2 %v6731_v40 }
0x13cb   :  { %4200 = vmatpush.msrb.mxu0 %v3985_v1  ;;  %4324 = vmatpush.msra.mxu1 %v6732_v3 }
0x13cc   :  { %4201 = vmatmul.f32.vlgmr.msrb.gmra.mxu0 %v8568_v20  ;;  %4347 = vmatpush.msrb.mxu2 %v6733_v56 }
0x13cd   :  { %4325 = vmatpush.msra.mxu1 %v6734_v47  ;;  %4365 = vmatpush.msra.mxu0 %v6735_v5 }
0x13ce   :  { %4348 = vmatpush.msrb.mxu2 %v6736_v2 }
0x13cf   :  { %4326 = vmatpush.msra.mxu1 %v6737_v38  ;;  %4366 = vmatpush.msra.mxu0 %v6738_v35 }
0x13d1   :  { %4327 = vmatpush.msra.mxu1 %v6739_v4  ;;  %4367 = vmatpush.msra.mxu0 %v6740_v11 }
0x13d3   :  { %4328 = vmatpush.msra.mxu1 %v6741_v39  ;;  %4368 = vmatpush.msra.mxu0 %v6742_v46 }
0x13d5   :  { %4418 = vmatpush.msrb.mxu0 %v6743_v6  ;;  %4478 = vmatpush.msrb.mxu1 %v6744_v7 }
0x13d7   :  { %4419 = vmatpush.msrb.mxu0 %v6745_v16  ;;  %4479 = vmatpush.msrb.mxu1 %v6746_v12 }
0x1429   :  { %v4142_v18 = vpop.f32.mrf.mxu0 }
0x142f   :  { %v4102_v8 = vpop.f32.mrf.mxu2  ;;  %v4082_v13 = vpop.f32.mrf.mxu1 }
0x1430   :  { %v8631_v14 = vadd.f32 %v4102_v8, %v4082_v13 }
0x1431   :  { %v4182_v26 = vpop.f32.mrf.mxu0 }
0x1432   :  { %v4226_v60 = vsel %vm597_vm0, %v8631_v14, 0.0  ;;  %v4254_v15 = vmul.f32 %v8631_v14, %v8631_v14 }
0x1433   :  { %v4227_v19 = vrot.slane %v4226_v60, 4 }
0x1434   :  { %v4258_v20 = vsel %vm597_vm0, %v4254_v15, 0.0 }
0x1435   :  { %v4228_v21 = vadd.f32 %v4227_v19, %v4226_v60  ;;  %v4259_v22 = vrot.slane %v4258_v20, 4  ;;  %v4122_v23 = vpop.f32.mrf.mxu3 }
0x1436   :  { %v8638_v24 = vadd.f32 %v4142_v18, %v4122_v23 }
0x1437   :  { %v4162_v25 = vpop.f32.mrf.mxu2  ;;  %v4229_v27 = vrot.slane %v4228_v21, 2  ;;  %v4260_v58 = vadd.f32 %v4259_v22, %v4258_v20  ;;  %v4222_v11 = vpop.f32.mrf.mxu1 }
0x1438   :  { %v8640_v29 = vadd.f32 %v4182_v26, %v4162_v25  ;;  %v4233_v34 = vsel %vm597_vm0, %v8638_v24, 0.0  ;;  %v4255_v32 = vmul.f32 %v8638_v24, %v8638_v24 }
0x1439   :  { %v4230_v33 = vadd.f32 %v4229_v27, %v4228_v21  ;;  %v4261_v36 = vrot.slane %v4260_v58, 2  ;;  %v4234_v37 = vrot.slane %v4233_v34, 4 }
0x143a   :  { %v4240_v41 = vsel %vm597_vm0, %v8640_v29, 0.0  ;;  %v4265_v42 = vsel %vm597_vm0, %v4255_v32, 0.0  ;;  %v4256_v44 = vmul.f32 %v8640_v29, %v8640_v29 }
0x143b   :  { %v4241_v43 = vrot.slane %v4240_v41, 4  ;;  %v4235_v9 = vadd.f32 %v4234_v37, %v4233_v34  ;;  %v4266_v45 = vrot.slane %v4265_v42, 4  ;;  %v4262_v55 = vadd.f32 %v4261_v36, %v4260_v58  ;;  %v6747_v58 = vld [vmem:[%s7989_s3 + $0x30] sm:$0xff] }
0x143c   :  { %v4272_v49 = vsel %vm597_vm0, %v4256_v44, 0.0  ;;  %v4231_v50 = vrot.slane %v4230_v33, 1  ;;  %v6748_v34 = vld [vmem:[%s7989_s3 + $0x10] sm:$0xff] }
0x143d   :  { %v4242_v48 = vadd.f32 %v4241_v43, %v4240_v41  ;;  %v4236_v10 = vrot.slane %v4235_v9, 2  ;;  %v4267_v51 = vadd.f32 %v4266_v45, %v4265_v42  ;;  %v4273_v52 = vrot.slane %v4272_v49, 4 }
0x143e   :  { %v4263_v63 = vrot.slane %v4262_v55, 1  ;;  %v4232_v30 = vadd.f32 %v4231_v50, %v4230_v33  ;;  %v4624_v50 = vld [vmem:[%s8674_s8 + $0x3c0] sm:$0xff] }
0x143f   :  { %v4243_v54 = vrot.slane %v4242_v48, 2  ;;  %v4237_v53 = vadd.f32 %v4236_v10, %v4235_v9  ;;  %v4268_v59 = vrot.slane %v4267_v51, 2  ;;  %v4274_v57 = vadd.f32 %v4273_v52, %v4272_v49  ;;  %v4616_v10 = vld [vmem:[%s8674_s8 + $0x380] sm:$0xff]  ;;  %4923 = vmatpush.msra.mxu2 %v4624_v50 }
0x1440   :  { %v4264_v62 = vadd.f32 %v4263_v63, %v4262_v55  ;;  %v4752_v52 = vld [vmem:[%s8674_s8 + $0x7c0] sm:$0xff] }
0x1441   :  { %v4244_v61 = vadd.f32 %v4243_v54, %v4242_v48  ;;  %v4238_v0 = vrot.slane %v4237_v53, 1  ;;  %v4269_v1 = vadd.f32 %v4268_v59, %v4267_v51  ;;  %v4275_v31 = vrot.slane %v4274_v57, 2  ;;  %v4608_v63 = vld [vmem:[%s8674_s8 + $0x340] sm:$0xff]  ;;  %4924 = vmatpush.msra.mxu2 %v4616_v10  ;;  %v4593_v10 = vld [vmem:[%s8674_s8 + $0x2c8] sm:$0xff] }
0x1442   :  { %v4286_v28 = vsel %vm719_vm1, %v4232_v30, %v4264_v62  ;;  %v4736_v59 = vld [vmem:[%s8674_s8 + $0x740] sm:$0xff] }
0x1443   :  { %v4270_v40 = vrot.slane %v4269_v1, 1  ;;  %v4245_v3 = vrot.slane %v4244_v61, 1  ;;  %v4276_v56 = vadd.f32 %v4275_v31, %v4274_v57  ;;  %4309 = vmatmul.f32.vlgmr.msrb.gmra.mxu3 %v4286_v28  ;;  %v4239_v47 = vadd.f32 %v4238_v0, %v4237_v53  ;;  %v4744_v53 = vld [vmem:[%s8674_s8 + $0x780] sm:$0xff]  ;;  %4925 = vmatpush.msra.mxu2 %v4608_v63  ;;  %v4585_v63 = vld [vmem:[%s8674_s8 + $0x288] sm:$0xff] }
0x1444   :  { %4943 = vmatpush.msrb.mxu3 %v4752_v52  ;;  %v4728_v30 = vld [vmem:[%s8674_s8 + $0x700] sm:$0xff]  ;;  %v4881_v52 = vld [vmem:[%s8674_s8 + $0xbc8] sm:$0xff] }
0x1445   :  { %v4277_v5 = vrot.slane %v4276_v56, 1  ;;  %v4271_v2 = vadd.f32 %v4270_v40, %v4269_v1  ;;  %v4246_v38 = vadd.f32 %v4245_v3, %v4244_v61  ;;  %v4600_v61 = vld [vmem:[%s8674_s8 + $0x300] sm:$0xff] }
0x1446   :  { %4944 = vmatpush.msrb.mxu3 %v4744_v53  ;;  %v4592_v0 = vld [vmem:[%s8674_s8 + $0x2c0] sm:$0xff]  ;;  %4926 = vmatpush.msra.mxu2 %v4600_v61  ;;  %v4729_v53 = vld [vmem:[%s8674_s8 + $0x708] sm:$0xff] }
0x1447   :  { %v4287_v35 = vsel %vm719_vm1, %v4239_v47, %v4271_v2  ;;  %v4278_v4 = vadd.f32 %v4277_v5, %v4276_v56  ;;  %v4720_v1 = vld [vmem:[%s8674_s8 + $0x6c0] sm:$0xff]  ;;  %v4577_v61 = vld [vmem:[%s8674_s8 + $0x248] sm:$0xff] }
0x1448   :  { %4329 = vmatmul.f32.vlgmr.msra.gmra.mxu1 %v4287_v35  ;;  %4945 = vmatpush.msrb.mxu3 %v4736_v59  ;;  %v4912_v31 = vld [vmem:[%s8674_s8 + $0xcc0] sm:$0xff]  ;;  %v4873_v59 = vld [vmem:[%s8674_s8 + $0xb88] sm:$0xff] }
0x1449   :  { %v4202_v39 = vpop.f32.mrf.mxu0  ;;  %v4288_v46 = vsel %vm719_vm1, %v4246_v38, %v4278_v4  ;;  %v4584_v40 = vld [vmem:[%s8674_s8 + $0x280] sm:$0xff]  ;;  %4995 = vmatpush.msra.mxu1 %v4912_v31  ;;  %4927 = vmatpush.msra.mxu2 %v4592_v0  ;;  %v4713_v31 = vld [vmem:[%s8674_s8 + $0x688] sm:$0xff] }
0x144a   :  { %v8655_v6 = vadd.f32 %v4222_v11, %v4202_v39  ;;  %4349 = vmatmul.f32.vlgmr.msrb.gmra.mxu2 %v4288_v46  ;;  %4946 = vmatpush.msrb.mxu3 %v4728_v30  ;;  %v4904_v3 = vld [vmem:[%s8674_s8 + $0xc80] sm:$0xff]  ;;  %v4721_v30 = vld [vmem:[%s8674_s8 + $0x6c8] sm:$0xff] }
0x144b   :  { %v4712_v56 = vld [vmem:[%s8674_s8 + $0x680] sm:$0xff]  ;;  %4996 = vmatpush.msra.mxu1 %v4904_v3  ;;  %4928 = vmatpush.msra.mxu2 %v4584_v40  ;;  %v4561_v3 = vld [vmem:[%s8674_s8 + $0x1c8] sm:$0xff] }
0x144c   :  { %v4247_v7 = vsel %vm2329_vm8, %v8655_v6, 0.0  ;;  %v4257_v16 = vmul.f32 %v8655_v6, %v8655_v6  ;;  %v4896_v47 = vld [vmem:[%s8674_s8 + $0xc40] sm:$0xff]  ;;  %4947 = vmatpush.msrb.mxu3 %v4720_v1  ;;  %v4569_v1 = vld [vmem:[%s8674_s8 + $0x208] sm:$0xff] }
0x144d   :  { %v4248_v12 = vrot.slane %v4247_v7, 4  ;;  %v4576_v2 = vld [vmem:[%s8674_s8 + $0x240] sm:$0xff]  ;;  %4997 = vmatpush.msra.mxu1 %v4896_v47  ;;  %v4849_v47 = vld [vmem:[%s8674_s8 + $0xac8] sm:$0xff] }
0x144e   :  { %v4279_v18 = vsel %vm2329_vm8, %v4257_v16, 0.0  ;;  %v4704_v38 = vld [vmem:[%s8674_s8 + $0x640] sm:$0xff]  ;;  %4948 = vmatpush.msrb.mxu3 %v4712_v56  ;;  %4929 = vmatpush.msra.mxu2 %v4576_v2  ;;  %v4705_v56 = vld [vmem:[%s8674_s8 + $0x648] sm:$0xff] }
0x144f   :  { %v4249_v8 = vadd.f32 %v4248_v12, %v4247_v7  ;;  %v4280_v13 = vrot.slane %v4279_v18, 4  ;;  %v4888_v35 = vld [vmem:[%s8674_s8 + $0xc00] sm:$0xff]  ;;  %v4553_v2 = vld [vmem:[%s8674_s8 + $0x188] sm:$0xff] }
0x1450   :  { %v4225_v4 = vld [vmem:[%s8685_s11] sm:$0x3]  ;;  %4949 = vmatpush.msrb.mxu3 %v4704_v38  ;;  %4998 = vmatpush.msra.mxu1 %v4888_v35  ;;  %v4697_v38 = vld [vmem:[%s8674_s8 + $0x608] sm:$0xff] }
0x1451   :  { %v4250_v60 = vrot.slane %v4249_v8, 2  ;;  %v4281_v15 = vadd.f32 %v4280_v13, %v4279_v18  ;;  %v4568_v39 = vld [vmem:[%s8674_s8 + $0x200] sm:$0xff]  ;;  %v4841_v35 = vld [vmem:[%s8674_s8 + $0xa88] sm:$0xff] }
0x1452   :  { %v4696_v7 = vld [vmem:[%s8674_s8 + $0x600] sm:$0xff]  ;;  %4930 = vmatpush.msra.mxu2 %v4568_v39  ;;  %v4689_v39 = vld [vmem:[%s8674_s8 + $0x5c8] sm:$0xff] }
0x1453   :  { %v4251_v19 = vadd.f32 %v4250_v60, %v4249_v8  ;;  %v4282_v20 = vrot.slane %v4281_v15, 2  ;;  %v4560_v16 = vld [vmem:[%s8674_s8 + $0x1c0] sm:$0xff]  ;;  %4950 = vmatpush.msrb.mxu3 %v4696_v7 }
0x1454   :  { %v4688_v18 = vld [vmem:[%s8674_s8 + $0x5c0] sm:$0xff]  ;;  %4931 = vmatpush.msra.mxu2 %v4560_v16  ;;  %v4681_v16 = vld [vmem:[%s8674_s8 + $0x588] sm:$0xff] }
0x1455   :  { %v4252_v21 = vrot.slane %v4251_v19, 1  ;;  %v4283_v22 = vadd.f32 %v4282_v20, %v4281_v15  ;;  %v4552_v8 = vld [vmem:[%s8674_s8 + $0x180] sm:$0xff]  ;;  %4951 = vmatpush.msrb.mxu3 %v4688_v18  ;;  %v4673_v18 = vld [vmem:[%s8674_s8 + $0x548] sm:$0xff] }
0x1456   :  { %v4680_v60 = vld [vmem:[%s8674_s8 + $0x580] sm:$0xff]  ;;  %4932 = vmatpush.msra.mxu2 %v4552_v8  ;;  %v4537_v8 = vld [vmem:[%s8674_s8 + $0x108] sm:$0xff] }
0x1457   :  { %v4284_v23 = vrot.slane %v4283_v22, 1  ;;  %v4253_v26 = vadd.f32 %v4252_v21, %v4251_v19  ;;  %v4544_v15 = vld [vmem:[%s8674_s8 + $0x140] sm:$0xff]  ;;  %4952 = vmatpush.msrb.mxu3 %v4680_v60 }
0x1458   :  { %v4672_v20 = vld [vmem:[%s8674_s8 + $0x540] sm:$0xff]  ;;  %4933 = vmatpush.msra.mxu2 %v4544_v15  ;;  %v4817_v15 = vld [vmem:[%s8674_s8 + $0x9c8] sm:$0xff] }
0x1459   :  { %v4285_v25 = vadd.f32 %v4284_v23, %v4283_v22  ;;  %v4536_v21 = vld [vmem:[%s8674_s8 + $0x100] sm:$0xff]  ;;  %4953 = vmatpush.msrb.mxu3 %v4672_v20  ;;  %v4657_v20 = vld [vmem:[%s8674_s8 + $0x4c8] sm:$0xff] }
0x145a   :  { %v4528_v23 = vld [vmem:[%s8674_s8 + $0xc0] sm:$0xff]  ;;  %4934 = vmatpush.msra.mxu2 %v4536_v21 }
0x145b   :  { %v4289_v27 = vsel %vm719_vm1, %v4253_v26, %v4285_v25  ;;  %v4664_v25 = vld [vmem:[%s8674_s8 + $0x500] sm:$0xff] }
0x145c   :  { %6546 = vmatmul.msk.f32.vlgmr.msra.gmra.mxu0 %vm920_vm7, %v4289_v27  ;;  %v4625_v27 = vld [vmem:[%s8674_s8 + $0x3c8] sm:$0xff]  ;;  %4935 = vmatpush.msra.mxu2 %v4528_v23  ;;  %v4632_v50 = vld [vmem:[%s8674_s8 + $0x400] sm:$0xff] }
0x145d   :  { %4458 = vmatpush.msra.mxu0 %v6747_v58  ;;  %v4520_v58 = vld [vmem:[%s8674_s8 + $0x80] sm:$0xff]  ;;  %4954 = vmatpush.msrb.mxu3 %v4664_v25  ;;  %v4521_v23 = vld [vmem:[%s8674_s8 + $0x88] sm:$0xff] }
0x145e   :  { %4936 = vmatpush.msra.mxu2 %v4520_v58  ;;  %v4832_v0 = vld [vmem:[%s8674_s8 + $0xa40] sm:$0xff]  ;;  %v4513_v58 = vld [vmem:[%s8674_s8 + $0x48] sm:$0xff] }
0x145f   :  { %4459 = vmatpush.msra.mxu0 %v6748_v34  ;;  %v4880_v34 = vld [vmem:[%s8674_s8 + $0xbc0] sm:$0xff] }
0x1460   :  { %v4824_v40 = vld [vmem:[%s8674_s8 + $0xa00] sm:$0xff] }
0x1461   :  { %v4800_v7 = vld [vmem:[%s8674_s8 + $0x940] sm:$0xff] }
0x1462   :  { %v4792_v60 = vld [vmem:[%s8674_s8 + $0x900] sm:$0xff] }
0x1463   :  { %v4784_v21 = vld [vmem:[%s8674_s8 + $0x8c0] sm:$0xff] }
0x1464   :  { %v4776_v25 = vld [vmem:[%s8674_s8 + $0x880] sm:$0xff] }
0x14c5   :  { %v4330_v33 = vpop.f32.mrf.mxu1 }
0x14c6   :  { %v4310_v32 = vpop.f32.mrf.mxu3 }
0x14c7   :  { %v4331_v37 = vadd.f32 %v4330_v33, %v4310_v32  ;;  %v4656_v32 = vld [vmem:[%s8674_s8 + $0x4c0] sm:$0xff]  ;;  %v4617_v33 = vld [vmem:[%s8674_s8 + $0x388] sm:$0xff] }
0x14c8   :  { %4955 = vmatpush.msrb.mxu3 %v4656_v32  ;;  %v4768_v32 = vld [vmem:[%s8674_s8 + $0x840] sm:$0xff] }
0x14cd   :  { %v4350_v36 = vpop.f32.mrf.mxu2 }
0x14ce   :  { %v4351_v41 = vadd.f32 %v4350_v36, %v4331_v37  ;;  %v4512_v36 = vld [vmem:[%s8674_s8 + $0x40] sm:$0xff] }
0x14cf   :  { %v4872_v37 = vld [vmem:[%s8674_s8 + $0xb80] sm:$0xff]  ;;  %4937 = vmatpush.msra.mxu2 %v4512_v36  ;;  %v4505_v36 = vld [vmem:[%s8674_s8 + $0x8] sm:$0xff] }
0x14d9   :  { %v4370_v42 = vpop.f32.mrf.mxu0 }
0x14da   :  { %v4371_v43 = vadd.f32 %v4370_v42, %v4351_v41  ;;  %v4648_v41 = vld [vmem:[%s8674_s8 + $0x480] sm:$0xff]  ;;  %v4609_v42 = vld [vmem:[%s8674_s8 + $0x348] sm:$0xff] }
0x14db   :  { %4956 = vmatpush.msrb.mxu3 %v4648_v41  ;;  %v4760_v41 = vld [vmem:[%s8674_s8 + $0x800] sm:$0xff] }
0x14dc   :  { %v8666_v44 = vmul.f32 0.01923077, %v4371_v43  ;;  %v4504_v43 = vld [vmem:[%s8674_s8] sm:$0xff] }
0x14dd   :  { %4938 = vmatpush.msra.mxu2 %v4504_v43  ;;  %v4913_v43 = vld [vmem:[%s8674_s8 + $0xcc8] sm:$0xff] }
0x14de   :  { %v4374_v9 = vmul.f32 %v8666_v44, %v8666_v44 }
0x14e0   :  { %v4376_v45 = vrot.slane %v4374_v9, 7  ;;  %v4753_v9 = vld [vmem:[%s8674_s8 + $0x7c8] sm:$0xff] }
0x14e1   :  { %5023 = vmatpush.msrb.mxu2 %v4753_v9  ;;  %v4905_v9 = vld [vmem:[%s8674_s8 + $0xc88] sm:$0xff] }
0x14e2   :  { %v4378_v55 = vsub.f32 %v8666_v44, %v4376_v45  ;;  %v4640_v45 = vld [vmem:[%s8674_s8 + $0x440] sm:$0xff] }
0x14e3   :  { %4957 = vmatpush.msrb.mxu3 %v4640_v45  ;;  %v4769_v45 = vld [vmem:[%s8674_s8 + $0x848] sm:$0xff] }
0x14e4   :  { %v4379_v48 = vmax.f32 %v4378_v55, 0.0  ;;  %v4601_v55 = vld [vmem:[%s8674_s8 + $0x308] sm:$0xff] }
0x14e5   :  { %4958 = vmatpush.msrb.mxu3 %v4632_v50 }
0x14e6   :  { %v4380_v49 = vadd.f32 1e-05, %v4379_v48  ;;  %v4745_v48 = vld [vmem:[%s8674_s8 + $0x788] sm:$0xff] }
0x14e7   :  { %5024 = vmatpush.msrb.mxu2 %v4745_v48  ;;  %v4761_v48 = vld [vmem:[%s8674_s8 + $0x808] sm:$0xff] }
0x14e8   :  { %6685 = vrsqrt.f32 %v4380_v49  ;;  %vm4387_vm14 = vweird.f32 %v4380_v49 }
0x14ee   :  { %v6686_v51 = vpop.eup %6685 }
0x14ef   :  { %v4382_v54 = vmul.f32 %v6686_v51, %v4380_v49  ;;  %vm4388_vm8 = vweird.f32 %v6686_v51  ;;  %v4856_v49 = vld [vmem:[%s8674_s8 + $0xb00] sm:$0xff] }
0x14f0   :  { %vm4389_vm15 = vmor %vm4387_vm14, %vm4388_vm8 }
0x14f1   :  { %v4383_v57 = vmul.f32 %v6686_v51, %v4382_v54  ;;  %v4848_v54 = vld [vmem:[%s8674_s8 + $0xac0] sm:$0xff] }
0x14f3   :  { %v4384_v62 = vmul.f32 0.5, %v4383_v57  ;;  %v4840_v57 = vld [vmem:[%s8674_s8 + $0xa80] sm:$0xff] }
0x14f5   :  { %v4385_v28 = vsub.f32 1.5, %v4384_v62  ;;  %v4865_v62 = vld [vmem:[%s8674_s8 + $0xb48] sm:$0xff] }
0x14f7   :  { %v4386_v5 = vmul.f32 %v6686_v51, %v4385_v28  ;;  %v4857_v28 = vld [vmem:[%s8674_s8 + $0xb08] sm:$0xff] }
0x14f9   :  { %v4390_v11 = vsel %vm4389_vm15, %v6686_v51, %v4386_v5  ;;  %v4737_v51 = vld [vmem:[%s8674_s8 + $0x748] sm:$0xff]  ;;  %v4816_v5 = vld [vmem:[%s8674_s8 + $0x9c0] sm:$0xff] }
0x14fa   :  { %v4392_v46 = vrot.slane %v4390_v11, 1  ;;  %5025 = vmatpush.msrb.mxu2 %v4737_v51  ;;  %v4545_v11 = vld [vmem:[%s8674_s8 + $0x148] sm:$0xff] }
0x14fc   :  { %v4394_v12 = vmul.f32 %v4392_v46, %v4225_v4  ;;  %5026 = vmatpush.msrb.mxu2 %v4729_v53  ;;  %v4833_v46 = vld [vmem:[%s8674_s8 + $0xa48] sm:$0xff] }
0x14fe   :  { %v4395_v13 = vmul.f32 %v4394_v12, %v8666_v44  ;;  %v4864_v44 = vld [vmem:[%s8674_s8 + $0xb40] sm:$0xff]  ;;  %5027 = vmatpush.msrb.mxu2 %v4721_v30 }
0x1500   :  { %v4397_v19 = vrot.slane %v4395_v13, 7  ;;  %5028 = vmatpush.msrb.mxu2 %v4713_v31  ;;  %v4665_v13 = vld [vmem:[%s8674_s8 + $0x508] sm:$0xff] }
0x1502   :  { %v4399_v22 = vsub.f32 %v4225_v4, %v4397_v19  ;;  %5029 = vmatpush.msrb.mxu2 %v4705_v56  ;;  %v4808_v4 = vld [vmem:[%s8674_s8 + $0x980] sm:$0xff]  ;;  %v4529_v19 = vld [vmem:[%s8674_s8 + $0xc8] sm:$0xff] }
0x1504   :  { %v4400_v26 = vsel %vm719_vm1, %v4394_v12, %v4399_v22  ;;  %5030 = vmatpush.msrb.mxu2 %v4697_v38  ;;  %v4825_v12 = vld [vmem:[%s8674_s8 + $0xa08] sm:$0xff] }
0x1505   :  { %6547 = vmatmul.msk.f32.vlgmr.msrb.gmra.mxu0 %vm2484_vm12, %v4400_v26  ;;  %6548 = vmatmul.msk.f32.vlgmr.msra.gmra.mxu3 %vm2484_vm12, %v4400_v26  ;;  %v4809_v22 = vld [vmem:[%s8674_s8 + $0x988] sm:$0xff] }
0x1506   :  { %6550 = vmatmul.msk.f32.vlgmr.msrb.gmra.mxu1 %vm2484_vm12, %v4400_v26  ;;  %4963 = vmatpush.msrb.mxu0 %v4880_v34  ;;  %v4641_v34 = vld [vmem:[%s8674_s8 + $0x448] sm:$0xff] }
0x1507   :  { %5003 = vmatpush.msrb.mxu1 %v4625_v27  ;;  %5043 = vmatpush.msra.mxu3 %v4881_v52  ;;  %v4801_v27 = vld [vmem:[%s8674_s8 + $0x948] sm:$0xff] }
0x1508   :  { %4964 = vmatpush.msrb.mxu0 %v4872_v37  ;;  %5031 = vmatpush.msrb.mxu2 %v4689_v39  ;;  %v4633_v37 = vld [vmem:[%s8674_s8 + $0x408] sm:$0xff]  ;;  %v4858_v39 = vld [vmem:[%s8674_s8 + $0xb10] sm:$0xff] }
0x1509   :  { %5004 = vmatpush.msrb.mxu1 %v4617_v33  ;;  %5044 = vmatpush.msra.mxu3 %v4873_v59  ;;  %v4793_v33 = vld [vmem:[%s8674_s8 + $0x908] sm:$0xff] }
0x150a   :  { %4965 = vmatpush.msrb.mxu0 %v4864_v44  ;;  %5032 = vmatpush.msrb.mxu2 %v4681_v16  ;;  %v4777_v44 = vld [vmem:[%s8674_s8 + $0x888] sm:$0xff]  ;;  %v4626_v16 = vld [vmem:[%s8674_s8 + $0x3d0] sm:$0xff] }
0x150b   :  { %5005 = vmatpush.msrb.mxu1 %v4609_v42  ;;  %5045 = vmatpush.msra.mxu3 %v4865_v62  ;;  %v4785_v42 = vld [vmem:[%s8674_s8 + $0x8c8] sm:$0xff] }
0x150c   :  { %4966 = vmatpush.msrb.mxu0 %v4856_v49  ;;  %5033 = vmatpush.msrb.mxu2 %v4673_v18  ;;  %v4889_v49 = vld [vmem:[%s8674_s8 + $0xc08] sm:$0xff]  ;;  %v4850_v18 = vld [vmem:[%s8674_s8 + $0xad0] sm:$0xff] }
0x150d   :  { %6549 = vmatmul.msk.f32.vlgmr.msra.gmra.mxu0 %vm2484_vm12, %v4400_v26  ;;  %5006 = vmatpush.msrb.mxu1 %v4601_v55  ;;  %v4649_v26 = vld [vmem:[%s8674_s8 + $0x488] sm:$0xff] }
0x150e   :  { %4967 = vmatpush.msrb.mxu0 %v4848_v54  ;;  %5046 = vmatpush.msra.mxu3 %v4857_v28  ;;  %v4897_v55 = vld [vmem:[%s8674_s8 + $0xc48] sm:$0xff] }
0x150f   :  { %5007 = vmatpush.msrb.mxu1 %v4593_v10  ;;  %5034 = vmatpush.msrb.mxu2 %v4665_v13  ;;  %v4618_v13 = vld [vmem:[%s8674_s8 + $0x390] sm:$0xff] }
0x1510   :  { %4968 = vmatpush.msrb.mxu0 %v4840_v57  ;;  %5047 = vmatpush.msra.mxu3 %v4849_v47  ;;  %v4746_v47 = vld [vmem:[%s8674_s8 + $0x790] sm:$0xff] }
0x1511   :  { %5008 = vmatpush.msrb.mxu1 %v4585_v63  ;;  %5035 = vmatpush.msrb.mxu2 %v4657_v20  ;;  %v4610_v20 = vld [vmem:[%s8674_s8 + $0x350] sm:$0xff] }
0x1512   :  { %4969 = vmatpush.msrb.mxu0 %v4832_v0  ;;  %5048 = vmatpush.msra.mxu3 %v4841_v35  ;;  %v4738_v35 = vld [vmem:[%s8674_s8 + $0x750] sm:$0xff] }
0x1513   :  { %5009 = vmatpush.msrb.mxu1 %v4577_v61  ;;  %5036 = vmatpush.msrb.mxu2 %v4649_v26  ;;  %v4602_v26 = vld [vmem:[%s8674_s8 + $0x310] sm:$0xff] }
0x1514   :  { %4970 = vmatpush.msrb.mxu0 %v4824_v40  ;;  %5049 = vmatpush.msra.mxu3 %v4833_v46  ;;  %v4754_v40 = vld [vmem:[%s8674_s8 + $0x7d0] sm:$0xff] }
0x1515   :  { %5010 = vmatpush.msrb.mxu1 %v4569_v1  ;;  %5037 = vmatpush.msrb.mxu2 %v4641_v34  ;;  %v4882_v1 = vld [vmem:[%s8674_s8 + $0xbd0] sm:$0xff] }
0x1516   :  { %4971 = vmatpush.msrb.mxu0 %v4816_v5  ;;  %5050 = vmatpush.msra.mxu3 %v4825_v12  ;;  %v4914_v46 = vld [vmem:[%s8674_s8 + $0xcd0] sm:$0xff] }
0x1517   :  { %5011 = vmatpush.msrb.mxu1 %v4561_v3  ;;  %5038 = vmatpush.msrb.mxu2 %v4633_v37  ;;  %v4722_v12 = vld [vmem:[%s8674_s8 + $0x6d0] sm:$0xff] }
0x1518   :  { %4972 = vmatpush.msrb.mxu0 %v4808_v4  ;;  %5051 = vmatpush.msra.mxu3 %v4817_v15  ;;  %v4842_v15 = vld [vmem:[%s8674_s8 + $0xa90] sm:$0xff] }
0x1519   :  { %5012 = vmatpush.msrb.mxu1 %v4553_v2  ;;  %v4594_v34 = vld [vmem:[%s8674_s8 + $0x2d0] sm:$0xff] }
0x151a   :  { %4973 = vmatpush.msrb.mxu0 %v4800_v7  ;;  %5052 = vmatpush.msra.mxu3 %v4809_v22  ;;  %v4730_v7 = vld [vmem:[%s8674_s8 + $0x710] sm:$0xff] }
0x151b   :  { %5013 = vmatpush.msrb.mxu1 %v4545_v11  ;;  %v4834_v22 = vld [vmem:[%s8674_s8 + $0xa50] sm:$0xff] }
0x151c   :  { %4974 = vmatpush.msrb.mxu0 %v4792_v60  ;;  %5053 = vmatpush.msra.mxu3 %v4801_v27  ;;  %v4714_v60 = vld [vmem:[%s8674_s8 + $0x690] sm:$0xff] }
0x151d   :  { %5014 = vmatpush.msrb.mxu1 %v4537_v8  ;;  %v4906_v8 = vld [vmem:[%s8674_s8 + $0xc90] sm:$0xff] }
0x151e   :  { %4975 = vmatpush.msrb.mxu0 %v4784_v21  ;;  %5054 = vmatpush.msra.mxu3 %v4793_v33  ;;  %v4706_v21 = vld [vmem:[%s8674_s8 + $0x650] sm:$0xff] }
0x151f   :  { %5015 = vmatpush.msrb.mxu1 %v4529_v19  ;;  %v4898_v19 = vld [vmem:[%s8674_s8 + $0xc50] sm:$0xff] }
0x1520   :  { %4976 = vmatpush.msrb.mxu0 %v4776_v25  ;;  %5055 = vmatpush.msra.mxu3 %v4785_v42  ;;  %v4698_v25 = vld [vmem:[%s8674_s8 + $0x610] sm:$0xff] }
0x1521   :  { %5016 = vmatpush.msrb.mxu1 %v4521_v23  ;;  %v4890_v23 = vld [vmem:[%s8674_s8 + $0xc10] sm:$0xff] }
0x1522   :  { %4977 = vmatpush.msrb.mxu0 %v4768_v32  ;;  %5056 = vmatpush.msra.mxu3 %v4777_v44  ;;  %v4826_v27 = vld [vmem:[%s8674_s8 + $0xa10] sm:$0xff] }
0x1523   :  { %5017 = vmatpush.msrb.mxu1 %v4513_v58  ;;  %v4627_v58 = vld [vmem:[%s8674_s8 + $0x3d8] sm:$0xff]  ;;  %v4690_v32 = vld [vmem:[%s8674_s8 + $0x5d0] sm:$0xff] }
0x1524   :  { %4978 = vmatpush.msrb.mxu0 %v4760_v41  ;;  %5057 = vmatpush.msra.mxu3 %v4769_v45  ;;  %v4818_v33 = vld [vmem:[%s8674_s8 + $0x9d0] sm:$0xff] }
0x1525   :  { %5018 = vmatpush.msrb.mxu1 %v4505_v36  ;;  %v4619_v36 = vld [vmem:[%s8674_s8 + $0x398] sm:$0xff]  ;;  %v4586_v37 = vld [vmem:[%s8674_s8 + $0x290] sm:$0xff] }
0x1526   :  { %5075 = vmatpush.msra.mxu0 %v4913_v43  ;;  %5058 = vmatpush.msra.mxu3 %v4761_v48  ;;  %v4682_v41 = vld [vmem:[%s8674_s8 + $0x590] sm:$0xff]  ;;  %v4611_v43 = vld [vmem:[%s8674_s8 + $0x358] sm:$0xff] }
0x1527   :  { %v4810_v42 = vld [vmem:[%s8674_s8 + $0x990] sm:$0xff] }
0x1528   :  { %5076 = vmatpush.msra.mxu0 %v4905_v9  ;;  %v4578_v44 = vld [vmem:[%s8674_s8 + $0x250] sm:$0xff] }
0x1529   :  { %v4674_v9 = vld [vmem:[%s8674_s8 + $0x550] sm:$0xff] }
0x152a   :  { %5077 = vmatpush.msra.mxu0 %v4897_v55  ;;  %v4802_v45 = vld [vmem:[%s8674_s8 + $0x950] sm:$0xff]  ;;  %v4603_v55 = vld [vmem:[%s8674_s8 + $0x318] sm:$0xff] }
0x152b   :  { %v4570_v48 = vld [vmem:[%s8674_s8 + $0x210] sm:$0xff] }
0x152c   :  { %5078 = vmatpush.msra.mxu0 %v4889_v49  ;;  %v4666_v49 = vld [vmem:[%s8674_s8 + $0x510] sm:$0xff] }
0x1582   :  { %v4421_v50 = vpop.f32.mrf.mxu0 }
0x1583   :  { %v4484_v10 = vperm.slane %v4421_v50, 0  ;;  %v4481_v51 = vpop.f32.mrf.mxu1  ;;  %v4492_v63 = vperm.slane %v4421_v50, 1  ;;  %v4794_v50 = vld [vmem:[%s8674_s8 + $0x910] sm:$0xff] }
0x1584   :  { %v4487_v52 = vperm.slane %v4481_v51, 0  ;;  %v4495_v59 = vperm.slane %v4481_v51, 1  ;;  %v4562_v51 = vld [vmem:[%s8674_s8 + $0x1d0] sm:$0xff] }
0x1585   :  { %v4488_v54 = vmul.f32 %v4484_v10, %v8631_v14  ;;  %v4595_v10 = vld [vmem:[%s8674_s8 + $0x2d8] sm:$0xff] }
0x1586   :  { %v4491_v53 = vmul.f32 %v4487_v52, %v8655_v6  ;;  %v4874_v6 = vld [vmem:[%s8674_s8 + $0xb90] sm:$0xff] }
0x1587   :  { %v4496_v57 = vadd.f32 %v4492_v63, %v4488_v54  ;;  %v4658_v52 = vld [vmem:[%s8674_s8 + $0x4d0] sm:$0xff]  ;;  %v4587_v63 = vld [vmem:[%s8674_s8 + $0x298] sm:$0xff] }
0x1588   :  { %v4499_v61 = vadd.f32 %v4495_v59, %v4491_v53  ;;  %v4441_v30 = vpop.f32.mrf.mxu3  ;;  %v4786_v54 = vld [vmem:[%s8674_s8 + $0x8d0] sm:$0xff] }
0x1589   :  { %v8794_v62 = vmax.f32 %v4496_v57, 0.0  ;;  %v4485_v0 = vperm.slane %v4441_v30, 0  ;;  %v4493_v3 = vperm.slane %v4441_v30, 1  ;;  %v4554_v53 = vld [vmem:[%s8674_s8 + $0x190] sm:$0xff] }
0x158a   :  { %v8797_v31 = vmax.f32 %v4499_v61, 0.0  ;;  %v4461_v28 = vpop.f32.mrf.mxu0  ;;  %v4650_v59 = vld [vmem:[%s8674_s8 + $0x490] sm:$0xff]  ;;  %v4579_v61 = vld [vmem:[%s8674_s8 + $0x258] sm:$0xff] }
0x158b   :  { %v4489_v14 = vmul.f32 %v4485_v0, %v8638_v24  ;;  %v4486_v56 = vperm.slane %v4461_v28, 0  ;;  %4939 = vmatmul.f32.vlgmr.msra.gmra.mxu2 %v8794_v62  ;;  %v4494_v38 = vperm.slane %v4461_v28, 1  ;;  %v4866_v24 = vld [vmem:[%s8674_s8 + $0xb50] sm:$0xff]  ;;  %v4571_v28 = vld [vmem:[%s8674_s8 + $0x218] sm:$0xff] }
0x158c   :  { %6551 = vmatmul.msk.f32.vlgmr.msra.gmra.mxu1 %vm920_vm7, %v8797_v31  ;;  %5123 = vmatpush.msra.mxu2 %v4882_v1  ;;  %v4778_v57 = vld [vmem:[%s8674_s8 + $0x890] sm:$0xff] }
0x158d   :  { %v4497_v5 = vadd.f32 %v4493_v3, %v4489_v14  ;;  %v4490_v2 = vmul.f32 %v4486_v56, %v8640_v29  ;;  %5103 = vmatpush.msra.mxu1 %v4754_v40  ;;  %v4546_v30 = vld [vmem:[%s8674_s8 + $0x150] sm:$0xff]  ;;  %v4563_v56 = vld [vmem:[%s8674_s8 + $0x1d8] sm:$0xff] }
0x158e   :  { %5124 = vmatpush.msra.mxu2 %v4874_v6  ;;  %v4642_v0 = vld [vmem:[%s8674_s8 + $0x450] sm:$0xff]  ;;  %v4883_v6 = vld [vmem:[%s8674_s8 + $0xbd8] sm:$0xff] }
0x158f   :  { %v8809_v4 = vmax.f32 %v4497_v5, 0.0  ;;  %v4498_v11 = vadd.f32 %v4494_v38, %v4490_v2  ;;  %5104 = vmatpush.msra.mxu1 %v4746_v47  ;;  %v4770_v1 = vld [vmem:[%s8674_s8 + $0x850] sm:$0xff]  ;;  %v4915_v47 = vld [vmem:[%s8674_s8 + $0xcd8] sm:$0xff] }
0x1590   :  { %5125 = vmatpush.msra.mxu2 %v4866_v24  ;;  %v4538_v40 = vld [vmem:[%s8674_s8 + $0x110] sm:$0xff]  ;;  %v4555_v2 = vld [vmem:[%s8674_s8 + $0x198] sm:$0xff] }
0x1591   :  { %v8814_v29 = vmax.f32 %v4498_v11, 0.0  ;;  %5105 = vmatpush.msra.mxu1 %v4738_v35  ;;  %4959 = vmatmul.f32.vlgmr.msrb.gmra.mxu3 %v8809_v4  ;;  %v4634_v14 = vld [vmem:[%s8674_s8 + $0x410] sm:$0xff]  ;;  %v4875_v38 = vld [vmem:[%s8674_s8 + $0xb98] sm:$0xff] }
0x1592   :  { %5126 = vmatpush.msra.mxu2 %v4858_v39  ;;  %5155 = vmatpush.msrb.mxu3 %v4914_v46  ;;  %v4762_v3 = vld [vmem:[%s8674_s8 + $0x810] sm:$0xff]  ;;  %v4907_v24 = vld [vmem:[%s8674_s8 + $0xc98] sm:$0xff] }
0x1593   :  { %5106 = vmatpush.msra.mxu1 %v4730_v7  ;;  %4979 = vmatmul.f32.vlgmr.msrb.gmra.mxu0 %v8814_v29  ;;  %v4530_v5 = vld [vmem:[%s8674_s8 + $0xd0] sm:$0xff]  ;;  %v4547_v11 = vld [vmem:[%s8674_s8 + $0x158] sm:$0xff] }
0x1594   :  { %5019 = vmatmul.f32.vlgmr.msrb.gmra.mxu1 %v8794_v62  ;;  %5039 = vmatmul.f32.vlgmr.msrb.gmra.mxu2 %v8809_v4  ;;  %v4522_v35 = vld [vmem:[%s8674_s8 + $0x90] sm:$0xff]  ;;  %v4867_v39 = vld [vmem:[%s8674_s8 + $0xb58] sm:$0xff] }
0x1595   :  { %5083 = vmatpush.msrb.mxu0 %v4626_v16  ;;  %5107 = vmatpush.msra.mxu1 %v4722_v12  ;;  %v4899_v46 = vld [vmem:[%s8674_s8 + $0xc58] sm:$0xff]  ;;  %v4514_v7 = vld [vmem:[%s8674_s8 + $0x50] sm:$0xff] }
0x1596   :  { %5127 = vmatpush.msra.mxu2 %v4850_v18  ;;  %5156 = vmatpush.msrb.mxu3 %v4906_v8  ;;  %v4539_v16 = vld [vmem:[%s8674_s8 + $0x118] sm:$0xff]  ;;  %v4506_v8 = vld [vmem:[%s8674_s8 + $0x10] sm:$0xff] }
0x1597   :  { %5084 = vmatpush.msrb.mxu0 %v4618_v13  ;;  %5108 = vmatpush.msra.mxu1 %v4714_v60  ;;  %v4859_v12 = vld [vmem:[%s8674_s8 + $0xb18] sm:$0xff]  ;;  %v4628_v60 = vld [vmem:[%s8674_s8 + $0x3e0] sm:$0xff] }
0x1598   :  { %5128 = vmatpush.msra.mxu2 %v4842_v15  ;;  %5157 = vmatpush.msrb.mxu3 %v4898_v19  ;;  %v4891_v18 = vld [vmem:[%s8674_s8 + $0xc18] sm:$0xff] }
0x1599   :  { %5085 = vmatpush.msrb.mxu0 %v4610_v20  ;;  %5109 = vmatpush.msra.mxu1 %v4706_v21  ;;  %v4531_v13 = vld [vmem:[%s8674_s8 + $0xd8] sm:$0xff]  ;;  %v4620_v21 = vld [vmem:[%s8674_s8 + $0x3a0] sm:$0xff] }
0x159a   :  { %5129 = vmatpush.msra.mxu2 %v4834_v22  ;;  %5158 = vmatpush.msrb.mxu3 %v4890_v23  ;;  %v4851_v15 = vld [vmem:[%s8674_s8 + $0xad8] sm:$0xff] }
0x159b   :  { %5059 = vmatmul.f32.vlgmr.msra.gmra.mxu3 %v8814_v29  ;;  %5086 = vmatpush.msrb.mxu0 %v4602_v26  ;;  %v4755_v19 = vld [vmem:[%s8674_s8 + $0x7d8] sm:$0xff] }
0x159c   :  { %5110 = vmatpush.msra.mxu1 %v4698_v25  ;;  %5130 = vmatpush.msra.mxu2 %v4826_v27  ;;  %v4523_v20 = vld [vmem:[%s8674_s8 + $0x98] sm:$0xff]  ;;  %v4612_v25 = vld [vmem:[%s8674_s8 + $0x360] sm:$0xff] }
0x159d   :  { %5163 = vmatpush.msra.mxu3 %v4627_v58  ;;  %6552 = vmatmul.msk.f32.vlgmr.msra.gmra.mxu0 %vm920_vm7, %v8797_v31  ;;  %v4747_v22 = vld [vmem:[%s8674_s8 + $0x798] sm:$0xff] }
0x159e   :  { %5087 = vmatpush.msrb.mxu0 %v4594_v34  ;;  %5111 = vmatpush.msra.mxu1 %v4690_v32  ;;  %v4843_v23 = vld [vmem:[%s8674_s8 + $0xa98] sm:$0xff]  ;;  %v4604_v32 = vld [vmem:[%s8674_s8 + $0x320] sm:$0xff] }
0x159f   :  { %5131 = vmatpush.msra.mxu2 %v4818_v33  ;;  %5164 = vmatpush.msra.mxu3 %v4619_v36  ;;  %v4515_v26 = vld [vmem:[%s8674_s8 + $0x58] sm:$0xff] }
0x15a0   :  { %5088 = vmatpush.msrb.mxu0 %v4586_v37  ;;  %5112 = vmatpush.msra.mxu1 %v4682_v41  ;;  %v4739_v27 = vld [vmem:[%s8674_s8 + $0x758] sm:$0xff]  ;;  %v4756_v37 = vld [vmem:[%s8674_s8 + $0x7e0] sm:$0xff] }
0x15a1   :  { %5132 = vmatpush.msra.mxu2 %v4810_v42  ;;  %5165 = vmatpush.msra.mxu3 %v4611_v43  ;;  %v4835_v58 = vld [vmem:[%s8674_s8 + $0xa58] sm:$0xff]  ;;  %v4596_v41 = vld [vmem:[%s8674_s8 + $0x2e0] sm:$0xff] }
0x15a2   :  { %5089 = vmatpush.msrb.mxu0 %v4578_v44  ;;  %5113 = vmatpush.msra.mxu1 %v4674_v9  ;;  %v4507_v34 = vld [vmem:[%s8674_s8 + $0x18] sm:$0xff]  ;;  %v4748_v44 = vld [vmem:[%s8674_s8 + $0x7a0] sm:$0xff] }
0x15a3   :  { %5133 = vmatpush.msra.mxu2 %v4802_v45  ;;  %5166 = vmatpush.msra.mxu3 %v4603_v55  ;;  %v4731_v33 = vld [vmem:[%s8674_s8 + $0x718] sm:$0xff]  ;;  %v4588_v9 = vld [vmem:[%s8674_s8 + $0x2a0] sm:$0xff] }
0x15a4   :  { %5090 = vmatpush.msrb.mxu0 %v4570_v48  ;;  %5114 = vmatpush.msra.mxu1 %v4666_v49  ;;  %v4827_v36 = vld [vmem:[%s8674_s8 + $0xa18] sm:$0xff]  ;;  %v4740_v48 = vld [vmem:[%s8674_s8 + $0x760] sm:$0xff] }
0x15a5   :  { %5134 = vmatpush.msra.mxu2 %v4794_v50  ;;  %6553 = vmatmul.msk.f32.vlgmr.msrb.gmra.mxu3 %vm920_vm7, %v8797_v31  ;;  %v4723_v42 = vld [vmem:[%s8674_s8 + $0x6d8] sm:$0xff]  ;;  %v4580_v49 = vld [vmem:[%s8674_s8 + $0x260] sm:$0xff] }
0x15a6   :  { %5167 = vmatpush.msra.mxu3 %v4595_v10  ;;  %5091 = vmatpush.msrb.mxu0 %v4562_v51  ;;  %v4819_v43 = vld [vmem:[%s8674_s8 + $0x9d8] sm:$0xff]  ;;  %v4732_v51 = vld [vmem:[%s8674_s8 + $0x720] sm:$0xff] }
0x15a7   :  { %5115 = vmatpush.msra.mxu1 %v4658_v52  ;;  %5135 = vmatpush.msra.mxu2 %v4786_v54  ;;  %v4715_v45 = vld [vmem:[%s8674_s8 + $0x698] sm:$0xff]  ;;  %v4572_v52 = vld [vmem:[%s8674_s8 + $0x220] sm:$0xff] }
0x15a8   :  { %5168 = vmatpush.msra.mxu3 %v4587_v63  ;;  %5092 = vmatpush.msrb.mxu0 %v4554_v53  ;;  %v4811_v55 = vld [vmem:[%s8674_s8 + $0x998] sm:$0xff]  ;;  %v4724_v53 = vld [vmem:[%s8674_s8 + $0x6e0] sm:$0xff] }
0x15a9   :  { %5116 = vmatpush.msra.mxu1 %v4650_v59  ;;  %5136 = vmatpush.msra.mxu2 %v4778_v57  ;;  %v4707_v50 = vld [vmem:[%s8674_s8 + $0x658] sm:$0xff]  ;;  %v4564_v59 = vld [vmem:[%s8674_s8 + $0x1e0] sm:$0xff] }
0x15aa   :  { %5169 = vmatpush.msra.mxu3 %v4579_v61  ;;  %5093 = vmatpush.msrb.mxu0 %v4546_v30  ;;  %v4803_v10 = vld [vmem:[%s8674_s8 + $0x958] sm:$0xff]  ;;  %v4716_v30 = vld [vmem:[%s8674_s8 + $0x6a0] sm:$0xff] }
0x15ab   :  { %5117 = vmatpush.msra.mxu1 %v4642_v0  ;;  %5137 = vmatpush.msra.mxu2 %v4770_v1  ;;  %v4699_v54 = vld [vmem:[%s8674_s8 + $0x618] sm:$0xff]  ;;  %v4556_v0 = vld [vmem:[%s8674_s8 + $0x1a0] sm:$0xff] }
0x15ac   :  { %5170 = vmatpush.msra.mxu3 %v4571_v28  ;;  %5094 = vmatpush.msrb.mxu0 %v4538_v40  ;;  %v4795_v63 = vld [vmem:[%s8674_s8 + $0x918] sm:$0xff]  ;;  %v4708_v40 = vld [vmem:[%s8674_s8 + $0x660] sm:$0xff] }
0x15ad   :  { %5118 = vmatpush.msra.mxu1 %v4634_v14  ;;  %5138 = vmatpush.msra.mxu2 %v4762_v3  ;;  %v4691_v57 = vld [vmem:[%s8674_s8 + $0x5d8] sm:$0xff]  ;;  %v4548_v14 = vld [vmem:[%s8674_s8 + $0x160] sm:$0xff] }
0x15ae   :  { %5171 = vmatpush.msra.mxu3 %v4563_v56  ;;  %5119 = vmatmul.f32.vlgmr.msra.gmra.mxu1 %v8809_v4  ;;  %v4787_v61 = vld [vmem:[%s8674_s8 + $0x8d8] sm:$0xff] }
0x15af   :  { %5139 = vmatmul.f32.vlgmr.msra.gmra.mxu2 %v8814_v29  ;;  %5203 = vmatpush.msrb.mxu1 %v4883_v6  ;;  %v4683_v1 = vld [vmem:[%s8674_s8 + $0x598] sm:$0xff]  ;;  %v4700_v6 = vld [vmem:[%s8674_s8 + $0x620] sm:$0xff] }
0x15b0   :  { %5235 = vmatpush.msrb.mxu2 %v4915_v47  ;;  %5095 = vmatpush.msrb.mxu0 %v4530_v5  ;;  %v4779_v28 = vld [vmem:[%s8674_s8 + $0x898] sm:$0xff]  ;;  %v4540_v47 = vld [vmem:[%s8674_s8 + $0x120] sm:$0xff] }
0x15b1   :  { %5172 = vmatpush.msra.mxu3 %v4555_v2  ;;  %5204 = vmatpush.msrb.mxu1 %v4875_v38  ;;  %v4675_v3 = vld [vmem:[%s8674_s8 + $0x558] sm:$0xff]  ;;  %v4692_v38 = vld [vmem:[%s8674_s8 + $0x5e0] sm:$0xff] }
0x15b2   :  { %5236 = vmatpush.msrb.mxu2 %v4907_v24  ;;  %5096 = vmatpush.msrb.mxu0 %v4522_v35  ;;  %v4771_v56 = vld [vmem:[%s8674_s8 + $0x858] sm:$0xff]  ;;  %v4532_v24 = vld [vmem:[%s8674_s8 + $0xe0] sm:$0xff] }
0x15b3   :  { %5173 = vmatpush.msra.mxu3 %v4547_v11  ;;  %5205 = vmatpush.msrb.mxu1 %v4867_v39  ;;  %v4667_v5 = vld [vmem:[%s8674_s8 + $0x518] sm:$0xff]  ;;  %v4916_v35 = vld [vmem:[%s8674_s8 + $0xce0] sm:$0xff] }
0x15b4   :  { %5237 = vmatpush.msrb.mxu2 %v4899_v46  ;;  %5097 = vmatpush.msrb.mxu0 %v4514_v7  ;;  %v4763_v2 = vld [vmem:[%s8674_s8 + $0x818] sm:$0xff]  ;;  %v4684_v39 = vld [vmem:[%s8674_s8 + $0x5a0] sm:$0xff] }
0x15b5   :  { %5174 = vmatpush.msra.mxu3 %v4539_v16  ;;  %5206 = vmatpush.msrb.mxu1 %v4859_v12  ;;  %v4659_v11 = vld [vmem:[%s8674_s8 + $0x4d8] sm:$0xff]  ;;  %v4524_v46 = vld [vmem:[%s8674_s8 + $0xa0] sm:$0xff] }
0x15b6   :  { %5238 = vmatpush.msrb.mxu2 %v4891_v18  ;;  %5098 = vmatpush.msrb.mxu0 %v4506_v8  ;;  %v4908_v7 = vld [vmem:[%s8674_s8 + $0xca0] sm:$0xff]  ;;  %v4651_v16 = vld [vmem:[%s8674_s8 + $0x498] sm:$0xff] }
0x15b7   :  { %5175 = vmatpush.msra.mxu3 %v4531_v13  ;;  %5099 = vmatmul.f32.vlgmr.msrb.gmra.mxu0 %v8794_v62  ;;  %v4676_v12 = vld [vmem:[%s8674_s8 + $0x560] sm:$0xff]  ;;  %v4643_v13 = vld [vmem:[%s8674_s8 + $0x458] sm:$0xff] }
0x15b8   :  { %5243 = vmatpush.msra.mxu2 %v4628_v60  ;;  %5207 = vmatpush.msrb.mxu1 %v4851_v15  ;;  %v4516_v18 = vld [vmem:[%s8674_s8 + $0x60] sm:$0xff] }
0x15b9   :  { %5183 = vmatpush.msra.mxu0 %v4755_v19  ;;  %6554 = vmatmul.msk.f32.vlgmr.msrb.gmra.mxu2 %vm920_vm7, %v8797_v31  ;;  %v4900_v8 = vld [vmem:[%s8674_s8 + $0xc60] sm:$0xff] }
0x15ba   :  { %5176 = vmatpush.msra.mxu3 %v4523_v20  ;;  %5244 = vmatpush.msra.mxu2 %v4620_v21  ;;  %v4668_v60 = vld [vmem:[%s8674_s8 + $0x520] sm:$0xff]  ;;  %v4635_v20 = vld [vmem:[%s8674_s8 + $0x418] sm:$0xff] }
0x15bb   :  { %5184 = vmatpush.msra.mxu0 %v4747_v22  ;;  %5208 = vmatpush.msrb.mxu1 %v4843_v23  ;;  %v4508_v15 = vld [vmem:[%s8674_s8 + $0x20] sm:$0xff]  ;;  %v4629_v22 = vld [vmem:[%s8674_s8 + $0x3e8] sm:$0xff] }
0x15bc   :  { %5177 = vmatpush.msra.mxu3 %v4515_v26  ;;  %5245 = vmatpush.msra.mxu2 %v4612_v25  ;;  %v4892_v19 = vld [vmem:[%s8674_s8 + $0xc20] sm:$0xff]  ;;  %v4757_v23 = vld [vmem:[%s8674_s8 + $0x7e8] sm:$0xff] }
0x15bd   :  { %5185 = vmatpush.msra.mxu0 %v4739_v27  ;;  %5209 = vmatpush.msrb.mxu1 %v4835_v58  ;;  %v4660_v21 = vld [vmem:[%s8674_s8 + $0x4e0] sm:$0xff]  ;;  %v4621_v27 = vld [vmem:[%s8674_s8 + $0x3a8] sm:$0xff] }
0x15be   :  { %5178 = vmatpush.msra.mxu3 %v4507_v34  ;;  %5246 = vmatpush.msra.mxu2 %v4604_v32  ;;  %v4884_v26 = vld [vmem:[%s8674_s8 + $0xbe0] sm:$0xff]  ;;  %v4749_v58 = vld [vmem:[%s8674_s8 + $0x7a8] sm:$0xff] }
0x15bf   :  { %5179 = vmatmul.f32.vlgmr.msra.gmra.mxu3 %v8794_v62  ;;  %5186 = vmatpush.msra.mxu0 %v4731_v33  ;;  %v4652_v25 = vld [vmem:[%s8674_s8 + $0x4a0] sm:$0xff]  ;;  %v4613_v33 = vld [vmem:[%s8674_s8 + $0x368] sm:$0xff] }
0x15c0   :  { %5210 = vmatpush.msrb.mxu1 %v4827_v36  ;;  %5263 = vmatpush.msrb.mxu3 %v4756_v37  ;;  %v4876_v34 = vld [vmem:[%s8674_s8 + $0xba0] sm:$0xff]  ;;  %v4741_v36 = vld [vmem:[%s8674_s8 + $0x768] sm:$0xff] }
0x15c1   :  { %5247 = vmatpush.msra.mxu2 %v4596_v41  ;;  %5187 = vmatpush.msra.mxu0 %v4723_v42  ;;  %v4644_v32 = vld [vmem:[%s8674_s8 + $0x460] sm:$0xff]  ;;  %v4605_v42 = vld [vmem:[%s8674_s8 + $0x328] sm:$0xff] }
0x15c2   :  { %5211 = vmatpush.msrb.mxu1 %v4819_v43  ;;  %5264 = vmatpush.msrb.mxu3 %v4748_v44  ;;  %v4868_v37 = vld [vmem:[%s8674_s8 + $0xb60] sm:$0xff]  ;;  %v4733_v43 = vld [vmem:[%s8674_s8 + $0x728] sm:$0xff] }
0x15c3   :  { %5248 = vmatpush.msra.mxu2 %v4588_v9  ;;  %5188 = vmatpush.msra.mxu0 %v4715_v45  ;;  %v4636_v41 = vld [vmem:[%s8674_s8 + $0x420] sm:$0xff]  ;;  %v4885_v9 = vld [vmem:[%s8674_s8 + $0xbe8] sm:$0xff] }
0x15c4   :  { %5212 = vmatpush.msrb.mxu1 %v4811_v55  ;;  %5265 = vmatpush.msrb.mxu3 %v4740_v48  ;;  %v4860_v44 = vld [vmem:[%s8674_s8 + $0xb20] sm:$0xff]  ;;  %v4597_v45 = vld [vmem:[%s8674_s8 + $0x2e8] sm:$0xff] }
0x15c5   :  { %5249 = vmatpush.msra.mxu2 %v4580_v49  ;;  %5189 = vmatpush.msra.mxu0 %v4707_v50  ;;  %v4725_v55 = vld [vmem:[%s8674_s8 + $0x6e8] sm:$0xff]  ;;  %v4852_v48 = vld [vmem:[%s8674_s8 + $0xae0] sm:$0xff] }
0x15c6   :  { %5213 = vmatpush.msrb.mxu1 %v4803_v10  ;;  %5266 = vmatpush.msrb.mxu3 %v4732_v51  ;;  %v4877_v49 = vld [vmem:[%s8674_s8 + $0xba8] sm:$0xff]  ;;  %v4844_v51 = vld [vmem:[%s8674_s8 + $0xaa0] sm:$0xff] }
0x15c7   :  { %5250 = vmatpush.msra.mxu2 %v4572_v52  ;;  %5190 = vmatpush.msra.mxu0 %v4699_v54  ;;  %v4589_v50 = vld [vmem:[%s8674_s8 + $0x2a8] sm:$0xff] }
0x15c8   :  { %5214 = vmatpush.msrb.mxu1 %v4795_v63  ;;  %5267 = vmatpush.msrb.mxu3 %v4724_v53  ;;  %v4717_v10 = vld [vmem:[%s8674_s8 + $0x6a8] sm:$0xff]  ;;  %v4836_v53 = vld [vmem:[%s8674_s8 + $0xa60] sm:$0xff] }
0x15c9   :  { %5251 = vmatpush.msra.mxu2 %v4564_v59  ;;  %5191 = vmatpush.msra.mxu0 %v4691_v57  ;;  %v4869_v52 = vld [vmem:[%s8674_s8 + $0xb68] sm:$0xff] }
0x15ca   :  { %5215 = vmatpush.msrb.mxu1 %v4787_v61  ;;  %5268 = vmatpush.msrb.mxu3 %v4716_v30  ;;  %v4581_v54 = vld [vmem:[%s8674_s8 + $0x268] sm:$0xff]  ;;  %v4828_v30 = vld [vmem:[%s8674_s8 + $0xa20] sm:$0xff] }
0x15cb   :  { %5252 = vmatpush.msra.mxu2 %v4556_v0  ;;  %5192 = vmatpush.msra.mxu0 %v4683_v1  ;;  %v4709_v63 = vld [vmem:[%s8674_s8 + $0x668] sm:$0xff] }
0x15cc   :  { %5216 = vmatpush.msrb.mxu1 %v4779_v28  ;;  %5269 = vmatpush.msrb.mxu3 %v4708_v40  ;;  %v4861_v59 = vld [vmem:[%s8674_s8 + $0xb28] sm:$0xff]  ;;  %v4820_v40 = vld [vmem:[%s8674_s8 + $0x9e0] sm:$0xff] }
0x15cd   :  { %5253 = vmatpush.msra.mxu2 %v4548_v14  ;;  %5193 = vmatpush.msra.mxu0 %v4675_v3  ;;  %v4573_v57 = vld [vmem:[%s8674_s8 + $0x228] sm:$0xff] }
0x15ce   :  { %5217 = vmatpush.msrb.mxu1 %v4771_v56  ;;  %5270 = vmatpush.msrb.mxu3 %v4700_v6  ;;  %v4701_v61 = vld [vmem:[%s8674_s8 + $0x628] sm:$0xff]  ;;  %v4812_v6 = vld [vmem:[%s8674_s8 + $0x9a0] sm:$0xff] }
0x15cf   :  { %5254 = vmatpush.msra.mxu2 %v4540_v47  ;;  %5194 = vmatpush.msra.mxu0 %v4667_v5  ;;  %v4853_v0 = vld [vmem:[%s8674_s8 + $0xae8] sm:$0xff] }
0x15d0   :  { %5218 = vmatpush.msrb.mxu1 %v4763_v2  ;;  %5271 = vmatpush.msrb.mxu3 %v4692_v38  ;;  %v4565_v1 = vld [vmem:[%s8674_s8 + $0x1e8] sm:$0xff]  ;;  %v4804_v38 = vld [vmem:[%s8674_s8 + $0x960] sm:$0xff] }
0x15d1   :  { %5219 = vmatmul.f32.vlgmr.msrb.gmra.mxu1 %v8814_v29  ;;  %5255 = vmatpush.msra.mxu2 %v4532_v24  ;;  %v4693_v28 = vld [vmem:[%s8674_s8 + $0x5e8] sm:$0xff] }
0x15d2   :  { %5315 = vmatpush.msra.mxu1 %v4916_v35  ;;  %5195 = vmatpush.msra.mxu0 %v4659_v11  ;;  %v4845_v14 = vld [vmem:[%s8674_s8 + $0xaa8] sm:$0xff] }
0x15d3   :  { %5272 = vmatpush.msrb.mxu3 %v4684_v39  ;;  %5256 = vmatpush.msra.mxu2 %v4524_v46  ;;  %v4557_v3 = vld [vmem:[%s8674_s8 + $0x1a8] sm:$0xff]  ;;  %v4796_v39 = vld [vmem:[%s8674_s8 + $0x920] sm:$0xff] }
0x15d4   :  { %5316 = vmatpush.msra.mxu1 %v4908_v7  ;;  %5196 = vmatpush.msra.mxu0 %v4651_v16  ;;  %v4685_v56 = vld [vmem:[%s8674_s8 + $0x5a8] sm:$0xff] }
0x15d5   :  { %5273 = vmatpush.msrb.mxu3 %v4676_v12  ;;  %5257 = vmatpush.msra.mxu2 %v4516_v18  ;;  %v4837_v47 = vld [vmem:[%s8674_s8 + $0xa68] sm:$0xff]  ;;  %v4788_v12 = vld [vmem:[%s8674_s8 + $0x8e0] sm:$0xff] }
0x15d6   :  { %5317 = vmatpush.msra.mxu1 %v4900_v8  ;;  %5197 = vmatpush.msra.mxu0 %v4643_v13  ;;  %v4549_v5 = vld [vmem:[%s8674_s8 + $0x168] sm:$0xff] }
0x15d7   :  { %5274 = vmatpush.msrb.mxu3 %v4668_v60  ;;  %5258 = vmatpush.msra.mxu2 %v4508_v15  ;;  %v4677_v2 = vld [vmem:[%s8674_s8 + $0x568] sm:$0xff]  ;;  %v4780_v60 = vld [vmem:[%s8674_s8 + $0x8a0] sm:$0xff] }
0x15d8   :  { %5318 = vmatpush.msra.mxu1 %v4892_v19  ;;  %5198 = vmatpush.msra.mxu0 %v4635_v20  ;;  %v4829_v24 = vld [vmem:[%s8674_s8 + $0xa28] sm:$0xff] }
0x15d9   :  { %5259 = vmatmul.f32.vlgmr.msra.gmra.mxu2 %v8794_v62  ;;  %5275 = vmatpush.msrb.mxu3 %v4660_v21  ;;  %v4541_v35 = vld [vmem:[%s8674_s8 + $0x128] sm:$0xff]  ;;  %v4772_v21 = vld [vmem:[%s8674_s8 + $0x860] sm:$0xff] }
0x15da   :  { %5323 = vmatpush.msrb.mxu1 %v4629_v22  ;;  %5343 = vmatpush.msrb.mxu2 %v4757_v23  ;;  %v4669_v11 = vld [vmem:[%s8674_s8 + $0x528] sm:$0xff] }
0x15db   :  { %5199 = vmatmul.f32.vlgmr.msra.gmra.mxu0 %v8809_v4  ;;  %6555 = vmatmul.msk.f32.vlgmr.msra.gmra.mxu1 %vm920_vm7, %v8797_v31  ;;  %v4821_v46 = vld [vmem:[%s8674_s8 + $0x9e8] sm:$0xff] }
0x15dc   :  { %5283 = vmatpush.msrb.mxu0 %v4884_v26  ;;  %5276 = vmatpush.msrb.mxu3 %v4652_v25  ;;  %v4533_v7 = vld [vmem:[%s8674_s8 + $0xe8] sm:$0xff]  ;;  %v4764_v25 = vld [vmem:[%s8674_s8 + $0x820] sm:$0xff] }
0x15dd   :  { %5324 = vmatpush.msrb.mxu1 %v4621_v27  ;;  %5344 = vmatpush.msrb.mxu2 %v4749_v58  ;;  %v4661_v16 = vld [vmem:[%s8674_s8 + $0x4e8] sm:$0xff]  ;;  %v4758_v58 = vld [vmem:[%s8674_s8 + $0x7f0] sm:$0xff] }
0x15de   :  { %5284 = vmatpush.msrb.mxu0 %v4876_v34  ;;  %5277 = vmatpush.msrb.mxu3 %v4644_v32  ;;  %v4813_v18 = vld [vmem:[%s8674_s8 + $0x9a8] sm:$0xff]  ;;  %v4886_v34 = vld [vmem:[%s8674_s8 + $0xbf0] sm:$0xff] }
0x15df   :  { %5325 = vmatpush.msrb.mxu1 %v4613_v33  ;;  %5345 = vmatpush.msrb.mxu2 %v4741_v36  ;;  %v4525_v8 = vld [vmem:[%s8674_s8 + $0xa8] sm:$0xff]  ;;  %v4750_v36 = vld [vmem:[%s8674_s8 + $0x7b0] sm:$0xff] }
0x15e0   :  { %5285 = vmatpush.msrb.mxu0 %v4868_v37  ;;  %5278 = vmatpush.msrb.mxu3 %v4636_v41  ;;  %v4653_v13 = vld [vmem:[%s8674_s8 + $0x4a8] sm:$0xff]  ;;  %v4878_v37 = vld [vmem:[%s8674_s8 + $0xbb0] sm:$0xff] }
0x15e1   :  { %5326 = vmatpush.msrb.mxu1 %v4605_v42  ;;  %5346 = vmatpush.msrb.mxu2 %v4733_v43  ;;  %v4805_v15 = vld [vmem:[%s8674_s8 + $0x968] sm:$0xff]  ;;  %v4742_v43 = vld [vmem:[%s8674_s8 + $0x770] sm:$0xff] }
0x15e2   :  { %5279 = vmatmul.f32.vlgmr.msrb.gmra.mxu3 %v8809_v4  ;;  %5286 = vmatpush.msrb.mxu0 %v4860_v44  ;;  %v4517_v19 = vld [vmem:[%s8674_s8 + $0x68] sm:$0xff]  ;;  %v4870_v44 = vld [vmem:[%s8674_s8 + $0xb70] sm:$0xff] }
0x15e3   :  { %5363 = vmatpush.msra.mxu3 %v4885_v9  ;;  %5327 = vmatpush.msrb.mxu1 %v4597_v45  ;;  %v4645_v20 = vld [vmem:[%s8674_s8 + $0x468] sm:$0xff] }
0x15e4   :  { %5347 = vmatpush.msrb.mxu2 %v4725_v55  ;;  %5287 = vmatpush.msrb.mxu0 %v4852_v48  ;;  %v4797_v22 = vld [vmem:[%s8674_s8 + $0x928] sm:$0xff]  ;;  %v4734_v55 = vld [vmem:[%s8674_s8 + $0x730] sm:$0xff] }
0x15e5   :  { %5364 = vmatpush.msra.mxu3 %v4877_v49  ;;  %5328 = vmatpush.msrb.mxu1 %v4589_v50  ;;  %v4509_v23 = vld [vmem:[%s8674_s8 + $0x28] sm:$0xff]  ;;  %v4862_v48 = vld [vmem:[%s8674_s8 + $0xb30] sm:$0xff] }
0x15e6   :  { %5348 = vmatpush.msrb.mxu2 %v4717_v10  ;;  %5288 = vmatpush.msrb.mxu0 %v4844_v51  ;;  %v4637_v26 = vld [vmem:[%s8674_s8 + $0x428] sm:$0xff]  ;;  %v4918_v50 = vld [vmem:[%s8674_s8 + $0xcf0] sm:$0xff] }
0x15e7   :  { %5365 = vmatpush.msra.mxu3 %v4869_v52  ;;  %5329 = vmatpush.msrb.mxu1 %v4581_v54  ;;  %v4789_v27 = vld [vmem:[%s8674_s8 + $0x8e8] sm:$0xff]  ;;  %v4630_v10 = vld [vmem:[%s8674_s8 + $0x3f0] sm:$0xff] }
0x15e8   :  { %5349 = vmatpush.msrb.mxu2 %v4709_v63  ;;  %5289 = vmatpush.msrb.mxu0 %v4836_v53  ;;  %v4917_v32 = vld [vmem:[%s8674_s8 + $0xce8] sm:$0xff]  ;;  %v4726_v51 = vld [vmem:[%s8674_s8 + $0x6f0] sm:$0xff] }
0x15e9   :  { %5366 = vmatpush.msra.mxu3 %v4861_v59  ;;  %5330 = vmatpush.msrb.mxu1 %v4573_v57  ;;  %v4781_v33 = vld [vmem:[%s8674_s8 + $0x8a8] sm:$0xff]  ;;  %v4854_v52 = vld [vmem:[%s8674_s8 + $0xaf0] sm:$0xff] }
0x15ea   :  { %5350 = vmatpush.msrb.mxu2 %v4701_v61  ;;  %5290 = vmatpush.msrb.mxu0 %v4828_v30  ;;  %v4909_v41 = vld [vmem:[%s8674_s8 + $0xca8] sm:$0xff]  ;;  %v4910_v54 = vld [vmem:[%s8674_s8 + $0xcb0] sm:$0xff] }
0x15eb   :  { %5367 = vmatpush.msra.mxu3 %v4853_v0  ;;  %5331 = vmatpush.msrb.mxu1 %v4565_v1  ;;  %v4773_v42 = vld [vmem:[%s8674_s8 + $0x868] sm:$0xff]  ;;  %v4622_v63 = vld [vmem:[%s8674_s8 + $0x3b0] sm:$0xff] }
0x15ec   :  { %5351 = vmatpush.msrb.mxu2 %v4693_v28  ;;  %5291 = vmatpush.msrb.mxu0 %v4820_v40  ;;  %v4901_v9 = vld [vmem:[%s8674_s8 + $0xc68] sm:$0xff]  ;;  %v4718_v53 = vld [vmem:[%s8674_s8 + $0x6b0] sm:$0xff] }
0x15ed   :  { %5368 = vmatpush.msra.mxu3 %v4845_v14  ;;  %5332 = vmatpush.msrb.mxu1 %v4557_v3  ;;  %v4765_v45 = vld [vmem:[%s8674_s8 + $0x828] sm:$0xff]  ;;  %v4846_v59 = vld [vmem:[%s8674_s8 + $0xab0] sm:$0xff]  ;;  %v4631_v3 = vld [vmem:[%s8674_s8 + $0x3f8] sm:$0xff] }
0x15ee   :  { %5352 = vmatpush.msrb.mxu2 %v4685_v56  ;;  %5292 = vmatpush.msrb.mxu0 %v4812_v6  ;;  %v4893_v49 = vld [vmem:[%s8674_s8 + $0xc28] sm:$0xff]  ;;  %v4902_v57 = vld [vmem:[%s8674_s8 + $0xc70] sm:$0xff] }
0x15ef   :  { %5369 = vmatpush.msra.mxu3 %v4837_v47  ;;  %5333 = vmatpush.msrb.mxu1 %v4549_v5  ;;  %v4614_v61 = vld [vmem:[%s8674_s8 + $0x370] sm:$0xff]  ;;  %v4623_v5 = vld [vmem:[%s8674_s8 + $0x3b8] sm:$0xff] }
0x15f0   :  { %5353 = vmatpush.msrb.mxu2 %v4677_v2  ;;  %5293 = vmatpush.msrb.mxu0 %v4804_v38  ;;  %v4710_v30 = vld [vmem:[%s8674_s8 + $0x670] sm:$0xff] }
0x15f1   :  { %5370 = vmatpush.msra.mxu3 %v4829_v24  ;;  %5334 = vmatpush.msrb.mxu1 %v4541_v35  ;;  %v4838_v0 = vld [vmem:[%s8674_s8 + $0xa70] sm:$0xff]  ;;  %v4615_v35 = vld [vmem:[%s8674_s8 + $0x378] sm:$0xff] }
0x15f2   :  { %5354 = vmatpush.msrb.mxu2 %v4669_v11  ;;  %5294 = vmatpush.msrb.mxu0 %v4796_v39  ;;  %v4894_v1 = vld [vmem:[%s8674_s8 + $0xc30] sm:$0xff] }
0x15f3   :  { %5371 = vmatpush.msra.mxu3 %v4821_v46  ;;  %5335 = vmatpush.msrb.mxu1 %v4533_v7  ;;  %v4606_v28 = vld [vmem:[%s8674_s8 + $0x330] sm:$0xff]  ;;  %v4607_v7 = vld [vmem:[%s8674_s8 + $0x338] sm:$0xff] }
0x15f4   :  { %5355 = vmatpush.msrb.mxu2 %v4661_v16  ;;  %5295 = vmatpush.msrb.mxu0 %v4788_v12  ;;  %v4702_v40 = vld [vmem:[%s8674_s8 + $0x630] sm:$0xff] }
0x15f5   :  { %5372 = vmatpush.msra.mxu3 %v4813_v18  ;;  %5336 = vmatpush.msrb.mxu1 %v4525_v8  ;;  %v4830_v14 = vld [vmem:[%s8674_s8 + $0xa30] sm:$0xff]  ;;  %v4599_v8 = vld [vmem:[%s8674_s8 + $0x2f8] sm:$0xff] }
0x15f6   :  { %5356 = vmatpush.msrb.mxu2 %v4653_v13  ;;  %5296 = vmatpush.msrb.mxu0 %v4780_v60  ;;  %v4598_v56 = vld [vmem:[%s8674_s8 + $0x2f0] sm:$0xff] }
0x15f7   :  { %5373 = vmatpush.msra.mxu3 %v4805_v15  ;;  %5337 = vmatpush.msrb.mxu1 %v4517_v19  ;;  %v4694_v6 = vld [vmem:[%s8674_s8 + $0x5f0] sm:$0xff]  ;;  %v4591_v19 = vld [vmem:[%s8674_s8 + $0x2b8] sm:$0xff] }
0x15f8   :  { %5357 = vmatpush.msrb.mxu2 %v4645_v20  ;;  %5297 = vmatpush.msrb.mxu0 %v4772_v21  ;;  %v4822_v47 = vld [vmem:[%s8674_s8 + $0x9f0] sm:$0xff] }
0x15f9   :  { %5374 = vmatpush.msra.mxu3 %v4797_v22  ;;  %5338 = vmatpush.msrb.mxu1 %v4509_v23  ;;  %v4590_v2 = vld [vmem:[%s8674_s8 + $0x2b0] sm:$0xff]  ;;  %v4583_v23 = vld [vmem:[%s8674_s8 + $0x278] sm:$0xff] }
0x15fa   :  { %5358 = vmatpush.msrb.mxu2 %v4637_v26  ;;  %5298 = vmatpush.msrb.mxu0 %v4764_v25  ;;  %v4686_v38 = vld [vmem:[%s8674_s8 + $0x5b0] sm:$0xff] }
0x15fb   :  { %5339 = vmatmul.f32.vlgmr.msrb.gmra.mxu1 %v8794_v62  ;;  %5359 = vmatmul.f32.vlgmr.msrb.gmra.mxu2 %v8809_v4  ;;  %v4814_v24 = vld [vmem:[%s8674_s8 + $0x9b0] sm:$0xff] }
0x15fc   :  { %5375 = vmatpush.msra.mxu3 %v4789_v27  ;;  %5423 = vmatpush.msra.mxu1 %v4758_v58  ;;  %v4582_v11 = vld [vmem:[%s8674_s8 + $0x270] sm:$0xff]  ;;  %v4575_v58 = vld [vmem:[%s8674_s8 + $0x238] sm:$0xff] }
0x15fd   :  { %5443 = vmatpush.msra.mxu2 %v4886_v34  ;;  %5299 = vmatmul.f32.vlgmr.msrb.gmra.mxu0 %v8814_v29  ;;  %v4678_v39 = vld [vmem:[%s8674_s8 + $0x570] sm:$0xff] }
0x15fe   :  { %5395 = vmatpush.msra.mxu0 %v4917_v32  ;;  %5376 = vmatpush.msra.mxu3 %v4781_v33  ;;  %v4806_v46 = vld [vmem:[%s8674_s8 + $0x970] sm:$0xff] }
0x15ff   :  { %5424 = vmatpush.msra.mxu1 %v4750_v36  ;;  %5444 = vmatpush.msra.mxu2 %v4878_v37  ;;  %v4574_v16 = vld [vmem:[%s8674_s8 + $0x230] sm:$0xff] }
0x1600   :  { %5396 = vmatpush.msra.mxu0 %v4909_v41  ;;  %5377 = vmatpush.msra.mxu3 %v4773_v42  ;;  %v4670_v12 = vld [vmem:[%s8674_s8 + $0x530] sm:$0xff]  ;;  %v4567_v42 = vld [vmem:[%s8674_s8 + $0x1f8] sm:$0xff] }
0x1601   :  { %5425 = vmatpush.msra.mxu1 %v4742_v43  ;;  %5445 = vmatpush.msra.mxu2 %v4870_v44  ;;  %v4798_v18 = vld [vmem:[%s8674_s8 + $0x930] sm:$0xff]  ;;  %v4887_v43 = vld [vmem:[%s8674_s8 + $0xbf8] sm:$0xff] }
0x1602   :  { %5397 = vmatpush.msra.mxu0 %v4901_v9  ;;  %5378 = vmatpush.msra.mxu3 %v4765_v45  ;;  %v4566_v13 = vld [vmem:[%s8674_s8 + $0x1f0] sm:$0xff]  ;;  %v4919_v9 = vld [vmem:[%s8674_s8 + $0xcf8] sm:$0xff] }
0x1603   :  { %5426 = vmatpush.msra.mxu1 %v4734_v55  ;;  %5446 = vmatpush.msra.mxu2 %v4862_v48  ;;  %v4662_v60 = vld [vmem:[%s8674_s8 + $0x4f0] sm:$0xff]  ;;  %v4559_v55 = vld [vmem:[%s8674_s8 + $0x1b8] sm:$0xff] }
0x1604   :  { %5379 = vmatmul.f32.vlgmr.msra.gmra.mxu3 %v8814_v29  ;;  %5398 = vmatpush.msra.mxu0 %v4893_v49  ;;  %v4790_v15 = vld [vmem:[%s8674_s8 + $0x8f0] sm:$0xff]  ;;  %v4879_v48 = vld [vmem:[%s8674_s8 + $0xbb8] sm:$0xff] }
0x1605   :  { %5475 = vmatpush.msrb.mxu3 %v4918_v50  ;;  %5427 = vmatpush.msra.mxu1 %v4726_v51  ;;  %v4558_v20 = vld [vmem:[%s8674_s8 + $0x1b0] sm:$0xff]  ;;  %v4911_v50 = vld [vmem:[%s8674_s8 + $0xcb8] sm:$0xff] }
0x1606   :  { %5403 = vmatpush.msrb.mxu0 %v4630_v10  ;;  %5447 = vmatpush.msra.mxu2 %v4854_v52  ;;  %v4654_v21 = vld [vmem:[%s8674_s8 + $0x4b0] sm:$0xff]  ;;  %v4551_v51 = vld [vmem:[%s8674_s8 + $0x178] sm:$0xff] }
0x1607   :  { %6556 = vmatmul.msk.f32.vlgmr.msra.gmra.mxu0 %vm920_vm7, %v8797_v31  ;;  %5476 = vmatpush.msrb.mxu3 %v4910_v54  ;;  %v4782_v22 = vld [vmem:[%s8674_s8 + $0x8b0] sm:$0xff]  ;;  %v4871_v52 = vld [vmem:[%s8674_s8 + $0xb78] sm:$0xff] }
0x1608   :  { %5404 = vmatpush.msrb.mxu0 %v4622_v63  ;;  %5428 = vmatpush.msra.mxu1 %v4718_v53  ;;  %v4550_v26 = vld [vmem:[%s8674_s8 + $0x170] sm:$0xff]  ;;  %v4903_v63 = vld [vmem:[%s8674_s8 + $0xc78] sm:$0xff] }
0x1609   :  { %5448 = vmatpush.msra.mxu2 %v4846_v59  ;;  %5477 = vmatpush.msrb.mxu3 %v4902_v57  ;;  %v4646_v25 = vld [vmem:[%s8674_s8 + $0x470] sm:$0xff]  ;;  %v5000_v41 = vpop.f32.mrf.mxu1  ;;  %v4543_v59 = vld [vmem:[%s8674_s8 + $0x138] sm:$0xff] }
0x160a   :  { %5405 = vmatpush.msrb.mxu0 %v4614_v61  ;;  %5429 = vmatpush.msra.mxu1 %v4710_v30  ;;  %v4774_v27 = vld [vmem:[%s8674_s8 + $0x870] sm:$0xff]  ;;  %v4863_v57 = vld [vmem:[%s8674_s8 + $0xb38] sm:$0xff] }
0x160b   :  { %5449 = vmatpush.msra.mxu2 %v4838_v0  ;;  %5478 = vmatpush.msrb.mxu3 %v4894_v1  ;;  %v4542_v34 = vld [vmem:[%s8674_s8 + $0x130] sm:$0xff]  ;;  %v4895_v61 = vld [vmem:[%s8674_s8 + $0xc38] sm:$0xff] }
0x160c   :  { %5406 = vmatpush.msrb.mxu0 %v4606_v28  ;;  %5430 = vmatpush.msra.mxu1 %v4702_v40  ;;  %v4638_v36 = vld [vmem:[%s8674_s8 + $0x430] sm:$0xff]  ;;  %v4535_v28 = vld [vmem:[%s8674_s8 + $0xf8] sm:$0xff] }
0x160d   :  { %5450 = vmatpush.msra.mxu2 %v4830_v14  ;;  %5483 = vmatpush.msra.mxu3 %v4631_v3  ;;  %v4766_v37 = vld [vmem:[%s8674_s8 + $0x830] sm:$0xff]  ;;  %v4855_v14 = vld [vmem:[%s8674_s8 + $0xaf8] sm:$0xff] }
0x160e   :  { %6557 = vmatmul.msk.f32.vlgmr.msrb.gmra.mxu3 %vm920_vm7, %v8797_v31  ;;  %5407 = vmatpush.msrb.mxu0 %v4598_v56  ;;  %v4940_v32 = vpop.f32.mrf.mxu2  ;;  %v4534_v45 = vld [vmem:[%s8674_s8 + $0xf0] sm:$0xff] }
0x160f   :  { %5431 = vmatpush.msra.mxu1 %v4694_v6  ;;  %5451 = vmatpush.msra.mxu2 %v4822_v47  ;;  %v4526_v10 = vld [vmem:[%s8674_s8 + $0xb0] sm:$0xff]  ;;  %v4759_v6 = vld [vmem:[%s8674_s8 + $0x7f8] sm:$0xff] }
0x1610   :  { %5484 = vmatpush.msra.mxu3 %v4623_v5  ;;  %5408 = vmatpush.msrb.mxu0 %v4590_v2  ;;  %v4980_v49 = vpop.f32.mrf.mxu0  ;;  %v4518_v53 = vld [vmem:[%s8674_s8 + $0x70] sm:$0xff]  ;;  %v6749_v47 = vld [vmem:[%s7082_s13 + $0x78] sm:$0xff] }
0x1611   :  { %5432 = vmatpush.msra.mxu1 %v4686_v38  ;;  %5452 = vmatpush.msra.mxu2 %v4814_v24  ;;  %v4510_v30 = vld [vmem:[%s8674_s8 + $0x30] sm:$0xff]  ;;  %v5020_v40 = vpop.f32.mrf.mxu1  ;;  %v4527_v5 = vld [vmem:[%s8674_s8 + $0xb8] sm:$0xff] }
0x1612   :  { %5485 = vmatpush.msra.mxu3 %v4615_v35  ;;  %5409 = vmatpush.msrb.mxu0 %v4582_v11  ;;  %v4751_v38 = vld [vmem:[%s8674_s8 + $0x7b8] sm:$0xff] }
0x1613   :  { %5433 = vmatpush.msra.mxu1 %v4678_v39  ;;  %5453 = vmatpush.msra.mxu2 %v4806_v46  ;;  %v4847_v24 = vld [vmem:[%s8674_s8 + $0xab8] sm:$0xff]  ;;  %v6750_v39 = vld [vmem:[%s7082_s13 + $0x70] sm:$0xff] }
0x1614   :  { %5486 = vmatpush.msra.mxu3 %v4607_v7  ;;  %5410 = vmatpush.msrb.mxu0 %v4574_v16  ;;  %v4960_v33 = vpop.f32.mrf.mxu3  ;;  %v4519_v11 = vld [vmem:[%s8674_s8 + $0x78] sm:$0xff] }
0x1615   :  { %5434 = vmatpush.msra.mxu1 %v4670_v12  ;;  %5454 = vmatpush.msra.mxu2 %v4798_v18  ;;  %v4961_v44 = vadd.f32 %v4960_v33, %v4940_v32  ;;  %v4743_v46 = vld [vmem:[%s8674_s8 + $0x778] sm:$0xff] }
0x1616   :  { %5487 = vmatpush.msra.mxu3 %v4599_v8  ;;  %5411 = vmatpush.msrb.mxu0 %v4566_v13  ;;  %v4839_v7 = vld [vmem:[%s8674_s8 + $0xa78] sm:$0xff]  ;;  %v6751_v8 = vld [vmem:[%s7082_s13 + $0x68] sm:$0xff] }
0x1617   :  { %5435 = vmatpush.msra.mxu1 %v4662_v60  ;;  %5455 = vmatpush.msra.mxu2 %v4790_v15  ;;  %v4981_v54 = vadd.f32 %v4980_v49, %v4961_v44  ;;  %v5040_v0 = vpop.f32.mrf.mxu2  ;;  %v4511_v12 = vld [vmem:[%s8674_s8 + $0x38] sm:$0xff] }
0x1618   :  { %5488 = vmatpush.msra.mxu3 %v4591_v19  ;;  %5412 = vmatpush.msrb.mxu0 %v4558_v20  ;;  %v5041_v56 = vadd.f32 %v5040_v0, %v5020_v40  ;;  %v4735_v13 = vld [vmem:[%s8674_s8 + $0x738] sm:$0xff]  ;;  %v6752_v19 = vld [vmem:[%s7082_s13 + $0x60] sm:$0xff] }
0x1619   :  { %5436 = vmatpush.msra.mxu1 %v4654_v21  ;;  %5456 = vmatpush.msra.mxu2 %v4782_v22  ;;  %v9118_v1 = vadd.f32 %v5000_v41, %v4981_v54  ;;  %v4831_v60 = vld [vmem:[%s8674_s8 + $0xa38] sm:$0xff] }
0x161a   :  { %5489 = vmatpush.msra.mxu3 %v4583_v23  ;;  %5413 = vmatpush.msrb.mxu0 %v4550_v26  ;;  %v5080_v16 = vpop.f32.mrf.mxu0  ;;  %v4727_v20 = vld [vmem:[%s8674_s8 + $0x6f8] sm:$0xff] }
0x161b   :  { %5437 = vmatpush.msra.mxu1 %v4646_v25  ;;  %5457 = vmatpush.msra.mxu2 %v4774_v27  ;;  %v5620_v2 = vmul.f32 %v9118_v1, %v9118_v1  ;;  %v5564_v15 = vsel %vm597_vm0, %v9118_v1, 0.0  ;;  %v4823_v22 = vld [vmem:[%s8674_s8 + $0x9f8] sm:$0xff] }
0x161c   :  { %5490 = vmatpush.msra.mxu3 %v4575_v58  ;;  %5414 = vmatpush.msrb.mxu0 %v4542_v34  ;;  %v6753_v26 = vld [vmem:[%s7082_s13 + $0xf8] sm:$0xff]  ;;  %v5565_v27 = vrot.slane %v5564_v15, 4 }
0x161d   :  { %5438 = vmatpush.msra.mxu1 %v4638_v36  ;;  %5458 = vmatpush.msra.mxu2 %v4766_v37  ;;  %v5628_v18 = vsel %vm597_vm0, %v5620_v2, 0.0  ;;  %v4719_v25 = vld [vmem:[%s8674_s8 + $0x6b8] sm:$0xff]  ;;  %v6756_v36 = vld [vmem:[%s7082_s13 + $0x50] sm:$0xff] }
0x161e   :  { %5491 = vmatpush.msra.mxu3 %v4567_v42  ;;  %5439 = vmatmul.f32.vlgmr.msra.gmra.mxu1 %v8809_v4  ;;  %v5060_v3 = vpop.f32.mrf.mxu3  ;;  %v5629_v21 = vrot.slane %v5628_v18, 4  ;;  %v6754_v58 = vld [vmem:[%s7082_s13 + $0x58] sm:$0xff]  ;;  %v6757_v42 = vld [vmem:[%s7082_s13 + $0xe8] sm:$0xff]  ;;  %v5566_v44 = vadd.f32 %v5565_v27, %v5564_v15 }
0x161f   :  { %5459 = vmatmul.f32.vlgmr.msra.gmra.mxu2 %v8814_v29  ;;  %5523 = vmatpush.msrb.mxu1 %v4887_v43  ;;  %v5061_v35 = vadd.f32 %v5060_v3, %v5041_v56  ;;  %v4815_v34 = vld [vmem:[%s8674_s8 + $0x9b8] sm:$0xff] }
0x1620   :  { %5555 = vmatpush.msrb.mxu2 %v4919_v9  ;;  %5415 = vmatpush.msrb.mxu0 %v4534_v45  ;;  %v4711_v32 = vld [vmem:[%s8674_s8 + $0x678] sm:$0xff]  ;;  %v5630_v33 = vadd.f32 %v5629_v21, %v5628_v18  ;;  %v6758_v9 = vld [vmem:[%s7082_s13 + $0x48] sm:$0xff]  ;;  %v6771_v21 = vld [vmem:[%s7082_s13 + $0xb0] sm:$0xff] }
0x1621   :  { %5492 = vmatpush.msra.mxu3 %v4559_v55  ;;  %5524 = vmatpush.msrb.mxu1 %v4879_v48  ;;  %v4807_v37 = vld [vmem:[%s8674_s8 + $0x978] sm:$0xff]  ;;  %v6759_v48 = vld [vmem:[%s7082_s13 + $0xe0] sm:$0xff] }
0x1622   :  { %5556 = vmatpush.msrb.mxu2 %v4911_v50  ;;  %5416 = vmatpush.msrb.mxu0 %v4526_v10  ;;  %v4703_v43 = vld [vmem:[%s8674_s8 + $0x638] sm:$0xff]  ;;  %v5631_v50 = vrot.slane %v5630_v33, 2 }
0x1623   :  { %5493 = vmatpush.msra.mxu3 %v4551_v51  ;;  %5525 = vmatpush.msrb.mxu1 %v4871_v52  ;;  %v4799_v45 = vld [vmem:[%s8674_s8 + $0x938] sm:$0xff]  ;;  %v6760_v51 = vld [vmem:[%s7082_s13 + $0x40] sm:$0xff] }
0x1624   :  { %5557 = vmatpush.msrb.mxu2 %v4903_v63  ;;  %5417 = vmatpush.msrb.mxu0 %v4518_v53  ;;  %v4695_v49 = vld [vmem:[%s8674_s8 + $0x5f8] sm:$0xff]  ;;  %v5567_v53 = vrot.slane %v5566_v44, 2  ;;  %v5632_v56 = vadd.f32 %v5631_v50, %v5630_v33  ;;  %v6782_v50 = vld [vmem:[%s7082_s13 + $0x1e0] sm:$0xff] }
0x1625   :  { %5494 = vmatpush.msra.mxu3 %v4543_v59  ;;  %5526 = vmatpush.msrb.mxu1 %v4863_v57  ;;  %v4791_v52 = vld [vmem:[%s8674_s8 + $0x8f8] sm:$0xff] }
0x1626   :  { %5558 = vmatpush.msrb.mxu2 %v4895_v61  ;;  %5418 = vmatpush.msrb.mxu0 %v4510_v30  ;;  %v6761_v54 = vld [vmem:[%s7082_s13 + $0xd8] sm:$0xff]  ;;  %v6763_v30 = vld [vmem:[%s7082_s13 + $0xd0] sm:$0xff]  ;;  %v5568_v2 = vadd.f32 %v5567_v53, %v5566_v44  ;;  %v6787_v53 = vld [vmem:[%s7082_s13 + $0x88] sm:$0xff] }
0x1627   :  { %5495 = vmatpush.msra.mxu3 %v4535_v28  ;;  %5419 = vmatmul.f32.vlgmr.msrb.gmra.mxu0 %v8794_v62  ;;  %v4687_v63 = vld [vmem:[%s8674_s8 + $0x5b8] sm:$0xff] }
0x1628   :  { %5695 = vmatpush.msra.mxu2 %v6749_v47  ;;  %5527 = vmatpush.msrb.mxu1 %v4855_v14  ;;  %v6762_v57 = vld [vmem:[%s7082_s13 + $0x38] sm:$0xff]  ;;  %v6764_v14 = vld [vmem:[%s7082_s13 + $0x30] sm:$0xff]  ;;  %v6765_v47 = vld [vmem:[%s7082_s13 + $0xc8] sm:$0xff] }
0x1629   :  { %5503 = vmatpush.msra.mxu0 %v4759_v6  ;;  %6558 = vmatmul.msk.f32.vlgmr.msrb.gmra.mxu2 %vm920_vm7, %v8797_v31  ;;  %v9139_v31 = vadd.f32 %v5080_v16, %v5061_v35  ;;  %v4783_v61 = vld [vmem:[%s8674_s8 + $0x8b8] sm:$0xff] }
0x162a   :  { %5496 = vmatpush.msra.mxu3 %v4527_v5  ;;  %5696 = vmatpush.msra.mxu2 %v6750_v39  ;;  %v4679_v0 = vld [vmem:[%s8674_s8 + $0x578] sm:$0xff]  ;;  %v6767_v39 = vld [vmem:[%s7082_s13 + $0xc0] sm:$0xff] }
0x162b   :  { %5504 = vmatpush.msra.mxu0 %v4751_v38  ;;  %5528 = vmatpush.msrb.mxu1 %v4847_v24  ;;  %v5621_v23 = vmul.f32 %v9139_v31, %v9139_v31  ;;  %v5571_v55 = vsel %vm597_vm0, %v9139_v31, 0.0  ;;  %v4775_v3 = vld [vmem:[%s8674_s8 + $0x878] sm:$0xff]  ;;  %v5120_v6 = vpop.f32.mrf.mxu1  ;;  %v6766_v24 = vld [vmem:[%s7082_s13 + $0x28] sm:$0xff] }
0x162c   :  { %5497 = vmatpush.msra.mxu3 %v4519_v11  ;;  %5697 = vmatpush.msra.mxu2 %v6751_v8  ;;  %v5572_v59 = vrot.slane %v5571_v55, 4  ;;  %v4671_v5 = vld [vmem:[%s8674_s8 + $0x538] sm:$0xff] }
0x162d   :  { %5505 = vmatpush.msra.mxu0 %v4743_v46  ;;  %5529 = vmatpush.msrb.mxu1 %v4839_v7  ;;  %v5635_v41 = vsel %vm597_vm0, %v5621_v23, 0.0  ;;  %v4767_v35 = vld [vmem:[%s8674_s8 + $0x838] sm:$0xff]  ;;  %v6768_v7 = vld [vmem:[%s7082_s13 + $0x20] sm:$0xff]  ;;  %v6772_v23 = vld [vmem:[%s7082_s13 + $0x10] sm:$0xff] }
0x162e   :  { %5498 = vmatpush.msra.mxu3 %v4511_v12  ;;  %5698 = vmatpush.msra.mxu2 %v6752_v19  ;;  %v5636_v10 = vrot.slane %v5635_v41, 4  ;;  %v5573_v38 = vadd.f32 %v5572_v59, %v5571_v55  ;;  %v4663_v16 = vld [vmem:[%s8674_s8 + $0x4f8] sm:$0xff]  ;;  %v5633_v12 = vrot.slane %v5632_v56, 1 }
0x162f   :  { %5499 = vmatmul.f32.vlgmr.msra.gmra.mxu3 %v8794_v62  ;;  %5506 = vmatpush.msra.mxu0 %v4735_v13  ;;  %v6755_v62 = vld [vmem:[%s7082_s13 + $0xf0] sm:$0xff]  ;;  %v6769_v18 = vld [vmem:[%s7082_s13 + $0xb8] sm:$0xff] }
0x1630   :  { %5530 = vmatpush.msrb.mxu1 %v4831_v60  ;;  %5715 = vmatpush.msrb.mxu3 %v6753_v26  ;;  %v5637_v40 = vadd.f32 %v5636_v10, %v5635_v41  ;;  %v5574_v13 = vrot.slane %v5573_v38, 2  ;;  %v6770_v60 = vld [vmem:[%s7082_s13 + $0x18] sm:$0xff]  ;;  %v6777_v41 = vld [vmem:[%s7082_s13 + $0xa0] sm:$0xff]  ;;  %v6783_v10 = vld [vmem:[%s7082_s13 + $0x90] sm:$0xff] }
0x1631   :  { %5699 = vmatpush.msra.mxu2 %v6754_v58  ;;  %5507 = vmatpush.msra.mxu0 %v4727_v20  ;;  %v4655_v19 = vld [vmem:[%s8674_s8 + $0x4b8] sm:$0xff]  ;;  %v5569_v20 = vrot.slane %v5568_v2, 1  ;;  %v6774_v58 = vld [vmem:[%s7082_s13 + $0xa8] sm:$0xff] }
0x1632   :  { %5531 = vmatpush.msrb.mxu1 %v4823_v22  ;;  %5716 = vmatpush.msrb.mxu3 %v6755_v62  ;;  %v5638_v46 = vrot.slane %v5637_v40, 2  ;;  %v5140_v8 = vpop.f32.mrf.mxu2  ;;  %v4647_v26 = vld [vmem:[%s8674_s8 + $0x478] sm:$0xff] }
0x1633   :  { %5700 = vmatpush.msra.mxu2 %v6756_v36  ;;  %5508 = vmatpush.msra.mxu0 %v4719_v25  ;;  %v5634_v25 = vadd.f32 %v5633_v12, %v5632_v56  ;;  %v6773_v27 = vld [vmem:[%s7082_s13 + $0x1f8] sm:$0xff]  ;;  %v5570_v36 = vadd.f32 %v5569_v20, %v5568_v2  ;;  %v6793_v56 = vld [vmem:[%s7082_s13 + $0x160] sm:$0xff] }
0x1634   :  { %5532 = vmatpush.msrb.mxu1 %v4815_v34  ;;  %5717 = vmatpush.msrb.mxu3 %v6757_v42  ;;  %v5100_v28 = vpop.f32.mrf.mxu0  ;;  %v5639_v22 = vadd.f32 %v5638_v46, %v5637_v40  ;;  %v5575_v34 = vadd.f32 %v5574_v13, %v5573_v38  ;;  %v4639_v33 = vld [vmem:[%s8674_s8 + $0x438] sm:$0xff]  ;;  %v6778_v42 = vld [vmem:[%s7082_s13] sm:$0xff]  ;;  %v6801_v46 = vld [vmem:[%s7082_s13 + $0x2f0] sm:$0xff] }
0x1635   :  { %5701 = vmatpush.msra.mxu2 %v6758_v9  ;;  %5509 = vmatpush.msra.mxu0 %v4711_v32  ;;  %v5121_v11 = vadd.f32 %v5120_v6, %v5100_v28  ;;  %v6775_v32 = vld [vmem:[%s7082_s13 + $0x8] sm:$0xff]  ;;  %v6791_v28 = vld [vmem:[%s7082_s13 + $0x80] sm:$0xff]  ;;  %v6796_v2 = vld [vmem:[%s7082_s13 + $0x158] sm:$0xff] }
0x1636   :  { %5533 = vmatpush.msrb.mxu1 %v4807_v37  ;;  %5718 = vmatpush.msrb.mxu3 %v6759_v48  ;;  %v6776_v37 = vld [vmem:[%s7082_s13 + $0x1f0] sm:$0xff]  ;;  %v5640_v44 = vrot.slane %v5639_v22, 1  ;;  %v6779_v9 = vld [vmem:[%s7082_s13 + $0x1e8] sm:$0xff]  ;;  %v6780_v48 = vld [vmem:[%s7082_s13 + $0x98] sm:$0xff] }
0x1637   :  { %5702 = vmatpush.msra.mxu2 %v6760_v51  ;;  %5510 = vmatpush.msra.mxu0 %v4703_v43  ;;  %v5141_v15 = vadd.f32 %v5140_v8, %v5121_v11  ;;  %v5684_v43 = vsel %vm719_vm1, %v5570_v36, %v5634_v25  ;;  %v6794_v6 = vld [vmem:[%s7082_s13 + $0x1c8] sm:$0xff]  ;;  %v6797_v38 = vld [vmem:[%s7082_s13 + $0x2f8] sm:$0xff]  ;;  %v6806_v13 = vld [vmem:[%s7082_s13 + $0x1b0] sm:$0xff] }
0x1638   :  { %5534 = vmatpush.msrb.mxu1 %v4799_v45  ;;  %5719 = vmatpush.msrb.mxu3 %v6761_v54  ;;  %v5576_v45 = vrot.slane %v5575_v34, 1  ;;  %v5641_v51 = vadd.f32 %v5640_v44, %v5639_v22  ;;  %v6785_v54 = vld [vmem:[%s7082_s13 + $0x170] sm:$0xff]  ;;  %v6805_v8 = vld [vmem:[%s7082_s13 + $0x2e8] sm:$0xff]  ;;  %v6808_v20 = vld [vmem:[%s7082_s13 + $0x140] sm:$0xff] }
0x1639   :  { %5703 = vmatpush.msra.mxu2 %v6762_v57  ;;  %5511 = vmatpush.msra.mxu0 %v4695_v49  ;;  %v6781_v49 = vld [vmem:[%s7082_s13 + $0x178] sm:$0xff]  ;;  %v6788_v57 = vld [vmem:[%s7082_s13 + $0x270] sm:$0xff]  ;;  %v6809_v22 = vld [vmem:[%s7082_s13 + $0x2e0] sm:$0xff] }
0x163a   :  { %5535 = vmatpush.msrb.mxu1 %v4791_v52  ;;  %5720 = vmatpush.msrb.mxu3 %v6763_v30  ;;  %v6784_v52 = vld [vmem:[%s7082_s13 + $0x278] sm:$0xff]  ;;  %v5577_v59 = vadd.f32 %v5576_v45, %v5575_v34  ;;  %v6790_v30 = vld [vmem:[%s7082_s13 + $0x1d0] sm:$0xff]  ;;  %v6811_v25 = vld [vmem:[%s7082_s13 + $0x240] sm:$0xff] }
0x163b   :  { %5704 = vmatpush.msra.mxu2 %v6764_v14  ;;  %5512 = vmatpush.msra.mxu0 %v4687_v63  ;;  %v6786_v63 = vld [vmem:[%s7082_s13 + $0x1d8] sm:$0xff]  ;;  %v6792_v14 = vld [vmem:[%s7082_s13 + $0x268] sm:$0xff]  ;;  %v6819_v45 = vld [vmem:[%s7082_s13 + $0x230] sm:$0xff] }
0x163c   :  { %5536 = vmatpush.msrb.mxu1 %v4783_v61  ;;  %5721 = vmatpush.msrb.mxu3 %v6765_v47  ;;  %v6789_v61 = vld [vmem:[%s7082_s13 + $0x168] sm:$0xff]  ;;  %v5685_v40 = vsel %vm719_vm1, %v5577_v59, %v5641_v51  ;;  %v6795_v47 = vld [vmem:[%s7082_s13 + $0x260] sm:$0xff]  ;;  %v6813_v34 = vld [vmem:[%s7082_s13 + $0x2d8] sm:$0xff] }
0x163d   :  { %5705 = vmatpush.msra.mxu2 %v6766_v24  ;;  %5513 = vmatpush.msra.mxu0 %v4679_v0  ;;  %v6798_v24 = vld [vmem:[%s7082_s13 + $0x1c0] sm:$0xff]  ;;  %v6815_v36 = vld [vmem:[%s7082_s13 + $0x238] sm:$0xff]  ;;  %v6822_v51 = vld [vmem:[%s7082_s13 + $0x190] sm:$0xff] }
0x163e   :  { %5537 = vmatpush.msrb.mxu1 %v4775_v3  ;;  %5722 = vmatpush.msrb.mxu3 %v6767_v39  ;;  %v6800_v39 = vld [vmem:[%s7082_s13 + $0x150] sm:$0xff] }
0x163f   :  { %5706 = vmatpush.msra.mxu2 %v6768_v7  ;;  %5514 = vmatpush.msra.mxu0 %v4671_v5  ;;  %v6802_v7 = vld [vmem:[%s7082_s13 + $0x1b8] sm:$0xff] }
0x1640   :  { %5538 = vmatpush.msrb.mxu1 %v4767_v35  ;;  %5723 = vmatpush.msrb.mxu3 %v6769_v18  ;;  %v6799_v35 = vld [vmem:[%s7082_s13 + $0x258] sm:$0xff]  ;;  %v6804_v18 = vld [vmem:[%s7082_s13 + $0x148] sm:$0xff] }
0x1641   :  { %5539 = vmatmul.f32.vlgmr.msrb.gmra.mxu1 %v8814_v29  ;;  %5707 = vmatpush.msra.mxu2 %v6770_v60  ;;  %v5160_v29 = vpop.f32.mrf.mxu3  ;;  %v6807_v60 = vld [vmem:[%s7082_s13 + $0x248] sm:$0xff] }
0x1642   :  { %5515 = vmatpush.msra.mxu0 %v4663_v16  ;;  %5724 = vmatpush.msrb.mxu3 %v6771_v21  ;;  %v9194_v62 = vadd.f32 %v5160_v29, %v5141_v15  ;;  %v6803_v16 = vld [vmem:[%s7082_s13 + $0x250] sm:$0xff]  ;;  %v6812_v29 = vld [vmem:[%s7082_s13 + $0x138] sm:$0xff] }
0x1643   :  { %5708 = vmatpush.msra.mxu2 %v6772_v23  ;;  %5755 = vmatpush.msra.mxu1 %v6773_v27 }
0x1644   :  { %5516 = vmatpush.msra.mxu0 %v4655_v19  ;;  %5725 = vmatpush.msrb.mxu3 %v6774_v58  ;;  %v5622_v55 = vmul.f32 %v9194_v62, %v9194_v62  ;;  %v5578_v0 = vsel %vm597_vm0, %v9194_v62, 0.0 }
0x1645   :  { %5709 = vmatpush.msra.mxu2 %v6775_v32  ;;  %5756 = vmatpush.msra.mxu1 %v6776_v37  ;;  %v5579_v5 = vrot.slane %v5578_v0, 4  ;;  %v5240_v37 = vpop.f32.mrf.mxu2 }
0x1646   :  { %5517 = vmatpush.msra.mxu0 %v4647_v26  ;;  %5726 = vmatpush.msrb.mxu3 %v6777_v41  ;;  %v6810_v26 = vld [vmem:[%s7082_s13 + $0x1a8] sm:$0xff]  ;;  %v6816_v41 = vld [vmem:[%s7082_s13 + $0x130] sm:$0xff] }
0x1647   :  { %5710 = vmatpush.msra.mxu2 %v6778_v42  ;;  %5757 = vmatpush.msra.mxu1 %v6779_v9  ;;  %v5580_v12 = vadd.f32 %v5579_v5, %v5578_v0  ;;  %v6818_v9 = vld [vmem:[%s7082_s13 + $0x198] sm:$0xff]  ;;  %v6832_v5 = vld [vmem:[%s7082_s13 + $0x110] sm:$0xff] }
0x1648   :  { %5518 = vmatpush.msra.mxu0 %v4639_v33  ;;  %5711 = vmatmul.f32.vlgmr.msra.gmra.mxu2 %v5684_v43  ;;  %v6814_v33 = vld [vmem:[%s7082_s13 + $0x1a0] sm:$0xff]  ;;  %v6817_v43 = vld [vmem:[%s7082_s13 + $0x2d0] sm:$0xff] }
0x1649   :  { %5727 = vmatpush.msrb.mxu3 %v6780_v48  ;;  %5519 = vmatmul.f32.vlgmr.msra.gmra.mxu0 %v8809_v4  ;;  %v5642_v4 = vsel %vm597_vm0, %v5622_v55, 0.0  ;;  %v5180_v19 = vpop.f32.mrf.mxu3  ;;  %v5581_v27 = vrot.slane %v5580_v12, 2  ;;  %v6820_v48 = vld [vmem:[%s7082_s13 + $0x128] sm:$0xff] }
0x164a   :  { %5735 = vmatpush.msrb.mxu0 %v6781_v49  ;;  %5758 = vmatpush.msra.mxu1 %v6782_v50  ;;  %v5643_v3 = vrot.slane %v5642_v4, 4  ;;  %v6821_v49 = vld [vmem:[%s7082_s13 + $0x2c8] sm:$0xff] }
0x164b   :  { %5728 = vmatpush.msrb.mxu3 %v6783_v10  ;;  %5775 = vmatpush.msrb.mxu2 %v6784_v52  ;;  %v5582_v55 = vadd.f32 %v5581_v27, %v5580_v12  ;;  %v6823_v52 = vld [vmem:[%s7082_s13 + $0x228] sm:$0xff] }
0x164c   :  { %5736 = vmatpush.msrb.mxu0 %v6785_v54  ;;  %5759 = vmatpush.msra.mxu1 %v6786_v63  ;;  %v5644_v11 = vadd.f32 %v5643_v3, %v5642_v4  ;;  %v6824_v54 = vld [vmem:[%s7082_s13 + $0x120] sm:$0xff]  ;;  %v6838_v12 = vld [vmem:[%s7082_s13 + $0x208] sm:$0xff] }
0x164d   :  { %5729 = vmatpush.msrb.mxu3 %v6787_v53  ;;  %5776 = vmatpush.msrb.mxu2 %v6788_v57  ;;  %v6825_v53 = vld [vmem:[%s7082_s13 + $0x2c0] sm:$0xff]  ;;  %v6826_v57 = vld [vmem:[%s7082_s13 + $0x188] sm:$0xff] }
0x164e   :  { %5737 = vmatpush.msrb.mxu0 %v6789_v61  ;;  %5760 = vmatpush.msra.mxu1 %v6790_v30  ;;  %v5645_v15 = vrot.slane %v5644_v11, 2  ;;  %v5220_v58 = vpop.f32.mrf.mxu1  ;;  %v6827_v61 = vld [vmem:[%s7082_s13 + $0x220] sm:$0xff]  ;;  %v6828_v30 = vld [vmem:[%s7082_s13 + $0x118] sm:$0xff] }
0x164f   :  { %5730 = vmatpush.msrb.mxu3 %v6791_v28  ;;  %5777 = vmatpush.msrb.mxu2 %v6792_v14  ;;  %v6829_v14 = vld [vmem:[%s7082_s13 + $0x2b8] sm:$0xff]  ;;  %v6830_v3 = vld [vmem:[%s7082_s13 + $0x180] sm:$0xff] }
0x1650   :  { %5731 = vmatmul.f32.vlgmr.msrb.gmra.mxu3 %v5685_v40  ;;  %5738 = vmatpush.msrb.mxu0 %v6793_v56  ;;  %v5646_v42 = vadd.f32 %v5645_v15, %v5644_v11  ;;  %v5583_v40 = vrot.slane %v5582_v55, 1  ;;  %v6831_v56 = vld [vmem:[%s7082_s13 + $0x218] sm:$0xff] }
0x1651   :  { %5761 = vmatpush.msra.mxu1 %v6794_v6  ;;  %5778 = vmatpush.msrb.mxu2 %v6795_v47 }
0x1652   :  { %5739 = vmatpush.msrb.mxu0 %v6796_v2  ;;  %5795 = vmatpush.msra.mxu3 %v6797_v38  ;;  %v5647_v4 = vrot.slane %v5646_v42, 1  ;;  %v6833_v38 = vld [vmem:[%s7082_s13 + $0x2b0] sm:$0xff] }
0x1653   :  { %5762 = vmatpush.msra.mxu1 %v6798_v24  ;;  %5779 = vmatpush.msrb.mxu2 %v6799_v35  ;;  %v6834_v24 = vld [vmem:[%s7082_s13 + $0x210] sm:$0xff]  ;;  %v6835_v35 = vld [vmem:[%s7082_s13 + $0x3b8] sm:$0xff] }
0x1654   :  { %5740 = vmatpush.msrb.mxu0 %v6800_v39  ;;  %5796 = vmatpush.msra.mxu3 %v6801_v46  ;;  %v5648_v2 = vadd.f32 %v5647_v4, %v5646_v42  ;;  %v6836_v46 = vld [vmem:[%s7082_s13 + $0x108] sm:$0xff]  ;;  %v6853_v42 = vld [vmem:[%s7291_s17 + $0x50] sm:$0xff] }
0x1655   :  { %5763 = vmatpush.msra.mxu1 %v6802_v7  ;;  %5780 = vmatpush.msrb.mxu2 %v6803_v16  ;;  %v5584_v7 = vadd.f32 %v5583_v40, %v5582_v55  ;;  %v6837_v16 = vld [vmem:[%s7082_s13 + $0x2a8] sm:$0xff]  ;;  %v6857_v55 = vld [vmem:[%s7291_s17 + $0xd8] sm:$0xff] }
0x1656   :  { %5741 = vmatpush.msrb.mxu0 %v6804_v18  ;;  %5797 = vmatpush.msra.mxu3 %v6805_v8  ;;  %v6839_v18 = vld [vmem:[%s7082_s13 + $0x3b0] sm:$0xff]  ;;  %v6840_v8 = vld [vmem:[%s7082_s13 + $0x100] sm:$0xff]  ;;  %v6865_v4 = vld [vmem:[%s7082_s13 + $0x348] sm:$0xff] }
0x1657   :  { %5764 = vmatpush.msra.mxu1 %v6806_v13  ;;  %5781 = vmatpush.msrb.mxu2 %v6807_v60  ;;  %v5686_v13 = vsel %vm719_vm1, %v5584_v7, %v5648_v2  ;;  %v6870_v40 = vld [vmem:[%s7082_s13 + $0x338] sm:$0xff]  ;;  %v6874_v2 = vld [vmem:[%s7082_s13 + $0x328] sm:$0xff] }
0x1658   :  { %5742 = vmatpush.msrb.mxu0 %v6808_v20  ;;  %v5200_v21 = vpop.f32.mrf.mxu0  ;;  %5798 = vmatpush.msra.mxu3 %v6809_v22  ;;  %v6842_v20 = vld [vmem:[%s7082_s13 + $0x200] sm:$0xff]  ;;  %v6843_v22 = vld [vmem:[%s7082_s13 + $0x298] sm:$0xff] }
0x1659   :  { %v5201_v23 = vadd.f32 %v5200_v21, %v5180_v19  ;;  %5765 = vmatpush.msra.mxu1 %v6810_v26  ;;  %5782 = vmatpush.msrb.mxu2 %v6811_v25  ;;  %v6841_v19 = vld [vmem:[%s7082_s13 + $0x2a0] sm:$0xff]  ;;  %v6845_v26 = vld [vmem:[%s7082_s13 + $0x3a8] sm:$0xff]  ;;  %v6846_v25 = vld [vmem:[%s7291_s17 + $0xd0] sm:$0xff] }
0x165a   :  { %5743 = vmatpush.msrb.mxu0 %v6812_v29  ;;  %5799 = vmatpush.msra.mxu3 %v6813_v34  ;;  %v6848_v34 = vld [vmem:[%s7082_s13 + $0x370] sm:$0xff] }
0x165b   :  { %v5221_v32 = vadd.f32 %v5220_v58, %v5201_v23  ;;  %5766 = vmatpush.msra.mxu1 %v6814_v33  ;;  %5783 = vmatpush.msrb.mxu2 %v6815_v36  ;;  %v6844_v23 = vld [vmem:[%s7082_s13 + $0x378] sm:$0xff]  ;;  %v6847_v58 = vld [vmem:[%s7082_s13 + $0x290] sm:$0xff] }
0x165c   :  { %5744 = vmatpush.msrb.mxu0 %v6816_v41  ;;  %5800 = vmatpush.msra.mxu3 %v6817_v43  ;;  %v6850_v33 = vld [vmem:[%s7291_s17 + $0x90] sm:$0xff]  ;;  %v6852_v41 = vld [vmem:[%s7082_s13 + $0x368] sm:$0xff]  ;;  %v6854_v43 = vld [vmem:[%s7082_s13 + $0x280] sm:$0xff] }
0x165d   :  { %v9248_v44 = vadd.f32 %v5240_v37, %v5221_v32  ;;  %5767 = vmatpush.msra.mxu1 %v6818_v9  ;;  %5784 = vmatpush.msrb.mxu2 %v6819_v45  ;;  %v6849_v32 = vld [vmem:[%s7082_s13 + $0x3a0] sm:$0xff]  ;;  %v6851_v37 = vld [vmem:[%s7082_s13 + $0x288] sm:$0xff]  ;;  %v6856_v45 = vld [vmem:[%s7082_s13 + $0x398] sm:$0xff] }
0x165e   :  { %5745 = vmatpush.msrb.mxu0 %v6820_v48  ;;  %5801 = vmatpush.msra.mxu3 %v6821_v49  ;;  %v6855_v9 = vld [vmem:[%s7082_s13 + $0x360] sm:$0xff]  ;;  %v6858_v48 = vld [vmem:[%s7082_s13 + $0x358] sm:$0xff]  ;;  %v6859_v49 = vld [vmem:[%s7291_s17 + $0x10] sm:$0xff] }
0x165f   :  { %v5585_v50 = vsel %vm597_vm0, %v9248_v44, 0.0  ;;  %v5623_v10 = vmul.f32 %v9248_v44, %v9248_v44  ;;  %5768 = vmatpush.msra.mxu1 %v6822_v51  ;;  %5785 = vmatpush.msrb.mxu2 %v6823_v52  ;;  %v6862_v51 = vld [vmem:[%s7082_s13 + $0x350] sm:$0xff]  ;;  %v6863_v52 = vld [vmem:[%s7082_s13 + $0x388] sm:$0xff] }
0x1660   :  { %5746 = vmatpush.msrb.mxu0 %v6824_v54  ;;  %v5586_v63 = vrot.slane %v5585_v50, 4  ;;  %5802 = vmatpush.msra.mxu3 %v6825_v53  ;;  %v6864_v54 = vld [vmem:[%s7291_s17 + $0x58] sm:$0xff]  ;;  %v6866_v53 = vld [vmem:[%s7082_s13 + $0x380] sm:$0xff] }
0x1661   :  { %v5649_v59 = vsel %vm597_vm0, %v5623_v10, 0.0  ;;  %5769 = vmatpush.msra.mxu1 %v6826_v57  ;;  %5786 = vmatpush.msrb.mxu2 %v6827_v61  ;;  %v6861_v10 = vld [vmem:[%s7291_s17 + $0x98] sm:$0xff]  ;;  %v5260_v57 = vpop.f32.mrf.mxu2  ;;  %v6868_v61 = vld [vmem:[%s7082_s13 + $0x340] sm:$0xff] }
0x1662   :  { %5747 = vmatpush.msrb.mxu0 %v6828_v30  ;;  %v5587_v0 = vadd.f32 %v5586_v63, %v5585_v50  ;;  %v5650_v28 = vrot.slane %v5649_v59, 4  ;;  %5803 = vmatpush.msra.mxu3 %v6829_v14  ;;  %v6860_v50 = vld [vmem:[%s7082_s13 + $0x390] sm:$0xff]  ;;  %v6869_v30 = vld [vmem:[%s7291_s17 + $0xc0] sm:$0xff] }
0x1663   :  { %5770 = vmatpush.msra.mxu1 %v6830_v3  ;;  %5787 = vmatpush.msrb.mxu2 %v6831_v56  ;;  %v6871_v14 = vld [vmem:[%s7291_s17 + $0x80] sm:$0xff]  ;;  %v5320_v56 = vpop.f32.mrf.mxu1 }
0x1664   :  { %v5588_v6 = vrot.slane %v5587_v0, 2  ;;  %v5651_v47 = vadd.f32 %v5650_v28, %v5649_v59  ;;  %5748 = vmatpush.msrb.mxu0 %v6832_v5  ;;  %5804 = vmatpush.msra.mxu3 %v6833_v38  ;;  %v6867_v59 = vld [vmem:[%s7291_s17 + $0x18] sm:$0xff]  ;;  %v6875_v38 = vld [vmem:[%s7291_s17] sm:$0xff] }
0x1665   :  { %5788 = vmatpush.msrb.mxu2 %v6834_v24  ;;  %5843 = vmatpush.msrb.mxu1 %v6835_v35  ;;  %v5280_v63 = vpop.f32.mrf.mxu3 }
0x1666   :  { %v5589_v11 = vadd.f32 %v5588_v6, %v5587_v0  ;;  %v5652_v39 = vrot.slane %v5651_v47, 2  ;;  %5749 = vmatpush.msrb.mxu0 %v6836_v46  ;;  %5805 = vmatpush.msra.mxu3 %v6837_v16  ;;  %v5281_v0 = vadd.f32 %v5280_v63, %v5260_v57  ;;  %v6872_v6 = vld [vmem:[%s7082_s13 + $0x330] sm:$0xff] }
0x1667   :  { %5789 = vmatpush.msrb.mxu2 %v6838_v12  ;;  %5844 = vmatpush.msrb.mxu1 %v6839_v18  ;;  %v6877_v12 = vld [vmem:[%s7082_s13 + $0x318] sm:$0xff]  ;;  %v6886_v63 = vld [vmem:[%s7291_s17 + $0xb0] sm:$0xff] }
0x1668   :  { %5750 = vmatpush.msrb.mxu0 %v6840_v8  ;;  %v5590_v60 = vrot.slane %v5589_v11, 1  ;;  %v5653_v15 = vadd.f32 %v5652_v39, %v5651_v47  ;;  %5806 = vmatpush.msra.mxu3 %v6841_v19  ;;  %v6873_v47 = vld [vmem:[%s7291_s17 + $0x40] sm:$0xff] }
0x1669   :  { %5751 = vmatmul.f32.vlgmr.msrb.gmra.mxu0 %v5686_v13  ;;  %5790 = vmatpush.msrb.mxu2 %v6842_v20  ;;  %v6876_v39 = vld [vmem:[%s7082_s13 + $0x320] sm:$0xff] }
0x166a   :  { %v5654_v21 = vrot.slane %v5653_v15, 1  ;;  %5807 = vmatpush.msra.mxu3 %v6843_v22  ;;  %5815 = vmatpush.msra.mxu0 %v6844_v23  ;;  %v5591_v27 = vadd.f32 %v5590_v60, %v5589_v11  ;;  %v6878_v60 = vld [vmem:[%s7082_s13 + $0x310] sm:$0xff]  ;;  %v6879_v22 = vld [vmem:[%s7082_s13 + $0x308] sm:$0xff] }
0x166b   :  { %5845 = vmatpush.msrb.mxu1 %v6845_v26  ;;  %5938 = vmatpush.msra.mxu2 %v6846_v25 }
0x166c   :  { %v5655_v29 = vadd.f32 %v5654_v21, %v5653_v15  ;;  %5808 = vmatpush.msra.mxu3 %v6847_v58  ;;  %5816 = vmatpush.msra.mxu0 %v6848_v34  ;;  %v6881_v34 = vld [vmem:[%s7291_s17 + $0xe0] sm:$0xff] }
0x166d   :  { %5846 = vmatpush.msrb.mxu1 %v6849_v32  ;;  %5939 = vmatpush.msra.mxu2 %v6850_v33 }
0x166e   :  { %v5687_v36 = vsel %vm719_vm1, %v5591_v27, %v5655_v29  ;;  %5809 = vmatpush.msra.mxu3 %v6851_v37  ;;  %5817 = vmatpush.msra.mxu0 %v6852_v41  ;;  %v6880_v29 = vld [vmem:[%s7082_s13 + $0x300] sm:$0xff]  ;;  %s6939_s13 = smov 34  }
0x166f   :  { %5771 = vmatmul.f32.vlgmr.msra.gmra.mxu1 %v5687_v36  ;;  %5940 = vmatpush.msra.mxu2 %v6853_v42  ;;  %v6882_v36 = vld [vmem:[%s7291_s17 + $0xa0] sm:$0xff]  ;;  %s9372_s14 = sld [smem:[%s9533_s0 + %s6939_s13]]  }
0x1670   :  { %5810 = vmatpush.msra.mxu3 %v6854_v43  ;;  %5818 = vmatpush.msra.mxu0 %v6855_v9 }
0x1671   :  { %5847 = vmatpush.msrb.mxu1 %v6856_v45  ;;  %5941 = vmatpush.msra.mxu2 %v6859_v49  ;;  %v6883_v45 = vld [vmem:[%s7291_s17 + $0x60] sm:$0xff] }
0x1672   :  { %5958 = vmatpush.msrb.mxu3 %v6857_v55  ;;  %5819 = vmatpush.msra.mxu0 %v6858_v48 }
0x1673   :  { %5848 = vmatpush.msrb.mxu1 %v6860_v50 }
0x1674   :  { %5959 = vmatpush.msrb.mxu3 %v6861_v10  ;;  %5820 = vmatpush.msra.mxu0 %v6862_v51  ;;  %v6884_v10 = vld [vmem:[%s7291_s17 + $0x20] sm:$0xff]  ;;  %v6885_v51 = vld [vmem:[%s7291_s17 + $0xf0] sm:$0xff] }
0x1675   :  { %5849 = vmatpush.msrb.mxu1 %v6863_v52 }
0x1676   :  { %5960 = vmatpush.msrb.mxu3 %v6864_v54  ;;  %5821 = vmatpush.msra.mxu0 %v6865_v4 }
0x1677   :  { %5850 = vmatpush.msrb.mxu1 %v6866_v53 }
0x1678   :  { %5961 = vmatpush.msrb.mxu3 %v6867_v59  ;;  %5822 = vmatpush.msra.mxu0 %v6868_v61  ;;  %v5340_v15 = vpop.f32.mrf.mxu1  ;;  %v6887_v59 = vld [vmem:[%s7291_s17 + $0x70] sm:$0xff] }
0x1679   :  { %5898 = vmatpush.msra.mxu1 %v6869_v30  ;;  %v6888_v30 = vld [vmem:[%s7291_s17 + $0x30] sm:$0xff] }
0x167a   :  { %v5300_v28 = vpop.f32.mrf.mxu0  ;;  %5823 = vmatpush.msra.mxu0 %v6870_v40 }
0x167b   :  { %5899 = vmatpush.msra.mxu1 %v6871_v14  ;;  %v5301_v3 = vadd.f32 %v5300_v28, %v5281_v0 }
0x167c   :  { %5824 = vmatpush.msra.mxu0 %v6872_v6  ;;  %v6891_v6 = vld [vmem:[%s7291_s17 + $0x78] sm:$0xff] }
0x167d   :  { %5900 = vmatpush.msra.mxu1 %v6873_v47  ;;  %v9313_v5 = vadd.f32 %v5320_v56, %v5301_v3  ;;  %v6889_v3 = vld [vmem:[%s7291_s17 + $0xf8] sm:$0xff] }
0x167e   :  { %5825 = vmatpush.msra.mxu0 %v6874_v2  ;;  %v5360_v18 = vpop.f32.mrf.mxu2  ;;  %v6890_v56 = vld [vmem:[%s7291_s17 + $0xb8] sm:$0xff] }
0x167f   :  { %5901 = vmatpush.msra.mxu1 %v6875_v38  ;;  %v5592_v24 = vsel %vm597_vm0, %v9313_v5, 0.0  ;;  %v5624_v35 = vmul.f32 %v9313_v5, %v9313_v5  ;;  %v5361_v21 = vadd.f32 %v5360_v18, %v5340_v15  ;;  %v6892_v47 = vld [vmem:[%s7291_s17 + $0x38] sm:$0xff] }
0x1680   :  { %v5593_v11 = vrot.slane %v5592_v24, 4  ;;  %5826 = vmatpush.msra.mxu0 %v6876_v39 }
0x1681   :  { %v5656_v46 = vsel %vm597_vm0, %v5624_v35, 0.0 }
0x1682   :  { %v5594_v7 = vadd.f32 %v5593_v11, %v5592_v24  ;;  %v5657_v16 = vrot.slane %v5656_v46, 4  ;;  %5827 = vmatpush.msra.mxu0 %v6877_v12 }
0x1684   :  { %v5595_v8 = vrot.slane %v5594_v7, 2  ;;  %v5658_v13 = vadd.f32 %v5657_v16, %v5656_v46  ;;  %5828 = vmatpush.msra.mxu0 %v6878_v60  ;;  %v5400_v58 = vpop.f32.mrf.mxu0 }
0x1686   :  { %v5596_v19 = vadd.f32 %v5595_v8, %v5594_v7  ;;  %v5659_v20 = vrot.slane %v5658_v13, 2  ;;  %5829 = vmatpush.msra.mxu0 %v6879_v22 }
0x1687   :  { %v5380_v23 = vpop.f32.mrf.mxu3 }
0x1688   :  { %v5597_v26 = vrot.slane %v5596_v19, 1  ;;  %v5660_v25 = vadd.f32 %v5659_v20, %v5658_v13  ;;  %v5381_v27 = vadd.f32 %v5380_v23, %v5361_v21  ;;  %5830 = vmatpush.msra.mxu0 %v6880_v29 }
0x168a   :  { %5978 = vmatpush.msrb.mxu0 %v6881_v34  ;;  %v9328_v32 = vadd.f32 %v5400_v58, %v5381_v27  ;;  %v5661_v33 = vrot.slane %v5660_v25, 1  ;;  %v5598_v42 = vadd.f32 %v5597_v26, %v5596_v19 }
0x168c   :  { %5979 = vmatpush.msrb.mxu0 %v6882_v36  ;;  %v5599_v37 = vsel %vm597_vm0, %v9328_v32, 0.0  ;;  %v5625_v41 = vmul.f32 %v9328_v32, %v9328_v32  ;;  %v5662_v43 = vadd.f32 %v5661_v33, %v5660_v25 }
0x168d   :  { %v5600_v9 = vrot.slane %v5599_v37, 4 }
0x168e   :  { %5980 = vmatpush.msrb.mxu0 %v6883_v45  ;;  %v5663_v55 = vsel %vm597_vm0, %v5625_v41, 0.0  ;;  %v5688_v48 = vsel %vm719_vm1, %v5598_v42, %v5662_v43 }
0x168f   :  { %v5601_v49 = vadd.f32 %v5600_v9, %v5599_v37  ;;  %v5664_v50 = vrot.slane %v5663_v55, 4  ;;  %5791 = vmatmul.f32.vlgmr.msrb.gmra.mxu2 %v5688_v48 }
0x1690   :  { %5981 = vmatpush.msrb.mxu0 %v6884_v10  ;;  %6018 = vmatpush.msrb.mxu2 %v6885_v51 }
0x1691   :  { %v5602_v52 = vrot.slane %v5601_v49, 2  ;;  %v5665_v54 = vadd.f32 %v5664_v50, %v5663_v55  ;;  %v5480_v39 = vpop.f32.mrf.mxu3 }
0x1692   :  { %6019 = vmatpush.msrb.mxu2 %v6886_v63 }
0x1693   :  { %v5603_v4 = vadd.f32 %v5602_v52, %v5601_v49  ;;  %v5666_v53 = vrot.slane %v5665_v54, 2 }
0x1694   :  { %6020 = vmatpush.msrb.mxu2 %v6887_v59 }
0x1695   :  { %v5604_v57 = vrot.slane %v5603_v4, 1  ;;  %v5667_v61 = vadd.f32 %v5666_v53, %v5665_v54 }
0x1696   :  { %6021 = vmatpush.msrb.mxu2 %v6888_v30  ;;  %v6895_v30 = vld [vmem:[%s7291_s17 + $0x48] sm:$0xff] }
0x1697   :  { %v5668_v0 = vrot.slane %v5667_v61, 1  ;;  %v5605_v28 = vadd.f32 %v5604_v57, %v5603_v4  ;;  %v6893_v57 = vld [vmem:[%s7291_s17 + $0xc8] sm:$0xff] }
0x1699   :  { %v5669_v40 = vadd.f32 %v5668_v0, %v5667_v61  ;;  %v6894_v61 = vld [vmem:[%s7291_s17 + $0x88] sm:$0xff] }
0x169a   :  { %v6896_v0 = vld [vmem:[%s7291_s17 + $0x8] sm:$0xff] }
0x169b   :  { %v5689_v14 = vsel %vm719_vm1, %v5605_v28, %v5669_v40  ;;  %v5440_v2 = vpop.f32.mrf.mxu1 }
0x169c   :  { %5811 = vmatmul.f32.vlgmr.msra.gmra.mxu3 %v5689_v14 }
0x169d   :  { %6038 = vmatpush.msra.mxu3 %v6889_v3 }
0x169f   :  { %6039 = vmatpush.msra.mxu3 %v6890_v56 }
0x16a1   :  { %6040 = vmatpush.msra.mxu3 %v6891_v6 }
0x16a2   :  { %v5460_v35 = vpop.f32.mrf.mxu2 }
0x16a3   :  { %6041 = vmatpush.msra.mxu3 %v6892_v47 }
0x16a4   :  { %v5420_v38 = vpop.f32.mrf.mxu0 }
0x16a5   :  { %v5441_v24 = vadd.f32 %v5440_v2, %v5420_v38 }
0x16a7   :  { %v5461_v11 = vadd.f32 %v5460_v35, %v5441_v24 }
0x16a9   :  { %v9348_v46 = vadd.f32 %v5480_v39, %v5461_v11 }
0x16ab   :  { %v5606_v7 = vsel %vm597_vm0, %v9348_v46, 0.0  ;;  %v5626_v16 = vmul.f32 %v9348_v46, %v9348_v46 }
0x16ac   :  { %v5607_v12 = vrot.slane %v5606_v7, 4  ;;  %v5560_v37 = vpop.f32.mrf.mxu2 }
0x16ad   :  { %v5670_v18 = vsel %vm597_vm0, %v5626_v16, 0.0 }
0x16ae   :  { %v5608_v8 = vadd.f32 %v5607_v12, %v5606_v7  ;;  %v5671_v13 = vrot.slane %v5670_v18, 4 }
0x16b0   :  { %v5609_v60 = vrot.slane %v5608_v8, 2  ;;  %v5672_v15 = vadd.f32 %v5671_v13, %v5670_v18 }
0x16b2   :  { %v5610_v19 = vadd.f32 %v5609_v60, %v5608_v8  ;;  %v5673_v20 = vrot.slane %v5672_v15, 2  ;;  %v5500_v29 = vpop.f32.mrf.mxu3 }
0x16b4   :  { %v5611_v21 = vrot.slane %v5610_v19, 1  ;;  %v5674_v22 = vadd.f32 %v5673_v20, %v5672_v15 }
0x16b6   :  { %v5675_v23 = vrot.slane %v5674_v22, 1  ;;  %v5612_v26 = vadd.f32 %v5611_v21, %v5610_v19 }
0x16b8   :  { %v5676_v25 = vadd.f32 %v5675_v23, %v5674_v22 }
0x16ba   :  { %v5690_v27 = vsel %vm719_vm1, %v5612_v26, %v5676_v25  ;;  %v6101_v26 = vld [vmem:[%s9372_s14 + $0x78] sm:$0xff]  ;;  %v6100_v25 = vld [vmem:[%s9372_s14 + $0x70] sm:$0xff] }
0x16bb   :  { %5831 = vmatmul.f32.vlgmr.msra.gmra.mxu0 %v5690_v27 }
0x16bc   :  { %6216 = vmatpush.msra.mxu0 %v6101_v26  ;;  %v6111_v26 = vld [vmem:[%s9372_s14 + $0xc8] sm:$0xff] }
0x16be   :  { %v5540_v33 = vpop.f32.mrf.mxu1  ;;  %6217 = vmatpush.msra.mxu0 %v6100_v25  ;;  %v6141_v25 = vld [vmem:[%s9372_s14 + $0x1b8] sm:$0xff] }
0x16c6   :  { %v5520_v58 = vpop.f32.mrf.mxu0 }
0x16c7   :  { %v5521_v34 = vadd.f32 %v5520_v58, %v5500_v29  ;;  %v6099_v29 = vld [vmem:[%s9372_s14 + $0x68] sm:$0xff]  ;;  %v5563_v58 = vld [vmem:[%s6429_s18] sm:$0x3] }
0x16c8   :  { %6218 = vmatpush.msra.mxu0 %v6099_v29  ;;  %v6163_v29 = vld [vmem:[%s9372_s14 + $0x268] sm:$0xff] }
0x16c9   :  { %v5541_v36 = vadd.f32 %v5540_v33, %v5521_v34  ;;  %v6098_v33 = vld [vmem:[%s9372_s14 + $0x60] sm:$0xff] }
0x16ca   :  { %6219 = vmatpush.msra.mxu0 %v6098_v33  ;;  %v6122_v33 = vld [vmem:[%s9372_s14 + $0x120] sm:$0xff] }
0x16cb   :  { %v9356_v41 = vadd.f32 %v5560_v37, %v5541_v36  ;;  %v5712_v28 = vpop.f32.mrf.mxu2  ;;  %v6097_v37 = vld [vmem:[%s9372_s14 + $0x58] sm:$0xff] }
0x16cc   :  { %6220 = vmatpush.msra.mxu0 %v6097_v37  ;;  %v6109_v37 = vld [vmem:[%s9372_s14 + $0xb8] sm:$0xff] }
0x16cd   :  { %v5613_v42 = vsel %vm647_vm2, %v9356_v41, 0.0  ;;  %v5627_v43 = vmul.f32 %v9356_v41, %v9356_v41 }
0x16ce   :  { %v5614_v9 = vrot.slane %v5613_v42, 4 }
0x16cf   :  { %v5677_v45 = vsel %vm647_vm2, %v5627_v43, 0.0  ;;  %v6096_v43 = vld [vmem:[%s9372_s14 + $0x50] sm:$0xff] }
0x16d0   :  { %v5615_v55 = vadd.f32 %v5614_v9, %v5613_v42  ;;  %v5678_v48 = vrot.slane %v5677_v45, 4  ;;  %6221 = vmatpush.msra.mxu0 %v6096_v43  ;;  %v6121_v43 = vld [vmem:[%s9372_s14 + $0x118] sm:$0xff] }
0x16d2   :  { %v5616_v49 = vrot.slane %v5615_v55, 2  ;;  %v5679_v50 = vadd.f32 %v5678_v48, %v5677_v45  ;;  %v6095_v45 = vld [vmem:[%s9372_s14 + $0x48] sm:$0xff]  ;;  %v6094_v48 = vld [vmem:[%s9372_s14 + $0x40] sm:$0xff] }
0x16d3   :  { %v5732_v40 = vpop.f32.mrf.mxu3  ;;  %6222 = vmatpush.msra.mxu0 %v6095_v45  ;;  %v6108_v45 = vld [vmem:[%s9372_s14 + $0xb0] sm:$0xff] }
0x16d4   :  { %v5617_v10 = vadd.f32 %v5616_v49, %v5615_v55  ;;  %v5680_v51 = vrot.slane %v5679_v50, 2  ;;  %v5733_v3 = vadd.f32 %v5732_v40, %v5712_v28  ;;  %v6117_v28 = vld [vmem:[%s9372_s14 + $0xf8] sm:$0xff]  ;;  %v6130_v40 = vld [vmem:[%s9372_s14 + $0x160] sm:$0xff] }
0x16d5   :  { %6223 = vmatpush.msra.mxu0 %v6094_v48  ;;  %v6120_v48 = vld [vmem:[%s9372_s14 + $0x110] sm:$0xff] }
0x16d6   :  { %v5618_v52 = vrot.slane %v5617_v10, 1  ;;  %v5681_v54 = vadd.f32 %v5680_v51, %v5679_v50  ;;  %v6093_v51 = vld [vmem:[%s9372_s14 + $0x38] sm:$0xff] }
0x16d7   :  { %6224 = vmatpush.msra.mxu0 %v6093_v51  ;;  %v6159_v51 = vld [vmem:[%s9372_s14 + $0x248] sm:$0xff] }
0x16d8   :  { %v5682_v63 = vrot.slane %v5681_v54, 1  ;;  %v5619_v4 = vadd.f32 %v5618_v52, %v5617_v10  ;;  %v6133_v10 = vld [vmem:[%s9372_s14 + $0x178] sm:$0xff] }
0x16d9   :  { %v6149_v52 = vld [vmem:[%s9372_s14 + $0x1f8] sm:$0xff] }
0x16da   :  { %v5683_v53 = vadd.f32 %v5682_v63, %v5681_v54  ;;  %v6132_v54 = vld [vmem:[%s9372_s14 + $0x170] sm:$0xff]  ;;  %v6897_v63 = vld [vmem:[%s7291_s17 + $0xe8] sm:$0xff] }
0x16dc   :  { %v5691_v59 = vsel %vm719_vm1, %v5619_v4, %v5683_v53  ;;  %v6092_v4 = vld [vmem:[%s9372_s14 + $0x30] sm:$0xff] }
0x16dd   :  { %6559 = vmatmul.msk.f32.vlgmr.msrb.gmra.mxu1 %vm728_vm3, %v5691_v59  ;;  %v6148_v53 = vld [vmem:[%s9372_s14 + $0x1f0] sm:$0xff]  ;;  %v6131_v59 = vld [vmem:[%s9372_s14 + $0x168] sm:$0xff]  ;;  %6225 = vmatpush.msra.mxu0 %v6092_v4  ;;  %v6197_v4 = vld [vmem:[%s9372_s14 + $0x378] sm:$0xff] }
0x16de   :  { %5918 = vmatpush.msrb.mxu1 %v6893_v57  ;;  %v6898_v57 = vld [vmem:[%s7291_s17 + $0xa8] sm:$0xff] }
0x16e0   :  { %5919 = vmatpush.msrb.mxu1 %v6894_v61  ;;  %v6091_v61 = vld [vmem:[%s9372_s14 + $0x28] sm:$0xff] }
0x16e1   :  { %6226 = vmatpush.msra.mxu0 %v6091_v61  ;;  %v6195_v61 = vld [vmem:[%s9372_s14 + $0x368] sm:$0xff] }
0x16e2   :  { %5920 = vmatpush.msrb.mxu1 %v6895_v30  ;;  %v6147_v30 = vld [vmem:[%s9372_s14 + $0x1e8] sm:$0xff] }
0x16e4   :  { %5921 = vmatpush.msrb.mxu1 %v6896_v0  ;;  %v6899_v0 = vld [vmem:[%s7291_s17 + $0x68] sm:$0xff] }
0x16e6   :  { %v5752_v14 = vpop.f32.mrf.mxu0 }
0x16e7   :  { %v5753_v6 = vadd.f32 %v5752_v14, %v5733_v3  ;;  %v6090_v14 = vld [vmem:[%s9372_s14 + $0x20] sm:$0xff] }
0x16e8   :  { %v6146_v3 = vld [vmem:[%s9372_s14 + $0x1e0] sm:$0xff]  ;;  %6227 = vmatpush.msra.mxu0 %v6090_v14  ;;  %v6179_v14 = vld [vmem:[%s9372_s14 + $0x2e8] sm:$0xff] }
0x16ec   :  { %v5772_v56 = vpop.f32.mrf.mxu1 }
0x16ed   :  { %v5773_v2 = vadd.f32 %v5772_v56, %v5753_v6  ;;  %v6900_v56 = vld [vmem:[%s7291_s17 + $0x28] sm:$0xff]  ;;  %v6116_v6 = vld [vmem:[%s9372_s14 + $0xf0] sm:$0xff]  ;;  %s6941_s17 = smov 36  }
0x16ee   :  { %s6432_s21 = sld [smem:[%s9533_s0 + %s6941_s17]]  }
0x1712   :  { %v5792_v47 = vpop.f32.mrf.mxu2 }
0x1713   :  { %v5793_v24 = vadd.f32 %v5792_v47, %v5773_v2  ;;  %v6129_v47 = vld [vmem:[%s9372_s14 + $0x158] sm:$0xff] }
0x1714   :  { %v6089_v2 = vld [vmem:[%s9372_s14 + $0x18] sm:$0xff] }
0x1715   :  { %6228 = vmatpush.msra.mxu0 %v6089_v2  ;;  %v6157_v2 = vld [vmem:[%s9372_s14 + $0x238] sm:$0xff] }
0x171f   :  { %v5812_v38 = vpop.f32.mrf.mxu3 }
0x1720   :  { %v5813_v11 = vadd.f32 %v5812_v38, %v5793_v24  ;;  %v6145_v38 = vld [vmem:[%s9372_s14 + $0x1d8] sm:$0xff]  ;;  %v6115_v24 = vld [vmem:[%s9372_s14 + $0xe8] sm:$0xff] }
0x1738   :  { %v5832_v35 = vpop.f32.mrf.mxu0 }
0x1739   :  { %v5833_v39 = vadd.f32 %v5832_v35, %v5813_v11  ;;  %v6128_v35 = vld [vmem:[%s9372_s14 + $0x150] sm:$0xff] }
0x173a   :  { %v6088_v11 = vld [vmem:[%s9372_s14 + $0x10] sm:$0xff] }
0x173b   :  { %6229 = vmatpush.msra.mxu0 %v6088_v11  ;;  %v6156_v11 = vld [vmem:[%s9372_s14 + $0x230] sm:$0xff] }
0x175a   :  { %v5852_v7 = vpop.f32.mrf.mxu1 }
0x175b   :  { %v5853_v16 = vadd.f32 %v5852_v7, %v5833_v39  ;;  %v6144_v39 = vld [vmem:[%s9372_s14 + $0x1d0] sm:$0xff]  ;;  %v6127_v7 = vld [vmem:[%s9372_s14 + $0x148] sm:$0xff] }
0x175d   :  { %v5855_v12 = vmul.f32 0.016666668, %v5853_v16  ;;  %v6114_v16 = vld [vmem:[%s9372_s14 + $0xe0] sm:$0xff] }
0x175f   :  { %v5856_v18 = vmul.f32 %v5855_v12, %v5855_v12 }
0x1761   :  { %v5858_v8 = vrot.slane %v5856_v18, 7  ;;  %v6126_v18 = vld [vmem:[%s9372_s14 + $0x140] sm:$0xff] }
0x1763   :  { %v5860_v13 = vsub.f32 %v5855_v12, %v5858_v8  ;;  %v6143_v8 = vld [vmem:[%s9372_s14 + $0x1c8] sm:$0xff] }
0x1765   :  { %v5861_v60 = vmax.f32 %v5860_v13, 0.0  ;;  %v6113_v13 = vld [vmem:[%s9372_s14 + $0xd8] sm:$0xff] }
0x1767   :  { %v5862_v15 = vadd.f32 1e-05, %v5861_v60  ;;  %v6086_v60 = vld [vmem:[%s9372_s14] sm:$0xff] }
0x1769   :  { %6687 = vrsqrt.f32 %v5862_v15  ;;  %vm5869_vm2 = vweird.f32 %v5862_v15 }
0x176f   :  { %v6688_v19 = vpop.eup %6687 }
0x1770   :  { %v5864_v20 = vmul.f32 %v6688_v19, %v5862_v15  ;;  %vm5870_vm0 = vweird.f32 %v6688_v19  ;;  %v6125_v15 = vld [vmem:[%s9372_s14 + $0x138] sm:$0xff] }
0x1771   :  { %vm5871_vm12 = vmor %vm5869_vm2, %vm5870_vm0 }
0x1772   :  { %v5865_v21 = vmul.f32 %v6688_v19, %v5864_v20  ;;  %v6112_v20 = vld [vmem:[%s9372_s14 + $0xd0] sm:$0xff] }
0x1774   :  { %v5866_v22 = vmul.f32 0.5, %v5865_v21  ;;  %v6142_v21 = vld [vmem:[%s9372_s14 + $0x1c0] sm:$0xff] }
0x1776   :  { %v5867_v23 = vsub.f32 1.5, %v5866_v22  ;;  %v6124_v22 = vld [vmem:[%s9372_s14 + $0x130] sm:$0xff] }
0x1778   :  { %v5868_v27 = vmul.f32 %v6688_v19, %v5867_v23  ;;  %v6164_v23 = vld [vmem:[%s9372_s14 + $0x270] sm:$0xff] }
0x177a   :  { %v5872_v34 = vsel %vm5871_vm12, %v6688_v19, %v5868_v27  ;;  %v6165_v19 = vld [vmem:[%s9372_s14 + $0x278] sm:$0xff]  ;;  %v6123_v27 = vld [vmem:[%s9372_s14 + $0x128] sm:$0xff] }
0x177b   :  { %v5874_v36 = vrot.slane %v5872_v34, 1  ;;  %v6140_v34 = vld [vmem:[%s9372_s14 + $0x1b0] sm:$0xff] }
0x177d   :  { %v5876_v42 = vmul.f32 %v5874_v36, %v5563_v58  ;;  %v6162_v36 = vld [vmem:[%s9372_s14 + $0x260] sm:$0xff] }
0x177f   :  { %v5877_v9 = vmul.f32 %v5876_v42, %v5855_v12  ;;  %v6087_v12 = vld [vmem:[%s9372_s14 + $0x8] sm:$0xff] }
0x1780   :  { %6230 = vmatpush.msra.mxu0 %v6087_v12  ;;  %v6155_v12 = vld [vmem:[%s9372_s14 + $0x228] sm:$0xff] }
0x1781   :  { %v5879_v55 = vrot.slane %v5877_v9, 7  ;;  %v6161_v9 = vld [vmem:[%s9372_s14 + $0x258] sm:$0xff] }
0x1782   :  { %6231 = vmatpush.msra.mxu0 %v6086_v60  ;;  %v6154_v60 = vld [vmem:[%s9372_s14 + $0x220] sm:$0xff] }
0x1783   :  { %v5881_v49 = vsub.f32 %v5563_v58, %v5879_v55  ;;  %v6110_v58 = vld [vmem:[%s9372_s14 + $0xc0] sm:$0xff] }
0x1784   :  { %v6138_v55 = vld [vmem:[%s9372_s14 + $0x1a0] sm:$0xff] }
0x1785   :  { %v9386_v50 = vsel %vm719_vm1, %v5876_v42, %v5881_v49  ;;  %v6139_v42 = vld [vmem:[%s9372_s14 + $0x1a8] sm:$0xff]  ;;  %v6160_v49 = vld [vmem:[%s9372_s14 + $0x250] sm:$0xff] }
0x1786   :  { %6560 = vmatmul.msk.f32.vlgmr.msra.gmra.mxu1 %vm920_vm7, %v9386_v50  ;;  %6562 = vmatmul.msk.f32.vlgmr.msra.gmra.mxu2 %vm920_vm7, %v9386_v50 }
0x1787   :  { %6563 = vmatmul.msk.f32.vlgmr.msrb.gmra.mxu3 %vm920_vm7, %v9386_v50  ;;  %6564 = vmatmul.msk.f32.vlgmr.msrb.gmra.mxu0 %vm920_vm7, %v9386_v50 }
0x1788   :  { %5998 = vmatpush.msra.mxu1 %v6897_v63  ;;  %6256 = vmatpush.msra.mxu2 %v6133_v10  ;;  %v6119_v10 = vld [vmem:[%s9372_s14 + $0x108] sm:$0xff]  ;;  %v6105_v63 = vld [vmem:[%s9372_s14 + $0x98] sm:$0xff] }
0x1789   :  { %6276 = vmatpush.msrb.mxu3 %v6149_v52  ;;  %6296 = vmatpush.msrb.mxu0 %v6165_v19  ;;  %v6106_v52 = vld [vmem:[%s9372_s14 + $0xa0] sm:$0xff]  ;;  %v6189_v19 = vld [vmem:[%s9372_s14 + $0x338] sm:$0xff] }
0x178a   :  { %5999 = vmatpush.msra.mxu1 %v6898_v57  ;;  %6257 = vmatpush.msra.mxu2 %v6132_v54  ;;  %v6118_v54 = vld [vmem:[%s9372_s14 + $0x100] sm:$0xff]  ;;  %v6103_v57 = vld [vmem:[%s9372_s14 + $0x88] sm:$0xff] }
0x178b   :  { %6277 = vmatpush.msrb.mxu3 %v6148_v53  ;;  %6297 = vmatpush.msrb.mxu0 %v6164_v23  ;;  %v6104_v53 = vld [vmem:[%s9372_s14 + $0x90] sm:$0xff] }
0x178c   :  { %6000 = vmatpush.msra.mxu1 %v6899_v0  ;;  %6258 = vmatpush.msra.mxu2 %v6131_v59  ;;  %v6196_v59 = vld [vmem:[%s9372_s14 + $0x370] sm:$0xff]  ;;  %v6194_v0 = vld [vmem:[%s9372_s14 + $0x360] sm:$0xff] }
0x178d   :  { %6278 = vmatpush.msrb.mxu3 %v6147_v30  ;;  %6298 = vmatpush.msrb.mxu0 %v6163_v29  ;;  %v6102_v30 = vld [vmem:[%s9372_s14 + $0x80] sm:$0xff]  ;;  %v6188_v23 = vld [vmem:[%s9372_s14 + $0x330] sm:$0xff]  ;;  %v6187_v29 = vld [vmem:[%s9372_s14 + $0x328] sm:$0xff] }
0x178e   :  { %6561 = vmatmul.msk.f32.vlgmr.msrb.gmra.mxu1 %vm920_vm7, %v9386_v50  ;;  %6566 = vmatmul.msk.f32.vlgmr.msrb.gmra.mxu2 %vm920_vm7, %v9386_v50 }
0x178f   :  { %6567 = vmatmul.msk.f32.vlgmr.msra.gmra.mxu3 %vm920_vm7, %v9386_v50  ;;  %6001 = vmatpush.msra.mxu1 %v6900_v56  ;;  %v6178_v56 = vld [vmem:[%s9372_s14 + $0x2e0] sm:$0xff] }
0x1790   :  { %6259 = vmatpush.msra.mxu2 %v6130_v40  ;;  %6279 = vmatpush.msrb.mxu3 %v6146_v3  ;;  %v6180_v40 = vld [vmem:[%s9372_s14 + $0x2f0] sm:$0xff]  ;;  %v6158_v3 = vld [vmem:[%s9372_s14 + $0x240] sm:$0xff] }
0x1791   :  { %6236 = vmatpush.msrb.mxu1 %v6117_v28  ;;  %6299 = vmatpush.msrb.mxu0 %v6162_v36  ;;  %v6181_v28 = vld [vmem:[%s9372_s14 + $0x2f8] sm:$0xff]  ;;  %v6186_v36 = vld [vmem:[%s9372_s14 + $0x320] sm:$0xff] }
0x1792   :  { %6260 = vmatpush.msra.mxu2 %v6129_v47  ;;  %6280 = vmatpush.msrb.mxu3 %v6145_v38  ;;  %v6137_v47 = vld [vmem:[%s9372_s14 + $0x198] sm:$0xff] }
0x1793   :  { %6237 = vmatpush.msrb.mxu1 %v6116_v6  ;;  %6300 = vmatpush.msrb.mxu0 %v6161_v9  ;;  %v6193_v6 = vld [vmem:[%s9372_s14 + $0x358] sm:$0xff] }
0x1794   :  { %6261 = vmatpush.msra.mxu2 %v6128_v35  ;;  %6281 = vmatpush.msrb.mxu3 %v6144_v39  ;;  %v6177_v38 = vld [vmem:[%s9372_s14 + $0x2d8] sm:$0xff]  ;;  %v6136_v35 = vld [vmem:[%s9372_s14 + $0x190] sm:$0xff] }
0x1795   :  { %6238 = vmatpush.msrb.mxu1 %v6115_v24  ;;  %6301 = vmatpush.msrb.mxu0 %v6160_v49  ;;  %v6192_v24 = vld [vmem:[%s9372_s14 + $0x350] sm:$0xff]  ;;  %v6185_v9 = vld [vmem:[%s9372_s14 + $0x318] sm:$0xff] }
0x1796   :  { %6565 = vmatmul.msk.f32.vlgmr.msra.gmra.mxu1 %vm920_vm7, %v9386_v50  ;;  %6262 = vmatpush.msra.mxu2 %v6127_v7  ;;  %v6107_v50 = vld [vmem:[%s9372_s14 + $0xa8] sm:$0xff]  ;;  %v6176_v39 = vld [vmem:[%s9372_s14 + $0x2d0] sm:$0xff] }
0x1797   :  { %6239 = vmatpush.msrb.mxu1 %v6114_v16  ;;  %6282 = vmatpush.msrb.mxu3 %v6143_v8  ;;  %v6191_v7 = vld [vmem:[%s9372_s14 + $0x348] sm:$0xff]  ;;  %v6190_v8 = vld [vmem:[%s9372_s14 + $0x340] sm:$0xff]  ;;  %v6200_v49 = vld [vmem:[%s9372_s14 + $0x390] sm:$0xff] }
0x1798   :  { %6263 = vmatpush.msra.mxu2 %v6126_v18  ;;  %6302 = vmatpush.msrb.mxu0 %v6159_v51  ;;  %v6135_v16 = vld [vmem:[%s9372_s14 + $0x188] sm:$0xff] }
0x1799   :  { %6240 = vmatpush.msrb.mxu1 %v6113_v13  ;;  %6283 = vmatpush.msrb.mxu3 %v6142_v21  ;;  %v6175_v18 = vld [vmem:[%s9372_s14 + $0x2c8] sm:$0xff]  ;;  %v6134_v13 = vld [vmem:[%s9372_s14 + $0x180] sm:$0xff]  ;;  %v6153_v21 = vld [vmem:[%s9372_s14 + $0x218] sm:$0xff] }
0x179a   :  { %6264 = vmatpush.msra.mxu2 %v6125_v15  ;;  %6303 = vmatpush.msrb.mxu0 %v6158_v3  ;;  %v6174_v15 = vld [vmem:[%s9372_s14 + $0x2c0] sm:$0xff]  ;;  %v6199_v51 = vld [vmem:[%s9372_s14 + $0x388] sm:$0xff] }
0x179b   :  { %6241 = vmatpush.msrb.mxu1 %v6112_v20  ;;  %6284 = vmatpush.msrb.mxu3 %v6141_v25  ;;  %v6205_v20 = vld [vmem:[%s9372_s14 + $0x3b8] sm:$0xff]  ;;  %v6152_v25 = vld [vmem:[%s9372_s14 + $0x210] sm:$0xff] }
0x179c   :  { %6265 = vmatpush.msra.mxu2 %v6124_v22  ;;  %6304 = vmatpush.msrb.mxu0 %v6157_v2  ;;  %v6173_v22 = vld [vmem:[%s9372_s14 + $0x2b8] sm:$0xff] }
0x179d   :  { %6242 = vmatpush.msrb.mxu1 %v6111_v26  ;;  %6285 = vmatpush.msrb.mxu3 %v6140_v34  ;;  %v6204_v26 = vld [vmem:[%s9372_s14 + $0x3b0] sm:$0xff]  ;;  %v6151_v34 = vld [vmem:[%s9372_s14 + $0x208] sm:$0xff] }
0x179e   :  { %6266 = vmatpush.msra.mxu2 %v6123_v27  ;;  %6305 = vmatpush.msrb.mxu0 %v6156_v11  ;;  %v6172_v27 = vld [vmem:[%s9372_s14 + $0x2b0] sm:$0xff] }
0x179f   :  { %6243 = vmatpush.msrb.mxu1 %v6110_v58  ;;  %6286 = vmatpush.msrb.mxu3 %v6139_v42  ;;  %v6203_v58 = vld [vmem:[%s9372_s14 + $0x3a8] sm:$0xff]  ;;  %v6150_v42 = vld [vmem:[%s9372_s14 + $0x200] sm:$0xff] }
0x17a0   :  { %6267 = vmatpush.msra.mxu2 %v6122_v33  ;;  %6306 = vmatpush.msrb.mxu0 %v6155_v12  ;;  %v6171_v33 = vld [vmem:[%s9372_s14 + $0x2a8] sm:$0xff] }
0x17a1   :  { %6244 = vmatpush.msrb.mxu1 %v6109_v37  ;;  %6287 = vmatpush.msrb.mxu3 %v6138_v55  ;;  %v6202_v37 = vld [vmem:[%s9372_s14 + $0x3a0] sm:$0xff]  ;;  %v6169_v55 = vld [vmem:[%s9372_s14 + $0x298] sm:$0xff] }
0x17a2   :  { %6268 = vmatpush.msra.mxu2 %v6121_v43  ;;  %6307 = vmatpush.msrb.mxu0 %v6154_v60  ;;  %v6170_v43 = vld [vmem:[%s9372_s14 + $0x2a0] sm:$0xff] }
0x17a3   :  { %6245 = vmatpush.msrb.mxu1 %v6108_v45  ;;  %6288 = vmatpush.msrb.mxu3 %v6137_v47  ;;  %v6201_v45 = vld [vmem:[%s9372_s14 + $0x398] sm:$0xff] }
0x17a4   :  { %6269 = vmatpush.msra.mxu2 %v6120_v48  ;;  %6308 = vmatpush.msrb.mxu0 %v6153_v21  ;;  %v6184_v48 = vld [vmem:[%s9372_s14 + $0x310] sm:$0xff] }
0x17a5   :  { %6246 = vmatpush.msrb.mxu1 %v6107_v50  ;;  %6289 = vmatpush.msrb.mxu3 %v6136_v35  ;;  %v6168_v50 = vld [vmem:[%s9372_s14 + $0x290] sm:$0xff] }
0x17a6   :  { %6270 = vmatpush.msra.mxu2 %v6119_v10  ;;  %6309 = vmatpush.msrb.mxu0 %v6152_v25  ;;  %v6183_v10 = vld [vmem:[%s9372_s14 + $0x308] sm:$0xff] }
0x17a7   :  { %6247 = vmatpush.msrb.mxu1 %v6106_v52  ;;  %6290 = vmatpush.msrb.mxu3 %v6135_v16  ;;  %v6167_v52 = vld [vmem:[%s9372_s14 + $0x288] sm:$0xff] }
0x17a8   :  { %6271 = vmatpush.msra.mxu2 %v6118_v54  ;;  %6310 = vmatpush.msrb.mxu0 %v6151_v34  ;;  %v6182_v54 = vld [vmem:[%s9372_s14 + $0x300] sm:$0xff] }
0x17a9   :  { %6248 = vmatpush.msrb.mxu1 %v6105_v63  ;;  %6291 = vmatpush.msrb.mxu3 %v6134_v13  ;;  %v6198_v63 = vld [vmem:[%s9372_s14 + $0x380] sm:$0xff] }
0x17aa   :  { %6336 = vmatpush.msrb.mxu2 %v6197_v4  ;;  %6311 = vmatpush.msrb.mxu0 %v6150_v42  ;;  %v6166_v4 = vld [vmem:[%s9372_s14 + $0x280] sm:$0xff] }
0x17ab   :  { %6249 = vmatpush.msrb.mxu1 %v6104_v53  ;;  %6364 = vmatpush.msra.mxu3 %v6205_v20 }
0x17ac   :  { %6337 = vmatpush.msrb.mxu2 %v6196_v59 }
0x17ad   :  { %6250 = vmatpush.msrb.mxu1 %v6103_v57  ;;  %6365 = vmatpush.msra.mxu3 %v6204_v26 }
0x17ae   :  { %6338 = vmatpush.msrb.mxu2 %v6195_v61 }
0x17af   :  { %6251 = vmatpush.msrb.mxu1 %v6102_v30  ;;  %6366 = vmatpush.msra.mxu3 %v6203_v58 }
0x17b0   :  { %6339 = vmatpush.msrb.mxu2 %v6194_v0 }
0x17b1   :  { %6316 = vmatpush.msra.mxu1 %v6181_v28  ;;  %6367 = vmatpush.msra.mxu3 %v6202_v37 }
0x17b2   :  { %6340 = vmatpush.msrb.mxu2 %v6193_v6 }
0x17b3   :  { %6317 = vmatpush.msra.mxu1 %v6180_v40  ;;  %6368 = vmatpush.msra.mxu3 %v6201_v45 }
0x17b4   :  { %6341 = vmatpush.msrb.mxu2 %v6192_v24 }
0x17b5   :  { %6318 = vmatpush.msra.mxu1 %v6179_v14  ;;  %6369 = vmatpush.msra.mxu3 %v6200_v49 }
0x17b6   :  { %6342 = vmatpush.msrb.mxu2 %v6191_v7 }
0x17b7   :  { %6319 = vmatpush.msra.mxu1 %v6178_v56  ;;  %6370 = vmatpush.msra.mxu3 %v6199_v51 }
0x17b8   :  { %6343 = vmatpush.msrb.mxu2 %v6190_v8 }
0x17b9   :  { %6320 = vmatpush.msra.mxu1 %v6177_v38  ;;  %6371 = vmatpush.msra.mxu3 %v6198_v63 }
0x17ba   :  { %6344 = vmatpush.msrb.mxu2 %v6189_v19 }
0x17bb   :  { %6321 = vmatpush.msra.mxu1 %v6176_v39 }
0x17bc   :  { %6345 = vmatpush.msrb.mxu2 %v6188_v23 }
0x17bd   :  { %6322 = vmatpush.msra.mxu1 %v6175_v18 }
0x17be   :  { %6346 = vmatpush.msrb.mxu2 %v6187_v29 }
0x17bf   :  { %6323 = vmatpush.msra.mxu1 %v6174_v15 }
0x17c0   :  { %6347 = vmatpush.msrb.mxu2 %v6186_v36 }
0x17c1   :  { %6324 = vmatpush.msra.mxu1 %v6173_v22 }
0x17c2   :  { %6348 = vmatpush.msrb.mxu2 %v6185_v9 }
0x17c3   :  { %6325 = vmatpush.msra.mxu1 %v6172_v27 }
0x17c4   :  { %6349 = vmatpush.msrb.mxu2 %v6184_v48 }
0x17c5   :  { %6326 = vmatpush.msra.mxu1 %v6171_v33 }
0x17c6   :  { %6350 = vmatpush.msrb.mxu2 %v6183_v10 }
0x17c7   :  { %6327 = vmatpush.msra.mxu1 %v6170_v43 }
0x17c8   :  { %6351 = vmatpush.msrb.mxu2 %v6182_v54 }
0x17c9   :  { %6328 = vmatpush.msra.mxu1 %v6169_v55 }
0x17cb   :  { %6329 = vmatpush.msra.mxu1 %v6168_v50 }
0x17cd   :  { %6330 = vmatpush.msra.mxu1 %v6167_v52 }
0x17cf   :  { %6331 = vmatpush.msra.mxu1 %v6166_v4 }
0x1803   :  { %v5903_v53 = vpop.f32.mrf.mxu1 }
0x1804   :  { %v6046_v59 = vperm.slane %v5903_v53, 0  ;;  %v5983_v57 = vpop.f32.mrf.mxu0  ;;  %v6062_v30 = vperm.slane %v5903_v53, 1 }
0x1805   :  { %v6050_v0 = vperm.slane %v5983_v57, 0  ;;  %v6066_v38 = vperm.slane %v5983_v57, 1 }
0x1806   :  { %v6054_v61 = vmul.f32 %v6046_v59, %v9118_v1 }
0x1807   :  { %v6058_v3 = vmul.f32 %v6050_v0, %v9313_v5 }
0x1808   :  { %v6070_v28 = vadd.f32 %v6062_v30, %v6054_v61 }
0x1809   :  { %v5943_v40 = vpop.f32.mrf.mxu2  ;;  %v6074_v7 = vadd.f32 %v6066_v38, %v6058_v3 }
0x180a   :  { %v6078_v14 = vmax.f32 %v6070_v28, 0.0  ;;  %v6048_v56 = vperm.slane %v5943_v40, 0  ;;  %v5963_v6 = vpop.f32.mrf.mxu3  ;;  %v6064_v35 = vperm.slane %v5943_v40, 1 }
0x180b   :  { %v6049_v47 = vperm.slane %v5963_v6, 0  ;;  %v5923_v2 = vpop.f32.mrf.mxu1  ;;  %v6065_v1 = vperm.slane %v5963_v6, 1  ;;  %v6082_v19 = vmax.f32 %v6074_v7, 0.0 }
0x180c   :  { %v6056_v24 = vmul.f32 %v6048_v56, %v9194_v62  ;;  %v6047_v11 = vperm.slane %v5923_v2, 0  ;;  %6232 = vmatmul.f32.vlgmr.msra.gmra.mxu0 %v6078_v14  ;;  %v6063_v18 = vperm.slane %v5923_v2, 1 }
0x180d   :  { %v6057_v39 = vmul.f32 %v6049_v47, %v9248_v44 }
0x180e   :  { %v6072_v16 = vadd.f32 %v6064_v35, %v6056_v24  ;;  %v6055_v12 = vmul.f32 %v6047_v11, %v9139_v31 }
0x180f   :  { %v6073_v8 = vadd.f32 %v6065_v1, %v6057_v39 }
0x1810   :  { %v6080_v5 = vmax.f32 %v6072_v16, 0.0  ;;  %v6071_v13 = vadd.f32 %v6063_v18, %v6055_v12 }
0x1811   :  { %v6081_v60 = vmax.f32 %v6073_v8, 0.0  ;;  %v6023_v15 = vpop.f32.mrf.mxu2 }
0x1812   :  { %v6079_v20 = vmax.f32 %v6071_v13, 0.0  ;;  %v6052_v21 = vperm.slane %v6023_v15, 0  ;;  %v6043_v62 = vpop.f32.mrf.mxu3  ;;  %6272 = vmatmul.f32.vlgmr.msra.gmra.mxu2 %v6080_v5  ;;  %v6068_v26 = vperm.slane %v6023_v15, 1 }
0x1813   :  { %v6053_v22 = vperm.slane %v6043_v62, 0  ;;  %6292 = vmatmul.f32.vlgmr.msrb.gmra.mxu3 %v6081_v60  ;;  %v6003_v23 = vpop.f32.mrf.mxu1  ;;  %v6069_v27 = vperm.slane %v6043_v62, 1 }
0x1814   :  { %v6060_v44 = vmul.f32 %v6052_v21, %v9348_v46  ;;  %v6051_v25 = vperm.slane %v6003_v23, 0  ;;  %6252 = vmatmul.f32.vlgmr.msrb.gmra.mxu1 %v6079_v20  ;;  %6312 = vmatmul.f32.vlgmr.msrb.gmra.mxu0 %v6082_v19  ;;  %v6067_v34 = vperm.slane %v6003_v23, 1 }
0x1815   :  { %v6061_v31 = vmul.f32 %v6053_v22, %v9356_v41 }
0x1816   :  { %v6076_v29 = vadd.f32 %v6068_v26, %v6060_v44  ;;  %v6059_v58 = vmul.f32 %v6051_v25, %v9328_v32 }
0x1817   :  { %v6077_v33 = vadd.f32 %v6069_v27, %v6061_v31 }
0x1818   :  { %v6084_v36 = vmax.f32 %v6076_v29, 0.0  ;;  %v6075_v37 = vadd.f32 %v6067_v34, %v6059_v58 }
0x1819   :  { %v6085_v42 = vmax.f32 %v6077_v33, 0.0 }
0x181a   :  { %v6083_v43 = vmax.f32 %v6075_v37, 0.0  ;;  %6352 = vmatmul.f32.vlgmr.msrb.gmra.mxu2 %v6084_v36 }
0x181b   :  { %6568 = vmatmul.msk.f32.vlgmr.msra.gmra.mxu3 %vm728_vm3, %v6085_v42 }
0x181c   :  { %6332 = vmatmul.f32.vlgmr.msra.gmra.mxu1 %v6083_v43 }
0x1889   :  { %v6233_v46 = vpop.f32.mrf.mxu0 }
0x188a   :  { %v6234_v45 = vadd.f32 %v6233_v46, %v8431_v17 }
0x1891   :  { %v6253_v9 = vpop.f32.mrf.mxu1  ;;  %v6313_v32 = vpop.f32.mrf.mxu0 }
0x1892   :  { %v6254_v55 = vadd.f32 %v6253_v9, %v6234_v45 }
0x1895   :  { %v6273_v41 = vpop.f32.mrf.mxu2 }
0x1896   :  { %v6274_v48 = vadd.f32 %v6273_v41, %v6254_v55  ;;  %v6293_v49 = vpop.f32.mrf.mxu3 }
0x1898   :  { %v6294_v50 = vadd.f32 %v6293_v49, %v6274_v48 }
0x1899   :  { %v6333_v51 = vpop.f32.mrf.mxu1 }
0x189a   :  { %v6314_v10 = vadd.f32 %v6313_v32, %v6294_v50 }
0x189c   :  { %v6334_v52 = vadd.f32 %v6333_v51, %v6314_v10 }
0x189d   :  { %v6353_v54 = vpop.f32.mrf.mxu2 }
0x189e   :  { %v6354_v63 = vadd.f32 %v6353_v54, %v6334_v52  ;;  %v6373_v4 = vpop.f32.mrf.mxu3 }
0x18a0   :  { %v6374_v53 = vadd.f32 %v6373_v4, %v6354_v63 }
0x18a2   :  { %6376 = vst [vmem:[%s6432_s21] sm:$0x3] %v6374_v53 }

</bundles_post_ra>
